<compile_context>
chip_gen: v7x
topology: tpu7x:2x2x1
jax: 0.10.0
libtpu: 0.0.40
codegen_flags: <defaults>
</compile_context>

<pallas_src>
import jax
import jax.numpy as jnp
from jax.experimental import pallas as pl
from jax.experimental.pallas import tpu as pltpu


# ------------------------------ fused kernel -------------------------------- #

def _net_kernel(patches_ref, w1_ref, b1_ref, w2_ref, b2_ref,
                w3_ref, b3_ref, w4_ref, b4_ref, o_ref,
                p1_ref, slab_ref, a2_ref):
    f32 = jnp.float32
    bf16 = jnp.bfloat16
    hidden = w3_ref.shape[2]

    # ---- conv1: im2col matmul (bf16 x bf16 -> f32 accumulate) + bias + ReLU ----
    a1 = jnp.dot(patches_ref[0], w1_ref[...], preferred_element_type=f32)  # (576, 20)
    a1 = jnp.maximum(a1 + b1_ref[...], 0.0)

    # ---- maxpool1: patch rows are quadrant-ordered (dy, dx, ph, pw), so the
    #      2x2 pool is a max over four contiguous 144-row blocks.  Result rows
    #      are ordered ph*12 + pw (12x12 spatial map, 20 channels in lanes).
    p1_ref[...] = jnp.maximum(jnp.maximum(a1[0:144, :], a1[144:288, :]),
                              jnp.maximum(a1[288:432, :], a1[432:576, :]))  # (144, 20)

    # ---- conv2: 25 per-tap MXU matmuls; the (64, 20) tap slab (8 contiguous
    #      8-row runs of p1) is staged in a VMEM scratch.  acc rows = h2*8 + w2.
    acc2 = jnp.zeros((64, 50), f32)
    for t in range(25):
        ki, kj = t // 5, t % 5
        for h2 in range(8):
            src = (h2 + ki) * 12 + kj
            slab_ref[h2 * 8:(h2 + 1) * 8, :] = p1_ref[src:src + 8, :]
        acc2 = acc2 + jnp.dot(slab_ref[...].astype(bf16), w2_ref[t],
                              preferred_element_type=f32)
    a2_ref[...] = jnp.maximum(acc2 + b2_ref[...], 0.0)                     # (64, 50)

    # ---- maxpool2 fused with fc1: 16 pooled spatial positions, each a (1, 50)
    #      max of 4 rows, contracted against its own (50, hidden) weight block.
    acc_fc = jnp.zeros((1, hidden), f32)
    for ph2 in range(4):
        for pw2 in range(4):
            r0 = (2 * ph2) * 8 + 2 * pw2
            r1 = r0 + 8
            piece = jnp.maximum(
                jnp.maximum(a2_ref[r0:r0 + 1, :], a2_ref[r0 + 1:r0 + 2, :]),
                jnp.maximum(a2_ref[r1:r1 + 1, :], a2_ref[r1 + 1:r1 + 2, :]))  # (1, 50)
            acc_fc = acc_fc + jnp.dot(piece, w3_ref[ph2 * 4 + pw2],
                                      preferred_element_type=f32)
    h1 = jnp.maximum(acc_fc + b3_ref[...], 0.0)                            # (1, hidden)

    # ---- fc2 + log_softmax (stable, f32) ----
    logits = jnp.dot(h1, w4_ref[...], preferred_element_type=f32) + b4_ref[...]  # (1, 10)
    m = jnp.max(logits, axis=-1, keepdims=True)
    s = logits - m
    lse = jnp.log(jnp.sum(jnp.exp(s), axis=-1, keepdims=True))
    o_ref[0] = (s - lse).astype(o_ref.dtype)


# ------------------------------ host-side glue ------------------------------ #

def _conv1_patches(x_nchw):
    """conv1 im2col with rows ordered (dy, dx, ph, pw), where output pixel
    (h, w) = (2*ph + dy, 2*pw + dx).  This ordering makes the in-kernel 2x2
    max-pool a max of 4 contiguous row blocks."""
    n = x_nchw.shape[0]
    x = x_nchw[:, 0, :, :]                                        # (N, 28, 28)
    cols = [x[:, ki:ki + 24, kj:kj + 24] for ki in range(5) for kj in range(5)]
    pat = jnp.stack(cols, axis=-1)                                # (N, 24, 24, 25), rows (h, w)
    pat = pat.reshape(n, 12, 2, 12, 2, 25)                        # (N, ph, dy, pw, dx, t)
    pat = pat.transpose(0, 2, 4, 1, 3, 5)                         # (N, dy, dx, ph, pw, t)
    return pat.reshape(n, 576, 25).astype(jnp.bfloat16)


def _prepare_weights(params):
    """One-time re-layout of PyTorch-convention weights for the fused kernel."""
    hidden = params["fc1_b"].shape[0]
    w1 = params["conv1_w"].transpose(2, 3, 1, 0).reshape(25, 20).astype(jnp.bfloat16)
    b1 = params["conv1_b"].reshape(1, 20)
    w2 = params["conv2_w"].transpose(2, 3, 1, 0).reshape(25, 20, 50).astype(jnp.bfloat16)
    b2 = params["conv2_b"].reshape(1, 50)
    # PyTorch's x.view(-1, 800) flattens (C=50, H=4, W=4) as c*16 + h*4 + w.
    # Regroup fc1 weights to one (50, hidden) block per pooled spatial position
    # p = h*4 + w, so no activation transpose is needed at runtime.
    w3 = params["fc1_w"].T.reshape(50, 16, hidden).transpose(1, 0, 2)  # (16, 50, hidden)
    b3 = params["fc1_b"].reshape(1, hidden)
    w4 = params["fc2_w"].T                                             # (hidden, 10)
    b4 = params["fc2_b"].reshape(1, 10)
    return w1, b1, w2, b2, w3, b3, w4, b4


@jax.jit
def net_forward(params, x_nchw):
    n = x_nchw.shape[0]
    hidden = params["fc1_b"].shape[0]
    w1, b1, w2, b2, w3, b3, w4, b4 = _prepare_weights(params)
    patches = _conv1_patches(x_nchw)

    out = pl.pallas_call(
        _net_kernel,
        out_shape=jax.ShapeDtypeStruct((n, 1, 10), jnp.float32),
        grid=(n,),
        in_specs=[
            pl.BlockSpec((1, 576, 25), lambda i: (i, 0, 0)),       # conv1 patches (per image)
            pl.BlockSpec((25, 20), lambda i: (0, 0)),              # w1
            pl.BlockSpec((1, 20), lambda i: (0, 0)),               # b1
            pl.BlockSpec((25, 20, 50), lambda i: (0, 0, 0)),       # w2 (per tap)
            pl.BlockSpec((1, 50), lambda i: (0, 0)),               # b2
            pl.BlockSpec((16, 50, hidden), lambda i: (0, 0, 0)),   # fc1 (per spatial block)
            pl.BlockSpec((1, hidden), lambda i: (0, 0)),           # b3
            pl.BlockSpec((hidden, 10), lambda i: (0, 0)),          # fc2
            pl.BlockSpec((1, 10), lambda i: (0, 0)),               # b4
        ],
        out_specs=pl.BlockSpec((1, 1, 10), lambda i: (i, 0, 0)),
        scratch_shapes=[
            pltpu.VMEM((144, 20), jnp.float32),   # pooled conv1 activation
            pltpu.VMEM((64, 20), jnp.float32),    # conv2 per-tap slab
            pltpu.VMEM((64, 50), jnp.float32),    # conv2 output (pre-pool)
        ],
        compiler_params=pltpu.CompilerParams(
            dimension_semantics=("parallel",)),
    )(patches, w1, b1, w2, b2, w3, b3, w4, b4)
    return out.reshape(n, 10)


# ------------------------------ reference & init ---------------------------- #

def init_params(hidden_size, key):
    ks = jax.random.split(key, 8)

    def u(k, shape, fan_in):
        bound = 1.0 / jnp.sqrt(fan_in)
        return jax.random.uniform(k, shape, jnp.float32, -bound, bound)

    return {
        "conv1_w": u(ks[0], (20, 1, 5, 5), 1 * 5 * 5),
        "conv1_b": u(ks[1], (20,), 1 * 5 * 5),
        "conv2_w": u(ks[2], (50, 20, 5, 5), 20 * 5 * 5),
        "conv2_b": u(ks[3], (50,), 20 * 5 * 5),
        "fc1_w":   u(ks[4], (hidden_size, 4 * 4 * 50), 4 * 4 * 50),  # torch (out, in)
        "fc1_b":   u(ks[5], (hidden_size,), 4 * 4 * 50),
        "fc2_w":   u(ks[6], (10, hidden_size), hidden_size),
        "fc2_b":   u(ks[7], (10,), hidden_size),
    }


def reference_forward(params, x_nchw):
    """Pure-JAX reference (same bf16 rounding of the conv matmul operands)."""
    bf = lambda a: a.astype(jnp.bfloat16).astype(jnp.float32)
    n = x_nchw.shape[0]
    x = x_nchw[:, 0, :, :]
    cols = [x[:, i:i + 24, j:j + 24] for i in range(5) for j in range(5)]
    pat = bf(jnp.stack(cols, axis=-1))                                       # (N,24,24,25)
    w1m = bf(params["conv1_w"].transpose(2, 3, 1, 0).reshape(25, 20))
    a1 = jax.nn.relu(jnp.einsum("nhwt,tc->nhwc", pat, w1m) + params["conv1_b"])
    p1 = jnp.max(a1.reshape(n, 12, 2, 12, 2, 20), axis=(2, 4))               # (N,12,12,20)
    cols2 = [p1[:, i:i + 8, j:j + 8, :] for i in range(5) for j in range(5)]
    pat2 = bf(jnp.stack(cols2, axis=3))                                      # (N,8,8,25,20)
    w2m = bf(params["conv2_w"].transpose(2, 3, 1, 0).reshape(25, 20, 50))
    a2 = jax.nn.relu(jnp.einsum("nhwtc,tco->nhwo", pat2, w2m) + params["conv2_b"])
    p2 = jnp.max(a2.reshape(n, 4, 2, 4, 2, 50), axis=(2, 4))                 # (N,4,4,50)
    flat = p2.transpose(0, 3, 1, 2).reshape(n, 4 * 4 * 50)                   # torch view order
    h = jax.nn.relu(flat @ params["fc1_w"].T + params["fc1_b"])
    logits = h @ params["fc2_w"].T + params["fc2_b"]
    return jax.nn.log_softmax(logits, axis=-1)


if __name__ == "__main__":
    hidden_size = 32
    key = jax.random.PRNGKey(0)
    pkey, xkey = jax.random.split(key)
    params = init_params(hidden_size, pkey)
    x = jax.random.normal(xkey, (2, 1, 28, 28), jnp.float32)   # NCHW like PyTorch

    out = jax.block_until_ready(net_forward(params, x))

    assert out.shape == (2, 10), out.shape
    # log_softmax rows must exponentiate to ~1
    assert jnp.allclose(jnp.sum(jnp.exp(out), axis=-1), 1.0, atol=1e-4)
    # compare against a pure-JAX reference (loose tol: bf16 MXU operands)
    ref = reference_forward(params, x)
    assert jnp.allclose(out, ref, atol=2e-2, rtol=2e-2), float(jnp.max(jnp.abs(out - ref)))
    print("KERNEL_OK")
</pallas_src>

<mosaic_0001>
module attributes {stable_mosaic.version = 11 : i64} {
  func.func @_net_kernel(%arg0: i32, %arg1: memref<1x576x25xbf16, #tpu.memory_space<vmem>>, %arg2: memref<25x20xbf16, #tpu.memory_space<vmem>>, %arg3: memref<1x20xf32, #tpu.memory_space<vmem>>, %arg4: memref<25x20x50xbf16, #tpu.memory_space<vmem>>, %arg5: memref<1x50xf32, #tpu.memory_space<vmem>>, %arg6: memref<16x50x32xf32, #tpu.memory_space<vmem>>, %arg7: memref<1x32xf32, #tpu.memory_space<vmem>>, %arg8: memref<32x10xf32, #tpu.memory_space<vmem>>, %arg9: memref<1x10xf32, #tpu.memory_space<vmem>>, %arg10: memref<1x1x10xf32, #tpu.memory_space<vmem>>, %arg11: memref<144x20xf32, #tpu.memory_space<vmem>>, %arg12: memref<64x20xf32, #tpu.memory_space<vmem>>, %arg13: memref<64x50xf32, #tpu.memory_space<vmem>>) attributes {dimension_semantics = [#tpu.dimension_semantics<parallel>], iteration_bounds = array<i64: 2>, scalar_prefetch = 0 : i64, scratch_operands = 3 : i64, tpu.core_type = #tpu.core_type<tc>, window_params = [{transform_indices = @transform_0, window_bounds = array<i64: 1, 576, 25>}, {pipeline_mode = #tpu.pipeline_mode<synchronous>, transform_indices = @transform_1, window_bounds = array<i64: 25, 20>}, {pipeline_mode = #tpu.pipeline_mode<synchronous>, transform_indices = @transform_2, window_bounds = array<i64: 1, 20>}, {pipeline_mode = #tpu.pipeline_mode<synchronous>, transform_indices = @transform_3, window_bounds = array<i64: 25, 20, 50>}, {pipeline_mode = #tpu.pipeline_mode<synchronous>, transform_indices = @transform_4, window_bounds = array<i64: 1, 50>}, {pipeline_mode = #tpu.pipeline_mode<synchronous>, transform_indices = @transform_5, window_bounds = array<i64: 16, 50, 32>}, {pipeline_mode = #tpu.pipeline_mode<synchronous>, transform_indices = @transform_6, window_bounds = array<i64: 1, 32>}, {pipeline_mode = #tpu.pipeline_mode<synchronous>, transform_indices = @transform_7, window_bounds = array<i64: 32, 10>}, {pipeline_mode = #tpu.pipeline_mode<synchronous>, transform_indices = @transform_8, window_bounds = array<i64: 1, 10>}, {transform_indices = @transform_9, window_bounds = array<i64: 1, 1, 10>}]} {
    %c0 = arith.constant 0 : index
    %c0_0 = arith.constant 0 : index
    %c0_1 = arith.constant 0 : index
    %0 = vector.load %arg1[%c0, %c0_0, %c0_1] : memref<1x576x25xbf16, #tpu.memory_space<vmem>>, vector<1x576x25xbf16>
    %1 = vector.shape_cast %0 : vector<1x576x25xbf16> to vector<576x25xbf16>
    %c0_2 = arith.constant 0 : index
    %c0_3 = arith.constant 0 : index
    %2 = vector.load %arg2[%c0_2, %c0_3] : memref<25x20xbf16, #tpu.memory_space<vmem>>, vector<25x20xbf16>
    %cst = arith.constant dense<0.000000e+00> : vector<576x20xf32>
    %3 = tpu.matmul %1, %2, %cst {dimension_numbers = #tpu.dot_dimension_numbers<[1], [0], [0], [1], [0, 0, 1, 1], [], []>} : vector<576x25xbf16>, vector<25x20xbf16>, vector<576x20xf32> -> vector<576x20xf32>
    %c0_4 = arith.constant 0 : index
    %c0_5 = arith.constant 0 : index
    %4 = vector.load %arg3[%c0_4, %c0_5] : memref<1x20xf32, #tpu.memory_space<vmem>>, vector<1x20xf32>
    %5 = vector.broadcast %4 : vector<1x20xf32> to vector<576x20xf32>
    %6 = arith.addf %3, %5 : vector<576x20xf32>
    %cst_6 = arith.constant 0.000000e+00 : f32
    %7 = vector.broadcast %cst_6 : f32 to vector<576x20xf32>
    %8 = arith.maximumf %6, %7 : vector<576x20xf32>
    %9 = vector.extract_strided_slice %8 {offsets = [0, 0], sizes = [144, 20], strides = [1, 1]} : vector<576x20xf32> to vector<144x20xf32>
    %10 = vector.extract_strided_slice %8 {offsets = [144, 0], sizes = [144, 20], strides = [1, 1]} : vector<576x20xf32> to vector<144x20xf32>
    %11 = arith.maximumf %9, %10 : vector<144x20xf32>
    %12 = vector.extract_strided_slice %8 {offsets = [288, 0], sizes = [144, 20], strides = [1, 1]} : vector<576x20xf32> to vector<144x20xf32>
    %13 = vector.extract_strided_slice %8 {offsets = [432, 0], sizes = [144, 20], strides = [1, 1]} : vector<576x20xf32> to vector<144x20xf32>
    %14 = arith.maximumf %12, %13 : vector<144x20xf32>
    %15 = arith.maximumf %11, %14 : vector<144x20xf32>
    %c0_7 = arith.constant 0 : index
    %c0_8 = arith.constant 0 : index
    %16 = vector.load %arg11[%c0_7, %c0_8] : memref<144x20xf32, #tpu.memory_space<vmem>>, vector<144x20xf32>
    tpu.vector_store %arg11[%c0_7, %c0_8], %15 {strides = array<i32>} : memref<144x20xf32, #tpu.memory_space<vmem>>, vector<144x20xf32>,
    %cst_9 = arith.constant 0.000000e+00 : f32
    %17 = vector.broadcast %cst_9 : f32 to vector<64x50xf32>
    %c0_10 = arith.constant 0 : index
    %c0_11 = arith.constant 0 : index
    %18 = vector.load %arg11[%c0_10, %c0_11] : memref<144x20xf32, #tpu.memory_space<vmem>>, vector<8x20xf32>
    %c0_12 = arith.constant 0 : index
    %c0_13 = arith.constant 0 : index
    %19 = vector.load %arg12[%c0_12, %c0_13] : memref<64x20xf32, #tpu.memory_space<vmem>>, vector<8x20xf32>
    tpu.vector_store %arg12[%c0_12, %c0_13], %18 {strides = array<i32>} : memref<64x20xf32, #tpu.memory_space<vmem>>, vector<8x20xf32>,
    %c12 = arith.constant 12 : index
    %c0_14 = arith.constant 0 : index
    %20 = vector.load %arg11[%c12, %c0_14] : memref<144x20xf32, #tpu.memory_space<vmem>>, vector<8x20xf32>
    %c8 = arith.constant 8 : index
    %c0_15 = arith.constant 0 : index
    %21 = vector.load %arg12[%c8, %c0_15] : memref<64x20xf32, #tpu.memory_space<vmem>>, vector<8x20xf32>
    tpu.vector_store %arg12[%c8, %c0_15], %20 {strides = array<i32>} : memref<64x20xf32, #tpu.memory_space<vmem>>, vector<8x20xf32>,
    %c24 = arith.constant 24 : index
    %c0_16 = arith.constant 0 : index
    %22 = vector.load %arg11[%c24, %c0_16] : memref<144x20xf32, #tpu.memory_space<vmem>>, vector<8x20xf32>
    %c16 = arith.constant 16 : index
    %c0_17 = arith.constant 0 : index
    %23 = vector.load %arg12[%c16, %c0_17] : memref<64x20xf32, #tpu.memory_space<vmem>>, vector<8x20xf32>
    tpu.vector_store %arg12[%c16, %c0_17], %22 {strides = array<i32>} : memref<64x20xf32, #tpu.memory_space<vmem>>, vector<8x20xf32>,
    %c36 = arith.constant 36 : index
    %c0_18 = arith.constant 0 : index
    %24 = vector.load %arg11[%c36, %c0_18] : memref<144x20xf32, #tpu.memory_space<vmem>>, vector<8x20xf32>
    %c24_19 = arith.constant 24 : index
    %c0_20 = arith.constant 0 : index
    %25 = vector.load %arg12[%c24_19, %c0_20] : memref<64x20xf32, #tpu.memory_space<vmem>>, vector<8x20xf32>
    tpu.vector_store %arg12[%c24_19, %c0_20], %24 {strides = array<i32>} : memref<64x20xf32, #tpu.memory_space<vmem>>, vector<8x20xf32>,
    %c48 = arith.constant 48 : index
    %c0_21 = arith.constant 0 : index
    %26 = vector.load %arg11[%c48, %c0_21] : memref<144x20xf32, #tpu.memory_space<vmem>>, vector<8x20xf32>
    %c32 = arith.constant 32 : index
    %c0_22 = arith.constant 0 : index
    %27 = vector.load %arg12[%c32, %c0_22] : memref<64x20xf32, #tpu.memory_space<vmem>>, vector<8x20xf32>
    tpu.vector_store %arg12[%c32, %c0_22], %26 {strides = array<i32>} : memref<64x20xf32, #tpu.memory_space<vmem>>, vector<8x20xf32>,
    %c60 = arith.constant 60 : index
    %c0_23 = arith.constant 0 : index
    %28 = vector.load %arg11[%c60, %c0_23] : memref<144x20xf32, #tpu.memory_space<vmem>>, vector<8x20xf32>
    %c40 = arith.constant 40 : index
    %c0_24 = arith.constant 0 : index
    %29 = vector.load %arg12[%c40, %c0_24] : memref<64x20xf32, #tpu.memory_space<vmem>>, vector<8x20xf32>
    tpu.vector_store %arg12[%c40, %c0_24], %28 {strides = array<i32>} : memref<64x20xf32, #tpu.memory_space<vmem>>, vector<8x20xf32>,
    %c72 = arith.constant 72 : index
    %c0_25 = arith.constant 0 : index
    %30 = vector.load %arg11[%c72, %c0_25] : memref<144x20xf32, #tpu.memory_space<vmem>>, vector<8x20xf32>
    %c48_26 = arith.constant 48 : index
    %c0_27 = arith.constant 0 : index
    %31 = vector.load %arg12[%c48_26, %c0_27] : memref<64x20xf32, #tpu.memory_space<vmem>>, vector<8x20xf32>
    tpu.vector_store %arg12[%c48_26, %c0_27], %30 {strides = array<i32>} : memref<64x20xf32, #tpu.memory_space<vmem>>, vector<8x20xf32>,
    %c84 = arith.constant 84 : index
    %c0_28 = arith.constant 0 : index
    %32 = vector.load %arg11[%c84, %c0_28] : memref<144x20xf32, #tpu.memory_space<vmem>>, vector<8x20xf32>
    %c56 = arith.constant 56 : index
    %c0_29 = arith.constant 0 : index
    %33 = vector.load %arg12[%c56, %c0_29] : memref<64x20xf32, #tpu.memory_space<vmem>>, vector<8x20xf32>
    tpu.vector_store %arg12[%c56, %c0_29], %32 {strides = array<i32>} : memref<64x20xf32, #tpu.memory_space<vmem>>, vector<8x20xf32>,
    %c0_30 = arith.constant 0 : index
    %c0_31 = arith.constant 0 : index
    %34 = vector.load %arg12[%c0_30, %c0_31] : memref<64x20xf32, #tpu.memory_space<vmem>>, vector<64x20xf32>
    %35 = arith.truncf %34 : vector<64x20xf32> to vector<64x20xbf16>
    %c0_32 = arith.constant 0 : index
    %c0_33 = arith.constant 0 : index
    %c0_34 = arith.constant 0 : index
    %36 = vector.load %arg4[%c0_32, %c0_33, %c0_34] : memref<25x20x50xbf16, #tpu.memory_space<vmem>>, vector<1x20x50xbf16>
    %37 = vector.shape_cast %36 : vector<1x20x50xbf16> to vector<20x50xbf16>
    %cst_35 = arith.constant dense<0.000000e+00> : vector<64x50xf32>
    %38 = tpu.matmul %35, %37, %cst_35 {dimension_numbers = #tpu.dot_dimension_numbers<[1], [0], [0], [1], [0, 0, 1, 1], [], []>} : vector<64x20xbf16>, vector<20x50xbf16>, vector<64x50xf32> -> vector<64x50xf32>
    %39 = arith.addf %17, %38 : vector<64x50xf32>
    %c1 = arith.constant 1 : index
    %c0_36 = arith.constant 0 : index
    %40 = vector.load %arg11[%c1, %c0_36] : memref<144x20xf32, #tpu.memory_space<vmem>>, vector<8x20xf32>
    %c0_37 = arith.constant 0 : index
    %c0_38 = arith.constant 0 : index
    %41 = vector.load %arg12[%c0_37, %c0_38] : memref<64x20xf32, #tpu.memory_space<vmem>>, vector<8x20xf32>
    tpu.vector_store %arg12[%c0_37, %c0_38], %40 {strides = array<i32>} : memref<64x20xf32, #tpu.memory_space<vmem>>, vector<8x20xf32>,
    %c13 = arith.constant 13 : index
    %c0_39 = arith.constant 0 : index
    %42 = vector.load %arg11[%c13, %c0_39] : memref<144x20xf32, #tpu.memory_space<vmem>>, vector<8x20xf32>
    %c8_40 = arith.constant 8 : index
    %c0_41 = arith.constant 0 : index
    %43 = vector.load %arg12[%c8_40, %c0_41] : memref<64x20xf32, #tpu.memory_space<vmem>>, vector<8x20xf32>
    tpu.vector_store %arg12[%c8_40, %c0_41], %42 {strides = array<i32>} : memref<64x20xf32, #tpu.memory_space<vmem>>, vector<8x20xf32>,
    %c25 = arith.constant 25 : index
    %c0_42 = arith.constant 0 : index
    %44 = vector.load %arg11[%c25, %c0_42] : memref<144x20xf32, #tpu.memory_space<vmem>>, vector<8x20xf32>
    %c16_43 = arith.constant 16 : index
    %c0_44 = arith.constant 0 : index
    %45 = vector.load %arg12[%c16_43, %c0_44] : memref<64x20xf32, #tpu.memory_space<vmem>>, vector<8x20xf32>
    tpu.vector_store %arg12[%c16_43, %c0_44], %44 {strides = array<i32>} : memref<64x20xf32, #tpu.memory_space<vmem>>, vector<8x20xf32>,
    %c37 = arith.constant 37 : index
    %c0_45 = arith.constant 0 : index
    %46 = vector.load %arg11[%c37, %c0_45] : memref<144x20xf32, #tpu.memory_space<vmem>>, vector<8x20xf32>
    %c24_46 = arith.constant 24 : index
    %c0_47 = arith.constant 0 : index
    %47 = vector.load %arg12[%c24_46, %c0_47] : memref<64x20xf32, #tpu.memory_space<vmem>>, vector<8x20xf32>
    tpu.vector_store %arg12[%c24_46, %c0_47], %46 {strides = array<i32>} : memref<64x20xf32, #tpu.memory_space<vmem>>, vector<8x20xf32>,
    %c49 = arith.constant 49 : index
    %c0_48 = arith.constant 0 : index
    %48 = vector.load %arg11[%c49, %c0_48] : memref<144x20xf32, #tpu.memory_space<vmem>>, vector<8x20xf32>
    %c32_49 = arith.constant 32 : index
    %c0_50 = arith.constant 0 : index
    %49 = vector.load %arg12[%c32_49, %c0_50] : memref<64x20xf32, #tpu.memory_space<vmem>>, vector<8x20xf32>
    tpu.vector_store %arg12[%c32_49, %c0_50], %48 {strides = array<i32>} : memref<64x20xf32, #tpu.memory_space<vmem>>, vector<8x20xf32>,
    %c61 = arith.constant 61 : index
    %c0_51 = arith.constant 0 : index
    %50 = vector.load %arg11[%c61, %c0_51] : memref<144x20xf32, #tpu.memory_space<vmem>>, vector<8x20xf32>
    %c40_52 = arith.constant 40 : index
    %c0_53 = arith.constant 0 : index
    %51 = vector.load %arg12[%c40_52, %c0_53] : memref<64x20xf32, #tpu.memory_space<vmem>>, vector<8x20xf32>
    tpu.vector_store %arg12[%c40_52, %c0_53], %50 {strides = array<i32>} : memref<64x20xf32, #tpu.memory_space<vmem>>, vector<8x20xf32>,
    %c73 = arith.constant 73 : index
    %c0_54 = arith.constant 0 : index
    %52 = vector.load %arg11[%c73, %c0_54] : memref<144x20xf32, #tpu.memory_space<vmem>>, vector<8x20xf32>
    %c48_55 = arith.constant 48 : index
    %c0_56 = arith.constant 0 : index
    %53 = vector.load %arg12[%c48_55, %c0_56] : memref<64x20xf32, #tpu.memory_space<vmem>>, vector<8x20xf32>
    tpu.vector_store %arg12[%c48_55, %c0_56], %52 {strides = array<i32>} : memref<64x20xf32, #tpu.memory_space<vmem>>, vector<8x20xf32>,
    %c85 = arith.constant 85 : index
    %c0_57 = arith.constant 0 : index
    %54 = vector.load %arg11[%c85, %c0_57] : memref<144x20xf32, #tpu.memory_space<vmem>>, vector<8x20xf32>
    %c56_58 = arith.constant 56 : index
    %c0_59 = arith.constant 0 : index
    %55 = vector.load %arg12[%c56_58, %c0_59] : memref<64x20xf32, #tpu.memory_space<vmem>>, vector<8x20xf32>
    tpu.vector_store %arg12[%c56_58, %c0_59], %54 {strides = array<i32>} : memref<64x20xf32, #tpu.memory_space<vmem>>, vector<8x20xf32>,
    %c0_60 = arith.constant 0 : index
    %c0_61 = arith.constant 0 : index
    %56 = vector.load %arg12[%c0_60, %c0_61] : memref<64x20xf32, #tpu.memory_space<vmem>>, vector<64x20xf32>
    %57 = arith.truncf %56 : vector<64x20xf32> to vector<64x20xbf16>
    %c1_62 = arith.constant 1 : index
    %c0_63 = arith.constant 0 : index
    %c0_64 = arith.constant 0 : index
    %58 = vector.load %arg4[%c1_62, %c0_63, %c0_64] : memref<25x20x50xbf16, #tpu.memory_space<vmem>>, vector<1x20x50xbf16>
    %59 = vector.shape_cast %58 : vector<1x20x50xbf16> to vector<20x50xbf16>
    %cst_65 = arith.constant dense<0.000000e+00> : vector<64x50xf32>
    %60 = tpu.matmul %57, %59, %cst_65 {dimension_numbers = #tpu.dot_dimension_numbers<[1], [0], [0], [1], [0, 0, 1, 1], [], []>} : vector<64x20xbf16>, vector<20x50xbf16>, vector<64x50xf32> -> vector<64x50xf32>
    %61 = arith.addf %39, %60 : vector<64x50xf32>
    %c2 = arith.constant 2 : index
    %c0_66 = arith.constant 0 : index
    %62 = vector.load %arg11[%c2, %c0_66] : memref<144x20xf32, #tpu.memory_space<vmem>>, vector<8x20xf32>
    %c0_67 = arith.constant 0 : index
    %c0_68 = arith.constant 0 : index
    %63 = vector.load %arg12[%c0_67, %c0_68] : memref<64x20xf32, #tpu.memory_space<vmem>>, vector<8x20xf32>
    tpu.vector_store %arg12[%c0_67, %c0_68], %62 {strides = array<i32>} : memref<64x20xf32, #tpu.memory_space<vmem>>, vector<8x20xf32>,
    %c14 = arith.constant 14 : index
    %c0_69 = arith.constant 0 : index
    %64 = vector.load %arg11[%c14, %c0_69] : memref<144x20xf32, #tpu.memory_space<vmem>>, vector<8x20xf32>
    %c8_70 = arith.constant 8 : index
    %c0_71 = arith.constant 0 : index
    %65 = vector.load %arg12[%c8_70, %c0_71] : memref<64x20xf32, #tpu.memory_space<vmem>>, vector<8x20xf32>
    tpu.vector_store %arg12[%c8_70, %c0_71], %64 {strides = array<i32>} : memref<64x20xf32, #tpu.memory_space<vmem>>, vector<8x20xf32>,
    %c26 = arith.constant 26 : index
    %c0_72 = arith.constant 0 : index
    %66 = vector.load %arg11[%c26, %c0_72] : memref<144x20xf32, #tpu.memory_space<vmem>>, vector<8x20xf32>
    %c16_73 = arith.constant 16 : index
    %c0_74 = arith.constant 0 : index
    %67 = vector.load %arg12[%c16_73, %c0_74] : memref<64x20xf32, #tpu.memory_space<vmem>>, vector<8x20xf32>
    tpu.vector_store %arg12[%c16_73, %c0_74], %66 {strides = array<i32>} : memref<64x20xf32, #tpu.memory_space<vmem>>, vector<8x20xf32>,
    %c38 = arith.constant 38 : index
    %c0_75 = arith.constant 0 : index
    %68 = vector.load %arg11[%c38, %c0_75] : memref<144x20xf32, #tpu.memory_space<vmem>>, vector<8x20xf32>
    %c24_76 = arith.constant 24 : index
    %c0_77 = arith.constant 0 : index
    %69 = vector.load %arg12[%c24_76, %c0_77] : memref<64x20xf32, #tpu.memory_space<vmem>>, vector<8x20xf32>
    tpu.vector_store %arg12[%c24_76, %c0_77], %68 {strides = array<i32>} : memref<64x20xf32, #tpu.memory_space<vmem>>, vector<8x20xf32>,
    %c50 = arith.constant 50 : index
    %c0_78 = arith.constant 0 : index
    %70 = vector.load %arg11[%c50, %c0_78] : memref<144x20xf32, #tpu.memory_space<vmem>>, vector<8x20xf32>
    %c32_79 = arith.constant 32 : index
    %c0_80 = arith.constant 0 : index
    %71 = vector.load %arg12[%c32_79, %c0_80] : memref<64x20xf32, #tpu.memory_space<vmem>>, vector<8x20xf32>
    tpu.vector_store %arg12[%c32_79, %c0_80], %70 {strides = array<i32>} : memref<64x20xf32, #tpu.memory_space<vmem>>, vector<8x20xf32>,
    %c62 = arith.constant 62 : index
    %c0_81 = arith.constant 0 : index
    %72 = vector.load %arg11[%c62, %c0_81] : memref<144x20xf32, #tpu.memory_space<vmem>>, vector<8x20xf32>
    %c40_82 = arith.constant 40 : index
    %c0_83 = arith.constant 0 : index
    %73 = vector.load %arg12[%c40_82, %c0_83] : memref<64x20xf32, #tpu.memory_space<vmem>>, vector<8x20xf32>
    tpu.vector_store %arg12[%c40_82, %c0_83], %72 {strides = array<i32>} : memref<64x20xf32, #tpu.memory_space<vmem>>, vector<8x20xf32>,
    %c74 = arith.constant 74 : index
    %c0_84 = arith.constant 0 : index
    %74 = vector.load %arg11[%c74, %c0_84] : memref<144x20xf32, #tpu.memory_space<vmem>>, vector<8x20xf32>
    %c48_85 = arith.constant 48 : index
    %c0_86 = arith.constant 0 : index
    %75 = vector.load %arg12[%c48_85, %c0_86] : memref<64x20xf32, #tpu.memory_space<vmem>>, vector<8x20xf32>
    tpu.vector_store %arg12[%c48_85, %c0_86], %74 {strides = array<i32>} : memref<64x20xf32, #tpu.memory_space<vmem>>, vector<8x20xf32>,
    %c86 = arith.constant 86 : index
    %c0_87 = arith.constant 0 : index
    %76 = vector.load %arg11[%c86, %c0_87] : memref<144x20xf32, #tpu.memory_space<vmem>>, vector<8x20xf32>
    %c56_88 = arith.constant 56 : index
    %c0_89 = arith.constant 0 : index
    %77 = vector.load %arg12[%c56_88, %c0_89] : memref<64x20xf32, #tpu.memory_space<vmem>>, vector<8x20xf32>
    tpu.vector_store %arg12[%c56_88, %c0_89], %76 {strides = array<i32>} : memref<64x20xf32, #tpu.memory_space<vmem>>, vector<8x20xf32>,
    %c0_90 = arith.constant 0 : index
    %c0_91 = arith.constant 0 : index
    %78 = vector.load %arg12[%c0_90, %c0_91] : memref<64x20xf32, #tpu.memory_space<vmem>>, vector<64x20xf32>
    %79 = arith.truncf %78 : vector<64x20xf32> to vector<64x20xbf16>
    %c2_92 = arith.constant 2 : index
    %c0_93 = arith.constant 0 : index
    %c0_94 = arith.constant 0 : index
    %80 = vector.load %arg4[%c2_92, %c0_93, %c0_94] : memref<25x20x50xbf16, #tpu.memory_space<vmem>>, vector<1x20x50xbf16>
    %81 = vector.shape_cast %80 : vector<1x20x50xbf16> to vector<20x50xbf16>
    %cst_95 = arith.constant dense<0.000000e+00> : vector<64x50xf32>
    %82 = tpu.matmul %79, %81, %cst_95 {dimension_numbers = #tpu.dot_dimension_numbers<[1], [0], [0], [1], [0, 0, 1, 1], [], []>} : vector<64x20xbf16>, vector<20x50xbf16>, vector<64x50xf32> -> vector<64x50xf32>
    %83 = arith.addf %61, %82 : vector<64x50xf32>
    %c3 = arith.constant 3 : index
    %c0_96 = arith.constant 0 : index
    %84 = vector.load %arg11[%c3, %c0_96] : memref<144x20xf32, #tpu.memory_space<vmem>>, vector<8x20xf32>
    %c0_97 = arith.constant 0 : index
    %c0_98 = arith.constant 0 : index
    %85 = vector.load %arg12[%c0_97, %c0_98] : memref<64x20xf32, #tpu.memory_space<vmem>>, vector<8x20xf32>
    tpu.vector_store %arg12[%c0_97, %c0_98], %84 {strides = array<i32>} : memref<64x20xf32, #tpu.memory_space<vmem>>, vector<8x20xf32>,
    %c15 = arith.constant 15 : index
    %c0_99 = arith.constant 0 : index
    %86 = vector.load %arg11[%c15, %c0_99] : memref<144x20xf32, #tpu.memory_space<vmem>>, vector<8x20xf32>
    %c8_100 = arith.constant 8 : index
    %c0_101 = arith.constant 0 : index
    %87 = vector.load %arg12[%c8_100, %c0_101] : memref<64x20xf32, #tpu.memory_space<vmem>>, vector<8x20xf32>
    tpu.vector_store %arg12[%c8_100, %c0_101], %86 {strides = array<i32>} : memref<64x20xf32, #tpu.memory_space<vmem>>, vector<8x20xf32>,
    %c27 = arith.constant 27 : index
    %c0_102 = arith.constant 0 : index
    %88 = vector.load %arg11[%c27, %c0_102] : memref<144x20xf32, #tpu.memory_space<vmem>>, vector<8x20xf32>
    %c16_103 = arith.constant 16 : index
    %c0_104 = arith.constant 0 : index
    %89 = vector.load %arg12[%c16_103, %c0_104] : memref<64x20xf32, #tpu.memory_space<vmem>>, vector<8x20xf32>
    tpu.vector_store %arg12[%c16_103, %c0_104], %88 {strides = array<i32>} : memref<64x20xf32, #tpu.memory_space<vmem>>, vector<8x20xf32>,
    %c39 = arith.constant 39 : index
    %c0_105 = arith.constant 0 : index
    %90 = vector.load %arg11[%c39, %c0_105] : memref<144x20xf32, #tpu.memory_space<vmem>>, vector<8x20xf32>
    %c24_106 = arith.constant 24 : index
    %c0_107 = arith.constant 0 : index
    %91 = vector.load %arg12[%c24_106, %c0_107] : memref<64x20xf32, #tpu.memory_space<vmem>>, vector<8x20xf32>
    tpu.vector_store %arg12[%c24_106, %c0_107], %90 {strides = array<i32>} : memref<64x20xf32, #tpu.memory_space<vmem>>, vector<8x20xf32>,
    %c51 = arith.constant 51 : index
    %c0_108 = arith.constant 0 : index
    %92 = vector.load %arg11[%c51, %c0_108] : memref<144x20xf32, #tpu.memory_space<vmem>>, vector<8x20xf32>
    %c32_109 = arith.constant 32 : index
    %c0_110 = arith.constant 0 : index
    %93 = vector.load %arg12[%c32_109, %c0_110] : memref<64x20xf32, #tpu.memory_space<vmem>>, vector<8x20xf32>
    tpu.vector_store %arg12[%c32_109, %c0_110], %92 {strides = array<i32>} : memref<64x20xf32, #tpu.memory_space<vmem>>, vector<8x20xf32>,
    %c63 = arith.constant 63 : index
    %c0_111 = arith.constant 0 : index
    %94 = vector.load %arg11[%c63, %c0_111] : memref<144x20xf32, #tpu.memory_space<vmem>>, vector<8x20xf32>
    %c40_112 = arith.constant 40 : index
    %c0_113 = arith.constant 0 : index
    %95 = vector.load %arg12[%c40_112, %c0_113] : memref<64x20xf32, #tpu.memory_space<vmem>>, vector<8x20xf32>
    tpu.vector_store %arg12[%c40_112, %c0_113], %94 {strides = array<i32>} : memref<64x20xf32, #tpu.memory_space<vmem>>, vector<8x20xf32>,
    %c75 = arith.constant 75 : index
    %c0_114 = arith.constant 0 : index
    %96 = vector.load %arg11[%c75, %c0_114] : memref<144x20xf32, #tpu.memory_space<vmem>>, vector<8x20xf32>
    %c48_115 = arith.constant 48 : index
    %c0_116 = arith.constant 0 : index
    %97 = vector.load %arg12[%c48_115, %c0_116] : memref<64x20xf32, #tpu.memory_space<vmem>>, vector<8x20xf32>
    tpu.vector_store %arg12[%c48_115, %c0_116], %96 {strides = array<i32>} : memref<64x20xf32, #tpu.memory_space<vmem>>, vector<8x20xf32>,
    %c87 = arith.constant 87 : index
    %c0_117 = arith.constant 0 : index
    %98 = vector.load %arg11[%c87, %c0_117] : memref<144x20xf32, #tpu.memory_space<vmem>>, vector<8x20xf32>
    %c56_118 = arith.constant 56 : index
    %c0_119 = arith.constant 0 : index
    %99 = vector.load %arg12[%c56_118, %c0_119] : memref<64x20xf32, #tpu.memory_space<vmem>>, vector<8x20xf32>
    tpu.vector_store %arg12[%c56_118, %c0_119], %98 {strides = array<i32>} : memref<64x20xf32, #tpu.memory_space<vmem>>, vector<8x20xf32>,
    %c0_120 = arith.constant 0 : index
    %c0_121 = arith.constant 0 : index
    %100 = vector.load %arg12[%c0_120, %c0_121] : memref<64x20xf32, #tpu.memory_space<vmem>>, vector<64x20xf32>
    %101 = arith.truncf %100 : vector<64x20xf32> to vector<64x20xbf16>
    %c3_122 = arith.constant 3 : index
    %c0_123 = arith.constant 0 : index
    %c0_124 = arith.constant 0 : index
    %102 = vector.load %arg4[%c3_122, %c0_123, %c0_124] : memref<25x20x50xbf16, #tpu.memory_space<vmem>>, vector<1x20x50xbf16>
    %103 = vector.shape_cast %102 : vector<1x20x50xbf16> to vector<20x50xbf16>
    %cst_125 = arith.constant dense<0.000000e+00> : vector<64x50xf32>
    %104 = tpu.matmul %101, %103, %cst_125 {dimension_numbers = #tpu.dot_dimension_numbers<[1], [0], [0], [1], [0, 0, 1, 1], [], []>} : vector<64x20xbf16>, vector<20x50xbf16>, vector<64x50xf32> -> vector<64x50xf32>
    %105 = arith.addf %83, %104 : vector<64x50xf32>
    %c4 = arith.constant 4 : index
    %c0_126 = arith.constant 0 : index
    %106 = vector.load %arg11[%c4, %c0_126] : memref<144x20xf32, #tpu.memory_space<vmem>>, vector<8x20xf32>
    %c0_127 = arith.constant 0 : index
    %c0_128 = arith.constant 0 : index
    %107 = vector.load %arg12[%c0_127, %c0_128] : memref<64x20xf32, #tpu.memory_space<vmem>>, vector<8x20xf32>
    tpu.vector_store %arg12[%c0_127, %c0_128], %106 {strides = array<i32>} : memref<64x20xf32, #tpu.memory_space<vmem>>, vector<8x20xf32>,
    %c16_129 = arith.constant 16 : index
    %c0_130 = arith.constant 0 : index
    %108 = vector.load %arg11[%c16_129, %c0_130] : memref<144x20xf32, #tpu.memory_space<vmem>>, vector<8x20xf32>
    %c8_131 = arith.constant 8 : index
    %c0_132 = arith.constant 0 : index
    %109 = vector.load %arg12[%c8_131, %c0_132] : memref<64x20xf32, #tpu.memory_space<vmem>>, vector<8x20xf32>
    tpu.vector_store %arg12[%c8_131, %c0_132], %108 {strides = array<i32>} : memref<64x20xf32, #tpu.memory_space<vmem>>, vector<8x20xf32>,
    %c28 = arith.constant 28 : index
    %c0_133 = arith.constant 0 : index
    %110 = vector.load %arg11[%c28, %c0_133] : memref<144x20xf32, #tpu.memory_space<vmem>>, vector<8x20xf32>
    %c16_134 = arith.constant 16 : index
    %c0_135 = arith.constant 0 : index
    %111 = vector.load %arg12[%c16_134, %c0_135] : memref<64x20xf32, #tpu.memory_space<vmem>>, vector<8x20xf32>
    tpu.vector_store %arg12[%c16_134, %c0_135], %110 {strides = array<i32>} : memref<64x20xf32, #tpu.memory_space<vmem>>, vector<8x20xf32>,
    %c40_136 = arith.constant 40 : index
    %c0_137 = arith.constant 0 : index
    %112 = vector.load %arg11[%c40_136, %c0_137] : memref<144x20xf32, #tpu.memory_space<vmem>>, vector<8x20xf32>
    %c24_138 = arith.constant 24 : index
    %c0_139 = arith.constant 0 : index
    %113 = vector.load %arg12[%c24_138, %c0_139] : memref<64x20xf32, #tpu.memory_space<vmem>>, vector<8x20xf32>
    tpu.vector_store %arg12[%c24_138, %c0_139], %112 {strides = array<i32>} : memref<64x20xf32, #tpu.memory_space<vmem>>, vector<8x20xf32>,
    %c52 = arith.constant 52 : index
    %c0_140 = arith.constant 0 : index
    %114 = vector.load %arg11[%c52, %c0_140] : memref<144x20xf32, #tpu.memory_space<vmem>>, vector<8x20xf32>
    %c32_141 = arith.constant 32 : index
    %c0_142 = arith.constant 0 : index
    %115 = vector.load %arg12[%c32_141, %c0_142] : memref<64x20xf32, #tpu.memory_space<vmem>>, vector<8x20xf32>
    tpu.vector_store %arg12[%c32_141, %c0_142], %114 {strides = array<i32>} : memref<64x20xf32, #tpu.memory_space<vmem>>, vector<8x20xf32>,
    %c64 = arith.constant 64 : index
    %c0_143 = arith.constant 0 : index
    %116 = vector.load %arg11[%c64, %c0_143] : memref<144x20xf32, #tpu.memory_space<vmem>>, vector<8x20xf32>
    %c40_144 = arith.constant 40 : index
    %c0_145 = arith.constant 0 : index
    %117 = vector.load %arg12[%c40_144, %c0_145] : memref<64x20xf32, #tpu.memory_space<vmem>>, vector<8x20xf32>
    tpu.vector_store %arg12[%c40_144, %c0_145], %116 {strides = array<i32>} : memref<64x20xf32, #tpu.memory_space<vmem>>, vector<8x20xf32>,
    %c76 = arith.constant 76 : index
    %c0_146 = arith.constant 0 : index
    %118 = vector.load %arg11[%c76, %c0_146] : memref<144x20xf32, #tpu.memory_space<vmem>>, vector<8x20xf32>
    %c48_147 = arith.constant 48 : index
    %c0_148 = arith.constant 0 : index
    %119 = vector.load %arg12[%c48_147, %c0_148] : memref<64x20xf32, #tpu.memory_space<vmem>>, vector<8x20xf32>
    tpu.vector_store %arg12[%c48_147, %c0_148], %118 {strides = array<i32>} : memref<64x20xf32, #tpu.memory_space<vmem>>, vector<8x20xf32>,
    %c88 = arith.constant 88 : index
    %c0_149 = arith.constant 0 : index
    %120 = vector.load %arg11[%c88, %c0_149] : memref<144x20xf32, #tpu.memory_space<vmem>>, vector<8x20xf32>
    %c56_150 = arith.constant 56 : index
    %c0_151 = arith.constant 0 : index
    %121 = vector.load %arg12[%c56_150, %c0_151] : memref<64x20xf32, #tpu.memory_space<vmem>>, vector<8x20xf32>
    tpu.vector_store %arg12[%c56_150, %c0_151], %120 {strides = array<i32>} : memref<64x20xf32, #tpu.memory_space<vmem>>, vector<8x20xf32>,
    %c0_152 = arith.constant 0 : index
    %c0_153 = arith.constant 0 : index
    %122 = vector.load %arg12[%c0_152, %c0_153] : memref<64x20xf32, #tpu.memory_space<vmem>>, vector<64x20xf32>
    %123 = arith.truncf %122 : vector<64x20xf32> to vector<64x20xbf16>
    %c4_154 = arith.constant 4 : index
    %c0_155 = arith.constant 0 : index
    %c0_156 = arith.constant 0 : index
    %124 = vector.load %arg4[%c4_154, %c0_155, %c0_156] : memref<25x20x50xbf16, #tpu.memory_space<vmem>>, vector<1x20x50xbf16>
    %125 = vector.shape_cast %124 : vector<1x20x50xbf16> to vector<20x50xbf16>
    %cst_157 = arith.constant dense<0.000000e+00> : vector<64x50xf32>
    %126 = tpu.matmul %123, %125, %cst_157 {dimension_numbers = #tpu.dot_dimension_numbers<[1], [0], [0], [1], [0, 0, 1, 1], [], []>} : vector<64x20xbf16>, vector<20x50xbf16>, vector<64x50xf32> -> vector<64x50xf32>
    %127 = arith.addf %105, %126 : vector<64x50xf32>
    %c12_158 = arith.constant 12 : index
    %c0_159 = arith.constant 0 : index
    %128 = vector.load %arg11[%c12_158, %c0_159] : memref<144x20xf32, #tpu.memory_space<vmem>>, vector<8x20xf32>
    %c0_160 = arith.constant 0 : index
    %c0_161 = arith.constant 0 : index
    %129 = vector.load %arg12[%c0_160, %c0_161] : memref<64x20xf32, #tpu.memory_space<vmem>>, vector<8x20xf32>
    tpu.vector_store %arg12[%c0_160, %c0_161], %128 {strides = array<i32>} : memref<64x20xf32, #tpu.memory_space<vmem>>, vector<8x20xf32>,
    %c24_162 = arith.constant 24 : index
    %c0_163 = arith.constant 0 : index
    %130 = vector.load %arg11[%c24_162, %c0_163] : memref<144x20xf32, #tpu.memory_space<vmem>>, vector<8x20xf32>
    %c8_164 = arith.constant 8 : index
    %c0_165 = arith.constant 0 : index
    %131 = vector.load %arg12[%c8_164, %c0_165] : memref<64x20xf32, #tpu.memory_space<vmem>>, vector<8x20xf32>
    tpu.vector_store %arg12[%c8_164, %c0_165], %130 {strides = array<i32>} : memref<64x20xf32, #tpu.memory_space<vmem>>, vector<8x20xf32>,
    %c36_166 = arith.constant 36 : index
    %c0_167 = arith.constant 0 : index
    %132 = vector.load %arg11[%c36_166, %c0_167] : memref<144x20xf32, #tpu.memory_space<vmem>>, vector<8x20xf32>
    %c16_168 = arith.constant 16 : index
    %c0_169 = arith.constant 0 : index
    %133 = vector.load %arg12[%c16_168, %c0_169] : memref<64x20xf32, #tpu.memory_space<vmem>>, vector<8x20xf32>
    tpu.vector_store %arg12[%c16_168, %c0_169], %132 {strides = array<i32>} : memref<64x20xf32, #tpu.memory_space<vmem>>, vector<8x20xf32>,
    %c48_170 = arith.constant 48 : index
    %c0_171 = arith.constant 0 : index
    %134 = vector.load %arg11[%c48_170, %c0_171] : memref<144x20xf32, #tpu.memory_space<vmem>>, vector<8x20xf32>
    %c24_172 = arith.constant 24 : index
    %c0_173 = arith.constant 0 : index
    %135 = vector.load %arg12[%c24_172, %c0_173] : memref<64x20xf32, #tpu.memory_space<vmem>>, vector<8x20xf32>
    tpu.vector_store %arg12[%c24_172, %c0_173], %134 {strides = array<i32>} : memref<64x20xf32, #tpu.memory_space<vmem>>, vector<8x20xf32>,
    %c60_174 = arith.constant 60 : index
    %c0_175 = arith.constant 0 : index
    %136 = vector.load %arg11[%c60_174, %c0_175] : memref<144x20xf32, #tpu.memory_space<vmem>>, vector<8x20xf32>
    %c32_176 = arith.constant 32 : index
    %c0_177 = arith.constant 0 : index
    %137 = vector.load %arg12[%c32_176, %c0_177] : memref<64x20xf32, #tpu.memory_space<vmem>>, vector<8x20xf32>
    tpu.vector_store %arg12[%c32_176, %c0_177], %136 {strides = array<i32>} : memref<64x20xf32, #tpu.memory_space<vmem>>, vector<8x20xf32>,
    %c72_178 = arith.constant 72 : index
    %c0_179 = arith.constant 0 : index
    %138 = vector.load %arg11[%c72_178, %c0_179] : memref<144x20xf32, #tpu.memory_space<vmem>>, vector<8x20xf32>
    %c40_180 = arith.constant 40 : index
    %c0_181 = arith.constant 0 : index
    %139 = vector.load %arg12[%c40_180, %c0_181] : memref<64x20xf32, #tpu.memory_space<vmem>>, vector<8x20xf32>
    tpu.vector_store %arg12[%c40_180, %c0_181], %138 {strides = array<i32>} : memref<64x20xf32, #tpu.memory_space<vmem>>, vector<8x20xf32>,
    %c84_182 = arith.constant 84 : index
    %c0_183 = arith.constant 0 : index
    %140 = vector.load %arg11[%c84_182, %c0_183] : memref<144x20xf32, #tpu.memory_space<vmem>>, vector<8x20xf32>
    %c48_184 = arith.constant 48 : index
    %c0_185 = arith.constant 0 : index
    %141 = vector.load %arg12[%c48_184, %c0_185] : memref<64x20xf32, #tpu.memory_space<vmem>>, vector<8x20xf32>
    tpu.vector_store %arg12[%c48_184, %c0_185], %140 {strides = array<i32>} : memref<64x20xf32, #tpu.memory_space<vmem>>, vector<8x20xf32>,
    %c96 = arith.constant 96 : index
    %c0_186 = arith.constant 0 : index
    %142 = vector.load %arg11[%c96, %c0_186] : memref<144x20xf32, #tpu.memory_space<vmem>>, vector<8x20xf32>
    %c56_187 = arith.constant 56 : index
    %c0_188 = arith.constant 0 : index
    %143 = vector.load %arg12[%c56_187, %c0_188] : memref<64x20xf32, #tpu.memory_space<vmem>>, vector<8x20xf32>
    tpu.vector_store %arg12[%c56_187, %c0_188], %142 {strides = array<i32>} : memref<64x20xf32, #tpu.memory_space<vmem>>, vector<8x20xf32>,
    %c0_189 = arith.constant 0 : index
    %c0_190 = arith.constant 0 : index
    %144 = vector.load %arg12[%c0_189, %c0_190] : memref<64x20xf32, #tpu.memory_space<vmem>>, vector<64x20xf32>
    %145 = arith.truncf %144 : vector<64x20xf32> to vector<64x20xbf16>
    %c5 = arith.constant 5 : index
    %c0_191 = arith.constant 0 : index
    %c0_192 = arith.constant 0 : index
    %146 = vector.load %arg4[%c5, %c0_191, %c0_192] : memref<25x20x50xbf16, #tpu.memory_space<vmem>>, vector<1x20x50xbf16>
    %147 = vector.shape_cast %146 : vector<1x20x50xbf16> to vector<20x50xbf16>
    %cst_193 = arith.constant dense<0.000000e+00> : vector<64x50xf32>
    %148 = tpu.matmul %145, %147, %cst_193 {dimension_numbers = #tpu.dot_dimension_numbers<[1], [0], [0], [1], [0, 0, 1, 1], [], []>} : vector<64x20xbf16>, vector<20x50xbf16>, vector<64x50xf32> -> vector<64x50xf32>
    %149 = arith.addf %127, %148 : vector<64x50xf32>
    %c13_194 = arith.constant 13 : index
    %c0_195 = arith.constant 0 : index
    %150 = vector.load %arg11[%c13_194, %c0_195] : memref<144x20xf32, #tpu.memory_space<vmem>>, vector<8x20xf32>
    %c0_196 = arith.constant 0 : index
    %c0_197 = arith.constant 0 : index
    %151 = vector.load %arg12[%c0_196, %c0_197] : memref<64x20xf32, #tpu.memory_space<vmem>>, vector<8x20xf32>
    tpu.vector_store %arg12[%c0_196, %c0_197], %150 {strides = array<i32>} : memref<64x20xf32, #tpu.memory_space<vmem>>, vector<8x20xf32>,
    %c25_198 = arith.constant 25 : index
    %c0_199 = arith.constant 0 : index
    %152 = vector.load %arg11[%c25_198, %c0_199] : memref<144x20xf32, #tpu.memory_space<vmem>>, vector<8x20xf32>
    %c8_200 = arith.constant 8 : index
    %c0_201 = arith.constant 0 : index
    %153 = vector.load %arg12[%c8_200, %c0_201] : memref<64x20xf32, #tpu.memory_space<vmem>>, vector<8x20xf32>
    tpu.vector_store %arg12[%c8_200, %c0_201], %152 {strides = array<i32>} : memref<64x20xf32, #tpu.memory_space<vmem>>, vector<8x20xf32>,
    %c37_202 = arith.constant 37 : index
    %c0_203 = arith.constant 0 : index
    %154 = vector.load %arg11[%c37_202, %c0_203] : memref<144x20xf32, #tpu.memory_space<vmem>>, vector<8x20xf32>
    %c16_204 = arith.constant 16 : index
    %c0_205 = arith.constant 0 : index
    %155 = vector.load %arg12[%c16_204, %c0_205] : memref<64x20xf32, #tpu.memory_space<vmem>>, vector<8x20xf32>
    tpu.vector_store %arg12[%c16_204, %c0_205], %154 {strides = array<i32>} : memref<64x20xf32, #tpu.memory_space<vmem>>, vector<8x20xf32>,
    %c49_206 = arith.constant 49 : index
    %c0_207 = arith.constant 0 : index
    %156 = vector.load %arg11[%c49_206, %c0_207] : memref<144x20xf32, #tpu.memory_space<vmem>>, vector<8x20xf32>
    %c24_208 = arith.constant 24 : index
    %c0_209 = arith.constant 0 : index
    %157 = vector.load %arg12[%c24_208, %c0_209] : memref<64x20xf32, #tpu.memory_space<vmem>>, vector<8x20xf32>
    tpu.vector_store %arg12[%c24_208, %c0_209], %156 {strides = array<i32>} : memref<64x20xf32, #tpu.memory_space<vmem>>, vector<8x20xf32>,
    %c61_210 = arith.constant 61 : index
    %c0_211 = arith.constant 0 : index
    %158 = vector.load %arg11[%c61_210, %c0_211] : memref<144x20xf32, #tpu.memory_space<vmem>>, vector<8x20xf32>
    %c32_212 = arith.constant 32 : index
    %c0_213 = arith.constant 0 : index
    %159 = vector.load %arg12[%c32_212, %c0_213] : memref<64x20xf32, #tpu.memory_space<vmem>>, vector<8x20xf32>
    tpu.vector_store %arg12[%c32_212, %c0_213], %158 {strides = array<i32>} : memref<64x20xf32, #tpu.memory_space<vmem>>, vector<8x20xf32>,
    %c73_214 = arith.constant 73 : index
    %c0_215 = arith.constant 0 : index
    %160 = vector.load %arg11[%c73_214, %c0_215] : memref<144x20xf32, #tpu.memory_space<vmem>>, vector<8x20xf32>
    %c40_216 = arith.constant 40 : index
    %c0_217 = arith.constant 0 : index
    %161 = vector.load %arg12[%c40_216, %c0_217] : memref<64x20xf32, #tpu.memory_space<vmem>>, vector<8x20xf32>
    tpu.vector_store %arg12[%c40_216, %c0_217], %160 {strides = array<i32>} : memref<64x20xf32, #tpu.memory_space<vmem>>, vector<8x20xf32>,
    %c85_218 = arith.constant 85 : index
    %c0_219 = arith.constant 0 : index
    %162 = vector.load %arg11[%c85_218, %c0_219] : memref<144x20xf32, #tpu.memory_space<vmem>>, vector<8x20xf32>
    %c48_220 = arith.constant 48 : index
    %c0_221 = arith.constant 0 : index
    %163 = vector.load %arg12[%c48_220, %c0_221] : memref<64x20xf32, #tpu.memory_space<vmem>>, vector<8x20xf32>
    tpu.vector_store %arg12[%c48_220, %c0_221], %162 {strides = array<i32>} : memref<64x20xf32, #tpu.memory_space<vmem>>, vector<8x20xf32>,
    %c97 = arith.constant 97 : index
    %c0_222 = arith.constant 0 : index
    %164 = vector.load %arg11[%c97, %c0_222] : memref<144x20xf32, #tpu.memory_space<vmem>>, vector<8x20xf32>
    %c56_223 = arith.constant 56 : index
    %c0_224 = arith.constant 0 : index
    %165 = vector.load %arg12[%c56_223, %c0_224] : memref<64x20xf32, #tpu.memory_space<vmem>>, vector<8x20xf32>
    tpu.vector_store %arg12[%c56_223, %c0_224], %164 {strides = array<i32>} : memref<64x20xf32, #tpu.memory_space<vmem>>, vector<8x20xf32>,
    %c0_225 = arith.constant 0 : index
    %c0_226 = arith.constant 0 : index
    %166 = vector.load %arg12[%c0_225, %c0_226] : memref<64x20xf32, #tpu.memory_space<vmem>>, vector<64x20xf32>
    %167 = arith.truncf %166 : vector<64x20xf32> to vector<64x20xbf16>
    %c6 = arith.constant 6 : index
    %c0_227 = arith.constant 0 : index
    %c0_228 = arith.constant 0 : index
    %168 = vector.load %arg4[%c6, %c0_227, %c0_228] : memref<25x20x50xbf16, #tpu.memory_space<vmem>>, vector<1x20x50xbf16>
    %169 = vector.shape_cast %168 : vector<1x20x50xbf16> to vector<20x50xbf16>
    %cst_229 = arith.constant dense<0.000000e+00> : vector<64x50xf32>
    %170 = tpu.matmul %167, %169, %cst_229 {dimension_numbers = #tpu.dot_dimension_numbers<[1], [0], [0], [1], [0, 0, 1, 1], [], []>} : vector<64x20xbf16>, vector<20x50xbf16>, vector<64x50xf32> -> vector<64x50xf32>
    %171 = arith.addf %149, %170 : vector<64x50xf32>
    %c14_230 = arith.constant 14 : index
    %c0_231 = arith.constant 0 : index
    %172 = vector.load %arg11[%c14_230, %c0_231] : memref<144x20xf32, #tpu.memory_space<vmem>>, vector<8x20xf32>
    %c0_232 = arith.constant 0 : index
    %c0_233 = arith.constant 0 : index
    %173 = vector.load %arg12[%c0_232, %c0_233] : memref<64x20xf32, #tpu.memory_space<vmem>>, vector<8x20xf32>
    tpu.vector_store %arg12[%c0_232, %c0_233], %172 {strides = array<i32>} : memref<64x20xf32, #tpu.memory_space<vmem>>, vector<8x20xf32>,
    %c26_234 = arith.constant 26 : index
    %c0_235 = arith.constant 0 : index
    %174 = vector.load %arg11[%c26_234, %c0_235] : memref<144x20xf32, #tpu.memory_space<vmem>>, vector<8x20xf32>
    %c8_236 = arith.constant 8 : index
    %c0_237 = arith.constant 0 : index
    %175 = vector.load %arg12[%c8_236, %c0_237] : memref<64x20xf32, #tpu.memory_space<vmem>>, vector<8x20xf32>
    tpu.vector_store %arg12[%c8_236, %c0_237], %174 {strides = array<i32>} : memref<64x20xf32, #tpu.memory_space<vmem>>, vector<8x20xf32>,
    %c38_238 = arith.constant 38 : index
    %c0_239 = arith.constant 0 : index
    %176 = vector.load %arg11[%c38_238, %c0_239] : memref<144x20xf32, #tpu.memory_space<vmem>>, vector<8x20xf32>
    %c16_240 = arith.constant 16 : index
    %c0_241 = arith.constant 0 : index
    %177 = vector.load %arg12[%c16_240, %c0_241] : memref<64x20xf32, #tpu.memory_space<vmem>>, vector<8x20xf32>
    tpu.vector_store %arg12[%c16_240, %c0_241], %176 {strides = array<i32>} : memref<64x20xf32, #tpu.memory_space<vmem>>, vector<8x20xf32>,
    %c50_242 = arith.constant 50 : index
    %c0_243 = arith.constant 0 : index
    %178 = vector.load %arg11[%c50_242, %c0_243] : memref<144x20xf32, #tpu.memory_space<vmem>>, vector<8x20xf32>
    %c24_244 = arith.constant 24 : index
    %c0_245 = arith.constant 0 : index
    %179 = vector.load %arg12[%c24_244, %c0_245] : memref<64x20xf32, #tpu.memory_space<vmem>>, vector<8x20xf32>
    tpu.vector_store %arg12[%c24_244, %c0_245], %178 {strides = array<i32>} : memref<64x20xf32, #tpu.memory_space<vmem>>, vector<8x20xf32>,
    %c62_246 = arith.constant 62 : index
    %c0_247 = arith.constant 0 : index
    %180 = vector.load %arg11[%c62_246, %c0_247] : memref<144x20xf32, #tpu.memory_space<vmem>>, vector<8x20xf32>
    %c32_248 = arith.constant 32 : index
    %c0_249 = arith.constant 0 : index
    %181 = vector.load %arg12[%c32_248, %c0_249] : memref<64x20xf32, #tpu.memory_space<vmem>>, vector<8x20xf32>
    tpu.vector_store %arg12[%c32_248, %c0_249], %180 {strides = array<i32>} : memref<64x20xf32, #tpu.memory_space<vmem>>, vector<8x20xf32>,
    %c74_250 = arith.constant 74 : index
    %c0_251 = arith.constant 0 : index
    %182 = vector.load %arg11[%c74_250, %c0_251] : memref<144x20xf32, #tpu.memory_space<vmem>>, vector<8x20xf32>
    %c40_252 = arith.constant 40 : index
    %c0_253 = arith.constant 0 : index
    %183 = vector.load %arg12[%c40_252, %c0_253] : memref<64x20xf32, #tpu.memory_space<vmem>>, vector<8x20xf32>
    tpu.vector_store %arg12[%c40_252, %c0_253], %182 {strides = array<i32>} : memref<64x20xf32, #tpu.memory_space<vmem>>, vector<8x20xf32>,
    %c86_254 = arith.constant 86 : index
    %c0_255 = arith.constant 0 : index
    %184 = vector.load %arg11[%c86_254, %c0_255] : memref<144x20xf32, #tpu.memory_space<vmem>>, vector<8x20xf32>
    %c48_256 = arith.constant 48 : index
    %c0_257 = arith.constant 0 : index
    %185 = vector.load %arg12[%c48_256, %c0_257] : memref<64x20xf32, #tpu.memory_space<vmem>>, vector<8x20xf32>
    tpu.vector_store %arg12[%c48_256, %c0_257], %184 {strides = array<i32>} : memref<64x20xf32, #tpu.memory_space<vmem>>, vector<8x20xf32>,
    %c98 = arith.constant 98 : index
    %c0_258 = arith.constant 0 : index
    %186 = vector.load %arg11[%c98, %c0_258] : memref<144x20xf32, #tpu.memory_space<vmem>>, vector<8x20xf32>
    %c56_259 = arith.constant 56 : index
    %c0_260 = arith.constant 0 : index
    %187 = vector.load %arg12[%c56_259, %c0_260] : memref<64x20xf32, #tpu.memory_space<vmem>>, vector<8x20xf32>
    tpu.vector_store %arg12[%c56_259, %c0_260], %186 {strides = array<i32>} : memref<64x20xf32, #tpu.memory_space<vmem>>, vector<8x20xf32>,
    %c0_261 = arith.constant 0 : index
    %c0_262 = arith.constant 0 : index
    %188 = vector.load %arg12[%c0_261, %c0_262] : memref<64x20xf32, #tpu.memory_space<vmem>>, vector<64x20xf32>
    %189 = arith.truncf %188 : vector<64x20xf32> to vector<64x20xbf16>
    %c7 = arith.constant 7 : index
    %c0_263 = arith.constant 0 : index
    %c0_264 = arith.constant 0 : index
    %190 = vector.load %arg4[%c7, %c0_263, %c0_264] : memref<25x20x50xbf16, #tpu.memory_space<vmem>>, vector<1x20x50xbf16>
    %191 = vector.shape_cast %190 : vector<1x20x50xbf16> to vector<20x50xbf16>
    %cst_265 = arith.constant dense<0.000000e+00> : vector<64x50xf32>
    %192 = tpu.matmul %189, %191, %cst_265 {dimension_numbers = #tpu.dot_dimension_numbers<[1], [0], [0], [1], [0, 0, 1, 1], [], []>} : vector<64x20xbf16>, vector<20x50xbf16>, vector<64x50xf32> -> vector<64x50xf32>
    %193 = arith.addf %171, %192 : vector<64x50xf32>
    %c15_266 = arith.constant 15 : index
    %c0_267 = arith.constant 0 : index
    %194 = vector.load %arg11[%c15_266, %c0_267] : memref<144x20xf32, #tpu.memory_space<vmem>>, vector<8x20xf32>
    %c0_268 = arith.constant 0 : index
    %c0_269 = arith.constant 0 : index
    %195 = vector.load %arg12[%c0_268, %c0_269] : memref<64x20xf32, #tpu.memory_space<vmem>>, vector<8x20xf32>
    tpu.vector_store %arg12[%c0_268, %c0_269], %194 {strides = array<i32>} : memref<64x20xf32, #tpu.memory_space<vmem>>, vector<8x20xf32>,
    %c27_270 = arith.constant 27 : index
    %c0_271 = arith.constant 0 : index
    %196 = vector.load %arg11[%c27_270, %c0_271] : memref<144x20xf32, #tpu.memory_space<vmem>>, vector<8x20xf32>
    %c8_272 = arith.constant 8 : index
    %c0_273 = arith.constant 0 : index
    %197 = vector.load %arg12[%c8_272, %c0_273] : memref<64x20xf32, #tpu.memory_space<vmem>>, vector<8x20xf32>
    tpu.vector_store %arg12[%c8_272, %c0_273], %196 {strides = array<i32>} : memref<64x20xf32, #tpu.memory_space<vmem>>, vector<8x20xf32>,
    %c39_274 = arith.constant 39 : index
    %c0_275 = arith.constant 0 : index
    %198 = vector.load %arg11[%c39_274, %c0_275] : memref<144x20xf32, #tpu.memory_space<vmem>>, vector<8x20xf32>
    %c16_276 = arith.constant 16 : index
    %c0_277 = arith.constant 0 : index
    %199 = vector.load %arg12[%c16_276, %c0_277] : memref<64x20xf32, #tpu.memory_space<vmem>>, vector<8x20xf32>
    tpu.vector_store %arg12[%c16_276, %c0_277], %198 {strides = array<i32>} : memref<64x20xf32, #tpu.memory_space<vmem>>, vector<8x20xf32>,
    %c51_278 = arith.constant 51 : index
    %c0_279 = arith.constant 0 : index
    %200 = vector.load %arg11[%c51_278, %c0_279] : memref<144x20xf32, #tpu.memory_space<vmem>>, vector<8x20xf32>
    %c24_280 = arith.constant 24 : index
    %c0_281 = arith.constant 0 : index
    %201 = vector.load %arg12[%c24_280, %c0_281] : memref<64x20xf32, #tpu.memory_space<vmem>>, vector<8x20xf32>
    tpu.vector_store %arg12[%c24_280, %c0_281], %200 {strides = array<i32>} : memref<64x20xf32, #tpu.memory_space<vmem>>, vector<8x20xf32>,
    %c63_282 = arith.constant 63 : index
    %c0_283 = arith.constant 0 : index
    %202 = vector.load %arg11[%c63_282, %c0_283] : memref<144x20xf32, #tpu.memory_space<vmem>>, vector<8x20xf32>
    %c32_284 = arith.constant 32 : index
    %c0_285 = arith.constant 0 : index
    %203 = vector.load %arg12[%c32_284, %c0_285] : memref<64x20xf32, #tpu.memory_space<vmem>>, vector<8x20xf32>
    tpu.vector_store %arg12[%c32_284, %c0_285], %202 {strides = array<i32>} : memref<64x20xf32, #tpu.memory_space<vmem>>, vector<8x20xf32>,
    %c75_286 = arith.constant 75 : index
    %c0_287 = arith.constant 0 : index
    %204 = vector.load %arg11[%c75_286, %c0_287] : memref<144x20xf32, #tpu.memory_space<vmem>>, vector<8x20xf32>
    %c40_288 = arith.constant 40 : index
    %c0_289 = arith.constant 0 : index
    %205 = vector.load %arg12[%c40_288, %c0_289] : memref<64x20xf32, #tpu.memory_space<vmem>>, vector<8x20xf32>
    tpu.vector_store %arg12[%c40_288, %c0_289], %204 {strides = array<i32>} : memref<64x20xf32, #tpu.memory_space<vmem>>, vector<8x20xf32>,
    %c87_290 = arith.constant 87 : index
    %c0_291 = arith.constant 0 : index
    %206 = vector.load %arg11[%c87_290, %c0_291] : memref<144x20xf32, #tpu.memory_space<vmem>>, vector<8x20xf32>
    %c48_292 = arith.constant 48 : index
    %c0_293 = arith.constant 0 : index
    %207 = vector.load %arg12[%c48_292, %c0_293] : memref<64x20xf32, #tpu.memory_space<vmem>>, vector<8x20xf32>
    tpu.vector_store %arg12[%c48_292, %c0_293], %206 {strides = array<i32>} : memref<64x20xf32, #tpu.memory_space<vmem>>, vector<8x20xf32>,
    %c99 = arith.constant 99 : index
    %c0_294 = arith.constant 0 : index
    %208 = vector.load %arg11[%c99, %c0_294] : memref<144x20xf32, #tpu.memory_space<vmem>>, vector<8x20xf32>
    %c56_295 = arith.constant 56 : index
    %c0_296 = arith.constant 0 : index
    %209 = vector.load %arg12[%c56_295, %c0_296] : memref<64x20xf32, #tpu.memory_space<vmem>>, vector<8x20xf32>
    tpu.vector_store %arg12[%c56_295, %c0_296], %208 {strides = array<i32>} : memref<64x20xf32, #tpu.memory_space<vmem>>, vector<8x20xf32>,
    %c0_297 = arith.constant 0 : index
    %c0_298 = arith.constant 0 : index
    %210 = vector.load %arg12[%c0_297, %c0_298] : memref<64x20xf32, #tpu.memory_space<vmem>>, vector<64x20xf32>
    %211 = arith.truncf %210 : vector<64x20xf32> to vector<64x20xbf16>
    %c8_299 = arith.constant 8 : index
    %c0_300 = arith.constant 0 : index
    %c0_301 = arith.constant 0 : index
    %212 = vector.load %arg4[%c8_299, %c0_300, %c0_301] : memref<25x20x50xbf16, #tpu.memory_space<vmem>>, vector<1x20x50xbf16>
    %213 = vector.shape_cast %212 : vector<1x20x50xbf16> to vector<20x50xbf16>
    %cst_302 = arith.constant dense<0.000000e+00> : vector<64x50xf32>
    %214 = tpu.matmul %211, %213, %cst_302 {dimension_numbers = #tpu.dot_dimension_numbers<[1], [0], [0], [1], [0, 0, 1, 1], [], []>} : vector<64x20xbf16>, vector<20x50xbf16>, vector<64x50xf32> -> vector<64x50xf32>
    %215 = arith.addf %193, %214 : vector<64x50xf32>
    %c16_303 = arith.constant 16 : index
    %c0_304 = arith.constant 0 : index
    %216 = vector.load %arg11[%c16_303, %c0_304] : memref<144x20xf32, #tpu.memory_space<vmem>>, vector<8x20xf32>
    %c0_305 = arith.constant 0 : index
    %c0_306 = arith.constant 0 : index
    %217 = vector.load %arg12[%c0_305, %c0_306] : memref<64x20xf32, #tpu.memory_space<vmem>>, vector<8x20xf32>
    tpu.vector_store %arg12[%c0_305, %c0_306], %216 {strides = array<i32>} : memref<64x20xf32, #tpu.memory_space<vmem>>, vector<8x20xf32>,
    %c28_307 = arith.constant 28 : index
    %c0_308 = arith.constant 0 : index
    %218 = vector.load %arg11[%c28_307, %c0_308] : memref<144x20xf32, #tpu.memory_space<vmem>>, vector<8x20xf32>
    %c8_309 = arith.constant 8 : index
    %c0_310 = arith.constant 0 : index
    %219 = vector.load %arg12[%c8_309, %c0_310] : memref<64x20xf32, #tpu.memory_space<vmem>>, vector<8x20xf32>
    tpu.vector_store %arg12[%c8_309, %c0_310], %218 {strides = array<i32>} : memref<64x20xf32, #tpu.memory_space<vmem>>, vector<8x20xf32>,
    %c40_311 = arith.constant 40 : index
    %c0_312 = arith.constant 0 : index
    %220 = vector.load %arg11[%c40_311, %c0_312] : memref<144x20xf32, #tpu.memory_space<vmem>>, vector<8x20xf32>
    %c16_313 = arith.constant 16 : index
    %c0_314 = arith.constant 0 : index
    %221 = vector.load %arg12[%c16_313, %c0_314] : memref<64x20xf32, #tpu.memory_space<vmem>>, vector<8x20xf32>
    tpu.vector_store %arg12[%c16_313, %c0_314], %220 {strides = array<i32>} : memref<64x20xf32, #tpu.memory_space<vmem>>, vector<8x20xf32>,
    %c52_315 = arith.constant 52 : index
    %c0_316 = arith.constant 0 : index
    %222 = vector.load %arg11[%c52_315, %c0_316] : memref<144x20xf32, #tpu.memory_space<vmem>>, vector<8x20xf32>
    %c24_317 = arith.constant 24 : index
    %c0_318 = arith.constant 0 : index
    %223 = vector.load %arg12[%c24_317, %c0_318] : memref<64x20xf32, #tpu.memory_space<vmem>>, vector<8x20xf32>
    tpu.vector_store %arg12[%c24_317, %c0_318], %222 {strides = array<i32>} : memref<64x20xf32, #tpu.memory_space<vmem>>, vector<8x20xf32>,
    %c64_319 = arith.constant 64 : index
    %c0_320 = arith.constant 0 : index
    %224 = vector.load %arg11[%c64_319, %c0_320] : memref<144x20xf32, #tpu.memory_space<vmem>>, vector<8x20xf32>
    %c32_321 = arith.constant 32 : index
    %c0_322 = arith.constant 0 : index
    %225 = vector.load %arg12[%c32_321, %c0_322] : memref<64x20xf32, #tpu.memory_space<vmem>>, vector<8x20xf32>
    tpu.vector_store %arg12[%c32_321, %c0_322], %224 {strides = array<i32>} : memref<64x20xf32, #tpu.memory_space<vmem>>, vector<8x20xf32>,
    %c76_323 = arith.constant 76 : index
    %c0_324 = arith.constant 0 : index
    %226 = vector.load %arg11[%c76_323, %c0_324] : memref<144x20xf32, #tpu.memory_space<vmem>>, vector<8x20xf32>
    %c40_325 = arith.constant 40 : index
    %c0_326 = arith.constant 0 : index
    %227 = vector.load %arg12[%c40_325, %c0_326] : memref<64x20xf32, #tpu.memory_space<vmem>>, vector<8x20xf32>
    tpu.vector_store %arg12[%c40_325, %c0_326], %226 {strides = array<i32>} : memref<64x20xf32, #tpu.memory_space<vmem>>, vector<8x20xf32>,
    %c88_327 = arith.constant 88 : index
    %c0_328 = arith.constant 0 : index
    %228 = vector.load %arg11[%c88_327, %c0_328] : memref<144x20xf32, #tpu.memory_space<vmem>>, vector<8x20xf32>
    %c48_329 = arith.constant 48 : index
    %c0_330 = arith.constant 0 : index
    %229 = vector.load %arg12[%c48_329, %c0_330] : memref<64x20xf32, #tpu.memory_space<vmem>>, vector<8x20xf32>
    tpu.vector_store %arg12[%c48_329, %c0_330], %228 {strides = array<i32>} : memref<64x20xf32, #tpu.memory_space<vmem>>, vector<8x20xf32>,
    %c100 = arith.constant 100 : index
    %c0_331 = arith.constant 0 : index
    %230 = vector.load %arg11[%c100, %c0_331] : memref<144x20xf32, #tpu.memory_space<vmem>>, vector<8x20xf32>
    %c56_332 = arith.constant 56 : index
    %c0_333 = arith.constant 0 : index
    %231 = vector.load %arg12[%c56_332, %c0_333] : memref<64x20xf32, #tpu.memory_space<vmem>>, vector<8x20xf32>
    tpu.vector_store %arg12[%c56_332, %c0_333], %230 {strides = array<i32>} : memref<64x20xf32, #tpu.memory_space<vmem>>, vector<8x20xf32>,
    %c0_334 = arith.constant 0 : index
    %c0_335 = arith.constant 0 : index
    %232 = vector.load %arg12[%c0_334, %c0_335] : memref<64x20xf32, #tpu.memory_space<vmem>>, vector<64x20xf32>
    %233 = arith.truncf %232 : vector<64x20xf32> to vector<64x20xbf16>
    %c9 = arith.constant 9 : index
    %c0_336 = arith.constant 0 : index
    %c0_337 = arith.constant 0 : index
    %234 = vector.load %arg4[%c9, %c0_336, %c0_337] : memref<25x20x50xbf16, #tpu.memory_space<vmem>>, vector<1x20x50xbf16>
    %235 = vector.shape_cast %234 : vector<1x20x50xbf16> to vector<20x50xbf16>
    %cst_338 = arith.constant dense<0.000000e+00> : vector<64x50xf32>
    %236 = tpu.matmul %233, %235, %cst_338 {dimension_numbers = #tpu.dot_dimension_numbers<[1], [0], [0], [1], [0, 0, 1, 1], [], []>} : vector<64x20xbf16>, vector<20x50xbf16>, vector<64x50xf32> -> vector<64x50xf32>
    %237 = arith.addf %215, %236 : vector<64x50xf32>
    %c24_339 = arith.constant 24 : index
    %c0_340 = arith.constant 0 : index
    %238 = vector.load %arg11[%c24_339, %c0_340] : memref<144x20xf32, #tpu.memory_space<vmem>>, vector<8x20xf32>
    %c0_341 = arith.constant 0 : index
    %c0_342 = arith.constant 0 : index
    %239 = vector.load %arg12[%c0_341, %c0_342] : memref<64x20xf32, #tpu.memory_space<vmem>>, vector<8x20xf32>
    tpu.vector_store %arg12[%c0_341, %c0_342], %238 {strides = array<i32>} : memref<64x20xf32, #tpu.memory_space<vmem>>, vector<8x20xf32>,
    %c36_343 = arith.constant 36 : index
    %c0_344 = arith.constant 0 : index
    %240 = vector.load %arg11[%c36_343, %c0_344] : memref<144x20xf32, #tpu.memory_space<vmem>>, vector<8x20xf32>
    %c8_345 = arith.constant 8 : index
    %c0_346 = arith.constant 0 : index
    %241 = vector.load %arg12[%c8_345, %c0_346] : memref<64x20xf32, #tpu.memory_space<vmem>>, vector<8x20xf32>
    tpu.vector_store %arg12[%c8_345, %c0_346], %240 {strides = array<i32>} : memref<64x20xf32, #tpu.memory_space<vmem>>, vector<8x20xf32>,
    %c48_347 = arith.constant 48 : index
    %c0_348 = arith.constant 0 : index
    %242 = vector.load %arg11[%c48_347, %c0_348] : memref<144x20xf32, #tpu.memory_space<vmem>>, vector<8x20xf32>
    %c16_349 = arith.constant 16 : index
    %c0_350 = arith.constant 0 : index
    %243 = vector.load %arg12[%c16_349, %c0_350] : memref<64x20xf32, #tpu.memory_space<vmem>>, vector<8x20xf32>
    tpu.vector_store %arg12[%c16_349, %c0_350], %242 {strides = array<i32>} : memref<64x20xf32, #tpu.memory_space<vmem>>, vector<8x20xf32>,
    %c60_351 = arith.constant 60 : index
    %c0_352 = arith.constant 0 : index
    %244 = vector.load %arg11[%c60_351, %c0_352] : memref<144x20xf32, #tpu.memory_space<vmem>>, vector<8x20xf32>
    %c24_353 = arith.constant 24 : index
    %c0_354 = arith.constant 0 : index
    %245 = vector.load %arg12[%c24_353, %c0_354] : memref<64x20xf32, #tpu.memory_space<vmem>>, vector<8x20xf32>
    tpu.vector_store %arg12[%c24_353, %c0_354], %244 {strides = array<i32>} : memref<64x20xf32, #tpu.memory_space<vmem>>, vector<8x20xf32>,
    %c72_355 = arith.constant 72 : index
    %c0_356 = arith.constant 0 : index
    %246 = vector.load %arg11[%c72_355, %c0_356] : memref<144x20xf32, #tpu.memory_space<vmem>>, vector<8x20xf32>
    %c32_357 = arith.constant 32 : index
    %c0_358 = arith.constant 0 : index
    %247 = vector.load %arg12[%c32_357, %c0_358] : memref<64x20xf32, #tpu.memory_space<vmem>>, vector<8x20xf32>
    tpu.vector_store %arg12[%c32_357, %c0_358], %246 {strides = array<i32>} : memref<64x20xf32, #tpu.memory_space<vmem>>, vector<8x20xf32>,
    %c84_359 = arith.constant 84 : index
    %c0_360 = arith.constant 0 : index
    %248 = vector.load %arg11[%c84_359, %c0_360] : memref<144x20xf32, #tpu.memory_space<vmem>>, vector<8x20xf32>
    %c40_361 = arith.constant 40 : index
    %c0_362 = arith.constant 0 : index
    %249 = vector.load %arg12[%c40_361, %c0_362] : memref<64x20xf32, #tpu.memory_space<vmem>>, vector<8x20xf32>
    tpu.vector_store %arg12[%c40_361, %c0_362], %248 {strides = array<i32>} : memref<64x20xf32, #tpu.memory_space<vmem>>, vector<8x20xf32>,
    %c96_363 = arith.constant 96 : index
    %c0_364 = arith.constant 0 : index
    %250 = vector.load %arg11[%c96_363, %c0_364] : memref<144x20xf32, #tpu.memory_space<vmem>>, vector<8x20xf32>
    %c48_365 = arith.constant 48 : index
    %c0_366 = arith.constant 0 : index
    %251 = vector.load %arg12[%c48_365, %c0_366] : memref<64x20xf32, #tpu.memory_space<vmem>>, vector<8x20xf32>
    tpu.vector_store %arg12[%c48_365, %c0_366], %250 {strides = array<i32>} : memref<64x20xf32, #tpu.memory_space<vmem>>, vector<8x20xf32>,
    %c108 = arith.constant 108 : index
    %c0_367 = arith.constant 0 : index
    %252 = vector.load %arg11[%c108, %c0_367] : memref<144x20xf32, #tpu.memory_space<vmem>>, vector<8x20xf32>
    %c56_368 = arith.constant 56 : index
    %c0_369 = arith.constant 0 : index
    %253 = vector.load %arg12[%c56_368, %c0_369] : memref<64x20xf32, #tpu.memory_space<vmem>>, vector<8x20xf32>
    tpu.vector_store %arg12[%c56_368, %c0_369], %252 {strides = array<i32>} : memref<64x20xf32, #tpu.memory_space<vmem>>, vector<8x20xf32>,
    %c0_370 = arith.constant 0 : index
    %c0_371 = arith.constant 0 : index
    %254 = vector.load %arg12[%c0_370, %c0_371] : memref<64x20xf32, #tpu.memory_space<vmem>>, vector<64x20xf32>
    %255 = arith.truncf %254 : vector<64x20xf32> to vector<64x20xbf16>
    %c10 = arith.constant 10 : index
    %c0_372 = arith.constant 0 : index
    %c0_373 = arith.constant 0 : index
    %256 = vector.load %arg4[%c10, %c0_372, %c0_373] : memref<25x20x50xbf16, #tpu.memory_space<vmem>>, vector<1x20x50xbf16>
    %257 = vector.shape_cast %256 : vector<1x20x50xbf16> to vector<20x50xbf16>
    %cst_374 = arith.constant dense<0.000000e+00> : vector<64x50xf32>
    %258 = tpu.matmul %255, %257, %cst_374 {dimension_numbers = #tpu.dot_dimension_numbers<[1], [0], [0], [1], [0, 0, 1, 1], [], []>} : vector<64x20xbf16>, vector<20x50xbf16>, vector<64x50xf32> -> vector<64x50xf32>
    %259 = arith.addf %237, %258 : vector<64x50xf32>
    %c25_375 = arith.constant 25 : index
    %c0_376 = arith.constant 0 : index
    %260 = vector.load %arg11[%c25_375, %c0_376] : memref<144x20xf32, #tpu.memory_space<vmem>>, vector<8x20xf32>
    %c0_377 = arith.constant 0 : index
    %c0_378 = arith.constant 0 : index
    %261 = vector.load %arg12[%c0_377, %c0_378] : memref<64x20xf32, #tpu.memory_space<vmem>>, vector<8x20xf32>
    tpu.vector_store %arg12[%c0_377, %c0_378], %260 {strides = array<i32>} : memref<64x20xf32, #tpu.memory_space<vmem>>, vector<8x20xf32>,
    %c37_379 = arith.constant 37 : index
    %c0_380 = arith.constant 0 : index
    %262 = vector.load %arg11[%c37_379, %c0_380] : memref<144x20xf32, #tpu.memory_space<vmem>>, vector<8x20xf32>
    %c8_381 = arith.constant 8 : index
    %c0_382 = arith.constant 0 : index
    %263 = vector.load %arg12[%c8_381, %c0_382] : memref<64x20xf32, #tpu.memory_space<vmem>>, vector<8x20xf32>
    tpu.vector_store %arg12[%c8_381, %c0_382], %262 {strides = array<i32>} : memref<64x20xf32, #tpu.memory_space<vmem>>, vector<8x20xf32>,
    %c49_383 = arith.constant 49 : index
    %c0_384 = arith.constant 0 : index
    %264 = vector.load %arg11[%c49_383, %c0_384] : memref<144x20xf32, #tpu.memory_space<vmem>>, vector<8x20xf32>
    %c16_385 = arith.constant 16 : index
    %c0_386 = arith.constant 0 : index
    %265 = vector.load %arg12[%c16_385, %c0_386] : memref<64x20xf32, #tpu.memory_space<vmem>>, vector<8x20xf32>
    tpu.vector_store %arg12[%c16_385, %c0_386], %264 {strides = array<i32>} : memref<64x20xf32, #tpu.memory_space<vmem>>, vector<8x20xf32>,
    %c61_387 = arith.constant 61 : index
    %c0_388 = arith.constant 0 : index
    %266 = vector.load %arg11[%c61_387, %c0_388] : memref<144x20xf32, #tpu.memory_space<vmem>>, vector<8x20xf32>
    %c24_389 = arith.constant 24 : index
    %c0_390 = arith.constant 0 : index
    %267 = vector.load %arg12[%c24_389, %c0_390] : memref<64x20xf32, #tpu.memory_space<vmem>>, vector<8x20xf32>
    tpu.vector_store %arg12[%c24_389, %c0_390], %266 {strides = array<i32>} : memref<64x20xf32, #tpu.memory_space<vmem>>, vector<8x20xf32>,
    %c73_391 = arith.constant 73 : index
    %c0_392 = arith.constant 0 : index
    %268 = vector.load %arg11[%c73_391, %c0_392] : memref<144x20xf32, #tpu.memory_space<vmem>>, vector<8x20xf32>
    %c32_393 = arith.constant 32 : index
    %c0_394 = arith.constant 0 : index
    %269 = vector.load %arg12[%c32_393, %c0_394] : memref<64x20xf32, #tpu.memory_space<vmem>>, vector<8x20xf32>
    tpu.vector_store %arg12[%c32_393, %c0_394], %268 {strides = array<i32>} : memref<64x20xf32, #tpu.memory_space<vmem>>, vector<8x20xf32>,
    %c85_395 = arith.constant 85 : index
    %c0_396 = arith.constant 0 : index
    %270 = vector.load %arg11[%c85_395, %c0_396] : memref<144x20xf32, #tpu.memory_space<vmem>>, vector<8x20xf32>
    %c40_397 = arith.constant 40 : index
    %c0_398 = arith.constant 0 : index
    %271 = vector.load %arg12[%c40_397, %c0_398] : memref<64x20xf32, #tpu.memory_space<vmem>>, vector<8x20xf32>
    tpu.vector_store %arg12[%c40_397, %c0_398], %270 {strides = array<i32>} : memref<64x20xf32, #tpu.memory_space<vmem>>, vector<8x20xf32>,
    %c97_399 = arith.constant 97 : index
    %c0_400 = arith.constant 0 : index
    %272 = vector.load %arg11[%c97_399, %c0_400] : memref<144x20xf32, #tpu.memory_space<vmem>>, vector<8x20xf32>
    %c48_401 = arith.constant 48 : index
    %c0_402 = arith.constant 0 : index
    %273 = vector.load %arg12[%c48_401, %c0_402] : memref<64x20xf32, #tpu.memory_space<vmem>>, vector<8x20xf32>
    tpu.vector_store %arg12[%c48_401, %c0_402], %272 {strides = array<i32>} : memref<64x20xf32, #tpu.memory_space<vmem>>, vector<8x20xf32>,
    %c109 = arith.constant 109 : index
    %c0_403 = arith.constant 0 : index
    %274 = vector.load %arg11[%c109, %c0_403] : memref<144x20xf32, #tpu.memory_space<vmem>>, vector<8x20xf32>
    %c56_404 = arith.constant 56 : index
    %c0_405 = arith.constant 0 : index
    %275 = vector.load %arg12[%c56_404, %c0_405] : memref<64x20xf32, #tpu.memory_space<vmem>>, vector<8x20xf32>
    tpu.vector_store %arg12[%c56_404, %c0_405], %274 {strides = array<i32>} : memref<64x20xf32, #tpu.memory_space<vmem>>, vector<8x20xf32>,
    %c0_406 = arith.constant 0 : index
    %c0_407 = arith.constant 0 : index
    %276 = vector.load %arg12[%c0_406, %c0_407] : memref<64x20xf32, #tpu.memory_space<vmem>>, vector<64x20xf32>
    %277 = arith.truncf %276 : vector<64x20xf32> to vector<64x20xbf16>
    %c11 = arith.constant 11 : index
    %c0_408 = arith.constant 0 : index
    %c0_409 = arith.constant 0 : index
    %278 = vector.load %arg4[%c11, %c0_408, %c0_409] : memref<25x20x50xbf16, #tpu.memory_space<vmem>>, vector<1x20x50xbf16>
    %279 = vector.shape_cast %278 : vector<1x20x50xbf16> to vector<20x50xbf16>
    %cst_410 = arith.constant dense<0.000000e+00> : vector<64x50xf32>
    %280 = tpu.matmul %277, %279, %cst_410 {dimension_numbers = #tpu.dot_dimension_numbers<[1], [0], [0], [1], [0, 0, 1, 1], [], []>} : vector<64x20xbf16>, vector<20x50xbf16>, vector<64x50xf32> -> vector<64x50xf32>
    %281 = arith.addf %259, %280 : vector<64x50xf32>
    %c26_411 = arith.constant 26 : index
    %c0_412 = arith.constant 0 : index
    %282 = vector.load %arg11[%c26_411, %c0_412] : memref<144x20xf32, #tpu.memory_space<vmem>>, vector<8x20xf32>
    %c0_413 = arith.constant 0 : index
    %c0_414 = arith.constant 0 : index
    %283 = vector.load %arg12[%c0_413, %c0_414] : memref<64x20xf32, #tpu.memory_space<vmem>>, vector<8x20xf32>
    tpu.vector_store %arg12[%c0_413, %c0_414], %282 {strides = array<i32>} : memref<64x20xf32, #tpu.memory_space<vmem>>, vector<8x20xf32>,
    %c38_415 = arith.constant 38 : index
    %c0_416 = arith.constant 0 : index
    %284 = vector.load %arg11[%c38_415, %c0_416] : memref<144x20xf32, #tpu.memory_space<vmem>>, vector<8x20xf32>
    %c8_417 = arith.constant 8 : index
    %c0_418 = arith.constant 0 : index
    %285 = vector.load %arg12[%c8_417, %c0_418] : memref<64x20xf32, #tpu.memory_space<vmem>>, vector<8x20xf32>
    tpu.vector_store %arg12[%c8_417, %c0_418], %284 {strides = array<i32>} : memref<64x20xf32, #tpu.memory_space<vmem>>, vector<8x20xf32>,
    %c50_419 = arith.constant 50 : index
    %c0_420 = arith.constant 0 : index
    %286 = vector.load %arg11[%c50_419, %c0_420] : memref<144x20xf32, #tpu.memory_space<vmem>>, vector<8x20xf32>
    %c16_421 = arith.constant 16 : index
    %c0_422 = arith.constant 0 : index
    %287 = vector.load %arg12[%c16_421, %c0_422] : memref<64x20xf32, #tpu.memory_space<vmem>>, vector<8x20xf32>
    tpu.vector_store %arg12[%c16_421, %c0_422], %286 {strides = array<i32>} : memref<64x20xf32, #tpu.memory_space<vmem>>, vector<8x20xf32>,
    %c62_423 = arith.constant 62 : index
    %c0_424 = arith.constant 0 : index
    %288 = vector.load %arg11[%c62_423, %c0_424] : memref<144x20xf32, #tpu.memory_space<vmem>>, vector<8x20xf32>
    %c24_425 = arith.constant 24 : index
    %c0_426 = arith.constant 0 : index
    %289 = vector.load %arg12[%c24_425, %c0_426] : memref<64x20xf32, #tpu.memory_space<vmem>>, vector<8x20xf32>
    tpu.vector_store %arg12[%c24_425, %c0_426], %288 {strides = array<i32>} : memref<64x20xf32, #tpu.memory_space<vmem>>, vector<8x20xf32>,
    %c74_427 = arith.constant 74 : index
    %c0_428 = arith.constant 0 : index
    %290 = vector.load %arg11[%c74_427, %c0_428] : memref<144x20xf32, #tpu.memory_space<vmem>>, vector<8x20xf32>
    %c32_429 = arith.constant 32 : index
    %c0_430 = arith.constant 0 : index
    %291 = vector.load %arg12[%c32_429, %c0_430] : memref<64x20xf32, #tpu.memory_space<vmem>>, vector<8x20xf32>
    tpu.vector_store %arg12[%c32_429, %c0_430], %290 {strides = array<i32>} : memref<64x20xf32, #tpu.memory_space<vmem>>, vector<8x20xf32>,
    %c86_431 = arith.constant 86 : index
    %c0_432 = arith.constant 0 : index
    %292 = vector.load %arg11[%c86_431, %c0_432] : memref<144x20xf32, #tpu.memory_space<vmem>>, vector<8x20xf32>
    %c40_433 = arith.constant 40 : index
    %c0_434 = arith.constant 0 : index
    %293 = vector.load %arg12[%c40_433, %c0_434] : memref<64x20xf32, #tpu.memory_space<vmem>>, vector<8x20xf32>
    tpu.vector_store %arg12[%c40_433, %c0_434], %292 {strides = array<i32>} : memref<64x20xf32, #tpu.memory_space<vmem>>, vector<8x20xf32>,
    %c98_435 = arith.constant 98 : index
    %c0_436 = arith.constant 0 : index
    %294 = vector.load %arg11[%c98_435, %c0_436] : memref<144x20xf32, #tpu.memory_space<vmem>>, vector<8x20xf32>
    %c48_437 = arith.constant 48 : index
    %c0_438 = arith.constant 0 : index
    %295 = vector.load %arg12[%c48_437, %c0_438] : memref<64x20xf32, #tpu.memory_space<vmem>>, vector<8x20xf32>
    tpu.vector_store %arg12[%c48_437, %c0_438], %294 {strides = array<i32>} : memref<64x20xf32, #tpu.memory_space<vmem>>, vector<8x20xf32>,
    %c110 = arith.constant 110 : index
    %c0_439 = arith.constant 0 : index
    %296 = vector.load %arg11[%c110, %c0_439] : memref<144x20xf32, #tpu.memory_space<vmem>>, vector<8x20xf32>
    %c56_440 = arith.constant 56 : index
    %c0_441 = arith.constant 0 : index
    %297 = vector.load %arg12[%c56_440, %c0_441] : memref<64x20xf32, #tpu.memory_space<vmem>>, vector<8x20xf32>
    tpu.vector_store %arg12[%c56_440, %c0_441], %296 {strides = array<i32>} : memref<64x20xf32, #tpu.memory_space<vmem>>, vector<8x20xf32>,
    %c0_442 = arith.constant 0 : index
    %c0_443 = arith.constant 0 : index
    %298 = vector.load %arg12[%c0_442, %c0_443] : memref<64x20xf32, #tpu.memory_space<vmem>>, vector<64x20xf32>
    %299 = arith.truncf %298 : vector<64x20xf32> to vector<64x20xbf16>
    %c12_444 = arith.constant 12 : index
    %c0_445 = arith.constant 0 : index
    %c0_446 = arith.constant 0 : index
    %300 = vector.load %arg4[%c12_444, %c0_445, %c0_446] : memref<25x20x50xbf16, #tpu.memory_space<vmem>>, vector<1x20x50xbf16>
    %301 = vector.shape_cast %300 : vector<1x20x50xbf16> to vector<20x50xbf16>
    %cst_447 = arith.constant dense<0.000000e+00> : vector<64x50xf32>
    %302 = tpu.matmul %299, %301, %cst_447 {dimension_numbers = #tpu.dot_dimension_numbers<[1], [0], [0], [1], [0, 0, 1, 1], [], []>} : vector<64x20xbf16>, vector<20x50xbf16>, vector<64x50xf32> -> vector<64x50xf32>
    %303 = arith.addf %281, %302 : vector<64x50xf32>
    %c27_448 = arith.constant 27 : index
    %c0_449 = arith.constant 0 : index
    %304 = vector.load %arg11[%c27_448, %c0_449] : memref<144x20xf32, #tpu.memory_space<vmem>>, vector<8x20xf32>
    %c0_450 = arith.constant 0 : index
    %c0_451 = arith.constant 0 : index
    %305 = vector.load %arg12[%c0_450, %c0_451] : memref<64x20xf32, #tpu.memory_space<vmem>>, vector<8x20xf32>
    tpu.vector_store %arg12[%c0_450, %c0_451], %304 {strides = array<i32>} : memref<64x20xf32, #tpu.memory_space<vmem>>, vector<8x20xf32>,
    %c39_452 = arith.constant 39 : index
    %c0_453 = arith.constant 0 : index
    %306 = vector.load %arg11[%c39_452, %c0_453] : memref<144x20xf32, #tpu.memory_space<vmem>>, vector<8x20xf32>
    %c8_454 = arith.constant 8 : index
    %c0_455 = arith.constant 0 : index
    %307 = vector.load %arg12[%c8_454, %c0_455] : memref<64x20xf32, #tpu.memory_space<vmem>>, vector<8x20xf32>
    tpu.vector_store %arg12[%c8_454, %c0_455], %306 {strides = array<i32>} : memref<64x20xf32, #tpu.memory_space<vmem>>, vector<8x20xf32>,
    %c51_456 = arith.constant 51 : index
    %c0_457 = arith.constant 0 : index
    %308 = vector.load %arg11[%c51_456, %c0_457] : memref<144x20xf32, #tpu.memory_space<vmem>>, vector<8x20xf32>
    %c16_458 = arith.constant 16 : index
    %c0_459 = arith.constant 0 : index
    %309 = vector.load %arg12[%c16_458, %c0_459] : memref<64x20xf32, #tpu.memory_space<vmem>>, vector<8x20xf32>
    tpu.vector_store %arg12[%c16_458, %c0_459], %308 {strides = array<i32>} : memref<64x20xf32, #tpu.memory_space<vmem>>, vector<8x20xf32>,
    %c63_460 = arith.constant 63 : index
    %c0_461 = arith.constant 0 : index
    %310 = vector.load %arg11[%c63_460, %c0_461] : memref<144x20xf32, #tpu.memory_space<vmem>>, vector<8x20xf32>
    %c24_462 = arith.constant 24 : index
    %c0_463 = arith.constant 0 : index
    %311 = vector.load %arg12[%c24_462, %c0_463] : memref<64x20xf32, #tpu.memory_space<vmem>>, vector<8x20xf32>
    tpu.vector_store %arg12[%c24_462, %c0_463], %310 {strides = array<i32>} : memref<64x20xf32, #tpu.memory_space<vmem>>, vector<8x20xf32>,
    %c75_464 = arith.constant 75 : index
    %c0_465 = arith.constant 0 : index
    %312 = vector.load %arg11[%c75_464, %c0_465] : memref<144x20xf32, #tpu.memory_space<vmem>>, vector<8x20xf32>
    %c32_466 = arith.constant 32 : index
    %c0_467 = arith.constant 0 : index
    %313 = vector.load %arg12[%c32_466, %c0_467] : memref<64x20xf32, #tpu.memory_space<vmem>>, vector<8x20xf32>
    tpu.vector_store %arg12[%c32_466, %c0_467], %312 {strides = array<i32>} : memref<64x20xf32, #tpu.memory_space<vmem>>, vector<8x20xf32>,
    %c87_468 = arith.constant 87 : index
    %c0_469 = arith.constant 0 : index
    %314 = vector.load %arg11[%c87_468, %c0_469] : memref<144x20xf32, #tpu.memory_space<vmem>>, vector<8x20xf32>
    %c40_470 = arith.constant 40 : index
    %c0_471 = arith.constant 0 : index
    %315 = vector.load %arg12[%c40_470, %c0_471] : memref<64x20xf32, #tpu.memory_space<vmem>>, vector<8x20xf32>
    tpu.vector_store %arg12[%c40_470, %c0_471], %314 {strides = array<i32>} : memref<64x20xf32, #tpu.memory_space<vmem>>, vector<8x20xf32>,
    %c99_472 = arith.constant 99 : index
    %c0_473 = arith.constant 0 : index
    %316 = vector.load %arg11[%c99_472, %c0_473] : memref<144x20xf32, #tpu.memory_space<vmem>>, vector<8x20xf32>
    %c48_474 = arith.constant 48 : index
    %c0_475 = arith.constant 0 : index
    %317 = vector.load %arg12[%c48_474, %c0_475] : memref<64x20xf32, #tpu.memory_space<vmem>>, vector<8x20xf32>
    tpu.vector_store %arg12[%c48_474, %c0_475], %316 {strides = array<i32>} : memref<64x20xf32, #tpu.memory_space<vmem>>, vector<8x20xf32>,
    %c111 = arith.constant 111 : index
    %c0_476 = arith.constant 0 : index
    %318 = vector.load %arg11[%c111, %c0_476] : memref<144x20xf32, #tpu.memory_space<vmem>>, vector<8x20xf32>
    %c56_477 = arith.constant 56 : index
    %c0_478 = arith.constant 0 : index
    %319 = vector.load %arg12[%c56_477, %c0_478] : memref<64x20xf32, #tpu.memory_space<vmem>>, vector<8x20xf32>
    tpu.vector_store %arg12[%c56_477, %c0_478], %318 {strides = array<i32>} : memref<64x20xf32, #tpu.memory_space<vmem>>, vector<8x20xf32>,
    %c0_479 = arith.constant 0 : index
    %c0_480 = arith.constant 0 : index
    %320 = vector.load %arg12[%c0_479, %c0_480] : memref<64x20xf32, #tpu.memory_space<vmem>>, vector<64x20xf32>
    %321 = arith.truncf %320 : vector<64x20xf32> to vector<64x20xbf16>
    %c13_481 = arith.constant 13 : index
    %c0_482 = arith.constant 0 : index
    %c0_483 = arith.constant 0 : index
    %322 = vector.load %arg4[%c13_481, %c0_482, %c0_483] : memref<25x20x50xbf16, #tpu.memory_space<vmem>>, vector<1x20x50xbf16>
    %323 = vector.shape_cast %322 : vector<1x20x50xbf16> to vector<20x50xbf16>
    %cst_484 = arith.constant dense<0.000000e+00> : vector<64x50xf32>
    %324 = tpu.matmul %321, %323, %cst_484 {dimension_numbers = #tpu.dot_dimension_numbers<[1], [0], [0], [1], [0, 0, 1, 1], [], []>} : vector<64x20xbf16>, vector<20x50xbf16>, vector<64x50xf32> -> vector<64x50xf32>
    %325 = arith.addf %303, %324 : vector<64x50xf32>
    %c28_485 = arith.constant 28 : index
    %c0_486 = arith.constant 0 : index
    %326 = vector.load %arg11[%c28_485, %c0_486] : memref<144x20xf32, #tpu.memory_space<vmem>>, vector<8x20xf32>
    %c0_487 = arith.constant 0 : index
    %c0_488 = arith.constant 0 : index
    %327 = vector.load %arg12[%c0_487, %c0_488] : memref<64x20xf32, #tpu.memory_space<vmem>>, vector<8x20xf32>
    tpu.vector_store %arg12[%c0_487, %c0_488], %326 {strides = array<i32>} : memref<64x20xf32, #tpu.memory_space<vmem>>, vector<8x20xf32>,
    %c40_489 = arith.constant 40 : index
    %c0_490 = arith.constant 0 : index
    %328 = vector.load %arg11[%c40_489, %c0_490] : memref<144x20xf32, #tpu.memory_space<vmem>>, vector<8x20xf32>
    %c8_491 = arith.constant 8 : index
    %c0_492 = arith.constant 0 : index
    %329 = vector.load %arg12[%c8_491, %c0_492] : memref<64x20xf32, #tpu.memory_space<vmem>>, vector<8x20xf32>
    tpu.vector_store %arg12[%c8_491, %c0_492], %328 {strides = array<i32>} : memref<64x20xf32, #tpu.memory_space<vmem>>, vector<8x20xf32>,
    %c52_493 = arith.constant 52 : index
    %c0_494 = arith.constant 0 : index
    %330 = vector.load %arg11[%c52_493, %c0_494] : memref<144x20xf32, #tpu.memory_space<vmem>>, vector<8x20xf32>
    %c16_495 = arith.constant 16 : index
    %c0_496 = arith.constant 0 : index
    %331 = vector.load %arg12[%c16_495, %c0_496] : memref<64x20xf32, #tpu.memory_space<vmem>>, vector<8x20xf32>
    tpu.vector_store %arg12[%c16_495, %c0_496], %330 {strides = array<i32>} : memref<64x20xf32, #tpu.memory_space<vmem>>, vector<8x20xf32>,
    %c64_497 = arith.constant 64 : index
    %c0_498 = arith.constant 0 : index
    %332 = vector.load %arg11[%c64_497, %c0_498] : memref<144x20xf32, #tpu.memory_space<vmem>>, vector<8x20xf32>
    %c24_499 = arith.constant 24 : index
    %c0_500 = arith.constant 0 : index
    %333 = vector.load %arg12[%c24_499, %c0_500] : memref<64x20xf32, #tpu.memory_space<vmem>>, vector<8x20xf32>
    tpu.vector_store %arg12[%c24_499, %c0_500], %332 {strides = array<i32>} : memref<64x20xf32, #tpu.memory_space<vmem>>, vector<8x20xf32>,
    %c76_501 = arith.constant 76 : index
    %c0_502 = arith.constant 0 : index
    %334 = vector.load %arg11[%c76_501, %c0_502] : memref<144x20xf32, #tpu.memory_space<vmem>>, vector<8x20xf32>
    %c32_503 = arith.constant 32 : index
    %c0_504 = arith.constant 0 : index
    %335 = vector.load %arg12[%c32_503, %c0_504] : memref<64x20xf32, #tpu.memory_space<vmem>>, vector<8x20xf32>
    tpu.vector_store %arg12[%c32_503, %c0_504], %334 {strides = array<i32>} : memref<64x20xf32, #tpu.memory_space<vmem>>, vector<8x20xf32>,
    %c88_505 = arith.constant 88 : index
    %c0_506 = arith.constant 0 : index
    %336 = vector.load %arg11[%c88_505, %c0_506] : memref<144x20xf32, #tpu.memory_space<vmem>>, vector<8x20xf32>
    %c40_507 = arith.constant 40 : index
    %c0_508 = arith.constant 0 : index
    %337 = vector.load %arg12[%c40_507, %c0_508] : memref<64x20xf32, #tpu.memory_space<vmem>>, vector<8x20xf32>
    tpu.vector_store %arg12[%c40_507, %c0_508], %336 {strides = array<i32>} : memref<64x20xf32, #tpu.memory_space<vmem>>, vector<8x20xf32>,
    %c100_509 = arith.constant 100 : index
    %c0_510 = arith.constant 0 : index
    %338 = vector.load %arg11[%c100_509, %c0_510] : memref<144x20xf32, #tpu.memory_space<vmem>>, vector<8x20xf32>
    %c48_511 = arith.constant 48 : index
    %c0_512 = arith.constant 0 : index
    %339 = vector.load %arg12[%c48_511, %c0_512] : memref<64x20xf32, #tpu.memory_space<vmem>>, vector<8x20xf32>
    tpu.vector_store %arg12[%c48_511, %c0_512], %338 {strides = array<i32>} : memref<64x20xf32, #tpu.memory_space<vmem>>, vector<8x20xf32>,
    %c112 = arith.constant 112 : index
    %c0_513 = arith.constant 0 : index
    %340 = vector.load %arg11[%c112, %c0_513] : memref<144x20xf32, #tpu.memory_space<vmem>>, vector<8x20xf32>
    %c56_514 = arith.constant 56 : index
    %c0_515 = arith.constant 0 : index
    %341 = vector.load %arg12[%c56_514, %c0_515] : memref<64x20xf32, #tpu.memory_space<vmem>>, vector<8x20xf32>
    tpu.vector_store %arg12[%c56_514, %c0_515], %340 {strides = array<i32>} : memref<64x20xf32, #tpu.memory_space<vmem>>, vector<8x20xf32>,
    %c0_516 = arith.constant 0 : index
    %c0_517 = arith.constant 0 : index
    %342 = vector.load %arg12[%c0_516, %c0_517] : memref<64x20xf32, #tpu.memory_space<vmem>>, vector<64x20xf32>
    %343 = arith.truncf %342 : vector<64x20xf32> to vector<64x20xbf16>
    %c14_518 = arith.constant 14 : index
    %c0_519 = arith.constant 0 : index
    %c0_520 = arith.constant 0 : index
    %344 = vector.load %arg4[%c14_518, %c0_519, %c0_520] : memref<25x20x50xbf16, #tpu.memory_space<vmem>>, vector<1x20x50xbf16>
    %345 = vector.shape_cast %344 : vector<1x20x50xbf16> to vector<20x50xbf16>
    %cst_521 = arith.constant dense<0.000000e+00> : vector<64x50xf32>
    %346 = tpu.matmul %343, %345, %cst_521 {dimension_numbers = #tpu.dot_dimension_numbers<[1], [0], [0], [1], [0, 0, 1, 1], [], []>} : vector<64x20xbf16>, vector<20x50xbf16>, vector<64x50xf32> -> vector<64x50xf32>
    %347 = arith.addf %325, %346 : vector<64x50xf32>
    %c36_522 = arith.constant 36 : index
    %c0_523 = arith.constant 0 : index
    %348 = vector.load %arg11[%c36_522, %c0_523] : memref<144x20xf32, #tpu.memory_space<vmem>>, vector<8x20xf32>
    %c0_524 = arith.constant 0 : index
    %c0_525 = arith.constant 0 : index
    %349 = vector.load %arg12[%c0_524, %c0_525] : memref<64x20xf32, #tpu.memory_space<vmem>>, vector<8x20xf32>
    tpu.vector_store %arg12[%c0_524, %c0_525], %348 {strides = array<i32>} : memref<64x20xf32, #tpu.memory_space<vmem>>, vector<8x20xf32>,
    %c48_526 = arith.constant 48 : index
    %c0_527 = arith.constant 0 : index
    %350 = vector.load %arg11[%c48_526, %c0_527] : memref<144x20xf32, #tpu.memory_space<vmem>>, vector<8x20xf32>
    %c8_528 = arith.constant 8 : index
    %c0_529 = arith.constant 0 : index
    %351 = vector.load %arg12[%c8_528, %c0_529] : memref<64x20xf32, #tpu.memory_space<vmem>>, vector<8x20xf32>
    tpu.vector_store %arg12[%c8_528, %c0_529], %350 {strides = array<i32>} : memref<64x20xf32, #tpu.memory_space<vmem>>, vector<8x20xf32>,
    %c60_530 = arith.constant 60 : index
    %c0_531 = arith.constant 0 : index
    %352 = vector.load %arg11[%c60_530, %c0_531] : memref<144x20xf32, #tpu.memory_space<vmem>>, vector<8x20xf32>
    %c16_532 = arith.constant 16 : index
    %c0_533 = arith.constant 0 : index
    %353 = vector.load %arg12[%c16_532, %c0_533] : memref<64x20xf32, #tpu.memory_space<vmem>>, vector<8x20xf32>
    tpu.vector_store %arg12[%c16_532, %c0_533], %352 {strides = array<i32>} : memref<64x20xf32, #tpu.memory_space<vmem>>, vector<8x20xf32>,
    %c72_534 = arith.constant 72 : index
    %c0_535 = arith.constant 0 : index
    %354 = vector.load %arg11[%c72_534, %c0_535] : memref<144x20xf32, #tpu.memory_space<vmem>>, vector<8x20xf32>
    %c24_536 = arith.constant 24 : index
    %c0_537 = arith.constant 0 : index
    %355 = vector.load %arg12[%c24_536, %c0_537] : memref<64x20xf32, #tpu.memory_space<vmem>>, vector<8x20xf32>
    tpu.vector_store %arg12[%c24_536, %c0_537], %354 {strides = array<i32>} : memref<64x20xf32, #tpu.memory_space<vmem>>, vector<8x20xf32>,
    %c84_538 = arith.constant 84 : index
    %c0_539 = arith.constant 0 : index
    %356 = vector.load %arg11[%c84_538, %c0_539] : memref<144x20xf32, #tpu.memory_space<vmem>>, vector<8x20xf32>
    %c32_540 = arith.constant 32 : index
    %c0_541 = arith.constant 0 : index
    %357 = vector.load %arg12[%c32_540, %c0_541] : memref<64x20xf32, #tpu.memory_space<vmem>>, vector<8x20xf32>
    tpu.vector_store %arg12[%c32_540, %c0_541], %356 {strides = array<i32>} : memref<64x20xf32, #tpu.memory_space<vmem>>, vector<8x20xf32>,
    %c96_542 = arith.constant 96 : index
    %c0_543 = arith.constant 0 : index
    %358 = vector.load %arg11[%c96_542, %c0_543] : memref<144x20xf32, #tpu.memory_space<vmem>>, vector<8x20xf32>
    %c40_544 = arith.constant 40 : index
    %c0_545 = arith.constant 0 : index
    %359 = vector.load %arg12[%c40_544, %c0_545] : memref<64x20xf32, #tpu.memory_space<vmem>>, vector<8x20xf32>
    tpu.vector_store %arg12[%c40_544, %c0_545], %358 {strides = array<i32>} : memref<64x20xf32, #tpu.memory_space<vmem>>, vector<8x20xf32>,
    %c108_546 = arith.constant 108 : index
    %c0_547 = arith.constant 0 : index
    %360 = vector.load %arg11[%c108_546, %c0_547] : memref<144x20xf32, #tpu.memory_space<vmem>>, vector<8x20xf32>
    %c48_548 = arith.constant 48 : index
    %c0_549 = arith.constant 0 : index
    %361 = vector.load %arg12[%c48_548, %c0_549] : memref<64x20xf32, #tpu.memory_space<vmem>>, vector<8x20xf32>
    tpu.vector_store %arg12[%c48_548, %c0_549], %360 {strides = array<i32>} : memref<64x20xf32, #tpu.memory_space<vmem>>, vector<8x20xf32>,
    %c120 = arith.constant 120 : index
    %c0_550 = arith.constant 0 : index
    %362 = vector.load %arg11[%c120, %c0_550] : memref<144x20xf32, #tpu.memory_space<vmem>>, vector<8x20xf32>
    %c56_551 = arith.constant 56 : index
    %c0_552 = arith.constant 0 : index
    %363 = vector.load %arg12[%c56_551, %c0_552] : memref<64x20xf32, #tpu.memory_space<vmem>>, vector<8x20xf32>
    tpu.vector_store %arg12[%c56_551, %c0_552], %362 {strides = array<i32>} : memref<64x20xf32, #tpu.memory_space<vmem>>, vector<8x20xf32>,
    %c0_553 = arith.constant 0 : index
    %c0_554 = arith.constant 0 : index
    %364 = vector.load %arg12[%c0_553, %c0_554] : memref<64x20xf32, #tpu.memory_space<vmem>>, vector<64x20xf32>
    %365 = arith.truncf %364 : vector<64x20xf32> to vector<64x20xbf16>
    %c15_555 = arith.constant 15 : index
    %c0_556 = arith.constant 0 : index
    %c0_557 = arith.constant 0 : index
    %366 = vector.load %arg4[%c15_555, %c0_556, %c0_557] : memref<25x20x50xbf16, #tpu.memory_space<vmem>>, vector<1x20x50xbf16>
    %367 = vector.shape_cast %366 : vector<1x20x50xbf16> to vector<20x50xbf16>
    %cst_558 = arith.constant dense<0.000000e+00> : vector<64x50xf32>
    %368 = tpu.matmul %365, %367, %cst_558 {dimension_numbers = #tpu.dot_dimension_numbers<[1], [0], [0], [1], [0, 0, 1, 1], [], []>} : vector<64x20xbf16>, vector<20x50xbf16>, vector<64x50xf32> -> vector<64x50xf32>
    %369 = arith.addf %347, %368 : vector<64x50xf32>
    %c37_559 = arith.constant 37 : index
    %c0_560 = arith.constant 0 : index
    %370 = vector.load %arg11[%c37_559, %c0_560] : memref<144x20xf32, #tpu.memory_space<vmem>>, vector<8x20xf32>
    %c0_561 = arith.constant 0 : index
    %c0_562 = arith.constant 0 : index
    %371 = vector.load %arg12[%c0_561, %c0_562] : memref<64x20xf32, #tpu.memory_space<vmem>>, vector<8x20xf32>
    tpu.vector_store %arg12[%c0_561, %c0_562], %370 {strides = array<i32>} : memref<64x20xf32, #tpu.memory_space<vmem>>, vector<8x20xf32>,
    %c49_563 = arith.constant 49 : index
    %c0_564 = arith.constant 0 : index
    %372 = vector.load %arg11[%c49_563, %c0_564] : memref<144x20xf32, #tpu.memory_space<vmem>>, vector<8x20xf32>
    %c8_565 = arith.constant 8 : index
    %c0_566 = arith.constant 0 : index
    %373 = vector.load %arg12[%c8_565, %c0_566] : memref<64x20xf32, #tpu.memory_space<vmem>>, vector<8x20xf32>
    tpu.vector_store %arg12[%c8_565, %c0_566], %372 {strides = array<i32>} : memref<64x20xf32, #tpu.memory_space<vmem>>, vector<8x20xf32>,
    %c61_567 = arith.constant 61 : index
    %c0_568 = arith.constant 0 : index
    %374 = vector.load %arg11[%c61_567, %c0_568] : memref<144x20xf32, #tpu.memory_space<vmem>>, vector<8x20xf32>
    %c16_569 = arith.constant 16 : index
    %c0_570 = arith.constant 0 : index
    %375 = vector.load %arg12[%c16_569, %c0_570] : memref<64x20xf32, #tpu.memory_space<vmem>>, vector<8x20xf32>
    tpu.vector_store %arg12[%c16_569, %c0_570], %374 {strides = array<i32>} : memref<64x20xf32, #tpu.memory_space<vmem>>, vector<8x20xf32>,
    %c73_571 = arith.constant 73 : index
    %c0_572 = arith.constant 0 : index
    %376 = vector.load %arg11[%c73_571, %c0_572] : memref<144x20xf32, #tpu.memory_space<vmem>>, vector<8x20xf32>
    %c24_573 = arith.constant 24 : index
    %c0_574 = arith.constant 0 : index
    %377 = vector.load %arg12[%c24_573, %c0_574] : memref<64x20xf32, #tpu.memory_space<vmem>>, vector<8x20xf32>
    tpu.vector_store %arg12[%c24_573, %c0_574], %376 {strides = array<i32>} : memref<64x20xf32, #tpu.memory_space<vmem>>, vector<8x20xf32>,
    %c85_575 = arith.constant 85 : index
    %c0_576 = arith.constant 0 : index
    %378 = vector.load %arg11[%c85_575, %c0_576] : memref<144x20xf32, #tpu.memory_space<vmem>>, vector<8x20xf32>
    %c32_577 = arith.constant 32 : index
    %c0_578 = arith.constant 0 : index
    %379 = vector.load %arg12[%c32_577, %c0_578] : memref<64x20xf32, #tpu.memory_space<vmem>>, vector<8x20xf32>
    tpu.vector_store %arg12[%c32_577, %c0_578], %378 {strides = array<i32>} : memref<64x20xf32, #tpu.memory_space<vmem>>, vector<8x20xf32>,
    %c97_579 = arith.constant 97 : index
    %c0_580 = arith.constant 0 : index
    %380 = vector.load %arg11[%c97_579, %c0_580] : memref<144x20xf32, #tpu.memory_space<vmem>>, vector<8x20xf32>
    %c40_581 = arith.constant 40 : index
    %c0_582 = arith.constant 0 : index
    %381 = vector.load %arg12[%c40_581, %c0_582] : memref<64x20xf32, #tpu.memory_space<vmem>>, vector<8x20xf32>
    tpu.vector_store %arg12[%c40_581, %c0_582], %380 {strides = array<i32>} : memref<64x20xf32, #tpu.memory_space<vmem>>, vector<8x20xf32>,
    %c109_583 = arith.constant 109 : index
    %c0_584 = arith.constant 0 : index
    %382 = vector.load %arg11[%c109_583, %c0_584] : memref<144x20xf32, #tpu.memory_space<vmem>>, vector<8x20xf32>
    %c48_585 = arith.constant 48 : index
    %c0_586 = arith.constant 0 : index
    %383 = vector.load %arg12[%c48_585, %c0_586] : memref<64x20xf32, #tpu.memory_space<vmem>>, vector<8x20xf32>
    tpu.vector_store %arg12[%c48_585, %c0_586], %382 {strides = array<i32>} : memref<64x20xf32, #tpu.memory_space<vmem>>, vector<8x20xf32>,
    %c121 = arith.constant 121 : index
    %c0_587 = arith.constant 0 : index
    %384 = vector.load %arg11[%c121, %c0_587] : memref<144x20xf32, #tpu.memory_space<vmem>>, vector<8x20xf32>
    %c56_588 = arith.constant 56 : index
    %c0_589 = arith.constant 0 : index
    %385 = vector.load %arg12[%c56_588, %c0_589] : memref<64x20xf32, #tpu.memory_space<vmem>>, vector<8x20xf32>
    tpu.vector_store %arg12[%c56_588, %c0_589], %384 {strides = array<i32>} : memref<64x20xf32, #tpu.memory_space<vmem>>, vector<8x20xf32>,
    %c0_590 = arith.constant 0 : index
    %c0_591 = arith.constant 0 : index
    %386 = vector.load %arg12[%c0_590, %c0_591] : memref<64x20xf32, #tpu.memory_space<vmem>>, vector<64x20xf32>
    %387 = arith.truncf %386 : vector<64x20xf32> to vector<64x20xbf16>
    %c16_592 = arith.constant 16 : index
    %c0_593 = arith.constant 0 : index
    %c0_594 = arith.constant 0 : index
    %388 = vector.load %arg4[%c16_592, %c0_593, %c0_594] : memref<25x20x50xbf16, #tpu.memory_space<vmem>>, vector<1x20x50xbf16>
    %389 = vector.shape_cast %388 : vector<1x20x50xbf16> to vector<20x50xbf16>
    %cst_595 = arith.constant dense<0.000000e+00> : vector<64x50xf32>
    %390 = tpu.matmul %387, %389, %cst_595 {dimension_numbers = #tpu.dot_dimension_numbers<[1], [0], [0], [1], [0, 0, 1, 1], [], []>} : vector<64x20xbf16>, vector<20x50xbf16>, vector<64x50xf32> -> vector<64x50xf32>
    %391 = arith.addf %369, %390 : vector<64x50xf32>
    %c38_596 = arith.constant 38 : index
    %c0_597 = arith.constant 0 : index
    %392 = vector.load %arg11[%c38_596, %c0_597] : memref<144x20xf32, #tpu.memory_space<vmem>>, vector<8x20xf32>
    %c0_598 = arith.constant 0 : index
    %c0_599 = arith.constant 0 : index
    %393 = vector.load %arg12[%c0_598, %c0_599] : memref<64x20xf32, #tpu.memory_space<vmem>>, vector<8x20xf32>
    tpu.vector_store %arg12[%c0_598, %c0_599], %392 {strides = array<i32>} : memref<64x20xf32, #tpu.memory_space<vmem>>, vector<8x20xf32>,
    %c50_600 = arith.constant 50 : index
    %c0_601 = arith.constant 0 : index
    %394 = vector.load %arg11[%c50_600, %c0_601] : memref<144x20xf32, #tpu.memory_space<vmem>>, vector<8x20xf32>
    %c8_602 = arith.constant 8 : index
    %c0_603 = arith.constant 0 : index
    %395 = vector.load %arg12[%c8_602, %c0_603] : memref<64x20xf32, #tpu.memory_space<vmem>>, vector<8x20xf32>
    tpu.vector_store %arg12[%c8_602, %c0_603], %394 {strides = array<i32>} : memref<64x20xf32, #tpu.memory_space<vmem>>, vector<8x20xf32>,
    %c62_604 = arith.constant 62 : index
    %c0_605 = arith.constant 0 : index
    %396 = vector.load %arg11[%c62_604, %c0_605] : memref<144x20xf32, #tpu.memory_space<vmem>>, vector<8x20xf32>
    %c16_606 = arith.constant 16 : index
    %c0_607 = arith.constant 0 : index
    %397 = vector.load %arg12[%c16_606, %c0_607] : memref<64x20xf32, #tpu.memory_space<vmem>>, vector<8x20xf32>
    tpu.vector_store %arg12[%c16_606, %c0_607], %396 {strides = array<i32>} : memref<64x20xf32, #tpu.memory_space<vmem>>, vector<8x20xf32>,
    %c74_608 = arith.constant 74 : index
    %c0_609 = arith.constant 0 : index
    %398 = vector.load %arg11[%c74_608, %c0_609] : memref<144x20xf32, #tpu.memory_space<vmem>>, vector<8x20xf32>
    %c24_610 = arith.constant 24 : index
    %c0_611 = arith.constant 0 : index
    %399 = vector.load %arg12[%c24_610, %c0_611] : memref<64x20xf32, #tpu.memory_space<vmem>>, vector<8x20xf32>
    tpu.vector_store %arg12[%c24_610, %c0_611], %398 {strides = array<i32>} : memref<64x20xf32, #tpu.memory_space<vmem>>, vector<8x20xf32>,
    %c86_612 = arith.constant 86 : index
    %c0_613 = arith.constant 0 : index
    %400 = vector.load %arg11[%c86_612, %c0_613] : memref<144x20xf32, #tpu.memory_space<vmem>>, vector<8x20xf32>
    %c32_614 = arith.constant 32 : index
    %c0_615 = arith.constant 0 : index
    %401 = vector.load %arg12[%c32_614, %c0_615] : memref<64x20xf32, #tpu.memory_space<vmem>>, vector<8x20xf32>
    tpu.vector_store %arg12[%c32_614, %c0_615], %400 {strides = array<i32>} : memref<64x20xf32, #tpu.memory_space<vmem>>, vector<8x20xf32>,
    %c98_616 = arith.constant 98 : index
    %c0_617 = arith.constant 0 : index
    %402 = vector.load %arg11[%c98_616, %c0_617] : memref<144x20xf32, #tpu.memory_space<vmem>>, vector<8x20xf32>
    %c40_618 = arith.constant 40 : index
    %c0_619 = arith.constant 0 : index
    %403 = vector.load %arg12[%c40_618, %c0_619] : memref<64x20xf32, #tpu.memory_space<vmem>>, vector<8x20xf32>
    tpu.vector_store %arg12[%c40_618, %c0_619], %402 {strides = array<i32>} : memref<64x20xf32, #tpu.memory_space<vmem>>, vector<8x20xf32>,
    %c110_620 = arith.constant 110 : index
    %c0_621 = arith.constant 0 : index
    %404 = vector.load %arg11[%c110_620, %c0_621] : memref<144x20xf32, #tpu.memory_space<vmem>>, vector<8x20xf32>
    %c48_622 = arith.constant 48 : index
    %c0_623 = arith.constant 0 : index
    %405 = vector.load %arg12[%c48_622, %c0_623] : memref<64x20xf32, #tpu.memory_space<vmem>>, vector<8x20xf32>
    tpu.vector_store %arg12[%c48_622, %c0_623], %404 {strides = array<i32>} : memref<64x20xf32, #tpu.memory_space<vmem>>, vector<8x20xf32>,
    %c122 = arith.constant 122 : index
    %c0_624 = arith.constant 0 : index
    %406 = vector.load %arg11[%c122, %c0_624] : memref<144x20xf32, #tpu.memory_space<vmem>>, vector<8x20xf32>
    %c56_625 = arith.constant 56 : index
    %c0_626 = arith.constant 0 : index
    %407 = vector.load %arg12[%c56_625, %c0_626] : memref<64x20xf32, #tpu.memory_space<vmem>>, vector<8x20xf32>
    tpu.vector_store %arg12[%c56_625, %c0_626], %406 {strides = array<i32>} : memref<64x20xf32, #tpu.memory_space<vmem>>, vector<8x20xf32>,
    %c0_627 = arith.constant 0 : index
    %c0_628 = arith.constant 0 : index
    %408 = vector.load %arg12[%c0_627, %c0_628] : memref<64x20xf32, #tpu.memory_space<vmem>>, vector<64x20xf32>
    %409 = arith.truncf %408 : vector<64x20xf32> to vector<64x20xbf16>
    %c17 = arith.constant 17 : index
    %c0_629 = arith.constant 0 : index
    %c0_630 = arith.constant 0 : index
    %410 = vector.load %arg4[%c17, %c0_629, %c0_630] : memref<25x20x50xbf16, #tpu.memory_space<vmem>>, vector<1x20x50xbf16>
    %411 = vector.shape_cast %410 : vector<1x20x50xbf16> to vector<20x50xbf16>
    %cst_631 = arith.constant dense<0.000000e+00> : vector<64x50xf32>
    %412 = tpu.matmul %409, %411, %cst_631 {dimension_numbers = #tpu.dot_dimension_numbers<[1], [0], [0], [1], [0, 0, 1, 1], [], []>} : vector<64x20xbf16>, vector<20x50xbf16>, vector<64x50xf32> -> vector<64x50xf32>
    %413 = arith.addf %391, %412 : vector<64x50xf32>
    %c39_632 = arith.constant 39 : index
    %c0_633 = arith.constant 0 : index
    %414 = vector.load %arg11[%c39_632, %c0_633] : memref<144x20xf32, #tpu.memory_space<vmem>>, vector<8x20xf32>
    %c0_634 = arith.constant 0 : index
    %c0_635 = arith.constant 0 : index
    %415 = vector.load %arg12[%c0_634, %c0_635] : memref<64x20xf32, #tpu.memory_space<vmem>>, vector<8x20xf32>
    tpu.vector_store %arg12[%c0_634, %c0_635], %414 {strides = array<i32>} : memref<64x20xf32, #tpu.memory_space<vmem>>, vector<8x20xf32>,
    %c51_636 = arith.constant 51 : index
    %c0_637 = arith.constant 0 : index
    %416 = vector.load %arg11[%c51_636, %c0_637] : memref<144x20xf32, #tpu.memory_space<vmem>>, vector<8x20xf32>
    %c8_638 = arith.constant 8 : index
    %c0_639 = arith.constant 0 : index
    %417 = vector.load %arg12[%c8_638, %c0_639] : memref<64x20xf32, #tpu.memory_space<vmem>>, vector<8x20xf32>
    tpu.vector_store %arg12[%c8_638, %c0_639], %416 {strides = array<i32>} : memref<64x20xf32, #tpu.memory_space<vmem>>, vector<8x20xf32>,
    %c63_640 = arith.constant 63 : index
    %c0_641 = arith.constant 0 : index
    %418 = vector.load %arg11[%c63_640, %c0_641] : memref<144x20xf32, #tpu.memory_space<vmem>>, vector<8x20xf32>
    %c16_642 = arith.constant 16 : index
    %c0_643 = arith.constant 0 : index
    %419 = vector.load %arg12[%c16_642, %c0_643] : memref<64x20xf32, #tpu.memory_space<vmem>>, vector<8x20xf32>
    tpu.vector_store %arg12[%c16_642, %c0_643], %418 {strides = array<i32>} : memref<64x20xf32, #tpu.memory_space<vmem>>, vector<8x20xf32>,
    %c75_644 = arith.constant 75 : index
    %c0_645 = arith.constant 0 : index
    %420 = vector.load %arg11[%c75_644, %c0_645] : memref<144x20xf32, #tpu.memory_space<vmem>>, vector<8x20xf32>
    %c24_646 = arith.constant 24 : index
    %c0_647 = arith.constant 0 : index
    %421 = vector.load %arg12[%c24_646, %c0_647] : memref<64x20xf32, #tpu.memory_space<vmem>>, vector<8x20xf32>
    tpu.vector_store %arg12[%c24_646, %c0_647], %420 {strides = array<i32>} : memref<64x20xf32, #tpu.memory_space<vmem>>, vector<8x20xf32>,
    %c87_648 = arith.constant 87 : index
    %c0_649 = arith.constant 0 : index
    %422 = vector.load %arg11[%c87_648, %c0_649] : memref<144x20xf32, #tpu.memory_space<vmem>>, vector<8x20xf32>
    %c32_650 = arith.constant 32 : index
    %c0_651 = arith.constant 0 : index
    %423 = vector.load %arg12[%c32_650, %c0_651] : memref<64x20xf32, #tpu.memory_space<vmem>>, vector<8x20xf32>
    tpu.vector_store %arg12[%c32_650, %c0_651], %422 {strides = array<i32>} : memref<64x20xf32, #tpu.memory_space<vmem>>, vector<8x20xf32>,
    %c99_652 = arith.constant 99 : index
    %c0_653 = arith.constant 0 : index
    %424 = vector.load %arg11[%c99_652, %c0_653] : memref<144x20xf32, #tpu.memory_space<vmem>>, vector<8x20xf32>
    %c40_654 = arith.constant 40 : index
    %c0_655 = arith.constant 0 : index
    %425 = vector.load %arg12[%c40_654, %c0_655] : memref<64x20xf32, #tpu.memory_space<vmem>>, vector<8x20xf32>
    tpu.vector_store %arg12[%c40_654, %c0_655], %424 {strides = array<i32>} : memref<64x20xf32, #tpu.memory_space<vmem>>, vector<8x20xf32>,
    %c111_656 = arith.constant 111 : index
    %c0_657 = arith.constant 0 : index
    %426 = vector.load %arg11[%c111_656, %c0_657] : memref<144x20xf32, #tpu.memory_space<vmem>>, vector<8x20xf32>
    %c48_658 = arith.constant 48 : index
    %c0_659 = arith.constant 0 : index
    %427 = vector.load %arg12[%c48_658, %c0_659] : memref<64x20xf32, #tpu.memory_space<vmem>>, vector<8x20xf32>
    tpu.vector_store %arg12[%c48_658, %c0_659], %426 {strides = array<i32>} : memref<64x20xf32, #tpu.memory_space<vmem>>, vector<8x20xf32>,
    %c123 = arith.constant 123 : index
    %c0_660 = arith.constant 0 : index
    %428 = vector.load %arg11[%c123, %c0_660] : memref<144x20xf32, #tpu.memory_space<vmem>>, vector<8x20xf32>
    %c56_661 = arith.constant 56 : index
    %c0_662 = arith.constant 0 : index
    %429 = vector.load %arg12[%c56_661, %c0_662] : memref<64x20xf32, #tpu.memory_space<vmem>>, vector<8x20xf32>
    tpu.vector_store %arg12[%c56_661, %c0_662], %428 {strides = array<i32>} : memref<64x20xf32, #tpu.memory_space<vmem>>, vector<8x20xf32>,
    %c0_663 = arith.constant 0 : index
    %c0_664 = arith.constant 0 : index
    %430 = vector.load %arg12[%c0_663, %c0_664] : memref<64x20xf32, #tpu.memory_space<vmem>>, vector<64x20xf32>
    %431 = arith.truncf %430 : vector<64x20xf32> to vector<64x20xbf16>
    %c18 = arith.constant 18 : index
    %c0_665 = arith.constant 0 : index
    %c0_666 = arith.constant 0 : index
    %432 = vector.load %arg4[%c18, %c0_665, %c0_666] : memref<25x20x50xbf16, #tpu.memory_space<vmem>>, vector<1x20x50xbf16>
    %433 = vector.shape_cast %432 : vector<1x20x50xbf16> to vector<20x50xbf16>
    %cst_667 = arith.constant dense<0.000000e+00> : vector<64x50xf32>
    %434 = tpu.matmul %431, %433, %cst_667 {dimension_numbers = #tpu.dot_dimension_numbers<[1], [0], [0], [1], [0, 0, 1, 1], [], []>} : vector<64x20xbf16>, vector<20x50xbf16>, vector<64x50xf32> -> vector<64x50xf32>
    %435 = arith.addf %413, %434 : vector<64x50xf32>
    %c40_668 = arith.constant 40 : index
    %c0_669 = arith.constant 0 : index
    %436 = vector.load %arg11[%c40_668, %c0_669] : memref<144x20xf32, #tpu.memory_space<vmem>>, vector<8x20xf32>
    %c0_670 = arith.constant 0 : index
    %c0_671 = arith.constant 0 : index
    %437 = vector.load %arg12[%c0_670, %c0_671] : memref<64x20xf32, #tpu.memory_space<vmem>>, vector<8x20xf32>
    tpu.vector_store %arg12[%c0_670, %c0_671], %436 {strides = array<i32>} : memref<64x20xf32, #tpu.memory_space<vmem>>, vector<8x20xf32>,
    %c52_672 = arith.constant 52 : index
    %c0_673 = arith.constant 0 : index
    %438 = vector.load %arg11[%c52_672, %c0_673] : memref<144x20xf32, #tpu.memory_space<vmem>>, vector<8x20xf32>
    %c8_674 = arith.constant 8 : index
    %c0_675 = arith.constant 0 : index
    %439 = vector.load %arg12[%c8_674, %c0_675] : memref<64x20xf32, #tpu.memory_space<vmem>>, vector<8x20xf32>
    tpu.vector_store %arg12[%c8_674, %c0_675], %438 {strides = array<i32>} : memref<64x20xf32, #tpu.memory_space<vmem>>, vector<8x20xf32>,
    %c64_676 = arith.constant 64 : index
    %c0_677 = arith.constant 0 : index
    %440 = vector.load %arg11[%c64_676, %c0_677] : memref<144x20xf32, #tpu.memory_space<vmem>>, vector<8x20xf32>
    %c16_678 = arith.constant 16 : index
    %c0_679 = arith.constant 0 : index
    %441 = vector.load %arg12[%c16_678, %c0_679] : memref<64x20xf32, #tpu.memory_space<vmem>>, vector<8x20xf32>
    tpu.vector_store %arg12[%c16_678, %c0_679], %440 {strides = array<i32>} : memref<64x20xf32, #tpu.memory_space<vmem>>, vector<8x20xf32>,
    %c76_680 = arith.constant 76 : index
    %c0_681 = arith.constant 0 : index
    %442 = vector.load %arg11[%c76_680, %c0_681] : memref<144x20xf32, #tpu.memory_space<vmem>>, vector<8x20xf32>
    %c24_682 = arith.constant 24 : index
    %c0_683 = arith.constant 0 : index
    %443 = vector.load %arg12[%c24_682, %c0_683] : memref<64x20xf32, #tpu.memory_space<vmem>>, vector<8x20xf32>
    tpu.vector_store %arg12[%c24_682, %c0_683], %442 {strides = array<i32>} : memref<64x20xf32, #tpu.memory_space<vmem>>, vector<8x20xf32>,
    %c88_684 = arith.constant 88 : index
    %c0_685 = arith.constant 0 : index
    %444 = vector.load %arg11[%c88_684, %c0_685] : memref<144x20xf32, #tpu.memory_space<vmem>>, vector<8x20xf32>
    %c32_686 = arith.constant 32 : index
    %c0_687 = arith.constant 0 : index
    %445 = vector.load %arg12[%c32_686, %c0_687] : memref<64x20xf32, #tpu.memory_space<vmem>>, vector<8x20xf32>
    tpu.vector_store %arg12[%c32_686, %c0_687], %444 {strides = array<i32>} : memref<64x20xf32, #tpu.memory_space<vmem>>, vector<8x20xf32>,
    %c100_688 = arith.constant 100 : index
    %c0_689 = arith.constant 0 : index
    %446 = vector.load %arg11[%c100_688, %c0_689] : memref<144x20xf32, #tpu.memory_space<vmem>>, vector<8x20xf32>
    %c40_690 = arith.constant 40 : index
    %c0_691 = arith.constant 0 : index
    %447 = vector.load %arg12[%c40_690, %c0_691] : memref<64x20xf32, #tpu.memory_space<vmem>>, vector<8x20xf32>
    tpu.vector_store %arg12[%c40_690, %c0_691], %446 {strides = array<i32>} : memref<64x20xf32, #tpu.memory_space<vmem>>, vector<8x20xf32>,
    %c112_692 = arith.constant 112 : index
    %c0_693 = arith.constant 0 : index
    %448 = vector.load %arg11[%c112_692, %c0_693] : memref<144x20xf32, #tpu.memory_space<vmem>>, vector<8x20xf32>
    %c48_694 = arith.constant 48 : index
    %c0_695 = arith.constant 0 : index
    %449 = vector.load %arg12[%c48_694, %c0_695] : memref<64x20xf32, #tpu.memory_space<vmem>>, vector<8x20xf32>
    tpu.vector_store %arg12[%c48_694, %c0_695], %448 {strides = array<i32>} : memref<64x20xf32, #tpu.memory_space<vmem>>, vector<8x20xf32>,
    %c124 = arith.constant 124 : index
    %c0_696 = arith.constant 0 : index
    %450 = vector.load %arg11[%c124, %c0_696] : memref<144x20xf32, #tpu.memory_space<vmem>>, vector<8x20xf32>
    %c56_697 = arith.constant 56 : index
    %c0_698 = arith.constant 0 : index
    %451 = vector.load %arg12[%c56_697, %c0_698] : memref<64x20xf32, #tpu.memory_space<vmem>>, vector<8x20xf32>
    tpu.vector_store %arg12[%c56_697, %c0_698], %450 {strides = array<i32>} : memref<64x20xf32, #tpu.memory_space<vmem>>, vector<8x20xf32>,
    %c0_699 = arith.constant 0 : index
    %c0_700 = arith.constant 0 : index
    %452 = vector.load %arg12[%c0_699, %c0_700] : memref<64x20xf32, #tpu.memory_space<vmem>>, vector<64x20xf32>
    %453 = arith.truncf %452 : vector<64x20xf32> to vector<64x20xbf16>
    %c19 = arith.constant 19 : index
    %c0_701 = arith.constant 0 : index
    %c0_702 = arith.constant 0 : index
    %454 = vector.load %arg4[%c19, %c0_701, %c0_702] : memref<25x20x50xbf16, #tpu.memory_space<vmem>>, vector<1x20x50xbf16>
    %455 = vector.shape_cast %454 : vector<1x20x50xbf16> to vector<20x50xbf16>
    %cst_703 = arith.constant dense<0.000000e+00> : vector<64x50xf32>
    %456 = tpu.matmul %453, %455, %cst_703 {dimension_numbers = #tpu.dot_dimension_numbers<[1], [0], [0], [1], [0, 0, 1, 1], [], []>} : vector<64x20xbf16>, vector<20x50xbf16>, vector<64x50xf32> -> vector<64x50xf32>
    %457 = arith.addf %435, %456 : vector<64x50xf32>
    %c48_704 = arith.constant 48 : index
    %c0_705 = arith.constant 0 : index
    %458 = vector.load %arg11[%c48_704, %c0_705] : memref<144x20xf32, #tpu.memory_space<vmem>>, vector<8x20xf32>
    %c0_706 = arith.constant 0 : index
    %c0_707 = arith.constant 0 : index
    %459 = vector.load %arg12[%c0_706, %c0_707] : memref<64x20xf32, #tpu.memory_space<vmem>>, vector<8x20xf32>
    tpu.vector_store %arg12[%c0_706, %c0_707], %458 {strides = array<i32>} : memref<64x20xf32, #tpu.memory_space<vmem>>, vector<8x20xf32>,
    %c60_708 = arith.constant 60 : index
    %c0_709 = arith.constant 0 : index
    %460 = vector.load %arg11[%c60_708, %c0_709] : memref<144x20xf32, #tpu.memory_space<vmem>>, vector<8x20xf32>
    %c8_710 = arith.constant 8 : index
    %c0_711 = arith.constant 0 : index
    %461 = vector.load %arg12[%c8_710, %c0_711] : memref<64x20xf32, #tpu.memory_space<vmem>>, vector<8x20xf32>
    tpu.vector_store %arg12[%c8_710, %c0_711], %460 {strides = array<i32>} : memref<64x20xf32, #tpu.memory_space<vmem>>, vector<8x20xf32>,
    %c72_712 = arith.constant 72 : index
    %c0_713 = arith.constant 0 : index
    %462 = vector.load %arg11[%c72_712, %c0_713] : memref<144x20xf32, #tpu.memory_space<vmem>>, vector<8x20xf32>
    %c16_714 = arith.constant 16 : index
    %c0_715 = arith.constant 0 : index
    %463 = vector.load %arg12[%c16_714, %c0_715] : memref<64x20xf32, #tpu.memory_space<vmem>>, vector<8x20xf32>
    tpu.vector_store %arg12[%c16_714, %c0_715], %462 {strides = array<i32>} : memref<64x20xf32, #tpu.memory_space<vmem>>, vector<8x20xf32>,
    %c84_716 = arith.constant 84 : index
    %c0_717 = arith.constant 0 : index
    %464 = vector.load %arg11[%c84_716, %c0_717] : memref<144x20xf32, #tpu.memory_space<vmem>>, vector<8x20xf32>
    %c24_718 = arith.constant 24 : index
    %c0_719 = arith.constant 0 : index
    %465 = vector.load %arg12[%c24_718, %c0_719] : memref<64x20xf32, #tpu.memory_space<vmem>>, vector<8x20xf32>
    tpu.vector_store %arg12[%c24_718, %c0_719], %464 {strides = array<i32>} : memref<64x20xf32, #tpu.memory_space<vmem>>, vector<8x20xf32>,
    %c96_720 = arith.constant 96 : index
    %c0_721 = arith.constant 0 : index
    %466 = vector.load %arg11[%c96_720, %c0_721] : memref<144x20xf32, #tpu.memory_space<vmem>>, vector<8x20xf32>
    %c32_722 = arith.constant 32 : index
    %c0_723 = arith.constant 0 : index
    %467 = vector.load %arg12[%c32_722, %c0_723] : memref<64x20xf32, #tpu.memory_space<vmem>>, vector<8x20xf32>
    tpu.vector_store %arg12[%c32_722, %c0_723], %466 {strides = array<i32>} : memref<64x20xf32, #tpu.memory_space<vmem>>, vector<8x20xf32>,
    %c108_724 = arith.constant 108 : index
    %c0_725 = arith.constant 0 : index
    %468 = vector.load %arg11[%c108_724, %c0_725] : memref<144x20xf32, #tpu.memory_space<vmem>>, vector<8x20xf32>
    %c40_726 = arith.constant 40 : index
    %c0_727 = arith.constant 0 : index
    %469 = vector.load %arg12[%c40_726, %c0_727] : memref<64x20xf32, #tpu.memory_space<vmem>>, vector<8x20xf32>
    tpu.vector_store %arg12[%c40_726, %c0_727], %468 {strides = array<i32>} : memref<64x20xf32, #tpu.memory_space<vmem>>, vector<8x20xf32>,
    %c120_728 = arith.constant 120 : index
    %c0_729 = arith.constant 0 : index
    %470 = vector.load %arg11[%c120_728, %c0_729] : memref<144x20xf32, #tpu.memory_space<vmem>>, vector<8x20xf32>
    %c48_730 = arith.constant 48 : index
    %c0_731 = arith.constant 0 : index
    %471 = vector.load %arg12[%c48_730, %c0_731] : memref<64x20xf32, #tpu.memory_space<vmem>>, vector<8x20xf32>
    tpu.vector_store %arg12[%c48_730, %c0_731], %470 {strides = array<i32>} : memref<64x20xf32, #tpu.memory_space<vmem>>, vector<8x20xf32>,
    %c132 = arith.constant 132 : index
    %c0_732 = arith.constant 0 : index
    %472 = vector.load %arg11[%c132, %c0_732] : memref<144x20xf32, #tpu.memory_space<vmem>>, vector<8x20xf32>
    %c56_733 = arith.constant 56 : index
    %c0_734 = arith.constant 0 : index
    %473 = vector.load %arg12[%c56_733, %c0_734] : memref<64x20xf32, #tpu.memory_space<vmem>>, vector<8x20xf32>
    tpu.vector_store %arg12[%c56_733, %c0_734], %472 {strides = array<i32>} : memref<64x20xf32, #tpu.memory_space<vmem>>, vector<8x20xf32>,
    %c0_735 = arith.constant 0 : index
    %c0_736 = arith.constant 0 : index
    %474 = vector.load %arg12[%c0_735, %c0_736] : memref<64x20xf32, #tpu.memory_space<vmem>>, vector<64x20xf32>
    %475 = arith.truncf %474 : vector<64x20xf32> to vector<64x20xbf16>
    %c20 = arith.constant 20 : index
    %c0_737 = arith.constant 0 : index
    %c0_738 = arith.constant 0 : index
    %476 = vector.load %arg4[%c20, %c0_737, %c0_738] : memref<25x20x50xbf16, #tpu.memory_space<vmem>>, vector<1x20x50xbf16>
    %477 = vector.shape_cast %476 : vector<1x20x50xbf16> to vector<20x50xbf16>
    %cst_739 = arith.constant dense<0.000000e+00> : vector<64x50xf32>
    %478 = tpu.matmul %475, %477, %cst_739 {dimension_numbers = #tpu.dot_dimension_numbers<[1], [0], [0], [1], [0, 0, 1, 1], [], []>} : vector<64x20xbf16>, vector<20x50xbf16>, vector<64x50xf32> -> vector<64x50xf32>
    %479 = arith.addf %457, %478 : vector<64x50xf32>
    %c49_740 = arith.constant 49 : index
    %c0_741 = arith.constant 0 : index
    %480 = vector.load %arg11[%c49_740, %c0_741] : memref<144x20xf32, #tpu.memory_space<vmem>>, vector<8x20xf32>
    %c0_742 = arith.constant 0 : index
    %c0_743 = arith.constant 0 : index
    %481 = vector.load %arg12[%c0_742, %c0_743] : memref<64x20xf32, #tpu.memory_space<vmem>>, vector<8x20xf32>
    tpu.vector_store %arg12[%c0_742, %c0_743], %480 {strides = array<i32>} : memref<64x20xf32, #tpu.memory_space<vmem>>, vector<8x20xf32>,
    %c61_744 = arith.constant 61 : index
    %c0_745 = arith.constant 0 : index
    %482 = vector.load %arg11[%c61_744, %c0_745] : memref<144x20xf32, #tpu.memory_space<vmem>>, vector<8x20xf32>
    %c8_746 = arith.constant 8 : index
    %c0_747 = arith.constant 0 : index
    %483 = vector.load %arg12[%c8_746, %c0_747] : memref<64x20xf32, #tpu.memory_space<vmem>>, vector<8x20xf32>
    tpu.vector_store %arg12[%c8_746, %c0_747], %482 {strides = array<i32>} : memref<64x20xf32, #tpu.memory_space<vmem>>, vector<8x20xf32>,
    %c73_748 = arith.constant 73 : index
    %c0_749 = arith.constant 0 : index
    %484 = vector.load %arg11[%c73_748, %c0_749] : memref<144x20xf32, #tpu.memory_space<vmem>>, vector<8x20xf32>
    %c16_750 = arith.constant 16 : index
    %c0_751 = arith.constant 0 : index
    %485 = vector.load %arg12[%c16_750, %c0_751] : memref<64x20xf32, #tpu.memory_space<vmem>>, vector<8x20xf32>
    tpu.vector_store %arg12[%c16_750, %c0_751], %484 {strides = array<i32>} : memref<64x20xf32, #tpu.memory_space<vmem>>, vector<8x20xf32>,
    %c85_752 = arith.constant 85 : index
    %c0_753 = arith.constant 0 : index
    %486 = vector.load %arg11[%c85_752, %c0_753] : memref<144x20xf32, #tpu.memory_space<vmem>>, vector<8x20xf32>
    %c24_754 = arith.constant 24 : index
    %c0_755 = arith.constant 0 : index
    %487 = vector.load %arg12[%c24_754, %c0_755] : memref<64x20xf32, #tpu.memory_space<vmem>>, vector<8x20xf32>
    tpu.vector_store %arg12[%c24_754, %c0_755], %486 {strides = array<i32>} : memref<64x20xf32, #tpu.memory_space<vmem>>, vector<8x20xf32>,
    %c97_756 = arith.constant 97 : index
    %c0_757 = arith.constant 0 : index
    %488 = vector.load %arg11[%c97_756, %c0_757] : memref<144x20xf32, #tpu.memory_space<vmem>>, vector<8x20xf32>
    %c32_758 = arith.constant 32 : index
    %c0_759 = arith.constant 0 : index
    %489 = vector.load %arg12[%c32_758, %c0_759] : memref<64x20xf32, #tpu.memory_space<vmem>>, vector<8x20xf32>
    tpu.vector_store %arg12[%c32_758, %c0_759], %488 {strides = array<i32>} : memref<64x20xf32, #tpu.memory_space<vmem>>, vector<8x20xf32>,
    %c109_760 = arith.constant 109 : index
    %c0_761 = arith.constant 0 : index
    %490 = vector.load %arg11[%c109_760, %c0_761] : memref<144x20xf32, #tpu.memory_space<vmem>>, vector<8x20xf32>
    %c40_762 = arith.constant 40 : index
    %c0_763 = arith.constant 0 : index
    %491 = vector.load %arg12[%c40_762, %c0_763] : memref<64x20xf32, #tpu.memory_space<vmem>>, vector<8x20xf32>
    tpu.vector_store %arg12[%c40_762, %c0_763], %490 {strides = array<i32>} : memref<64x20xf32, #tpu.memory_space<vmem>>, vector<8x20xf32>,
    %c121_764 = arith.constant 121 : index
    %c0_765 = arith.constant 0 : index
    %492 = vector.load %arg11[%c121_764, %c0_765] : memref<144x20xf32, #tpu.memory_space<vmem>>, vector<8x20xf32>
    %c48_766 = arith.constant 48 : index
    %c0_767 = arith.constant 0 : index
    %493 = vector.load %arg12[%c48_766, %c0_767] : memref<64x20xf32, #tpu.memory_space<vmem>>, vector<8x20xf32>
    tpu.vector_store %arg12[%c48_766, %c0_767], %492 {strides = array<i32>} : memref<64x20xf32, #tpu.memory_space<vmem>>, vector<8x20xf32>,
    %c133 = arith.constant 133 : index
    %c0_768 = arith.constant 0 : index
    %494 = vector.load %arg11[%c133, %c0_768] : memref<144x20xf32, #tpu.memory_space<vmem>>, vector<8x20xf32>
    %c56_769 = arith.constant 56 : index
    %c0_770 = arith.constant 0 : index
    %495 = vector.load %arg12[%c56_769, %c0_770] : memref<64x20xf32, #tpu.memory_space<vmem>>, vector<8x20xf32>
    tpu.vector_store %arg12[%c56_769, %c0_770], %494 {strides = array<i32>} : memref<64x20xf32, #tpu.memory_space<vmem>>, vector<8x20xf32>,
    %c0_771 = arith.constant 0 : index
    %c0_772 = arith.constant 0 : index
    %496 = vector.load %arg12[%c0_771, %c0_772] : memref<64x20xf32, #tpu.memory_space<vmem>>, vector<64x20xf32>
    %497 = arith.truncf %496 : vector<64x20xf32> to vector<64x20xbf16>
    %c21 = arith.constant 21 : index
    %c0_773 = arith.constant 0 : index
    %c0_774 = arith.constant 0 : index
    %498 = vector.load %arg4[%c21, %c0_773, %c0_774] : memref<25x20x50xbf16, #tpu.memory_space<vmem>>, vector<1x20x50xbf16>
    %499 = vector.shape_cast %498 : vector<1x20x50xbf16> to vector<20x50xbf16>
    %cst_775 = arith.constant dense<0.000000e+00> : vector<64x50xf32>
    %500 = tpu.matmul %497, %499, %cst_775 {dimension_numbers = #tpu.dot_dimension_numbers<[1], [0], [0], [1], [0, 0, 1, 1], [], []>} : vector<64x20xbf16>, vector<20x50xbf16>, vector<64x50xf32> -> vector<64x50xf32>
    %501 = arith.addf %479, %500 : vector<64x50xf32>
    %c50_776 = arith.constant 50 : index
    %c0_777 = arith.constant 0 : index
    %502 = vector.load %arg11[%c50_776, %c0_777] : memref<144x20xf32, #tpu.memory_space<vmem>>, vector<8x20xf32>
    %c0_778 = arith.constant 0 : index
    %c0_779 = arith.constant 0 : index
    %503 = vector.load %arg12[%c0_778, %c0_779] : memref<64x20xf32, #tpu.memory_space<vmem>>, vector<8x20xf32>
    tpu.vector_store %arg12[%c0_778, %c0_779], %502 {strides = array<i32>} : memref<64x20xf32, #tpu.memory_space<vmem>>, vector<8x20xf32>,
    %c62_780 = arith.constant 62 : index
    %c0_781 = arith.constant 0 : index
    %504 = vector.load %arg11[%c62_780, %c0_781] : memref<144x20xf32, #tpu.memory_space<vmem>>, vector<8x20xf32>
    %c8_782 = arith.constant 8 : index
    %c0_783 = arith.constant 0 : index
    %505 = vector.load %arg12[%c8_782, %c0_783] : memref<64x20xf32, #tpu.memory_space<vmem>>, vector<8x20xf32>
    tpu.vector_store %arg12[%c8_782, %c0_783], %504 {strides = array<i32>} : memref<64x20xf32, #tpu.memory_space<vmem>>, vector<8x20xf32>,
    %c74_784 = arith.constant 74 : index
    %c0_785 = arith.constant 0 : index
    %506 = vector.load %arg11[%c74_784, %c0_785] : memref<144x20xf32, #tpu.memory_space<vmem>>, vector<8x20xf32>
    %c16_786 = arith.constant 16 : index
    %c0_787 = arith.constant 0 : index
    %507 = vector.load %arg12[%c16_786, %c0_787] : memref<64x20xf32, #tpu.memory_space<vmem>>, vector<8x20xf32>
    tpu.vector_store %arg12[%c16_786, %c0_787], %506 {strides = array<i32>} : memref<64x20xf32, #tpu.memory_space<vmem>>, vector<8x20xf32>,
    %c86_788 = arith.constant 86 : index
    %c0_789 = arith.constant 0 : index
    %508 = vector.load %arg11[%c86_788, %c0_789] : memref<144x20xf32, #tpu.memory_space<vmem>>, vector<8x20xf32>
    %c24_790 = arith.constant 24 : index
    %c0_791 = arith.constant 0 : index
    %509 = vector.load %arg12[%c24_790, %c0_791] : memref<64x20xf32, #tpu.memory_space<vmem>>, vector<8x20xf32>
    tpu.vector_store %arg12[%c24_790, %c0_791], %508 {strides = array<i32>} : memref<64x20xf32, #tpu.memory_space<vmem>>, vector<8x20xf32>,
    %c98_792 = arith.constant 98 : index
    %c0_793 = arith.constant 0 : index
    %510 = vector.load %arg11[%c98_792, %c0_793] : memref<144x20xf32, #tpu.memory_space<vmem>>, vector<8x20xf32>
    %c32_794 = arith.constant 32 : index
    %c0_795 = arith.constant 0 : index
    %511 = vector.load %arg12[%c32_794, %c0_795] : memref<64x20xf32, #tpu.memory_space<vmem>>, vector<8x20xf32>
    tpu.vector_store %arg12[%c32_794, %c0_795], %510 {strides = array<i32>} : memref<64x20xf32, #tpu.memory_space<vmem>>, vector<8x20xf32>,
    %c110_796 = arith.constant 110 : index
    %c0_797 = arith.constant 0 : index
    %512 = vector.load %arg11[%c110_796, %c0_797] : memref<144x20xf32, #tpu.memory_space<vmem>>, vector<8x20xf32>
    %c40_798 = arith.constant 40 : index
    %c0_799 = arith.constant 0 : index
    %513 = vector.load %arg12[%c40_798, %c0_799] : memref<64x20xf32, #tpu.memory_space<vmem>>, vector<8x20xf32>
    tpu.vector_store %arg12[%c40_798, %c0_799], %512 {strides = array<i32>} : memref<64x20xf32, #tpu.memory_space<vmem>>, vector<8x20xf32>,
    %c122_800 = arith.constant 122 : index
    %c0_801 = arith.constant 0 : index
    %514 = vector.load %arg11[%c122_800, %c0_801] : memref<144x20xf32, #tpu.memory_space<vmem>>, vector<8x20xf32>
    %c48_802 = arith.constant 48 : index
    %c0_803 = arith.constant 0 : index
    %515 = vector.load %arg12[%c48_802, %c0_803] : memref<64x20xf32, #tpu.memory_space<vmem>>, vector<8x20xf32>
    tpu.vector_store %arg12[%c48_802, %c0_803], %514 {strides = array<i32>} : memref<64x20xf32, #tpu.memory_space<vmem>>, vector<8x20xf32>,
    %c134 = arith.constant 134 : index
    %c0_804 = arith.constant 0 : index
    %516 = vector.load %arg11[%c134, %c0_804] : memref<144x20xf32, #tpu.memory_space<vmem>>, vector<8x20xf32>
    %c56_805 = arith.constant 56 : index
    %c0_806 = arith.constant 0 : index
    %517 = vector.load %arg12[%c56_805, %c0_806] : memref<64x20xf32, #tpu.memory_space<vmem>>, vector<8x20xf32>
    tpu.vector_store %arg12[%c56_805, %c0_806], %516 {strides = array<i32>} : memref<64x20xf32, #tpu.memory_space<vmem>>, vector<8x20xf32>,
    %c0_807 = arith.constant 0 : index
    %c0_808 = arith.constant 0 : index
    %518 = vector.load %arg12[%c0_807, %c0_808] : memref<64x20xf32, #tpu.memory_space<vmem>>, vector<64x20xf32>
    %519 = arith.truncf %518 : vector<64x20xf32> to vector<64x20xbf16>
    %c22 = arith.constant 22 : index
    %c0_809 = arith.constant 0 : index
    %c0_810 = arith.constant 0 : index
    %520 = vector.load %arg4[%c22, %c0_809, %c0_810] : memref<25x20x50xbf16, #tpu.memory_space<vmem>>, vector<1x20x50xbf16>
    %521 = vector.shape_cast %520 : vector<1x20x50xbf16> to vector<20x50xbf16>
    %cst_811 = arith.constant dense<0.000000e+00> : vector<64x50xf32>
    %522 = tpu.matmul %519, %521, %cst_811 {dimension_numbers = #tpu.dot_dimension_numbers<[1], [0], [0], [1], [0, 0, 1, 1], [], []>} : vector<64x20xbf16>, vector<20x50xbf16>, vector<64x50xf32> -> vector<64x50xf32>
    %523 = arith.addf %501, %522 : vector<64x50xf32>
    %c51_812 = arith.constant 51 : index
    %c0_813 = arith.constant 0 : index
    %524 = vector.load %arg11[%c51_812, %c0_813] : memref<144x20xf32, #tpu.memory_space<vmem>>, vector<8x20xf32>
    %c0_814 = arith.constant 0 : index
    %c0_815 = arith.constant 0 : index
    %525 = vector.load %arg12[%c0_814, %c0_815] : memref<64x20xf32, #tpu.memory_space<vmem>>, vector<8x20xf32>
    tpu.vector_store %arg12[%c0_814, %c0_815], %524 {strides = array<i32>} : memref<64x20xf32, #tpu.memory_space<vmem>>, vector<8x20xf32>,
    %c63_816 = arith.constant 63 : index
    %c0_817 = arith.constant 0 : index
    %526 = vector.load %arg11[%c63_816, %c0_817] : memref<144x20xf32, #tpu.memory_space<vmem>>, vector<8x20xf32>
    %c8_818 = arith.constant 8 : index
    %c0_819 = arith.constant 0 : index
    %527 = vector.load %arg12[%c8_818, %c0_819] : memref<64x20xf32, #tpu.memory_space<vmem>>, vector<8x20xf32>
    tpu.vector_store %arg12[%c8_818, %c0_819], %526 {strides = array<i32>} : memref<64x20xf32, #tpu.memory_space<vmem>>, vector<8x20xf32>,
    %c75_820 = arith.constant 75 : index
    %c0_821 = arith.constant 0 : index
    %528 = vector.load %arg11[%c75_820, %c0_821] : memref<144x20xf32, #tpu.memory_space<vmem>>, vector<8x20xf32>
    %c16_822 = arith.constant 16 : index
    %c0_823 = arith.constant 0 : index
    %529 = vector.load %arg12[%c16_822, %c0_823] : memref<64x20xf32, #tpu.memory_space<vmem>>, vector<8x20xf32>
    tpu.vector_store %arg12[%c16_822, %c0_823], %528 {strides = array<i32>} : memref<64x20xf32, #tpu.memory_space<vmem>>, vector<8x20xf32>,
    %c87_824 = arith.constant 87 : index
    %c0_825 = arith.constant 0 : index
    %530 = vector.load %arg11[%c87_824, %c0_825] : memref<144x20xf32, #tpu.memory_space<vmem>>, vector<8x20xf32>
    %c24_826 = arith.constant 24 : index
    %c0_827 = arith.constant 0 : index
    %531 = vector.load %arg12[%c24_826, %c0_827] : memref<64x20xf32, #tpu.memory_space<vmem>>, vector<8x20xf32>
    tpu.vector_store %arg12[%c24_826, %c0_827], %530 {strides = array<i32>} : memref<64x20xf32, #tpu.memory_space<vmem>>, vector<8x20xf32>,
    %c99_828 = arith.constant 99 : index
    %c0_829 = arith.constant 0 : index
    %532 = vector.load %arg11[%c99_828, %c0_829] : memref<144x20xf32, #tpu.memory_space<vmem>>, vector<8x20xf32>
    %c32_830 = arith.constant 32 : index
    %c0_831 = arith.constant 0 : index
    %533 = vector.load %arg12[%c32_830, %c0_831] : memref<64x20xf32, #tpu.memory_space<vmem>>, vector<8x20xf32>
    tpu.vector_store %arg12[%c32_830, %c0_831], %532 {strides = array<i32>} : memref<64x20xf32, #tpu.memory_space<vmem>>, vector<8x20xf32>,
    %c111_832 = arith.constant 111 : index
    %c0_833 = arith.constant 0 : index
    %534 = vector.load %arg11[%c111_832, %c0_833] : memref<144x20xf32, #tpu.memory_space<vmem>>, vector<8x20xf32>
    %c40_834 = arith.constant 40 : index
    %c0_835 = arith.constant 0 : index
    %535 = vector.load %arg12[%c40_834, %c0_835] : memref<64x20xf32, #tpu.memory_space<vmem>>, vector<8x20xf32>
    tpu.vector_store %arg12[%c40_834, %c0_835], %534 {strides = array<i32>} : memref<64x20xf32, #tpu.memory_space<vmem>>, vector<8x20xf32>,
    %c123_836 = arith.constant 123 : index
    %c0_837 = arith.constant 0 : index
    %536 = vector.load %arg11[%c123_836, %c0_837] : memref<144x20xf32, #tpu.memory_space<vmem>>, vector<8x20xf32>
    %c48_838 = arith.constant 48 : index
    %c0_839 = arith.constant 0 : index
    %537 = vector.load %arg12[%c48_838, %c0_839] : memref<64x20xf32, #tpu.memory_space<vmem>>, vector<8x20xf32>
    tpu.vector_store %arg12[%c48_838, %c0_839], %536 {strides = array<i32>} : memref<64x20xf32, #tpu.memory_space<vmem>>, vector<8x20xf32>,
    %c135 = arith.constant 135 : index
    %c0_840 = arith.constant 0 : index
    %538 = vector.load %arg11[%c135, %c0_840] : memref<144x20xf32, #tpu.memory_space<vmem>>, vector<8x20xf32>
    %c56_841 = arith.constant 56 : index
    %c0_842 = arith.constant 0 : index
    %539 = vector.load %arg12[%c56_841, %c0_842] : memref<64x20xf32, #tpu.memory_space<vmem>>, vector<8x20xf32>
    tpu.vector_store %arg12[%c56_841, %c0_842], %538 {strides = array<i32>} : memref<64x20xf32, #tpu.memory_space<vmem>>, vector<8x20xf32>,
    %c0_843 = arith.constant 0 : index
    %c0_844 = arith.constant 0 : index
    %540 = vector.load %arg12[%c0_843, %c0_844] : memref<64x20xf32, #tpu.memory_space<vmem>>, vector<64x20xf32>
    %541 = arith.truncf %540 : vector<64x20xf32> to vector<64x20xbf16>
    %c23 = arith.constant 23 : index
    %c0_845 = arith.constant 0 : index
    %c0_846 = arith.constant 0 : index
    %542 = vector.load %arg4[%c23, %c0_845, %c0_846] : memref<25x20x50xbf16, #tpu.memory_space<vmem>>, vector<1x20x50xbf16>
    %543 = vector.shape_cast %542 : vector<1x20x50xbf16> to vector<20x50xbf16>
    %cst_847 = arith.constant dense<0.000000e+00> : vector<64x50xf32>
    %544 = tpu.matmul %541, %543, %cst_847 {dimension_numbers = #tpu.dot_dimension_numbers<[1], [0], [0], [1], [0, 0, 1, 1], [], []>} : vector<64x20xbf16>, vector<20x50xbf16>, vector<64x50xf32> -> vector<64x50xf32>
    %545 = arith.addf %523, %544 : vector<64x50xf32>
    %c52_848 = arith.constant 52 : index
    %c0_849 = arith.constant 0 : index
    %546 = vector.load %arg11[%c52_848, %c0_849] : memref<144x20xf32, #tpu.memory_space<vmem>>, vector<8x20xf32>
    %c0_850 = arith.constant 0 : index
    %c0_851 = arith.constant 0 : index
    %547 = vector.load %arg12[%c0_850, %c0_851] : memref<64x20xf32, #tpu.memory_space<vmem>>, vector<8x20xf32>
    tpu.vector_store %arg12[%c0_850, %c0_851], %546 {strides = array<i32>} : memref<64x20xf32, #tpu.memory_space<vmem>>, vector<8x20xf32>,
    %c64_852 = arith.constant 64 : index
    %c0_853 = arith.constant 0 : index
    %548 = vector.load %arg11[%c64_852, %c0_853] : memref<144x20xf32, #tpu.memory_space<vmem>>, vector<8x20xf32>
    %c8_854 = arith.constant 8 : index
    %c0_855 = arith.constant 0 : index
    %549 = vector.load %arg12[%c8_854, %c0_855] : memref<64x20xf32, #tpu.memory_space<vmem>>, vector<8x20xf32>
    tpu.vector_store %arg12[%c8_854, %c0_855], %548 {strides = array<i32>} : memref<64x20xf32, #tpu.memory_space<vmem>>, vector<8x20xf32>,
    %c76_856 = arith.constant 76 : index
    %c0_857 = arith.constant 0 : index
    %550 = vector.load %arg11[%c76_856, %c0_857] : memref<144x20xf32, #tpu.memory_space<vmem>>, vector<8x20xf32>
    %c16_858 = arith.constant 16 : index
    %c0_859 = arith.constant 0 : index
    %551 = vector.load %arg12[%c16_858, %c0_859] : memref<64x20xf32, #tpu.memory_space<vmem>>, vector<8x20xf32>
    tpu.vector_store %arg12[%c16_858, %c0_859], %550 {strides = array<i32>} : memref<64x20xf32, #tpu.memory_space<vmem>>, vector<8x20xf32>,
    %c88_860 = arith.constant 88 : index
    %c0_861 = arith.constant 0 : index
    %552 = vector.load %arg11[%c88_860, %c0_861] : memref<144x20xf32, #tpu.memory_space<vmem>>, vector<8x20xf32>
    %c24_862 = arith.constant 24 : index
    %c0_863 = arith.constant 0 : index
    %553 = vector.load %arg12[%c24_862, %c0_863] : memref<64x20xf32, #tpu.memory_space<vmem>>, vector<8x20xf32>
    tpu.vector_store %arg12[%c24_862, %c0_863], %552 {strides = array<i32>} : memref<64x20xf32, #tpu.memory_space<vmem>>, vector<8x20xf32>,
    %c100_864 = arith.constant 100 : index
    %c0_865 = arith.constant 0 : index
    %554 = vector.load %arg11[%c100_864, %c0_865] : memref<144x20xf32, #tpu.memory_space<vmem>>, vector<8x20xf32>
    %c32_866 = arith.constant 32 : index
    %c0_867 = arith.constant 0 : index
    %555 = vector.load %arg12[%c32_866, %c0_867] : memref<64x20xf32, #tpu.memory_space<vmem>>, vector<8x20xf32>
    tpu.vector_store %arg12[%c32_866, %c0_867], %554 {strides = array<i32>} : memref<64x20xf32, #tpu.memory_space<vmem>>, vector<8x20xf32>,
    %c112_868 = arith.constant 112 : index
    %c0_869 = arith.constant 0 : index
    %556 = vector.load %arg11[%c112_868, %c0_869] : memref<144x20xf32, #tpu.memory_space<vmem>>, vector<8x20xf32>
    %c40_870 = arith.constant 40 : index
    %c0_871 = arith.constant 0 : index
    %557 = vector.load %arg12[%c40_870, %c0_871] : memref<64x20xf32, #tpu.memory_space<vmem>>, vector<8x20xf32>
    tpu.vector_store %arg12[%c40_870, %c0_871], %556 {strides = array<i32>} : memref<64x20xf32, #tpu.memory_space<vmem>>, vector<8x20xf32>,
    %c124_872 = arith.constant 124 : index
    %c0_873 = arith.constant 0 : index
    %558 = vector.load %arg11[%c124_872, %c0_873] : memref<144x20xf32, #tpu.memory_space<vmem>>, vector<8x20xf32>
    %c48_874 = arith.constant 48 : index
    %c0_875 = arith.constant 0 : index
    %559 = vector.load %arg12[%c48_874, %c0_875] : memref<64x20xf32, #tpu.memory_space<vmem>>, vector<8x20xf32>
    tpu.vector_store %arg12[%c48_874, %c0_875], %558 {strides = array<i32>} : memref<64x20xf32, #tpu.memory_space<vmem>>, vector<8x20xf32>,
    %c136 = arith.constant 136 : index
    %c0_876 = arith.constant 0 : index
    %560 = vector.load %arg11[%c136, %c0_876] : memref<144x20xf32, #tpu.memory_space<vmem>>, vector<8x20xf32>
    %c56_877 = arith.constant 56 : index
    %c0_878 = arith.constant 0 : index
    %561 = vector.load %arg12[%c56_877, %c0_878] : memref<64x20xf32, #tpu.memory_space<vmem>>, vector<8x20xf32>
    tpu.vector_store %arg12[%c56_877, %c0_878], %560 {strides = array<i32>} : memref<64x20xf32, #tpu.memory_space<vmem>>, vector<8x20xf32>,
    %c0_879 = arith.constant 0 : index
    %c0_880 = arith.constant 0 : index
    %562 = vector.load %arg12[%c0_879, %c0_880] : memref<64x20xf32, #tpu.memory_space<vmem>>, vector<64x20xf32>
    %563 = arith.truncf %562 : vector<64x20xf32> to vector<64x20xbf16>
    %c24_881 = arith.constant 24 : index
    %c0_882 = arith.constant 0 : index
    %c0_883 = arith.constant 0 : index
    %564 = vector.load %arg4[%c24_881, %c0_882, %c0_883] : memref<25x20x50xbf16, #tpu.memory_space<vmem>>, vector<1x20x50xbf16>
    %565 = vector.shape_cast %564 : vector<1x20x50xbf16> to vector<20x50xbf16>
    %cst_884 = arith.constant dense<0.000000e+00> : vector<64x50xf32>
    %566 = tpu.matmul %563, %565, %cst_884 {dimension_numbers = #tpu.dot_dimension_numbers<[1], [0], [0], [1], [0, 0, 1, 1], [], []>} : vector<64x20xbf16>, vector<20x50xbf16>, vector<64x50xf32> -> vector<64x50xf32>
    %567 = arith.addf %545, %566 : vector<64x50xf32>
    %c0_885 = arith.constant 0 : index
    %c0_886 = arith.constant 0 : index
    %568 = vector.load %arg5[%c0_885, %c0_886] : memref<1x50xf32, #tpu.memory_space<vmem>>, vector<1x50xf32>
    %569 = vector.broadcast %568 : vector<1x50xf32> to vector<64x50xf32>
    %570 = arith.addf %567, %569 : vector<64x50xf32>
    %cst_887 = arith.constant 0.000000e+00 : f32
    %571 = vector.broadcast %cst_887 : f32 to vector<64x50xf32>
    %572 = arith.maximumf %570, %571 : vector<64x50xf32>
    %c0_888 = arith.constant 0 : index
    %c0_889 = arith.constant 0 : index
    %573 = vector.load %arg13[%c0_888, %c0_889] : memref<64x50xf32, #tpu.memory_space<vmem>>, vector<64x50xf32>
    tpu.vector_store %arg13[%c0_888, %c0_889], %572 {strides = array<i32>} : memref<64x50xf32, #tpu.memory_space<vmem>>, vector<64x50xf32>,
    %cst_890 = arith.constant 0.000000e+00 : f32
    %574 = vector.broadcast %cst_890 : f32 to vector<1x32xf32>
    %c0_891 = arith.constant 0 : index
    %c0_892 = arith.constant 0 : index
    %575 = vector.load %arg13[%c0_891, %c0_892] : memref<64x50xf32, #tpu.memory_space<vmem>>, vector<1x50xf32>
    %c1_893 = arith.constant 1 : index
    %c0_894 = arith.constant 0 : index
    %576 = vector.load %arg13[%c1_893, %c0_894] : memref<64x50xf32, #tpu.memory_space<vmem>>, vector<1x50xf32>
    %577 = arith.maximumf %575, %576 : vector<1x50xf32>
    %c8_895 = arith.constant 8 : index
    %c0_896 = arith.constant 0 : index
    %578 = vector.load %arg13[%c8_895, %c0_896] : memref<64x50xf32, #tpu.memory_space<vmem>>, vector<1x50xf32>
    %c9_897 = arith.constant 9 : index
    %c0_898 = arith.constant 0 : index
    %579 = vector.load %arg13[%c9_897, %c0_898] : memref<64x50xf32, #tpu.memory_space<vmem>>, vector<1x50xf32>
    %580 = arith.maximumf %578, %579 : vector<1x50xf32>
    %581 = arith.maximumf %577, %580 : vector<1x50xf32>
    %c0_899 = arith.constant 0 : index
    %c0_900 = arith.constant 0 : index
    %c0_901 = arith.constant 0 : index
    %582 = vector.load %arg6[%c0_899, %c0_900, %c0_901] : memref<16x50x32xf32, #tpu.memory_space<vmem>>, vector<1x50x32xf32>
    %583 = vector.shape_cast %582 : vector<1x50x32xf32> to vector<50x32xf32>
    %cst_902 = arith.constant dense<0.000000e+00> : vector<1x32xf32>
    %584 = tpu.matmul %581, %583, %cst_902 {dimension_numbers = #tpu.dot_dimension_numbers<[1], [0], [0], [1], [0, 0, 1, 1], [], []>} : vector<1x50xf32>, vector<50x32xf32>, vector<1x32xf32> -> vector<1x32xf32>
    %585 = arith.addf %574, %584 : vector<1x32xf32>
    %c2_903 = arith.constant 2 : index
    %c0_904 = arith.constant 0 : index
    %586 = vector.load %arg13[%c2_903, %c0_904] : memref<64x50xf32, #tpu.memory_space<vmem>>, vector<1x50xf32>
    %c3_905 = arith.constant 3 : index
    %c0_906 = arith.constant 0 : index
    %587 = vector.load %arg13[%c3_905, %c0_906] : memref<64x50xf32, #tpu.memory_space<vmem>>, vector<1x50xf32>
    %588 = arith.maximumf %586, %587 : vector<1x50xf32>
    %c10_907 = arith.constant 10 : index
    %c0_908 = arith.constant 0 : index
    %589 = vector.load %arg13[%c10_907, %c0_908] : memref<64x50xf32, #tpu.memory_space<vmem>>, vector<1x50xf32>
    %c11_909 = arith.constant 11 : index
    %c0_910 = arith.constant 0 : index
    %590 = vector.load %arg13[%c11_909, %c0_910] : memref<64x50xf32, #tpu.memory_space<vmem>>, vector<1x50xf32>
    %591 = arith.maximumf %589, %590 : vector<1x50xf32>
    %592 = arith.maximumf %588, %591 : vector<1x50xf32>
    %c1_911 = arith.constant 1 : index
    %c0_912 = arith.constant 0 : index
    %c0_913 = arith.constant 0 : index
    %593 = vector.load %arg6[%c1_911, %c0_912, %c0_913] : memref<16x50x32xf32, #tpu.memory_space<vmem>>, vector<1x50x32xf32>
    %594 = vector.shape_cast %593 : vector<1x50x32xf32> to vector<50x32xf32>
    %cst_914 = arith.constant dense<0.000000e+00> : vector<1x32xf32>
    %595 = tpu.matmul %592, %594, %cst_914 {dimension_numbers = #tpu.dot_dimension_numbers<[1], [0], [0], [1], [0, 0, 1, 1], [], []>} : vector<1x50xf32>, vector<50x32xf32>, vector<1x32xf32> -> vector<1x32xf32>
    %596 = arith.addf %585, %595 : vector<1x32xf32>
    %c4_915 = arith.constant 4 : index
    %c0_916 = arith.constant 0 : index
    %597 = vector.load %arg13[%c4_915, %c0_916] : memref<64x50xf32, #tpu.memory_space<vmem>>, vector<1x50xf32>
    %c5_917 = arith.constant 5 : index
    %c0_918 = arith.constant 0 : index
    %598 = vector.load %arg13[%c5_917, %c0_918] : memref<64x50xf32, #tpu.memory_space<vmem>>, vector<1x50xf32>
    %599 = arith.maximumf %597, %598 : vector<1x50xf32>
    %c12_919 = arith.constant 12 : index
    %c0_920 = arith.constant 0 : index
    %600 = vector.load %arg13[%c12_919, %c0_920] : memref<64x50xf32, #tpu.memory_space<vmem>>, vector<1x50xf32>
    %c13_921 = arith.constant 13 : index
    %c0_922 = arith.constant 0 : index
    %601 = vector.load %arg13[%c13_921, %c0_922] : memref<64x50xf32, #tpu.memory_space<vmem>>, vector<1x50xf32>
    %602 = arith.maximumf %600, %601 : vector<1x50xf32>
    %603 = arith.maximumf %599, %602 : vector<1x50xf32>
    %c2_923 = arith.constant 2 : index
    %c0_924 = arith.constant 0 : index
    %c0_925 = arith.constant 0 : index
    %604 = vector.load %arg6[%c2_923, %c0_924, %c0_925] : memref<16x50x32xf32, #tpu.memory_space<vmem>>, vector<1x50x32xf32>
    %605 = vector.shape_cast %604 : vector<1x50x32xf32> to vector<50x32xf32>
    %cst_926 = arith.constant dense<0.000000e+00> : vector<1x32xf32>
    %606 = tpu.matmul %603, %605, %cst_926 {dimension_numbers = #tpu.dot_dimension_numbers<[1], [0], [0], [1], [0, 0, 1, 1], [], []>} : vector<1x50xf32>, vector<50x32xf32>, vector<1x32xf32> -> vector<1x32xf32>
    %607 = arith.addf %596, %606 : vector<1x32xf32>
    %c6_927 = arith.constant 6 : index
    %c0_928 = arith.constant 0 : index
    %608 = vector.load %arg13[%c6_927, %c0_928] : memref<64x50xf32, #tpu.memory_space<vmem>>, vector<1x50xf32>
    %c7_929 = arith.constant 7 : index
    %c0_930 = arith.constant 0 : index
    %609 = vector.load %arg13[%c7_929, %c0_930] : memref<64x50xf32, #tpu.memory_space<vmem>>, vector<1x50xf32>
    %610 = arith.maximumf %608, %609 : vector<1x50xf32>
    %c14_931 = arith.constant 14 : index
    %c0_932 = arith.constant 0 : index
    %611 = vector.load %arg13[%c14_931, %c0_932] : memref<64x50xf32, #tpu.memory_space<vmem>>, vector<1x50xf32>
    %c15_933 = arith.constant 15 : index
    %c0_934 = arith.constant 0 : index
    %612 = vector.load %arg13[%c15_933, %c0_934] : memref<64x50xf32, #tpu.memory_space<vmem>>, vector<1x50xf32>
    %613 = arith.maximumf %611, %612 : vector<1x50xf32>
    %614 = arith.maximumf %610, %613 : vector<1x50xf32>
    %c3_935 = arith.constant 3 : index
    %c0_936 = arith.constant 0 : index
    %c0_937 = arith.constant 0 : index
    %615 = vector.load %arg6[%c3_935, %c0_936, %c0_937] : memref<16x50x32xf32, #tpu.memory_space<vmem>>, vector<1x50x32xf32>
    %616 = vector.shape_cast %615 : vector<1x50x32xf32> to vector<50x32xf32>
    %cst_938 = arith.constant dense<0.000000e+00> : vector<1x32xf32>
    %617 = tpu.matmul %614, %616, %cst_938 {dimension_numbers = #tpu.dot_dimension_numbers<[1], [0], [0], [1], [0, 0, 1, 1], [], []>} : vector<1x50xf32>, vector<50x32xf32>, vector<1x32xf32> -> vector<1x32xf32>
    %618 = arith.addf %607, %617 : vector<1x32xf32>
    %c16_939 = arith.constant 16 : index
    %c0_940 = arith.constant 0 : index
    %619 = vector.load %arg13[%c16_939, %c0_940] : memref<64x50xf32, #tpu.memory_space<vmem>>, vector<1x50xf32>
    %c17_941 = arith.constant 17 : index
    %c0_942 = arith.constant 0 : index
    %620 = vector.load %arg13[%c17_941, %c0_942] : memref<64x50xf32, #tpu.memory_space<vmem>>, vector<1x50xf32>
    %621 = arith.maximumf %619, %620 : vector<1x50xf32>
    %c24_943 = arith.constant 24 : index
    %c0_944 = arith.constant 0 : index
    %622 = vector.load %arg13[%c24_943, %c0_944] : memref<64x50xf32, #tpu.memory_space<vmem>>, vector<1x50xf32>
    %c25_945 = arith.constant 25 : index
    %c0_946 = arith.constant 0 : index
    %623 = vector.load %arg13[%c25_945, %c0_946] : memref<64x50xf32, #tpu.memory_space<vmem>>, vector<1x50xf32>
    %624 = arith.maximumf %622, %623 : vector<1x50xf32>
    %625 = arith.maximumf %621, %624 : vector<1x50xf32>
    %c4_947 = arith.constant 4 : index
    %c0_948 = arith.constant 0 : index
    %c0_949 = arith.constant 0 : index
    %626 = vector.load %arg6[%c4_947, %c0_948, %c0_949] : memref<16x50x32xf32, #tpu.memory_space<vmem>>, vector<1x50x32xf32>
    %627 = vector.shape_cast %626 : vector<1x50x32xf32> to vector<50x32xf32>
    %cst_950 = arith.constant dense<0.000000e+00> : vector<1x32xf32>
    %628 = tpu.matmul %625, %627, %cst_950 {dimension_numbers = #tpu.dot_dimension_numbers<[1], [0], [0], [1], [0, 0, 1, 1], [], []>} : vector<1x50xf32>, vector<50x32xf32>, vector<1x32xf32> -> vector<1x32xf32>
    %629 = arith.addf %618, %628 : vector<1x32xf32>
    %c18_951 = arith.constant 18 : index
    %c0_952 = arith.constant 0 : index
    %630 = vector.load %arg13[%c18_951, %c0_952] : memref<64x50xf32, #tpu.memory_space<vmem>>, vector<1x50xf32>
    %c19_953 = arith.constant 19 : index
    %c0_954 = arith.constant 0 : index
    %631 = vector.load %arg13[%c19_953, %c0_954] : memref<64x50xf32, #tpu.memory_space<vmem>>, vector<1x50xf32>
    %632 = arith.maximumf %630, %631 : vector<1x50xf32>
    %c26_955 = arith.constant 26 : index
    %c0_956 = arith.constant 0 : index
    %633 = vector.load %arg13[%c26_955, %c0_956] : memref<64x50xf32, #tpu.memory_space<vmem>>, vector<1x50xf32>
    %c27_957 = arith.constant 27 : index
    %c0_958 = arith.constant 0 : index
    %634 = vector.load %arg13[%c27_957, %c0_958] : memref<64x50xf32, #tpu.memory_space<vmem>>, vector<1x50xf32>
    %635 = arith.maximumf %633, %634 : vector<1x50xf32>
    %636 = arith.maximumf %632, %635 : vector<1x50xf32>
    %c5_959 = arith.constant 5 : index
    %c0_960 = arith.constant 0 : index
    %c0_961 = arith.constant 0 : index
    %637 = vector.load %arg6[%c5_959, %c0_960, %c0_961] : memref<16x50x32xf32, #tpu.memory_space<vmem>>, vector<1x50x32xf32>
    %638 = vector.shape_cast %637 : vector<1x50x32xf32> to vector<50x32xf32>
    %cst_962 = arith.constant dense<0.000000e+00> : vector<1x32xf32>
    %639 = tpu.matmul %636, %638, %cst_962 {dimension_numbers = #tpu.dot_dimension_numbers<[1], [0], [0], [1], [0, 0, 1, 1], [], []>} : vector<1x50xf32>, vector<50x32xf32>, vector<1x32xf32> -> vector<1x32xf32>
    %640 = arith.addf %629, %639 : vector<1x32xf32>
    %c20_963 = arith.constant 20 : index
    %c0_964 = arith.constant 0 : index
    %641 = vector.load %arg13[%c20_963, %c0_964] : memref<64x50xf32, #tpu.memory_space<vmem>>, vector<1x50xf32>
    %c21_965 = arith.constant 21 : index
    %c0_966 = arith.constant 0 : index
    %642 = vector.load %arg13[%c21_965, %c0_966] : memref<64x50xf32, #tpu.memory_space<vmem>>, vector<1x50xf32>
    %643 = arith.maximumf %641, %642 : vector<1x50xf32>
    %c28_967 = arith.constant 28 : index
    %c0_968 = arith.constant 0 : index
    %644 = vector.load %arg13[%c28_967, %c0_968] : memref<64x50xf32, #tpu.memory_space<vmem>>, vector<1x50xf32>
    %c29 = arith.constant 29 : index
    %c0_969 = arith.constant 0 : index
    %645 = vector.load %arg13[%c29, %c0_969] : memref<64x50xf32, #tpu.memory_space<vmem>>, vector<1x50xf32>
    %646 = arith.maximumf %644, %645 : vector<1x50xf32>
    %647 = arith.maximumf %643, %646 : vector<1x50xf32>
    %c6_970 = arith.constant 6 : index
    %c0_971 = arith.constant 0 : index
    %c0_972 = arith.constant 0 : index
    %648 = vector.load %arg6[%c6_970, %c0_971, %c0_972] : memref<16x50x32xf32, #tpu.memory_space<vmem>>, vector<1x50x32xf32>
    %649 = vector.shape_cast %648 : vector<1x50x32xf32> to vector<50x32xf32>
    %cst_973 = arith.constant dense<0.000000e+00> : vector<1x32xf32>
    %650 = tpu.matmul %647, %649, %cst_973 {dimension_numbers = #tpu.dot_dimension_numbers<[1], [0], [0], [1], [0, 0, 1, 1], [], []>} : vector<1x50xf32>, vector<50x32xf32>, vector<1x32xf32> -> vector<1x32xf32>
    %651 = arith.addf %640, %650 : vector<1x32xf32>
    %c22_974 = arith.constant 22 : index
    %c0_975 = arith.constant 0 : index
    %652 = vector.load %arg13[%c22_974, %c0_975] : memref<64x50xf32, #tpu.memory_space<vmem>>, vector<1x50xf32>
    %c23_976 = arith.constant 23 : index
    %c0_977 = arith.constant 0 : index
    %653 = vector.load %arg13[%c23_976, %c0_977] : memref<64x50xf32, #tpu.memory_space<vmem>>, vector<1x50xf32>
    %654 = arith.maximumf %652, %653 : vector<1x50xf32>
    %c30 = arith.constant 30 : index
    %c0_978 = arith.constant 0 : index
    %655 = vector.load %arg13[%c30, %c0_978] : memref<64x50xf32, #tpu.memory_space<vmem>>, vector<1x50xf32>
    %c31 = arith.constant 31 : index
    %c0_979 = arith.constant 0 : index
    %656 = vector.load %arg13[%c31, %c0_979] : memref<64x50xf32, #tpu.memory_space<vmem>>, vector<1x50xf32>
    %657 = arith.maximumf %655, %656 : vector<1x50xf32>
    %658 = arith.maximumf %654, %657 : vector<1x50xf32>
    %c7_980 = arith.constant 7 : index
    %c0_981 = arith.constant 0 : index
    %c0_982 = arith.constant 0 : index
    %659 = vector.load %arg6[%c7_980, %c0_981, %c0_982] : memref<16x50x32xf32, #tpu.memory_space<vmem>>, vector<1x50x32xf32>
    %660 = vector.shape_cast %659 : vector<1x50x32xf32> to vector<50x32xf32>
    %cst_983 = arith.constant dense<0.000000e+00> : vector<1x32xf32>
    %661 = tpu.matmul %658, %660, %cst_983 {dimension_numbers = #tpu.dot_dimension_numbers<[1], [0], [0], [1], [0, 0, 1, 1], [], []>} : vector<1x50xf32>, vector<50x32xf32>, vector<1x32xf32> -> vector<1x32xf32>
    %662 = arith.addf %651, %661 : vector<1x32xf32>
    %c32_984 = arith.constant 32 : index
    %c0_985 = arith.constant 0 : index
    %663 = vector.load %arg13[%c32_984, %c0_985] : memref<64x50xf32, #tpu.memory_space<vmem>>, vector<1x50xf32>
    %c33 = arith.constant 33 : index
    %c0_986 = arith.constant 0 : index
    %664 = vector.load %arg13[%c33, %c0_986] : memref<64x50xf32, #tpu.memory_space<vmem>>, vector<1x50xf32>
    %665 = arith.maximumf %663, %664 : vector<1x50xf32>
    %c40_987 = arith.constant 40 : index
    %c0_988 = arith.constant 0 : index
    %666 = vector.load %arg13[%c40_987, %c0_988] : memref<64x50xf32, #tpu.memory_space<vmem>>, vector<1x50xf32>
    %c41 = arith.constant 41 : index
    %c0_989 = arith.constant 0 : index
    %667 = vector.load %arg13[%c41, %c0_989] : memref<64x50xf32, #tpu.memory_space<vmem>>, vector<1x50xf32>
    %668 = arith.maximumf %666, %667 : vector<1x50xf32>
    %669 = arith.maximumf %665, %668 : vector<1x50xf32>
    %c8_990 = arith.constant 8 : index
    %c0_991 = arith.constant 0 : index
    %c0_992 = arith.constant 0 : index
    %670 = vector.load %arg6[%c8_990, %c0_991, %c0_992] : memref<16x50x32xf32, #tpu.memory_space<vmem>>, vector<1x50x32xf32>
    %671 = vector.shape_cast %670 : vector<1x50x32xf32> to vector<50x32xf32>
    %cst_993 = arith.constant dense<0.000000e+00> : vector<1x32xf32>
    %672 = tpu.matmul %669, %671, %cst_993 {dimension_numbers = #tpu.dot_dimension_numbers<[1], [0], [0], [1], [0, 0, 1, 1], [], []>} : vector<1x50xf32>, vector<50x32xf32>, vector<1x32xf32> -> vector<1x32xf32>
    %673 = arith.addf %662, %672 : vector<1x32xf32>
    %c34 = arith.constant 34 : index
    %c0_994 = arith.constant 0 : index
    %674 = vector.load %arg13[%c34, %c0_994] : memref<64x50xf32, #tpu.memory_space<vmem>>, vector<1x50xf32>
    %c35 = arith.constant 35 : index
    %c0_995 = arith.constant 0 : index
    %675 = vector.load %arg13[%c35, %c0_995] : memref<64x50xf32, #tpu.memory_space<vmem>>, vector<1x50xf32>
    %676 = arith.maximumf %674, %675 : vector<1x50xf32>
    %c42 = arith.constant 42 : index
    %c0_996 = arith.constant 0 : index
    %677 = vector.load %arg13[%c42, %c0_996] : memref<64x50xf32, #tpu.memory_space<vmem>>, vector<1x50xf32>
    %c43 = arith.constant 43 : index
    %c0_997 = arith.constant 0 : index
    %678 = vector.load %arg13[%c43, %c0_997] : memref<64x50xf32, #tpu.memory_space<vmem>>, vector<1x50xf32>
    %679 = arith.maximumf %677, %678 : vector<1x50xf32>
    %680 = arith.maximumf %676, %679 : vector<1x50xf32>
    %c9_998 = arith.constant 9 : index
    %c0_999 = arith.constant 0 : index
    %c0_1000 = arith.constant 0 : index
    %681 = vector.load %arg6[%c9_998, %c0_999, %c0_1000] : memref<16x50x32xf32, #tpu.memory_space<vmem>>, vector<1x50x32xf32>
    %682 = vector.shape_cast %681 : vector<1x50x32xf32> to vector<50x32xf32>
    %cst_1001 = arith.constant dense<0.000000e+00> : vector<1x32xf32>
    %683 = tpu.matmul %680, %682, %cst_1001 {dimension_numbers = #tpu.dot_dimension_numbers<[1], [0], [0], [1], [0, 0, 1, 1], [], []>} : vector<1x50xf32>, vector<50x32xf32>, vector<1x32xf32> -> vector<1x32xf32>
    %684 = arith.addf %673, %683 : vector<1x32xf32>
    %c36_1002 = arith.constant 36 : index
    %c0_1003 = arith.constant 0 : index
    %685 = vector.load %arg13[%c36_1002, %c0_1003] : memref<64x50xf32, #tpu.memory_space<vmem>>, vector<1x50xf32>
    %c37_1004 = arith.constant 37 : index
    %c0_1005 = arith.constant 0 : index
    %686 = vector.load %arg13[%c37_1004, %c0_1005] : memref<64x50xf32, #tpu.memory_space<vmem>>, vector<1x50xf32>
    %687 = arith.maximumf %685, %686 : vector<1x50xf32>
    %c44 = arith.constant 44 : index
    %c0_1006 = arith.constant 0 : index
    %688 = vector.load %arg13[%c44, %c0_1006] : memref<64x50xf32, #tpu.memory_space<vmem>>, vector<1x50xf32>
    %c45 = arith.constant 45 : index
    %c0_1007 = arith.constant 0 : index
    %689 = vector.load %arg13[%c45, %c0_1007] : memref<64x50xf32, #tpu.memory_space<vmem>>, vector<1x50xf32>
    %690 = arith.maximumf %688, %689 : vector<1x50xf32>
    %691 = arith.maximumf %687, %690 : vector<1x50xf32>
    %c10_1008 = arith.constant 10 : index
    %c0_1009 = arith.constant 0 : index
    %c0_1010 = arith.constant 0 : index
    %692 = vector.load %arg6[%c10_1008, %c0_1009, %c0_1010] : memref<16x50x32xf32, #tpu.memory_space<vmem>>, vector<1x50x32xf32>
    %693 = vector.shape_cast %692 : vector<1x50x32xf32> to vector<50x32xf32>
    %cst_1011 = arith.constant dense<0.000000e+00> : vector<1x32xf32>
    %694 = tpu.matmul %691, %693, %cst_1011 {dimension_numbers = #tpu.dot_dimension_numbers<[1], [0], [0], [1], [0, 0, 1, 1], [], []>} : vector<1x50xf32>, vector<50x32xf32>, vector<1x32xf32> -> vector<1x32xf32>
    %695 = arith.addf %684, %694 : vector<1x32xf32>
    %c38_1012 = arith.constant 38 : index
    %c0_1013 = arith.constant 0 : index
    %696 = vector.load %arg13[%c38_1012, %c0_1013] : memref<64x50xf32, #tpu.memory_space<vmem>>, vector<1x50xf32>
    %c39_1014 = arith.constant 39 : index
    %c0_1015 = arith.constant 0 : index
    %697 = vector.load %arg13[%c39_1014, %c0_1015] : memref<64x50xf32, #tpu.memory_space<vmem>>, vector<1x50xf32>
    %698 = arith.maximumf %696, %697 : vector<1x50xf32>
    %c46 = arith.constant 46 : index
    %c0_1016 = arith.constant 0 : index
    %699 = vector.load %arg13[%c46, %c0_1016] : memref<64x50xf32, #tpu.memory_space<vmem>>, vector<1x50xf32>
    %c47 = arith.constant 47 : index
    %c0_1017 = arith.constant 0 : index
    %700 = vector.load %arg13[%c47, %c0_1017] : memref<64x50xf32, #tpu.memory_space<vmem>>, vector<1x50xf32>
    %701 = arith.maximumf %699, %700 : vector<1x50xf32>
    %702 = arith.maximumf %698, %701 : vector<1x50xf32>
    %c11_1018 = arith.constant 11 : index
    %c0_1019 = arith.constant 0 : index
    %c0_1020 = arith.constant 0 : index
    %703 = vector.load %arg6[%c11_1018, %c0_1019, %c0_1020] : memref<16x50x32xf32, #tpu.memory_space<vmem>>, vector<1x50x32xf32>
    %704 = vector.shape_cast %703 : vector<1x50x32xf32> to vector<50x32xf32>
    %cst_1021 = arith.constant dense<0.000000e+00> : vector<1x32xf32>
    %705 = tpu.matmul %702, %704, %cst_1021 {dimension_numbers = #tpu.dot_dimension_numbers<[1], [0], [0], [1], [0, 0, 1, 1], [], []>} : vector<1x50xf32>, vector<50x32xf32>, vector<1x32xf32> -> vector<1x32xf32>
    %706 = arith.addf %695, %705 : vector<1x32xf32>
    %c48_1022 = arith.constant 48 : index
    %c0_1023 = arith.constant 0 : index
    %707 = vector.load %arg13[%c48_1022, %c0_1023] : memref<64x50xf32, #tpu.memory_space<vmem>>, vector<1x50xf32>
    %c49_1024 = arith.constant 49 : index
    %c0_1025 = arith.constant 0 : index
    %708 = vector.load %arg13[%c49_1024, %c0_1025] : memref<64x50xf32, #tpu.memory_space<vmem>>, vector<1x50xf32>
    %709 = arith.maximumf %707, %708 : vector<1x50xf32>
    %c56_1026 = arith.constant 56 : index
    %c0_1027 = arith.constant 0 : index
    %710 = vector.load %arg13[%c56_1026, %c0_1027] : memref<64x50xf32, #tpu.memory_space<vmem>>, vector<1x50xf32>
    %c57 = arith.constant 57 : index
    %c0_1028 = arith.constant 0 : index
    %711 = vector.load %arg13[%c57, %c0_1028] : memref<64x50xf32, #tpu.memory_space<vmem>>, vector<1x50xf32>
    %712 = arith.maximumf %710, %711 : vector<1x50xf32>
    %713 = arith.maximumf %709, %712 : vector<1x50xf32>
    %c12_1029 = arith.constant 12 : index
    %c0_1030 = arith.constant 0 : index
    %c0_1031 = arith.constant 0 : index
    %714 = vector.load %arg6[%c12_1029, %c0_1030, %c0_1031] : memref<16x50x32xf32, #tpu.memory_space<vmem>>, vector<1x50x32xf32>
    %715 = vector.shape_cast %714 : vector<1x50x32xf32> to vector<50x32xf32>
    %cst_1032 = arith.constant dense<0.000000e+00> : vector<1x32xf32>
    %716 = tpu.matmul %713, %715, %cst_1032 {dimension_numbers = #tpu.dot_dimension_numbers<[1], [0], [0], [1], [0, 0, 1, 1], [], []>} : vector<1x50xf32>, vector<50x32xf32>, vector<1x32xf32> -> vector<1x32xf32>
    %717 = arith.addf %706, %716 : vector<1x32xf32>
    %c50_1033 = arith.constant 50 : index
    %c0_1034 = arith.constant 0 : index
    %718 = vector.load %arg13[%c50_1033, %c0_1034] : memref<64x50xf32, #tpu.memory_space<vmem>>, vector<1x50xf32>
    %c51_1035 = arith.constant 51 : index
    %c0_1036 = arith.constant 0 : index
    %719 = vector.load %arg13[%c51_1035, %c0_1036] : memref<64x50xf32, #tpu.memory_space<vmem>>, vector<1x50xf32>
    %720 = arith.maximumf %718, %719 : vector<1x50xf32>
    %c58 = arith.constant 58 : index
    %c0_1037 = arith.constant 0 : index
    %721 = vector.load %arg13[%c58, %c0_1037] : memref<64x50xf32, #tpu.memory_space<vmem>>, vector<1x50xf32>
    %c59 = arith.constant 59 : index
    %c0_1038 = arith.constant 0 : index
    %722 = vector.load %arg13[%c59, %c0_1038] : memref<64x50xf32, #tpu.memory_space<vmem>>, vector<1x50xf32>
    %723 = arith.maximumf %721, %722 : vector<1x50xf32>
    %724 = arith.maximumf %720, %723 : vector<1x50xf32>
    %c13_1039 = arith.constant 13 : index
    %c0_1040 = arith.constant 0 : index
    %c0_1041 = arith.constant 0 : index
    %725 = vector.load %arg6[%c13_1039, %c0_1040, %c0_1041] : memref<16x50x32xf32, #tpu.memory_space<vmem>>, vector<1x50x32xf32>
    %726 = vector.shape_cast %725 : vector<1x50x32xf32> to vector<50x32xf32>
    %cst_1042 = arith.constant dense<0.000000e+00> : vector<1x32xf32>
    %727 = tpu.matmul %724, %726, %cst_1042 {dimension_numbers = #tpu.dot_dimension_numbers<[1], [0], [0], [1], [0, 0, 1, 1], [], []>} : vector<1x50xf32>, vector<50x32xf32>, vector<1x32xf32> -> vector<1x32xf32>
    %728 = arith.addf %717, %727 : vector<1x32xf32>
    %c52_1043 = arith.constant 52 : index
    %c0_1044 = arith.constant 0 : index
    %729 = vector.load %arg13[%c52_1043, %c0_1044] : memref<64x50xf32, #tpu.memory_space<vmem>>, vector<1x50xf32>
    %c53 = arith.constant 53 : index
    %c0_1045 = arith.constant 0 : index
    %730 = vector.load %arg13[%c53, %c0_1045] : memref<64x50xf32, #tpu.memory_space<vmem>>, vector<1x50xf32>
    %731 = arith.maximumf %729, %730 : vector<1x50xf32>
    %c60_1046 = arith.constant 60 : index
    %c0_1047 = arith.constant 0 : index
    %732 = vector.load %arg13[%c60_1046, %c0_1047] : memref<64x50xf32, #tpu.memory_space<vmem>>, vector<1x50xf32>
    %c61_1048 = arith.constant 61 : index
    %c0_1049 = arith.constant 0 : index
    %733 = vector.load %arg13[%c61_1048, %c0_1049] : memref<64x50xf32, #tpu.memory_space<vmem>>, vector<1x50xf32>
    %734 = arith.maximumf %732, %733 : vector<1x50xf32>
    %735 = arith.maximumf %731, %734 : vector<1x50xf32>
    %c14_1050 = arith.constant 14 : index
    %c0_1051 = arith.constant 0 : index
    %c0_1052 = arith.constant 0 : index
    %736 = vector.load %arg6[%c14_1050, %c0_1051, %c0_1052] : memref<16x50x32xf32, #tpu.memory_space<vmem>>, vector<1x50x32xf32>
    %737 = vector.shape_cast %736 : vector<1x50x32xf32> to vector<50x32xf32>
    %cst_1053 = arith.constant dense<0.000000e+00> : vector<1x32xf32>
    %738 = tpu.matmul %735, %737, %cst_1053 {dimension_numbers = #tpu.dot_dimension_numbers<[1], [0], [0], [1], [0, 0, 1, 1], [], []>} : vector<1x50xf32>, vector<50x32xf32>, vector<1x32xf32> -> vector<1x32xf32>
    %739 = arith.addf %728, %738 : vector<1x32xf32>
    %c54 = arith.constant 54 : index
    %c0_1054 = arith.constant 0 : index
    %740 = vector.load %arg13[%c54, %c0_1054] : memref<64x50xf32, #tpu.memory_space<vmem>>, vector<1x50xf32>
    %c55 = arith.constant 55 : index
    %c0_1055 = arith.constant 0 : index
    %741 = vector.load %arg13[%c55, %c0_1055] : memref<64x50xf32, #tpu.memory_space<vmem>>, vector<1x50xf32>
    %742 = arith.maximumf %740, %741 : vector<1x50xf32>
    %c62_1056 = arith.constant 62 : index
    %c0_1057 = arith.constant 0 : index
    %743 = vector.load %arg13[%c62_1056, %c0_1057] : memref<64x50xf32, #tpu.memory_space<vmem>>, vector<1x50xf32>
    %c63_1058 = arith.constant 63 : index
    %c0_1059 = arith.constant 0 : index
    %744 = vector.load %arg13[%c63_1058, %c0_1059] : memref<64x50xf32, #tpu.memory_space<vmem>>, vector<1x50xf32>
    %745 = arith.maximumf %743, %744 : vector<1x50xf32>
    %746 = arith.maximumf %742, %745 : vector<1x50xf32>
    %c15_1060 = arith.constant 15 : index
    %c0_1061 = arith.constant 0 : index
    %c0_1062 = arith.constant 0 : index
    %747 = vector.load %arg6[%c15_1060, %c0_1061, %c0_1062] : memref<16x50x32xf32, #tpu.memory_space<vmem>>, vector<1x50x32xf32>
    %748 = vector.shape_cast %747 : vector<1x50x32xf32> to vector<50x32xf32>
    %cst_1063 = arith.constant dense<0.000000e+00> : vector<1x32xf32>
    %749 = tpu.matmul %746, %748, %cst_1063 {dimension_numbers = #tpu.dot_dimension_numbers<[1], [0], [0], [1], [0, 0, 1, 1], [], []>} : vector<1x50xf32>, vector<50x32xf32>, vector<1x32xf32> -> vector<1x32xf32>
    %750 = arith.addf %739, %749 : vector<1x32xf32>
    %c0_1064 = arith.constant 0 : index
    %c0_1065 = arith.constant 0 : index
    %751 = vector.load %arg7[%c0_1064, %c0_1065] : memref<1x32xf32, #tpu.memory_space<vmem>>, vector<1x32xf32>
    %752 = arith.addf %750, %751 : vector<1x32xf32>
    %cst_1066 = arith.constant 0.000000e+00 : f32
    %753 = vector.broadcast %cst_1066 : f32 to vector<1x32xf32>
    %754 = arith.maximumf %752, %753 : vector<1x32xf32>
    %c0_1067 = arith.constant 0 : index
    %c0_1068 = arith.constant 0 : index
    %755 = vector.load %arg8[%c0_1067, %c0_1068] : memref<32x10xf32, #tpu.memory_space<vmem>>, vector<32x10xf32>
    %cst_1069 = arith.constant dense<0.000000e+00> : vector<1x10xf32>
    %756 = tpu.matmul %754, %755, %cst_1069 {dimension_numbers = #tpu.dot_dimension_numbers<[1], [0], [0], [1], [0, 0, 1, 1], [], []>} : vector<1x32xf32>, vector<32x10xf32>, vector<1x10xf32> -> vector<1x10xf32>
    %c0_1070 = arith.constant 0 : index
    %c0_1071 = arith.constant 0 : index
    %757 = vector.load %arg9[%c0_1070, %c0_1071] : memref<1x10xf32, #tpu.memory_space<vmem>>, vector<1x10xf32>
    %758 = arith.addf %756, %757 : vector<1x10xf32>
    %cst_1072 = arith.constant dense<0xFF800000> : vector<1xf32>
    %759 = vector.multi_reduction <maximumf>, %758, %cst_1072 [1] : vector<1x10xf32> to vector<1xf32>
    %760 = vector.shape_cast %759 : vector<1xf32> to vector<1x1xf32>
    %761 = vector.broadcast %760 : vector<1x1xf32> to vector<1x10xf32>
    %762 = arith.subf %758, %761 : vector<1x10xf32>
    %763 = math.exp %762 : vector<1x10xf32>
    %cst_1073 = arith.constant dense<0.000000e+00> : vector<1xf32>
    %764 = vector.multi_reduction <add>, %763, %cst_1073 [1] : vector<1x10xf32> to vector<1xf32>
    %765 = vector.shape_cast %764 : vector<1xf32> to vector<1x1xf32>
    %766 = math.log %765 : vector<1x1xf32>
    %767 = vector.broadcast %766 : vector<1x1xf32> to vector<1x10xf32>
    %768 = arith.subf %762, %767 : vector<1x10xf32>
    %c0_1074 = arith.constant 0 : index
    %c0_1075 = arith.constant 0 : index
    %c0_1076 = arith.constant 0 : index
    %769 = vector.load %arg10[%c0_1074, %c0_1075, %c0_1076] : memref<1x1x10xf32, #tpu.memory_space<vmem>>, vector<1x1x10xf32>
    %770 = vector.shape_cast %769 : vector<1x1x10xf32> to vector<1x10xf32>
    %771 = vector.shape_cast %768 : vector<1x10xf32> to vector<1x1x10xf32>
    tpu.vector_store %arg10[%c0_1074, %c0_1075, %c0_1076], %771 {strides = array<i32>} : memref<1x1x10xf32, #tpu.memory_space<vmem>>, vector<1x1x10xf32>,
    return
  }
  func.func @transform_0(%arg0: i32) -> (i32, i32, i32) {
    %c0_i32 = arith.constant 0 : i32
    %c0_i32_0 = arith.constant 0 : i32
    %c0_i32_1 = arith.constant 0 : i32
    return %arg0, %c0_i32, %c0_i32_0 : i32, i32, i32
  }
  func.func @transform_1(%arg0: i32) -> (i32, i32) {
    %c0_i32 = arith.constant 0 : i32
    %c0_i32_0 = arith.constant 0 : i32
    %c0_i32_1 = arith.constant 0 : i32
    return %c0_i32, %c0_i32_0 : i32, i32
  }
  func.func @transform_2(%arg0: i32) -> (i32, i32) {
    %c0_i32 = arith.constant 0 : i32
    %c0_i32_0 = arith.constant 0 : i32
    %c0_i32_1 = arith.constant 0 : i32
    return %c0_i32, %c0_i32_0 : i32, i32
  }
  func.func @transform_3(%arg0: i32) -> (i32, i32, i32) {
    %c0_i32 = arith.constant 0 : i32
    %c0_i32_0 = arith.constant 0 : i32
    %c0_i32_1 = arith.constant 0 : i32
    %c0_i32_2 = arith.constant 0 : i32
    return %c0_i32, %c0_i32_0, %c0_i32_1 : i32, i32, i32
  }
  func.func @transform_4(%arg0: i32) -> (i32, i32) {
    %c0_i32 = arith.constant 0 : i32
    %c0_i32_0 = arith.constant 0 : i32
    %c0_i32_1 = arith.constant 0 : i32
    return %c0_i32, %c0_i32_0 : i32, i32
  }
  func.func @transform_5(%arg0: i32) -> (i32, i32, i32) {
    %c0_i32 = arith.constant 0 : i32
    %c0_i32_0 = arith.constant 0 : i32
    %c0_i32_1 = arith.constant 0 : i32
    %c0_i32_2 = arith.constant 0 : i32
    return %c0_i32, %c0_i32_0, %c0_i32_1 : i32, i32, i32
  }
  func.func @transform_6(%arg0: i32) -> (i32, i32) {
    %c0_i32 = arith.constant 0 : i32
    %c0_i32_0 = arith.constant 0 : i32
    %c0_i32_1 = arith.constant 0 : i32
    return %c0_i32, %c0_i32_0 : i32, i32
  }
  func.func @transform_7(%arg0: i32) -> (i32, i32) {
    %c0_i32 = arith.constant 0 : i32
    %c0_i32_0 = arith.constant 0 : i32
    %c0_i32_1 = arith.constant 0 : i32
    return %c0_i32, %c0_i32_0 : i32, i32
  }
  func.func @transform_8(%arg0: i32) -> (i32, i32) {
    %c0_i32 = arith.constant 0 : i32
    %c0_i32_0 = arith.constant 0 : i32
    %c0_i32_1 = arith.constant 0 : i32
    return %c0_i32, %c0_i32_0 : i32, i32
  }
  func.func @transform_9(%arg0: i32) -> (i32, i32, i32) {
    %c0_i32 = arith.constant 0 : i32
    %c0_i32_0 = arith.constant 0 : i32
    %c0_i32_1 = arith.constant 0 : i32
    return %arg0, %c0_i32, %c0_i32_0 : i32, i32, i32
  }
}

</mosaic_0001>

<bundles_post_ra>
// kernel: net_forward.1
= control target key start
LH: loop header
LB: loop body
LE: loop exit
PB: predicated region body
PF: predicated region fallthrough
CT: control target
= control target key end

     0   :  { %14 = vsyncpa [#allocation6], 0  ;;  %s10519_s0 = inlined_call_operand.vmem [shape: bf16[2,576,25], index: 0, kind: input, shape index: {}]   ;;  %s10520_s1 = inlined_call_operand.vmem [shape: bf16[25,20], index: 1, kind: input, shape index: {}]   ;;  %s10521_s2 = inlined_call_operand.vmem [shape: f32[1,20], index: 2, kind: input, shape index: {}]   ;;  %s10522_s3 = inlined_call_operand.vmem [shape: bf16[25,20,50], index: 3, kind: input, shape index: {}]   ;;  %s10523_s4 = inlined_call_operand.vmem [shape: f32[1,50], index: 4, kind: input, shape index: {}]   ;;  %s10524_s5 = inlined_call_operand.vmem [shape: f32[16,50,32], index: 5, kind: input, shape index: {}]   ;;  %s10525_s6 = inlined_call_operand.vmem [shape: f32[1,32], index: 6, kind: input, shape index: {}]   ;;  %s10526_s7 = inlined_call_operand.vmem [shape: f32[32,10], index: 7, kind: input, shape index: {}]   ;;  %s10527_s8 = inlined_call_operand.vmem [shape: f32[1,10], index: 8, kind: input, shape index: {}]   ;;  %s10528_s9 = inlined_call_operand.hbm [shape: f32[2,1,10], index: 9, kind: output, shape index: {}]  }
   0x1   :  { %16 = vsyncpa [#allocation6 + $0x1], 0  ;;  %s8107_s30 = smov 0   ;;  %s8109_s10 = smov 0  }
   0x2   :  { %s8111_s11 = smov 0   ;;  %s8113_s12 = smov 0  }
   0x3 LB: > { %s8128_s13 = sadd.s32 4294967295, %s8050_s12   ;;  %s6061_s14 = sadd.s32 4294967294, %s8050_s12   ;;  %s8050_s12 = sphi %s8113_s12, %s10742_s12   ;;  %s8046_s11 = sphi %s8111_s11, %s10741_s11   ;;  %s8042_s10 = sphi %s8109_s10, %s10740_s10   ;;  %s8038_s30 = sphi %s8107_s30, %s10739_s30  }
   0x4   : > { %s8132_s15 = sadd.s32 1, %s8050_s12   ;;  %s223_s16 = sadd.s32 1, %s8046_s11 }
   0x5   : > { %s220_s17 = ssub.s32 %s8050_s12, %s8132_s15  ;;  %p233_p0 = scmp.ne.s32.totalorder %s8046_s11, %s8042_s10 }
   0x6   : > { %p221_p1 = scmp.eq.s32.totalorder %s220_s17, 0  ;;  %p234_p2 = scmp.eq.s32.totalorder %s8128_s13, 1 }
   0x7   : > { %p239_p3 = scmp.ne.s32.totalorder %s8042_s10, %s8038_s30  ;;  %p240_p4 = scmp.eq.s32.totalorder %s6061_s14, 1 }
   0x8   : > { %s8143_s18 = scalar_select %p221_p1, %s8046_s11, %s223_s16  }
   0x9   : > { %p8145_p5 = por %p234_p2, %p233_p0  ;;  %p8149_p6 = por %p240_p4, %p239_p3 }
   0xa   : > { %p6064_p7 = scmp.ge.s32.totalorder %s8050_s12, 1  ;;  %p290_p8 = scmp.lt.s32.totalorder %s8050_s12, 3 }
   0xc   : > { %p291_p9 = pnand %p6064_p7, %p290_p8 }
   0xe   : > { %294 = sbr.rel (%p291_p9) target bundleno = 1967 (0x7af), region = 56 }
  0x15   : > { %v7896_v0 = vld [vmem:[%s10520_s1] sm:$0xff]   ;;  %vm714_vm0 = vcmask 1043456   ;;  %v7897_v1 = vld [vmem:[%s10520_s1 + $0x8] sm:$0x1f]   ;;  %vm715_vm1 = vcmask 1044480   ;;  %p325_p10 = scmp.lt.s32.totalorder %s8128_s13, 1 }
  0x16   : > { %6826 = vmatprep.subr.bf16.mxu0 %v7896_v0  ;;  %v8052_v2 = vmov 65535   ;;  %vm605_vm2 = vcmask 203776   ;;  %v7934_v46 = vld [vmem:[%s10522_s3] sm:$0xff]   ;;  %v7935_v48 = vld [vmem:[%s10522_s3 + $0x8] ss:$0 sps:$4 sm:$0x33]  }
  0x17   : > { %6827 = vmatpush3.bf16.msra.mxu0 %v7896_v0  ;;  %v716_v3 = vsel %vm714_vm0, 4294967295, %v8052_v2  ;;  %s326_s25 = scalar_select %p325_p10, %s8128_s13, 1  ;;  %6914 = vmatprep.subr.bf16.mxu1 %v7934_v46  ;;  %vm1271_vm3 = vcmask 1041408   ;;  %v7936_v53 = vld [vmem:[%s10522_s3 + $0xc] sm:$0xff]   ;;  %v8267_v60 = vld [vmem:[%s10522_s3 + $0x18] sm:$0xff]   ;;  %vm1168_vm4 = vcmask 162816  }
  0x18   : > { %v717_v4 = vsel %vm715_vm1, %v716_v3, 0  ;;  %6915 = vmatpush3.bf16.msra.mxu1 %v7934_v46  ;;  %v1362_v51 = vsel %vm1271_vm3, %v7935_v48, 0  ;;  %v7937_v55 = vld [vmem:[%s10522_s3 + $0x14] ss:$0 sps:$4 sm:$0x33]   ;;  %vm8054_vm5 = vmmov 0  }
  0x19   : > { %v719_v5 = vand.u32 %v7897_v1, %v717_v4  ;;  %s7852_s26 = smul.u32 288, %s326_s25  ;;  %7828 = vmatprep.subr.msk.bf16.mxu1 %vm1271_vm3, %v7935_v48  ;;  %v1273_v58 = vsel %vm1271_vm3, %v7937_v55, 0  ;;  %v8281_v1 = vld [vmem:[%s10521_s2] ss:$0 sm:$0xff]  ;;  %vm4419_vm6 = vcmask 408576   ;;  %vm5905_vm7 = vcmask 261120  }
  0x1a   : > { %vm5979_vm8 = vcmask 73728   ;;  %s323_s22 = sand.u32 1, %s8042_s10   ;;  %s6502_s23 = sshll.u32 %s8128_s13, 4 }
  0x1b   : > { %6828 = vmatprep.subr.bf16.mxu0 %v719_v5  ;;  %s8166_s29 = scalar_lea.vmem %s10519_s0, %s7852_s26  ;;  %s324_s24 = scalar_lea.vmem [#allocation5], %s323_s22 }
  0x1c   : > { %6829 = vmatpush3.bf16.msra.mxu0 %v719_v5  ;;  %v7898_v6 = vld [vmem:[%s8166_s29] sm:$0xff]   ;;  %v7899_v7 = vld [vmem:[%s8166_s29 + $0x8] sm:$0xff]   ;;  %v7900_v8 = vld [vmem:[%s8166_s29 + $0x10] sm:$0xff]   ;;  %6917 = vmatpush3.bf16.msra.mxu1 %v1362_v51  ;;  %s6006_s25 = sshll.u32 %s324_s24, 4  ;;  %s10476_s28 = scalar_lea.hbm %s10528_s9, %s6502_s23  ;;  %s10478_s25 = int_to_ptr.vmem [resolvable:$true] %s6006_s25 }
  0x1d   : > { %6830 = vmatprep.mubr.msk.bf16.mxu0 %vm605_vm2, %v7898_v6  ;;  %v7901_v9 = vld [vmem:[%s8166_s29 + $0x18] sm:$0xff]   ;;  %v7902_v10 = vld [vmem:[%s8166_s29 + $0x20] sm:$0xff]   ;;  %v7903_v11 = vld [vmem:[%s8166_s29 + $0x28] sm:$0xff]   ;;  %6902 = vmatprep.subr.bf16.mxu0 %v7936_v53  ;;  %s7988_s14 = scalar_lea.vmem %s10478_s25, 16  ;;  %s8056_s13 = smov [#allocation5]  }
  0x1e   : > { %v7904_v12 = vld [vmem:[%s8166_s29 + $0x30] sm:$0xff]   ;;  %v7905_v13 = vld [vmem:[%s8166_s29 + $0x38] sm:$0xff]   ;;  %v7906_v14 = vld [vmem:[%s8166_s29 + $0x40] sm:$0xff]   ;;  %6926 = vmatprep.subr.bf16.mxu1 %v8267_v60  ;;  %p7989_p11 = scmp.ne.s32.totalorder %s10478_s25, %s7988_s14  ;;  %s7992_s16 = sshll.u32 %s8056_s13, 4  ;;  %s7993_s16 = int_to_ptr.vmem [resolvable:$false] %s7992_s16 }
  0x1f   : > { %6831 = vmatmul.mubr.msk.bf16.vlgmr.msra.gmra.mrb[0].mxu0 %vm605_vm2, %v7899_v7  ;;  %v7907_v15 = vld [vmem:[%s8166_s29 + $0x48] sm:$0xff]   ;;  %v7908_v16 = vld [vmem:[%s8166_s29 + $0x50] sm:$0xff]   ;;  %v7909_v17 = vld [vmem:[%s8166_s29 + $0x58] sm:$0xff]   ;;  %s7994_s17 = scalar_lea.vmem %s7993_s16, 32  ;;  %p7995_p0 = scmp.lt.s32.totalorder %s10478_s25, %s7993_s16 }
  0x20   : > { %6834 = vmatprep.mubr.msk.bf16.mxu0 %vm605_vm2, %v7900_v8  ;;  %v7910_v18 = vld [vmem:[%s8166_s29 + $0x60] sm:$0xff]   ;;  %v7911_v19 = vld [vmem:[%s8166_s29 + $0x68] sm:$0xff]   ;;  %v7912_v20 = vld [vmem:[%s8166_s29 + $0x70] sm:$0xff]   ;;  %6903 = vmatpush3.bf16.msra.mxu0 %v7936_v53  ;;  %p7990_p12 = pnand %p7989_p11, %p8145_p5  ;;  %p7996_p1 = scmp.lt.s32.totalorder %s7994_s17, %s7988_s14 }
  0x21   : > { %v7913_v21 = vld [vmem:[%s8166_s29 + $0x78] sm:$0xff]   ;;  %v7914_v22 = vld [vmem:[%s8166_s29 + $0x80] sm:$0xff]   ;;  %v7915_v23 = vld [vmem:[%s8166_s29 + $0x88] sm:$0xff]   ;;  %7827 = vmatprep.subr.msk.bf16.mxu0 %vm1271_vm3, %v7937_v55 }
  0x22   : > { %v7916_v24 = vld [vmem:[%s8166_s29 + $0x90] sm:$0xff]   ;;  %v7917_v25 = vld [vmem:[%s8166_s29 + $0x98] sm:$0xff]   ;;  %v7918_v26 = vld [vmem:[%s8166_s29 + $0xa0] sm:$0xff]   ;;  %p7991_p13 = pneg %p7990_p12  ;;  %p7997_p2 = por %p7996_p1, %p7995_p0 }
  0x23   : > { %v7919_v27 = vld [vmem:[%s8166_s29 + $0xa8] sm:$0xff]   ;;  %v7920_v28 = vld [vmem:[%s8166_s29 + $0xb0] sm:$0xff]   ;;  %v7921_v29 = vld [vmem:[%s8166_s29 + $0xb8] sm:$0xff]  }
  0x24   : > { %v7922_v30 = vld [vmem:[%s8166_s29 + $0xc0] sm:$0xff]   ;;  %v7923_v31 = vld [vmem:[%s8166_s29 + $0xc8] sm:$0xff]   ;;  %v7924_v32 = vld [vmem:[%s8166_s29 + $0xd0] sm:$0xff]   ;;  %6905 = vmatpush3.bf16.msra.mxu0 %v1273_v58  ;;  %p7998_p3 = pnand %p7997_p2, %p7991_p13 }
  0x25   : > { %v7925_v33 = vld [vmem:[%s8166_s29 + $0xd8] sm:$0xff]   ;;  %v7926_v34 = vld [vmem:[%s8166_s29 + $0xe0] sm:$0xff]   ;;  %v7927_v35 = vld [vmem:[%s8166_s29 + $0xe8] sm:$0xff]  }
  0x26   : > { %v7928_v36 = vld [vmem:[%s8166_s29 + $0xf0] sm:$0xff]   ;;  %v7929_v37 = vld [vmem:[%s8166_s29 + $0xf8] sm:$0xff]   ;;  %v7930_v38 = vld [vmem:[%s8166_s29 + $0x100] sm:$0xff]  }
  0x27   : > { %6835 = vmatmul.mubr.msk.bf16.gmra.mrb[4].mxu0 %vm605_vm2, %v7901_v9  ;;  %v7931_v39 = vld [vmem:[%s8166_s29 + $0x108] sm:$0xff]   ;;  %v7932_v40 = vld [vmem:[%s8166_s29 + $0x110] sm:$0xff]   ;;  %v7933_v41 = vld [vmem:[%s8166_s29 + $0x118] sm:$0xff]   ;;  %s5994_s29 = scalar_lea.sflag [#allocation6], %s323_s22 }
  0x28   : > { %6838 = vmatprep.mubr.msk.bf16.mxu0 %vm605_vm2, %v7902_v10 }
  0x2f   : > { %6839 = vmatmul.mubr.msk.bf16.gmra.mrb[8].mxu0 %vm605_vm2, %v7903_v11 }
  0x30   : > { %6842 = vmatprep.mubr.msk.bf16.mxu0 %vm605_vm2, %v7904_v12 }
  0x37   : > { %6843 = vmatmul.mubr.msk.bf16.gmra.mrb[12].mxu0 %vm605_vm2, %v7905_v13 }
  0x38   : > { %6846 = vmatprep.mubr.msk.bf16.mxu0 %vm605_vm2, %v7906_v14 }
  0x3f   : > { %6847 = vmatmul.mubr.msk.bf16.gmra.mrb[16].mxu0 %vm605_vm2, %v7907_v15 }
  0x40   : > { %6850 = vmatprep.mubr.msk.bf16.mxu0 %vm605_vm2, %v7908_v16 }
  0x47   : > { %6851 = vmatmul.mubr.msk.bf16.gmra.mrb[20].mxu0 %vm605_vm2, %v7909_v17 }
  0x48   : > { %6854 = vmatprep.mubr.msk.bf16.mxu0 %vm605_vm2, %v7910_v18 }
  0x4f   : > { %6855 = vmatmul.mubr.msk.bf16.gmra.mrb[24].mxu0 %vm605_vm2, %v7911_v19 }
  0x50   : > { %6858 = vmatprep.mubr.msk.bf16.mxu0 %vm605_vm2, %v7912_v20 }
  0x57   : > { %6859 = vmatmul.mubr.msk.bf16.gmra.mrb[28].mxu0 %vm605_vm2, %v7913_v21 }
  0x58   : > { %6862 = vmatprep.mubr.msk.bf16.mxu0 %vm605_vm2, %v7914_v22 }
  0x5f   : > { %6863 = vmatmul.mubr.msk.bf16.gmra.mrb[32].mxu0 %vm605_vm2, %v7915_v23 }
  0x60   : > { %6866 = vmatprep.mubr.msk.bf16.mxu0 %vm605_vm2, %v7916_v24 }
  0x67   : > { %6867 = vmatmul.mubr.msk.bf16.gmra.mrb[36].mxu0 %vm605_vm2, %v7917_v25 }
  0x68   : > { %6870 = vmatprep.mubr.msk.bf16.mxu0 %vm605_vm2, %v7918_v26 }
  0x6f   : > { %6871 = vmatmul.mubr.msk.bf16.gmra.mrb[40].mxu0 %vm605_vm2, %v7919_v27 }
  0x70   : > { %6874 = vmatprep.mubr.msk.bf16.mxu0 %vm605_vm2, %v7920_v28 }
  0x77   : > { %6875 = vmatmul.mubr.msk.bf16.gmra.mrb[44].mxu0 %vm605_vm2, %v7921_v29 }
  0x78   : > { %6878 = vmatprep.mubr.msk.bf16.mxu0 %vm605_vm2, %v7922_v30 }
  0x7f   : > { %6879 = vmatmul.mubr.msk.bf16.gmra.mrb[48].mxu0 %vm605_vm2, %v7923_v31 }
  0x80   : > { %6882 = vmatprep.mubr.msk.bf16.mxu0 %vm605_vm2, %v7924_v32 }
  0x87   : > { %6883 = vmatmul.mubr.msk.bf16.gmra.mrb[52].mxu0 %vm605_vm2, %v7925_v33 }
  0x88   : > { %6886 = vmatprep.mubr.msk.bf16.mxu0 %vm605_vm2, %v7926_v34 }
  0x8f   : > { %6887 = vmatmul.mubr.msk.bf16.gmra.mrb[56].mxu0 %vm605_vm2, %v7927_v35 }
  0x90   : > { %6890 = vmatprep.mubr.msk.bf16.mxu0 %vm605_vm2, %v7928_v36 }
  0x97   : > { %6891 = vmatmul.mubr.msk.bf16.gmra.mrb[60].mxu0 %vm605_vm2, %v7929_v37 }
  0x98   : > { %6894 = vmatprep.mubr.msk.bf16.mxu0 %vm605_vm2, %v7930_v38 }
  0x9f   : > { %6895 = vmatmul.mubr.msk.bf16.gmra.mrb[64].mxu0 %vm605_vm2, %v7931_v39 }
  0xa0   : > { %6898 = vmatprep.mubr.msk.bf16.mxu0 %vm605_vm2, %v7932_v40 }
  0xa7   : > { %6899 = vmatmul.mubr.msk.bf16.gmra.mrb[68].mxu0 %vm605_vm2, %v7933_v41 }
  0xf2   : > { %v6832_v42 = vpop.f32.mrb[0].mxu0 }
  0xf3   : > { %v755_v43 = vpop.f32.mrb[1].mxu0  ;;  %v764_v17 = vadd.f32 %v6832_v42, %v8281_v1 }
  0xf4   : > { %v6833_v44 = vpop.f32.mrb[2].mxu0  ;;  %v756_v2 = vadd.f32 %v8281_v1, %v755_v43 }
  0xf5   : > { %v758_v45 = vpop.f32.mrb[3].mxu0  ;;  %v767_v22 = vadd.f32 %v6833_v44, %v8281_v1  ;;  %v1044_v29 = vmax.f32 %v764_v17, 0.0 }
  0xf6   : > { %v759_v4 = vadd.f32 %v8281_v1, %v758_v45  ;;  %v1042_v8 = vmax.f32 %v756_v2, 0.0 }
  0xf7   : > { %v1045_v35 = vmax.f32 %v767_v22, 0.0 }
  0xf8   : > { %v1043_v12 = vmax.f32 %v759_v4, 0.0 }
  0xfa   : > { %v8243_v47 = vpop.f32.mrb[4].mxu0 }
  0xfb   : > { %v771_v49 = vpop.f32.mrb[5].mxu0  ;;  %v780_v40 = vadd.f32 %v8243_v47, %v8281_v1 }
  0xfc   : > { %v8248_v50 = vpop.f32.mrb[6].mxu0  ;;  %v772_v15 = vadd.f32 %v8281_v1, %v771_v49 }
  0xfd   : > { %v774_v52 = vpop.f32.mrb[7].mxu0  ;;  %v783_v46 = vadd.f32 %v8248_v50, %v8281_v1  ;;  %v1048_v47 = vmax.f32 %v780_v40, 0.0 }
  0xfe   : > { %v775_v19 = vadd.f32 %v8281_v1, %v774_v52  ;;  %v1046_v25 = vmax.f32 %v772_v15, 0.0 }
  0xff   : > { %v1049_v4 = vmax.f32 %v783_v46, 0.0 }
 0x100   : > { %v1047_v32 = vmax.f32 %v775_v19, 0.0 }
 0x102   : > { %v8255_v54 = vpop.f32.mrb[8].mxu0 }
 0x103   : > { %v787_v56 = vpop.f32.mrb[9].mxu0 }
 0x104   : > { %v8260_v57 = vpop.f32.mrb[10].mxu0  ;;  %v788_v38 = vadd.f32 %v8281_v1, %v787_v56 }
 0x105   : > { %v790_v59 = vpop.f32.mrb[11].mxu0 }
 0x106   : > { %v791_v43 = vadd.f32 %v8281_v1, %v790_v59  ;;  %v1050_v51 = vmax.f32 %v788_v38, 0.0 }
 0x108   : > { %v1051_v2 = vmax.f32 %v791_v43, 0.0 }
 0x10a   : > { %v8270_v61 = vpop.f32.mrb[12].mxu0 }
 0x10b   : > { %v8272_v62 = vpop.f32.mrb[13].mxu0 }
 0x10c   : > { %v8274_v63 = vpop.f32.mrb[14].mxu0 }
 0x10d   : > { %v8276_v0 = vpop.f32.mrb[15].mxu0 }
 0x112   : > { %v6848_v3 = vpop.f32.mrb[16].mxu0 }
 0x113   : > { %v828_v5 = vadd.f32 %v6848_v3, %v8281_v1  ;;  %v8286_v6 = vpop.f32.mrb[17].mxu0 }
 0x114   : > { %v6849_v7 = vpop.f32.mrb[18].mxu0 }
 0x115   : > { %v1060_v9 = vmax.f32 %v828_v5, 0.0  ;;  %v831_v10 = vadd.f32 %v6849_v7, %v8281_v1  ;;  %v8289_v11 = vpop.f32.mrb[19].mxu0  ;;  %v804_v7 = vadd.f32 %v8281_v1, %v8272_v62 }
 0x117   : > { %v8291_v13 = vmax.f32 %v1042_v8, %v1060_v9  ;;  %v1061_v14 = vmax.f32 %v831_v10, 0.0  ;;  %v796_v9 = vadd.f32 %v8255_v54, %v8281_v1 }
 0x119   : > { %v8294_v16 = vmax.f32 %v1043_v12, %v1061_v14  ;;  %v807_v14 = vadd.f32 %v8281_v1, %v8276_v0 }
 0x11a   : > { %v6852_v18 = vpop.f32.mrb[20].mxu0 }
 0x11b   : > { %v844_v20 = vadd.f32 %v6852_v18, %v8281_v1  ;;  %v835_v21 = vpop.f32.mrb[21].mxu0  ;;  %v799_v18 = vadd.f32 %v8260_v57, %v8281_v1 }
 0x11c   : > { %v836_v23 = vadd.f32 %v8281_v1, %v835_v21  ;;  %v6853_v24 = vpop.f32.mrb[22].mxu0 }
 0x11d   : > { %v1064_v26 = vmax.f32 %v844_v20, 0.0  ;;  %v847_v27 = vadd.f32 %v6853_v24, %v8281_v1  ;;  %v838_v28 = vpop.f32.mrb[23].mxu0  ;;  %v1054_v20 = vmax.f32 %v804_v7, 0.0 }
 0x11e   : > { %v1062_v30 = vmax.f32 %v836_v23, 0.0  ;;  %v839_v31 = vadd.f32 %v8281_v1, %v838_v28  ;;  %v1052_v23 = vmax.f32 %v796_v9, 0.0  ;;  %v1053_v28 = vmax.f32 %v799_v18, 0.0 }
 0x11f   : > { %v8303_v33 = vmax.f32 %v1046_v25, %v1064_v26  ;;  %v1065_v34 = vmax.f32 %v847_v27, 0.0  ;;  %v1055_v26 = vmax.f32 %v807_v14, 0.0 }
 0x120   : > { %v8305_v36 = vmax.f32 %v1044_v29, %v1062_v30  ;;  %v1063_v37 = vmax.f32 %v839_v31, 0.0  ;;  %v820_v30 = vadd.f32 %v8281_v1, %v8286_v6 }
 0x121   : > { %v8308_v39 = vmax.f32 %v1047_v32, %v1065_v34  ;;  %v812_v32 = vadd.f32 %v8270_v61, %v8281_v1 }
 0x122   : > { %v8312_v41 = vmax.f32 %v1045_v35, %v1063_v37  ;;  %v6856_v42 = vpop.f32.mrb[24].mxu0  ;;  %v823_v37 = vadd.f32 %v8281_v1, %v8289_v11 }
 0x123   : > { %v860_v44 = vadd.f32 %v6856_v42, %v8281_v1  ;;  %v851_v45 = vpop.f32.mrb[25].mxu0  ;;  %v815_v42 = vadd.f32 %v8274_v63, %v8281_v1 }
 0x124   : > { %v852_v48 = vadd.f32 %v8281_v1, %v851_v45  ;;  %v6857_v49 = vpop.f32.mrb[26].mxu0 }
 0x125   : > { %v1068_v52 = vmax.f32 %v860_v44, 0.0  ;;  %v863_v53 = vadd.f32 %v6857_v49, %v8281_v1  ;;  %v854_v55 = vpop.f32.mrb[27].mxu0  ;;  %v1058_v44 = vmax.f32 %v820_v30, 0.0 }
 0x126   : > { %v1066_v56 = vmax.f32 %v852_v48, 0.0  ;;  %v855_v58 = vadd.f32 %v8281_v1, %v854_v55  ;;  %v1056_v48 = vmax.f32 %v812_v32, 0.0  ;;  %v1057_v55 = vmax.f32 %v815_v42, 0.0 }
 0x127   : > { %v8321_v59 = vmax.f32 %v1050_v51, %v1068_v52  ;;  %v1069_v3 = vmax.f32 %v863_v53, 0.0  ;;  %v1059_v52 = vmax.f32 %v823_v37, 0.0 }
 0x128   : > { %v8323_v5 = vmax.f32 %v1048_v47, %v1066_v56  ;;  %v1067_v50 = vmax.f32 %v855_v58, 0.0 }
 0x129   : > { %v8327_v8 = vmax.f32 %v1051_v2, %v1069_v3 }
 0x12a   : > { %v8331_v10 = vmax.f32 %v1049_v4, %v1067_v50  ;;  %v6860_v12 = vpop.f32.mrb[28].mxu0 }
 0x12b   : > { %v876_v15 = vadd.f32 %v6860_v12, %v8281_v1  ;;  %v867_v17 = vpop.f32.mrb[29].mxu0 }
 0x12c   : > { %v868_v19 = vadd.f32 %v8281_v1, %v867_v17  ;;  %v6861_v62 = vpop.f32.mrb[30].mxu0 }
 0x12d   : > { %v1072_v21 = vmax.f32 %v876_v15, 0.0  ;;  %v879_v22 = vadd.f32 %v6861_v62, %v8281_v1  ;;  %v870_v54 = vpop.f32.mrb[31].mxu0 }
 0x12e   : > { %v1070_v24 = vmax.f32 %v868_v19, 0.0  ;;  %v871_v25 = vadd.f32 %v8281_v1, %v870_v54 }
 0x12f   : > { %v8341_v0 = vmax.f32 %v1054_v20, %v1072_v21  ;;  %v1073_v27 = vmax.f32 %v879_v22, 0.0 }
 0x130   : > { %v8343_v29 = vmax.f32 %v1052_v23, %v1070_v24  ;;  %v1071_v57 = vmax.f32 %v871_v25, 0.0 }
 0x131   : > { %v8347_v31 = vmax.f32 %v1055_v26, %v1073_v27 }
 0x132   : > { %v8351_v34 = vmax.f32 %v1053_v28, %v1071_v57  ;;  %v6864_v35 = vpop.f32.mrb[32].mxu0 }
 0x133   : > { %v892_v38 = vadd.f32 %v6864_v35, %v8281_v1  ;;  %v883_v40 = vpop.f32.mrb[33].mxu0 }
 0x134   : > { %v884_v43 = vadd.f32 %v8281_v1, %v883_v40  ;;  %v6865_v6 = vpop.f32.mrb[34].mxu0 }
 0x135   : > { %v1076_v45 = vmax.f32 %v892_v38, 0.0  ;;  %v895_v46 = vadd.f32 %v6865_v6, %v8281_v1  ;;  %v886_v61 = vpop.f32.mrb[35].mxu0 }
 0x136   : > { %v1074_v49 = vmax.f32 %v884_v43, 0.0  ;;  %v887_v51 = vadd.f32 %v8281_v1, %v886_v61 }
 0x137   : > { %v8361_v11 = vmax.f32 %v1058_v44, %v1076_v45  ;;  %v1077_v53 = vmax.f32 %v895_v46, 0.0 }
 0x138   : > { %v8363_v47 = vmax.f32 %v1056_v48, %v1074_v49  ;;  %v1075_v63 = vmax.f32 %v887_v51, 0.0 }
 0x139   : > { %v8365_v56 = vmax.f32 %v1059_v52, %v1077_v53 }
 0x13a   : > { %v8367_v58 = vmax.f32 %v1057_v55, %v1075_v63  ;;  %v6868_v2 = vpop.f32.mrb[36].mxu0 }
 0x13b   : > { %v899_v3 = vpop.f32.mrb[37].mxu0  ;;  %v908_v6 = vadd.f32 %v6868_v2, %v8281_v1 }
 0x13c   : > { %v6869_v4 = vpop.f32.mrb[38].mxu0  ;;  %v900_v54 = vadd.f32 %v8281_v1, %v899_v3 }
 0x13d   : > { %v902_v50 = vpop.f32.mrb[39].mxu0  ;;  %v911_v49 = vadd.f32 %v6869_v4, %v8281_v1  ;;  %v1080_v2 = vmax.f32 %v908_v6, 0.0 }
 0x13e   : > { %v903_v24 = vadd.f32 %v8281_v1, %v902_v50  ;;  %v1078_v28 = vmax.f32 %v900_v54, 0.0 }
 0x13f   : > { %v1081_v54 = vmax.f32 %v911_v49, 0.0 }
 0x140   : > { %v1079_v35 = vmax.f32 %v903_v24, 0.0 }
 0x142   : > { %v6872_v7 = vpop.f32.mrb[40].mxu0 }
 0x143   : > { %v915_v9 = vpop.f32.mrb[41].mxu0 }
 0x144   : > { %v8369_v12 = vpop.f32.mrb[42].mxu0  ;;  %v916_v40 = vadd.f32 %v8281_v1, %v915_v9 }
 0x145   : > { %v918_v14 = vpop.f32.mrb[43].mxu0 }
 0x146   : > { %v919_v45 = vadd.f32 %v8281_v1, %v918_v14  ;;  %v1082_v53 = vmax.f32 %v916_v40, 0.0 }
 0x14a   : > { %v8371_v15 = vpop.f32.mrb[44].mxu0 }
 0x14b   : > { %v931_v17 = vpop.f32.mrb[45].mxu0 }
 0x14c   : > { %v8373_v18 = vpop.f32.mrb[46].mxu0  ;;  %v932_v24 = vadd.f32 %v8281_v1, %v931_v17 }
 0x14d   : > { %v934_v19 = vpop.f32.mrb[47].mxu0 }
 0x152   : > { %v8375_v62 = vpop.f32.mrb[48].mxu0 }
 0x153   : > { %v8377_v20 = vpop.f32.mrb[49].mxu0 }
 0x154   : > { %v8379_v21 = vpop.f32.mrb[50].mxu0 }
 0x155   : > { %v8381_v22 = vpop.f32.mrb[51].mxu0 }
 0x15a   : > { %v6884_v23 = vpop.f32.mrb[52].mxu0 }
 0x15b   : > { %v972_v25 = vadd.f32 %v6884_v23, %v8281_v1  ;;  %v8386_v26 = vpop.f32.mrb[53].mxu0 }
 0x15c   : > { %v6885_v27 = vpop.f32.mrb[54].mxu0 }
 0x15d   : > { %v1096_v57 = vmax.f32 %v972_v25, 0.0  ;;  %v975_v30 = vadd.f32 %v6885_v27, %v8281_v1  ;;  %v8389_v32 = vpop.f32.mrb[55].mxu0 }
 0x15f   : > { %v1132_v37 = vmax.f32 %v1078_v28, %v1096_v57  ;;  %v1097_v38 = vmax.f32 %v975_v30, 0.0  ;;  %v924_v28 = vadd.f32 %v6872_v7, %v8281_v1 }
 0x161   : > { %v1150_v42 = vmax.f32 %v8291_v13, %v1132_v37  ;;  %v1133_v43 = vmax.f32 %v1079_v35, %v1097_v38  ;;  %v935_v38 = vadd.f32 %v8281_v1, %v934_v19  ;;  %v1086_v19 = vmax.f32 %v932_v24, 0.0 }
 0x162   : > { %v6888_v44 = vpop.f32.mrb[56].mxu0 }
 0x163   : > { %1169 = vst.msk [vmem:[#allocation2] sm:$0xff] %vm1168_vm4, %v1150_v42  ;;  %v1151_v46 = vmax.f32 %v8294_v16, %v1133_v43  ;;  %v988_v61 = vadd.f32 %v6888_v44, %v8281_v1  ;;  %v979_v48 = vpop.f32.mrb[57].mxu0  ;;  %v1083_v16 = vmax.f32 %v919_v45, 0.0  ;;  %v1084_v45 = vmax.f32 %v924_v28, 0.0 }
 0x164   : > { %v980_v51 = vadd.f32 %v8281_v1, %v979_v48  ;;  %v6889_v52 = vpop.f32.mrb[58].mxu0 }
 0x165   : > { %1170 = vst.msk [vmem:[#allocation2 + $0x8] sm:$0xff] %vm1168_vm4, %v1151_v46  ;;  %v1100_v13 = vmax.f32 %v988_v61, 0.0  ;;  %v991_v55 = vadd.f32 %v6889_v52, %v8281_v1  ;;  %v982_v63 = vpop.f32.mrb[59].mxu0  ;;  %v1087_v61 = vmax.f32 %v935_v38, 0.0 }
 0x166   : > { %v1098_v3 = vmax.f32 %v980_v51, 0.0  ;;  %v983_v50 = vadd.f32 %v8281_v1, %v982_v63  ;;  %v940_v63 = vadd.f32 %v8371_v15, %v8281_v1 }
 0x167   : > { %v1136_v9 = vmax.f32 %v1082_v53, %v1100_v13  ;;  %v1101_v14 = vmax.f32 %v991_v55, 0.0  ;;  %v948_v53 = vadd.f32 %v8281_v1, %v8377_v20 }
 0x168   : > { %v1134_v23 = vmax.f32 %v1080_v2, %v1098_v3  ;;  %v1099_v4 = vmax.f32 %v983_v50, 0.0 }
 0x169   : > { %v1154_v25 = vmax.f32 %v8303_v33, %v1136_v9  ;;  %v1137_v27 = vmax.f32 %v1083_v16, %v1101_v14  ;;  %v927_v33 = vadd.f32 %v8369_v12, %v8281_v1  ;;  %v951_v14 = vadd.f32 %v8281_v1, %v8381_v22 }
 0x16a   : > { %v1152_v57 = vmax.f32 %v8305_v36, %v1134_v23  ;;  %v1135_v30 = vmax.f32 %v1081_v54, %v1099_v4  ;;  %v6892_v35 = vpop.f32.mrb[60].mxu0  ;;  %v1187_v37 = vld [vmem:[#allocation2] sm:$0xff]  ;;  %v1090_v24 = vmax.f32 %v948_v53, 0.0 }
 0x16b   : > { %1173 = vst.msk [vmem:[#allocation2 + $0x20] sm:$0xff] %vm1168_vm4, %v1154_v25  ;;  %v1155_v40 = vmax.f32 %v8308_v39, %v1137_v27  ;;  %v1004_v42 = vadd.f32 %v6892_v35, %v8281_v1  ;;  %v995_v43 = vpop.f32.mrb[61].mxu0  ;;  %1188 = vst.msk [vmem:[#allocation3] sm:$0xff] %vm1168_vm4, %v1187_v37  ;;  %v1091_v35 = vmax.f32 %v951_v14, 0.0 }
 0x16c   : > { %1171 = vst.msk [vmem:[#allocation2 + $0x10] sm:$0xff] %vm1168_vm4, %v1152_v57  ;;  %v1153_v36 = vmax.f32 %v8312_v41, %v1135_v30  ;;  %v996_v7 = vadd.f32 %v8281_v1, %v995_v43  ;;  %v6893_v17 = vpop.f32.mrb[62].mxu0  ;;  %v1085_v41 = vmax.f32 %v927_v33, 0.0  ;;  %v1218_v9 = vld [vmem:[#allocation2 + $0x1] sm:$0xff]  ;;  %v964_v33 = vadd.f32 %v8281_v1, %v8386_v26 }
 0x16d   : > { %1174 = vst.msk [vmem:[#allocation2 + $0x28] sm:$0xff] %vm1168_vm4, %v1155_v40  ;;  %v1104_v6 = vmax.f32 %v1004_v42, 0.0  ;;  %v1007_v39 = vadd.f32 %v6893_v17, %v8281_v1  ;;  %v998_v44 = vpop.f32.mrb[63].mxu0  ;;  %v956_v17 = vadd.f32 %v8375_v62, %v8281_v1  ;;  %v959_v62 = vadd.f32 %v8379_v21, %v8281_v1 }
 0x16e   : > { %1172 = vst.msk [vmem:[#allocation2 + $0x18] sm:$0xff] %vm1168_vm4, %v1153_v36  ;;  %v1102_v46 = vmax.f32 %v996_v7, 0.0  ;;  %v999_v12 = vadd.f32 %v8281_v1, %v998_v44  ;;  %v1094_v21 = vmax.f32 %v964_v33, 0.0 }
 0x16f   : > { %v1140_v48 = vmax.f32 %v1086_v19, %v1104_v6  ;;  %v1105_v49 = vmax.f32 %v1007_v39, 0.0 }
 0x170   : > { %v1138_v51 = vmax.f32 %v1084_v45, %v1102_v46  ;;  %v1103_v52 = vmax.f32 %v999_v12, 0.0  ;;  %v1429_v45 = vld [vmem:[#allocation2 + $0x2] sm:$0xff]  ;;  %v967_v46 = vadd.f32 %v8281_v1, %v8389_v32 }
 0x171   : > { %v1158_v13 = vmax.f32 %v8321_v59, %v1140_v48  ;;  %v1141_v55 = vmax.f32 %v1087_v61, %v1105_v49 }
 0x172   : > { %v1156_v2 = vmax.f32 %v8323_v5, %v1138_v51  ;;  %v1139_v3 = vmax.f32 %v1085_v41, %v1103_v52  ;;  %v6896_v50 = vpop.f32.mrb[64].mxu0  ;;  %v8427_v16 = vld [vmem:[#allocation3] sm:$0xff]  ;;  %v943_v5 = vadd.f32 %v8373_v18, %v8281_v1 }
 0x173   : > { %1177 = vst.msk [vmem:[#allocation2 + $0x40] sm:$0xff] %vm1168_vm4, %v1158_v13  ;;  %v1159_v20 = vmax.f32 %v8327_v8, %v1141_v55  ;;  %v1020_v59 = vadd.f32 %v6896_v50, %v8281_v1  ;;  %v1011_v54 = vpop.f32.mrb[65].mxu0  ;;  %v8434_v23 = vld [vmem:[#allocation2 + $0xc] sm:$0xff]  ;;  %1219 = vst.msk [vmem:[#allocation3] sm:$0xff] %vm1168_vm4, %v1218_v9  ;;  %v1092_v50 = vmax.f32 %v956_v17, 0.0 }
 0x174   : > { %1175 = vst.msk [vmem:[#allocation2 + $0x30] sm:$0xff] %vm1168_vm4, %v1156_v2  ;;  %v1157_v15 = vmax.f32 %v8331_v10, %v1139_v3  ;;  %v1012_v22 = vadd.f32 %v8281_v1, %v1011_v54  ;;  %v6897_v4 = vpop.f32.mrb[66].mxu0  ;;  %1190 = vst.msk [vmem:[#allocation3 + $0x8] sm:$0xff] %vm1168_vm4, %v8434_v23  ;;  %v8444_v8 = vld [vmem:[#allocation2 + $0x24] sm:$0xff]  ;;  %v1088_v10 = vmax.f32 %v940_v63, 0.0  ;;  %v1089_v40 = vmax.f32 %v943_v5, 0.0 }
 0x175   : > { %1178 = vst.msk [vmem:[#allocation2 + $0x48] sm:$0xff] %vm1168_vm4, %v1159_v20  ;;  %v1108_v25 = vmax.f32 %v1020_v59, 0.0  ;;  %v1023_v27 = vadd.f32 %v6897_v4, %v8281_v1  ;;  %v1014_v28 = vpop.f32.mrb[67].mxu0  ;;  %v8448_v18 = vld [vmem:[#allocation2 + $0x18] sm:$0xff]  ;;  %1194 = vst.msk [vmem:[#allocation3 + $0x18] sm:$0xff] %vm1168_vm4, %v8444_v8  ;;  %v8469_v48 = vld [vmem:[#allocation2 + $0xd] sm:$0xff] }
 0x176   : > { %1176 = vst.msk [vmem:[#allocation2 + $0x38] sm:$0xff] %vm1168_vm4, %v1157_v15  ;;  %v1106_v57 = vmax.f32 %v1012_v22, 0.0  ;;  %v1015_v30 = vadd.f32 %v8281_v1, %v1014_v28  ;;  %1192 = vst.msk [vmem:[#allocation3 + $0x10] sm:$0xff] %vm1168_vm4, %v8448_v18  ;;  %v8482_v52 = vld [vmem:[#allocation2 + $0x25] sm:$0xff]  ;;  %v8490_v2 = vld [vmem:[#allocation2 + $0x19] sm:$0xff]  ;;  %v1095_v59 = vmax.f32 %v967_v46, 0.0 }
 0x177   : > { %v1144_v37 = vmax.f32 %v1090_v24, %v1108_v25  ;;  %v1109_v38 = vmax.f32 %v1023_v27, 0.0  ;;  %v7939_v20 = vld [vmem:[%s10522_s3 + $0x20] ss:$0 sps:$4 sm:$0x33]   ;;  %v1093_v15 = vmax.f32 %v959_v62, 0.0  ;;  %v8510_v25 = vld [vmem:[#allocation2 + $0xe] sm:$0xff] }
 0x178   : > { %v1142_v42 = vmax.f32 %v1088_v10, %v1106_v57  ;;  %v1107_v43 = vmax.f32 %v1015_v30, 0.0  ;;  %v1558_v27 = vld [vmem:[#allocation2 + $0x3] sm:$0xff] }
 0x179   : > { %v1162_v36 = vmax.f32 %v8341_v0, %v1144_v37  ;;  %v1145_v7 = vmax.f32 %v1091_v35, %v1109_v38  ;;  %v8516_v28 = vld [vmem:[%s10522_s3 + $0x24] sm:$0xff]   ;;  %v8529_v38 = vld [vmem:[#allocation2 + $0x1a] sm:$0xff] }
 0x17a   : > { %v1160_v19 = vmax.f32 %v8343_v29, %v1142_v42  ;;  %v1143_v6 = vmax.f32 %v1089_v40, %v1107_v43  ;;  %v6900_v39 = vpop.f32.mrb[68].mxu0  ;;  %v8462_v44 = vld [vmem:[#allocation3] sm:$0xff]  ;;  %v8519_v30 = vld [vmem:[#allocation2 + $0x26] sm:$0xff] }
 0x17b   : > { %1181 = vst.msk [vmem:[#allocation2 + $0x60] sm:$0xff] %vm1168_vm4, %v1162_v36  ;;  %v1163_v26 = vmax.f32 %v8347_v31, %v1145_v7  ;;  %v1036_v0 = vadd.f32 %v6900_v39, %v8281_v1  ;;  %v1027_v12 = vpop.f32.mrb[69].mxu0  ;;  %v1204_v61 = vld [vmem:[#allocation3 + $0x8] sm:$0xff]  ;;  %1430 = vst.msk [vmem:[#allocation3] sm:$0xff] %vm1168_vm4, %v1429_v45  ;;  %v8472_v29 = vld [vmem:[#allocation2 + $0x30] sm:$0xff] }
 0x17c   : > { %1179 = vst.msk [vmem:[#allocation2 + $0x50] sm:$0xff] %vm1168_vm4, %v1160_v19  ;;  %v1161_v32 = vmax.f32 %v8351_v34, %v1143_v6  ;;  %v1028_v49 = vadd.f32 %v8281_v1, %v1027_v12  ;;  %v6901_v31 = vpop.f32.mrb[70].mxu0  ;;  %v1211_v41 = vpack.c.bf16 %v1204_v61, %v8427_v16  ;;  %1221 = vst.msk [vmem:[#allocation3 + $0x8] sm:$0xff] %vm1168_vm4, %v8469_v48  ;;  %v1206_v51 = vld [vmem:[#allocation3 + $0x18] sm:$0xff] }
 0x17d   : > { %1196 = vst.msk [vmem:[#allocation3 + $0x20] sm:$0xff] %vm1168_vm4, %v8472_v29  ;;  %v8486_v53 = vld [vmem:[#allocation2 + $0x48] sm:$0xff]  ;;  %1182 = vst.msk [vmem:[#allocation2 + $0x68] sm:$0xff] %vm1168_vm4, %v1163_v26  ;;  %v1112_v34 = vmax.f32 %v1036_v0, 0.0  ;;  %v1039_v13 = vadd.f32 %v6901_v31, %v8281_v1  ;;  %v1030_v55 = vpop.f32.mrb[71].mxu0  ;;  %v1205_v63 = vld [vmem:[#allocation3 + $0x10] sm:$0xff] }
 0x17e   : > { %1225 = vst.msk [vmem:[#allocation3 + $0x18] sm:$0xff] %vm1168_vm4, %v8482_v52  ;;  %v8494_v3 = vld [vmem:[#allocation2 + $0x3c] sm:$0xff]  ;;  %1200 = vst.msk [vmem:[#allocation3 + $0x30] sm:$0xff] %vm1168_vm4, %v8486_v53  ;;  %v1110_v16 = vmax.f32 %v1028_v49, 0.0  ;;  %v1031_v9 = vadd.f32 %v8281_v1, %v1030_v55  ;;  %6918 = vmatprep.mubr.msk.bf16.mxu1 %vm1168_vm4, %v1211_v41  ;;  %v1212_v14 = vpack.c.bf16 %v1206_v51, %v1205_v63  ;;  %v8521_v35 = vld [vmem:[#allocation2 + $0x31] sm:$0xff] }
 0x17f   : > { %1180 = vst.msk [vmem:[#allocation2 + $0x58] sm:$0xff] %vm1168_vm4, %v1161_v32  ;;  %1223 = vst.msk [vmem:[#allocation3 + $0x10] sm:$0xff] %vm1168_vm4, %v8490_v2  ;;  %v1148_v54 = vmax.f32 %v1094_v21, %v1112_v34  ;;  %v1113_v5 = vmax.f32 %v1039_v13, 0.0  ;;  %v1687_v45 = vld [vmem:[#allocation2 + $0x4] sm:$0xff]  ;;  %v8563_v46 = vld [vmem:[#allocation2 + $0x32] sm:$0xff] }
 0x180   : > { %1198 = vst.msk [vmem:[#allocation3 + $0x28] sm:$0xff] %vm1168_vm4, %v8494_v3  ;;  %v1146_v22 = vmax.f32 %v1092_v50, %v1110_v16  ;;  %v1111_v4 = vmax.f32 %v1031_v9, 0.0  ;;  %6919 = vmatmul.mubr.msk.bf16.vlgmr.msra.gmra.mrb[0].mxu1 %vm1168_vm4, %v1212_v14  ;;  %v8565_v26 = vld [vmem:[#allocation2 + $0x27] sm:$0xff]  ;;  %v8569_v61 = vld [vmem:[#allocation2 + $0x3e] sm:$0xff]  ;;  %v8596_v16 = vld [vmem:[#allocation2 + $0x10] sm:$0xff] }
 0x181   : > { %v1166_v1 = vmax.f32 %v8361_v11, %v1148_v54  ;;  %v1149_v24 = vmax.f32 %v1095_v59, %v1113_v5  ;;  %6927 = vmatpush3.bf16.msra.mxu1 %v8267_v60  ;;  %v1483_v11 = vsel %vm1271_vm3, %v7939_v20, 0  ;;  %v8573_v49 = vld [vmem:[#allocation2 + $0x1b] sm:$0xff]  ;;  %v8598_v9 = vld [vmem:[#allocation2 + $0x33] sm:$0xff]  ;;  %v8600_v14 = vld [vmem:[#allocation2 + $0x28] sm:$0xff] }
 0x182   : > { %v1164_v10 = vmax.f32 %v8363_v47, %v1146_v22  ;;  %v1147_v57 = vmax.f32 %v1093_v15, %v1111_v4  ;;  %7829 = vmatprep.subr.msk.bf16.mxu1 %vm1271_vm3, %v7939_v20  ;;  %v8525_v37 = vld [vmem:[#allocation3] sm:$0xff]  ;;  %v8606_v5 = vld [vmem:[#allocation2 + $0x3f] sm:$0xff] }
 0x183   : > { %1185 = vst.msk [vmem:[#allocation2 + $0x80] sm:$0xff] %vm1168_vm4, %v1166_v1  ;;  %v1167_v60 = vmax.f32 %v8365_v56, %v1149_v24  ;;  %v1235_v40 = vld [vmem:[#allocation3 + $0x8] sm:$0xff]  ;;  %v8531_v47 = vld [vmem:[#allocation2 + $0x49] sm:$0xff]  ;;  %1559 = vst.msk [vmem:[#allocation3] sm:$0xff] %vm1168_vm4, %v1558_v27 }
 0x184   : > { %v1207_v42 = vld [vmem:[#allocation3 + $0x20] sm:$0xff]  ;;  %1183 = vst.msk [vmem:[#allocation2 + $0x70] sm:$0xff] %vm1168_vm4, %v1164_v10  ;;  %v1165_v43 = vmax.f32 %v8367_v58, %v1147_v57  ;;  %v1242_v36 = vpack.c.bf16 %v1235_v40, %v8462_v44  ;;  %1432 = vst.msk [vmem:[#allocation3 + $0x8] sm:$0xff] %vm1168_vm4, %v8510_v25  ;;  %v8541_v56 = vld [vmem:[#allocation2 + $0x3d] sm:$0xff] }
 0x185   : > { %v1237_v33 = vld [vmem:[#allocation3 + $0x18] sm:$0xff]  ;;  %1227 = vst.msk [vmem:[#allocation3 + $0x20] sm:$0xff] %vm1168_vm4, %v8521_v35  ;;  %v1209_v7 = vld [vmem:[#allocation3 + $0x30] sm:$0xff]  ;;  %1186 = vst.msk [vmem:[#allocation2 + $0x88] sm:$0xff] %vm1168_vm4, %v1167_v60  ;;  %6929 = vmatpush3.bf16.msra.mxu1 %v1483_v11 }
 0x186   : > { %v1236_v17 = vld [vmem:[#allocation3 + $0x10] sm:$0xff]  ;;  %1436 = vst.msk [vmem:[#allocation3 + $0x18] sm:$0xff] %vm1168_vm4, %v8519_v30  ;;  %v8546_v58 = vld [vmem:[#allocation2 + $0x54] sm:$0xff]  ;;  %1231 = vst.msk [vmem:[#allocation3 + $0x30] sm:$0xff] %vm1168_vm4, %v8531_v47  ;;  %6906 = vmatprep.mubr.msk.bf16.mxu0 %vm1168_vm4, %v1242_v36  ;;  %6938 = vmatprep.subr.bf16.mxu1 %v8516_v28 }
 0x187   : > { %v1208_v19 = vld [vmem:[#allocation3 + $0x28] sm:$0xff]  ;;  %1184 = vst.msk [vmem:[#allocation2 + $0x78] sm:$0xff] %vm1168_vm4, %v1165_v43  ;;  %1434 = vst.msk [vmem:[#allocation3 + $0x10] sm:$0xff] %vm1168_vm4, %v8529_v38  ;;  %v1243_v6 = vpack.c.bf16 %v1237_v33, %v1236_v17  ;;  %v8561_v44 = vld [vmem:[#allocation2 + $0xf] sm:$0xff] }
 0x188   : > { %v1213_v39 = vpack.c.bf16 %v1208_v19, %v1207_v42  ;;  %1229 = vst.msk [vmem:[#allocation3 + $0x28] sm:$0xff] %vm1168_vm4, %v8541_v56  ;;  %1202 = vst.msk [vmem:[#allocation3 + $0x38] sm:$0xff] %vm1168_vm4, %v8546_v58  ;;  %v8571_v32 = vld [vmem:[#allocation2 + $0x4a] sm:$0xff]  ;;  %v8578_v31 = vld [vmem:[#allocation2 + $0x55] sm:$0xff] }
 0x189   : > { %6907 = vmatmul.mubr.msk.bf16.vlgmr.msra.gmra.mrb[72].mxu0 %vm1168_vm4, %v1243_v6  ;;  %v8604_v59 = vld [vmem:[#allocation2 + $0x56] sm:$0xff]  ;;  %v8614_v1 = vld [vmem:[#allocation2 + $0x4b] sm:$0xff]  ;;  %v8650_v17 = vld [vmem:[#allocation2 + $0x40] sm:$0xff] }
 0x18a   : > { %6922 = vmatprep.mubr.msk.bf16.mxu1 %vm1168_vm4, %v1213_v39  ;;  %v8567_v0 = vld [vmem:[#allocation3] sm:$0xff]  ;;  %v8608_v22 = vld [vmem:[#allocation2 + $0x1c] sm:$0xff]  ;;  %v7941_v60 = vld [vmem:[%s10522_s3 + $0x2c] ss:$0 sps:$4 sm:$0x33]  }
 0x18b   : > { %v1446_v62 = vld [vmem:[#allocation3 + $0x8] sm:$0xff]  ;;  %1688 = vst.msk [vmem:[#allocation3] sm:$0xff] %vm1168_vm4, %v1687_v45  ;;  %v1612_v40 = vsel %vm1271_vm3, %v7941_v60, 0  ;;  %v7942_v42 = vld [vmem:[%s10522_s3 + $0x30] sm:$0xff]  }
 0x18c   : > { %v1238_v12 = vld [vmem:[#allocation3 + $0x20] sm:$0xff]  ;;  %1561 = vst.msk [vmem:[#allocation3 + $0x8] sm:$0xff] %vm1168_vm4, %v8561_v44  ;;  %v1453_v50 = vpack.c.bf16 %v1446_v62, %v8525_v37 }
 0x18d   : > { %1438 = vst.msk [vmem:[#allocation3 + $0x20] sm:$0xff] %vm1168_vm4, %v8563_v46  ;;  %v1240_v41 = vld [vmem:[#allocation3 + $0x30] sm:$0xff]  ;;  %v1448_v51 = vld [vmem:[#allocation3 + $0x18] sm:$0xff]  ;;  %v8644_v43 = vld [vmem:[#allocation2 + $0x34] sm:$0xff] }
 0x18e   : > { %1442 = vst.msk [vmem:[#allocation3 + $0x30] sm:$0xff] %vm1168_vm4, %v8571_v32  ;;  %v1447_v13 = vld [vmem:[#allocation3 + $0x10] sm:$0xff]  ;;  %1565 = vst.msk [vmem:[#allocation3 + $0x18] sm:$0xff] %vm1168_vm4, %v8565_v26  ;;  %v8648_v36 = vld [vmem:[#allocation2 + $0x57] sm:$0xff] }
 0x18f   : > { %v1239_v21 = vld [vmem:[#allocation3 + $0x28] sm:$0xff]  ;;  %v1210_v34 = vld [vmem:[#allocation3 + $0x38] sm:$0xff]  ;;  %1563 = vst.msk [vmem:[#allocation3 + $0x10] sm:$0xff] %vm1168_vm4, %v8573_v49  ;;  %v1454_v11 = vpack.c.bf16 %v1448_v51, %v1447_v13 }
 0x190   : > { %v1244_v55 = vpack.c.bf16 %v1239_v21, %v1238_v12  ;;  %1440 = vst.msk [vmem:[#allocation3 + $0x28] sm:$0xff] %vm1168_vm4, %v8569_v61  ;;  %v1214_v63 = vpack.c.bf16 %v1210_v34, %v1209_v7  ;;  %1233 = vst.msk [vmem:[#allocation3 + $0x38] sm:$0xff] %vm1168_vm4, %v8578_v31  ;;  %v8660_v6 = vld [vmem:[#allocation2 + $0x4c] sm:$0xff]  ;;  %v8689_v13 = vld [vmem:[#allocation2 + $0x58] sm:$0xff] }
 0x192   : > { %6910 = vmatprep.mubr.msk.bf16.mxu0 %vm1168_vm4, %v1244_v55  ;;  %6923 = vmatmul.mubr.msk.bf16.gmra.mrb[4].mxu1 %vm1168_vm4, %v1214_v63  ;;  %v8602_v20 = vld [vmem:[#allocation3] sm:$0xff] }
 0x193   : > { %6930 = vmatprep.mubr.msk.bf16.mxu1 %vm1168_vm4, %v1453_v50  ;;  %v1575_v15 = vld [vmem:[#allocation3 + $0x8] sm:$0xff]  ;;  %1817 = vst.msk [vmem:[#allocation3] sm:$0xff] %vm1168_vm4, %v8434_v23 }
 0x194   : > { %v1449_v54 = vld [vmem:[#allocation3 + $0x20] sm:$0xff]  ;;  %1690 = vst.msk [vmem:[#allocation3 + $0x8] sm:$0xff] %vm1168_vm4, %v8596_v16 }
 0x195   : > { %1567 = vst.msk [vmem:[#allocation3 + $0x20] sm:$0xff] %vm1168_vm4, %v8598_v9  ;;  %v1451_v4 = vld [vmem:[#allocation3 + $0x30] sm:$0xff]  ;;  %v8618_v24 = vld [vmem:[#allocation3 + $0x18] sm:$0xff] }
 0x196   : > { %1571 = vst.msk [vmem:[#allocation3 + $0x30] sm:$0xff] %vm1168_vm4, %v8614_v1  ;;  %v8622_v57 = vld [vmem:[#allocation3 + $0x10] sm:$0xff]  ;;  %1694 = vst.msk [vmem:[#allocation3 + $0x18] sm:$0xff] %vm1168_vm4, %v8600_v14 }
 0x197   : > { %v1241_v27 = vld [vmem:[#allocation3 + $0x38] sm:$0xff]  ;;  %v1450_v10 = vld [vmem:[#allocation3 + $0x28] sm:$0xff]  ;;  %1692 = vst.msk [vmem:[#allocation3 + $0x10] sm:$0xff] %vm1168_vm4, %v8608_v22 }
 0x198   : > { %v1245_v23 = vpack.c.bf16 %v1241_v27, %v1240_v41  ;;  %1444 = vst.msk [vmem:[#allocation3 + $0x38] sm:$0xff] %vm1168_vm4, %v8604_v59  ;;  %v1455_v37 = vpack.c.bf16 %v1450_v10, %v1449_v54  ;;  %1569 = vst.msk [vmem:[#allocation3 + $0x28] sm:$0xff] %vm1168_vm4, %v8606_v5  ;;  %v1582_v41 = vpack.c.bf16 %v1575_v15, %v8567_v0  ;;  %v7943_v15 = vld [vmem:[%s10522_s3 + $0x38] ss:$0 sps:$4 sm:$0x33]   ;;  %v7944_v27 = vld [vmem:[%s10522_s3 + $0x3c] sm:$0xff]  }
 0x19a   : > { %6911 = vmatmul.mubr.msk.bf16.gmra.mrb[76].mxu0 %vm1168_vm4, %v1245_v23  ;;  %6931 = vmatmul.mubr.msk.bf16.vlgmr.msra.gmra.mrb[0].mxu1 %vm1168_vm4, %v1454_v11  ;;  %v8646_v33 = vld [vmem:[#allocation3] sm:$0xff]  ;;  %v8731_v11 = vld [vmem:[#allocation2 + $0x60] sm:$0xff] }
 0x19b   : > { %6939 = vmatpush3.bf16.msra.mxu1 %v8516_v28  ;;  %6934 = vmatprep.mubr.msk.bf16.mxu1 %vm1168_vm4, %v1455_v37  ;;  %v8652_v28 = vld [vmem:[#allocation3 + $0x8] sm:$0xff]  ;;  %1946 = vst.msk [vmem:[#allocation3] sm:$0xff] %vm1168_vm4, %v8469_v48 }
 0x19c   : > { %7830 = vmatprep.subr.msk.bf16.mxu1 %vm1271_vm3, %v7941_v60  ;;  %v1578_v7 = vld [vmem:[#allocation3 + $0x20] sm:$0xff]  ;;  %1819 = vst.msk [vmem:[#allocation3 + $0x8] sm:$0xff] %vm1168_vm4, %v8448_v18 }
 0x19d   : > { %1696 = vst.msk [vmem:[#allocation3 + $0x20] sm:$0xff] %vm1168_vm4, %v8644_v43  ;;  %v8658_v19 = vld [vmem:[#allocation3 + $0x30] sm:$0xff]  ;;  %v8664_v39 = vld [vmem:[#allocation3 + $0x18] sm:$0xff] }
 0x19e   : > { %1700 = vst.msk [vmem:[#allocation3 + $0x30] sm:$0xff] %vm1168_vm4, %v8660_v6  ;;  %v8668_v62 = vld [vmem:[#allocation3 + $0x10] sm:$0xff]  ;;  %1823 = vst.msk [vmem:[#allocation3 + $0x18] sm:$0xff] %vm1168_vm4, %v8472_v29 }
 0x19f   : > { %v1452_v45 = vld [vmem:[#allocation3 + $0x38] sm:$0xff]  ;;  %6941 = vmatpush3.bf16.msra.mxu1 %v1612_v40  ;;  %v1579_v12 = vld [vmem:[#allocation3 + $0x28] sm:$0xff]  ;;  %1821 = vst.msk [vmem:[#allocation3 + $0x10] sm:$0xff] %vm1168_vm4, %v8444_v8 }
 0x1a0   : > { %v1456_v48 = vpack.c.bf16 %v1452_v45, %v1451_v4  ;;  %1573 = vst.msk [vmem:[#allocation3 + $0x38] sm:$0xff] %vm1168_vm4, %v8648_v36  ;;  %6950 = vmatprep.subr.bf16.mxu1 %v7942_v42  ;;  %1698 = vst.msk [vmem:[#allocation3 + $0x28] sm:$0xff] %vm1168_vm4, %v8650_v17  ;;  %v1584_v4 = vpack.c.bf16 %v1579_v12, %v1578_v7  ;;  %v1711_v45 = vpack.c.bf16 %v8652_v28, %v8602_v20 }
 0x1a2   : > { %6935 = vmatmul.mubr.msk.bf16.gmra.mrb[4].mxu1 %vm1168_vm4, %v1456_v48  ;;  %v8681_v51 = vld [vmem:[#allocation3] sm:$0xff] }
 0x1a3   : > { %6942 = vmatprep.mubr.msk.bf16.mxu1 %vm1168_vm4, %v1582_v41  ;;  %v8685_v34 = vld [vmem:[#allocation3 + $0x8] sm:$0xff]  ;;  %2075 = vst.msk [vmem:[#allocation3] sm:$0xff] %vm1168_vm4, %v8510_v25  ;;  %v1583_v25 = vpack.c.bf16 %v8618_v24, %v8622_v57  ;;  %v1741_v24 = vsel %vm1271_vm3, %v7943_v15, 0  ;;  %v8768_v41 = vld [vmem:[#allocation2 + $0x61] sm:$0xff] }
 0x1a4   : > { %v8683_v21 = vld [vmem:[#allocation3 + $0x20] sm:$0xff]  ;;  %1948 = vst.msk [vmem:[#allocation3 + $0x8] sm:$0xff] %vm1168_vm4, %v8490_v2 }
 0x1a5   : > { %1825 = vst.msk [vmem:[#allocation3 + $0x20] sm:$0xff] %vm1168_vm4, %v8494_v3  ;;  %v8693_v55 = vld [vmem:[#allocation3 + $0x30] sm:$0xff]  ;;  %v8697_v0 = vld [vmem:[#allocation3 + $0x18] sm:$0xff] }
 0x1a6   : > { %1829 = vst.msk [vmem:[#allocation3 + $0x30] sm:$0xff] %vm1168_vm4, %v8546_v58  ;;  %v8701_v54 = vld [vmem:[#allocation3 + $0x10] sm:$0xff]  ;;  %1952 = vst.msk [vmem:[#allocation3 + $0x18] sm:$0xff] %vm1168_vm4, %v8521_v35 }
 0x1a7   : > { %v1581_v63 = vld [vmem:[#allocation3 + $0x38] sm:$0xff]  ;;  %v1708_v50 = vld [vmem:[#allocation3 + $0x28] sm:$0xff]  ;;  %1950 = vst.msk [vmem:[#allocation3 + $0x10] sm:$0xff] %vm1168_vm4, %v8482_v52 }
 0x1a8   : > { %1702 = vst.msk [vmem:[#allocation3 + $0x38] sm:$0xff] %vm1168_vm4, %v8689_v13  ;;  %1827 = vst.msk [vmem:[#allocation3 + $0x28] sm:$0xff] %vm1168_vm4, %v8486_v53  ;;  %v1585_v7 = vpack.c.bf16 %v1581_v63, %v8658_v19 }
 0x1aa   : > { %6943 = vmatmul.mubr.msk.bf16.vlgmr.msra.gmra.mrb[0].mxu1 %vm1168_vm4, %v1583_v25  ;;  %v8723_v10 = vld [vmem:[#allocation3] sm:$0xff] }
 0x1ab   : > { %6951 = vmatpush3.bf16.msra.mxu1 %v7942_v42  ;;  %6946 = vmatprep.mubr.msk.bf16.mxu1 %vm1168_vm4, %v1584_v4  ;;  %v8727_v23 = vld [vmem:[#allocation3 + $0x8] sm:$0xff]  ;;  %2204 = vst.msk [vmem:[#allocation3] sm:$0xff] %vm1168_vm4, %v8561_v44  ;;  %v7945_v4 = vld [vmem:[%s10522_s3 + $0x44] ss:$0 sps:$4 sm:$0x33]  }
 0x1ac   : > { %7831 = vmatprep.subr.msk.bf16.mxu1 %vm1271_vm3, %v7943_v15  ;;  %v8725_v57 = vld [vmem:[#allocation3 + $0x20] sm:$0xff]  ;;  %2077 = vst.msk [vmem:[#allocation3 + $0x8] sm:$0xff] %vm1168_vm4, %v8529_v38  ;;  %v1712_v15 = vpack.c.bf16 %v8664_v39, %v8668_v62  ;;  %v1870_v39 = vsel %vm1271_vm3, %v7945_v4, 0  ;;  %v7946_v62 = vld [vmem:[%s10522_s3 + $0x48] sm:$0xff]  }
 0x1ad   : > { %1954 = vst.msk [vmem:[#allocation3 + $0x20] sm:$0xff] %vm1168_vm4, %v8541_v56  ;;  %v8735_v37 = vld [vmem:[#allocation3 + $0x30] sm:$0xff]  ;;  %v8739_v60 = vld [vmem:[#allocation3 + $0x18] sm:$0xff] }
 0x1ae   : > { %1958 = vst.msk [vmem:[#allocation3 + $0x30] sm:$0xff] %vm1168_vm4, %v8578_v31  ;;  %v8745_v44 = vld [vmem:[#allocation3 + $0x10] sm:$0xff]  ;;  %2081 = vst.msk [vmem:[#allocation3 + $0x18] sm:$0xff] %vm1168_vm4, %v8563_v46 }
 0x1af   : > { %6953 = vmatpush3.bf16.msra.mxu1 %v1741_v24  ;;  %v1710_v40 = vld [vmem:[#allocation3 + $0x38] sm:$0xff]  ;;  %v8741_v42 = vld [vmem:[#allocation3 + $0x28] sm:$0xff]  ;;  %2079 = vst.msk [vmem:[#allocation3 + $0x10] sm:$0xff] %vm1168_vm4, %v8519_v30  ;;  %v1713_v24 = vpack.c.bf16 %v1708_v50, %v8683_v21 }
 0x1b0   : > { %6962 = vmatprep.subr.bf16.mxu1 %v7944_v27  ;;  %1831 = vst.msk [vmem:[#allocation3 + $0x38] sm:$0xff] %vm1168_vm4, %v8731_v11  ;;  %1956 = vst.msk [vmem:[#allocation3 + $0x28] sm:$0xff] %vm1168_vm4, %v8531_v47  ;;  %v8815_v21 = vld [vmem:[#allocation2 + $0x62] sm:$0xff] }
 0x1b2   : > { %6947 = vmatmul.mubr.msk.bf16.gmra.mrb[4].mxu1 %vm1168_vm4, %v1585_v7  ;;  %v8760_v12 = vld [vmem:[#allocation3] sm:$0xff] }
 0x1b3   : > { %6954 = vmatprep.mubr.msk.bf16.mxu1 %vm1168_vm4, %v1711_v45  ;;  %10574 = vst [vmem:[#allocation8_spill] sm:$0xff] %v8760_v12  ;;  %v8764_v48 = vld [vmem:[#allocation3 + $0x8] sm:$0xff]  ;;  %2333 = vst.msk [vmem:[#allocation3] sm:$0xff] %vm1168_vm4, %v8596_v16 }
 0x1b4   : > { %v8762_v19 = vld [vmem:[#allocation3 + $0x20] sm:$0xff]  ;;  %2206 = vst.msk [vmem:[#allocation3 + $0x8] sm:$0xff] %vm1168_vm4, %v8573_v49 }
 0x1b5   : > { %2083 = vst.msk [vmem:[#allocation3 + $0x20] sm:$0xff] %vm1168_vm4, %v8569_v61  ;;  %v8772_v63 = vld [vmem:[#allocation3 + $0x30] sm:$0xff]  ;;  %v8776_v20 = vld [vmem:[#allocation3 + $0x18] sm:$0xff] }
 0x1b6   : > { %2087 = vst.msk [vmem:[#allocation3 + $0x30] sm:$0xff] %vm1168_vm4, %v8604_v59  ;;  %v8784_v16 = vld [vmem:[#allocation3 + $0x10] sm:$0xff]  ;;  %2210 = vst.msk [vmem:[#allocation3 + $0x18] sm:$0xff] %vm1168_vm4, %v8598_v9 }
 0x1b7   : > { %v8778_v28 = vld [vmem:[#allocation3 + $0x38] sm:$0xff]  ;;  %v8780_v25 = vld [vmem:[#allocation3 + $0x28] sm:$0xff]  ;;  %2208 = vst.msk [vmem:[#allocation3 + $0x10] sm:$0xff] %vm1168_vm4, %v8565_v26 }
 0x1b8   : > { %1960 = vst.msk [vmem:[#allocation3 + $0x38] sm:$0xff] %vm1168_vm4, %v8768_v41  ;;  %2085 = vst.msk [vmem:[#allocation3 + $0x28] sm:$0xff] %vm1168_vm4, %v8571_v32 }
 0x1ba   : > { %6955 = vmatmul.mubr.msk.bf16.vlgmr.msra.gmra.mrb[0].mxu1 %vm1168_vm4, %v1712_v15  ;;  %v8807_v7 = vld [vmem:[#allocation3] sm:$0xff] }
 0x1bb   : > { %6963 = vmatpush3.bf16.msra.mxu1 %v7944_v27  ;;  %6958 = vmatprep.mubr.msk.bf16.mxu1 %vm1168_vm4, %v1713_v24  ;;  %10575 = vst [vmem:[#allocation9_spill] sm:$0xff] %v8807_v7  ;;  %v8811_v12 = vld [vmem:[#allocation3 + $0x8] sm:$0xff]  ;;  %2462 = vst.msk [vmem:[#allocation3] sm:$0xff] %vm1168_vm4, %v8448_v18  ;;  %v1714_v24 = vpack.c.bf16 %v1710_v40, %v8693_v55 }
 0x1bc   : > { %7832 = vmatprep.subr.msk.bf16.mxu1 %vm1271_vm3, %v7945_v4  ;;  %v8809_v45 = vld [vmem:[#allocation3 + $0x20] sm:$0xff]  ;;  %2335 = vst.msk [vmem:[#allocation3 + $0x8] sm:$0xff] %vm1168_vm4, %v8608_v22 }
 0x1bd   : > { %2212 = vst.msk [vmem:[#allocation3 + $0x20] sm:$0xff] %vm1168_vm4, %v8606_v5  ;;  %v8819_v50 = vld [vmem:[#allocation3 + $0x30] sm:$0xff]  ;;  %v8823_v27 = vld [vmem:[#allocation3 + $0x18] sm:$0xff] }
 0x1be   : > { %10576 = vst [vmem:[#allocation10_spill] sm:$0xff] %v8823_v27  ;;  %2216 = vst.msk [vmem:[#allocation3 + $0x30] sm:$0xff] %vm1168_vm4, %v8648_v36  ;;  %v8831_v18 = vld [vmem:[#allocation3 + $0x10] sm:$0xff] }
 0x1bf   : > { %6965 = vmatpush3.bf16.msra.mxu1 %v1870_v39  ;;  %v8825_v15 = vld [vmem:[#allocation3 + $0x38] sm:$0xff]  ;;  %v8827_v4 = vld [vmem:[#allocation3 + $0x28] sm:$0xff]  ;;  %10577 = vst [vmem:[#allocation11_spill] sm:$0xff] %v8831_v18  ;;  %2339 = vst.msk [vmem:[#allocation3 + $0x18] sm:$0xff] %vm1168_vm4, %v8644_v43  ;;  %v1840_v39 = vpack.c.bf16 %v8685_v34, %v8646_v33 }
 0x1c0   : > { %6974 = vmatprep.subr.bf16.mxu1 %v7946_v62  ;;  %2089 = vst.msk [vmem:[#allocation3 + $0x38] sm:$0xff] %vm1168_vm4, %v8815_v21  ;;  %2214 = vst.msk [vmem:[#allocation3 + $0x28] sm:$0xff] %vm1168_vm4, %v8614_v1  ;;  %v8854_v27 = vld [vmem:[#allocation2 + $0x63] sm:$0xff] }
 0x1c1   : > { %2337 = vst.msk [vmem:[#allocation3 + $0x10] sm:$0xff] %vm1168_vm4, %v8600_v14 }
 0x1c2   : > { %6959 = vmatmul.mubr.msk.bf16.gmra.mrb[4].mxu1 %vm1168_vm4, %v1714_v24  ;;  %v8846_v7 = vld [vmem:[#allocation3] sm:$0xff] }
 0x1c3   : > { %6966 = vmatprep.mubr.msk.bf16.mxu1 %vm1168_vm4, %v1840_v39  ;;  %v8850_v40 = vld [vmem:[#allocation3 + $0x8] sm:$0xff]  ;;  %2591 = vst.msk [vmem:[#allocation3] sm:$0xff] %vm1168_vm4, %v8490_v2  ;;  %v1841_v39 = vpack.c.bf16 %v8697_v0, %v8701_v54 }
 0x1c4   : > { %v8848_v55 = vld [vmem:[#allocation3 + $0x20] sm:$0xff]  ;;  %10578 = vst [vmem:[#allocation12_spill] sm:$0xff] %v8850_v40  ;;  %2464 = vst.msk [vmem:[#allocation3 + $0x8] sm:$0xff] %vm1168_vm4, %v8444_v8 }
 0x1c5   : > { %2341 = vst.msk [vmem:[#allocation3 + $0x20] sm:$0xff] %vm1168_vm4, %v8650_v17  ;;  %v8858_v18 = vld [vmem:[#allocation3 + $0x30] sm:$0xff]  ;;  %v7947_v8 = vld [vmem:[%s10522_s3 + $0x50] ss:$0 sps:$4 sm:$0x33]   ;;  %v7948_v54 = vld [vmem:[%s10522_s3 + $0x54] sm:$0xff]  }
 0x1c6   : > { %v8862_v33 = vld [vmem:[#allocation3 + $0x18] sm:$0xff]  ;;  %2345 = vst.msk [vmem:[#allocation3 + $0x30] sm:$0xff] %vm1168_vm4, %v8689_v13  ;;  %v1999_v0 = vsel %vm1271_vm3, %v7947_v8, 0 }
 0x1c7   : > { %v8864_v34 = vld [vmem:[#allocation3 + $0x38] sm:$0xff]  ;;  %v8866_v24 = vld [vmem:[#allocation3 + $0x28] sm:$0xff]  ;;  %2468 = vst.msk [vmem:[#allocation3 + $0x18] sm:$0xff] %vm1168_vm4, %v8494_v3  ;;  %v1842_v3 = vpack.c.bf16 %v8741_v42, %v8725_v57 }
 0x1c8   : > { %v8870_v2 = vld [vmem:[#allocation3 + $0x10] sm:$0xff]  ;;  %2218 = vst.msk [vmem:[#allocation3 + $0x38] sm:$0xff] %vm1168_vm4, %v8854_v27  ;;  %2343 = vst.msk [vmem:[#allocation3 + $0x28] sm:$0xff] %vm1168_vm4, %v8660_v6 }
 0x1c9   : > { %10579 = vst [vmem:[#allocation13_spill] sm:$0xff] %v8870_v2  ;;  %2466 = vst.msk [vmem:[#allocation3 + $0x10] sm:$0xff] %vm1168_vm4, %v8472_v29  ;;  %v8904_v57 = vld [vmem:[#allocation2 + $0x64] sm:$0xff] }
 0x1ca   : > { %6967 = vmatmul.mubr.msk.bf16.vlgmr.msra.gmra.mrb[0].mxu1 %vm1168_vm4, %v1841_v39  ;;  %v8896_v40 = vld [vmem:[#allocation3] sm:$0xff] }
 0x1cb   : > { %6975 = vmatpush3.bf16.msra.mxu1 %v7946_v62  ;;  %6970 = vmatprep.mubr.msk.bf16.mxu1 %vm1168_vm4, %v1842_v3  ;;  %v8900_v29 = vld [vmem:[#allocation3 + $0x8] sm:$0xff]  ;;  %2720 = vst.msk [vmem:[#allocation3] sm:$0xff] %vm1168_vm4, %v8529_v38 }
 0x1cc   : > { %7833 = vmatprep.subr.msk.bf16.mxu1 %vm1271_vm3, %v7947_v8  ;;  %v8898_v2 = vld [vmem:[#allocation3 + $0x20] sm:$0xff]  ;;  %2593 = vst.msk [vmem:[#allocation3 + $0x8] sm:$0xff] %vm1168_vm4, %v8482_v52 }
 0x1cd   : > { %2470 = vst.msk [vmem:[#allocation3 + $0x20] sm:$0xff] %vm1168_vm4, %v8486_v53  ;;  %v8908_v42 = vld [vmem:[#allocation3 + $0x30] sm:$0xff]  ;;  %v1843_v53 = vpack.c.bf16 %v8778_v28, %v8735_v37 }
 0x1ce   : > { %v8914_v39 = vld [vmem:[#allocation3 + $0x18] sm:$0xff]  ;;  %2474 = vst.msk [vmem:[#allocation3 + $0x30] sm:$0xff] %vm1168_vm4, %v8731_v11 }
 0x1cf   : > { %6977 = vmatpush3.bf16.msra.mxu1 %v1999_v0  ;;  %v8916_v8 = vld [vmem:[#allocation3 + $0x38] sm:$0xff]  ;;  %v8918_v3 = vld [vmem:[#allocation3 + $0x28] sm:$0xff]  ;;  %2597 = vst.msk [vmem:[#allocation3 + $0x18] sm:$0xff] %vm1168_vm4, %v8541_v56  ;;  %v1969_v0 = vpack.c.bf16 %v8727_v23, %v8681_v51 }
 0x1d0   : > { %v8922_v38 = vld [vmem:[#allocation3 + $0x10] sm:$0xff]  ;;  %6986 = vmatprep.subr.bf16.mxu1 %v7948_v54  ;;  %2347 = vst.msk [vmem:[#allocation3 + $0x38] sm:$0xff] %vm1168_vm4, %v8904_v57  ;;  %2472 = vst.msk [vmem:[#allocation3 + $0x28] sm:$0xff] %vm1168_vm4, %v8546_v58  ;;  %v8948_v58 = vld [vmem:[#allocation2 + $0x6c] sm:$0xff] }
 0x1d1   : > { %2595 = vst.msk [vmem:[#allocation3 + $0x10] sm:$0xff] %vm1168_vm4, %v8521_v35 }
 0x1d2   : > { %6971 = vmatmul.mubr.msk.bf16.gmra.mrb[4].mxu1 %vm1168_vm4, %v1843_v53  ;;  %v8940_v56 = vld [vmem:[#allocation3] sm:$0xff] }
 0x1d3   : > { %6978 = vmatprep.mubr.msk.bf16.mxu1 %vm1168_vm4, %v1969_v0  ;;  %v8944_v28 = vld [vmem:[#allocation3 + $0x8] sm:$0xff]  ;;  %2849 = vst.msk [vmem:[#allocation3] sm:$0xff] %vm1168_vm4, %v8573_v49 }
 0x1d4   : > { %v8942_v37 = vld [vmem:[#allocation3 + $0x20] sm:$0xff]  ;;  %2722 = vst.msk [vmem:[#allocation3 + $0x8] sm:$0xff] %vm1168_vm4, %v8519_v30  ;;  %v7949_v30 = vld [vmem:[%s10522_s3 + $0x5c] ss:$0 sps:$4 sm:$0x33]  }
 0x1d5   : > { %2599 = vst.msk [vmem:[#allocation3 + $0x20] sm:$0xff] %vm1168_vm4, %v8531_v47  ;;  %v8952_v35 = vld [vmem:[#allocation3 + $0x30] sm:$0xff]  ;;  %v1970_v47 = vpack.c.bf16 %v8739_v60, %v8745_v44  ;;  %v2128_v60 = vsel %vm1271_vm3, %v7949_v30, 0 }
 0x1d6   : > { %v8958_v23 = vld [vmem:[#allocation3 + $0x18] sm:$0xff]  ;;  %2603 = vst.msk [vmem:[#allocation3 + $0x30] sm:$0xff] %vm1168_vm4, %v8768_v41 }
 0x1d7   : > { %v8960_v53 = vld [vmem:[#allocation3 + $0x38] sm:$0xff]  ;;  %v8962_v0 = vld [vmem:[#allocation3 + $0x28] sm:$0xff]  ;;  %2726 = vst.msk [vmem:[#allocation3 + $0x18] sm:$0xff] %vm1168_vm4, %v8569_v61  ;;  %v1971_v61 = vpack.c.bf16 %v8780_v25, %v8762_v19 }
 0x1d8   : > { %v8966_v49 = vld [vmem:[#allocation3 + $0x10] sm:$0xff]  ;;  %2476 = vst.msk [vmem:[#allocation3 + $0x38] sm:$0xff] %vm1168_vm4, %v8948_v58  ;;  %2601 = vst.msk [vmem:[#allocation3 + $0x28] sm:$0xff] %vm1168_vm4, %v8578_v31  ;;  %v9002_v19 = vld [vmem:[#allocation2 + $0x6d] sm:$0xff] }
 0x1d9   : > { %2724 = vst.msk [vmem:[#allocation3 + $0x10] sm:$0xff] %vm1168_vm4, %v8563_v46  ;;  %v7950_v31 = vld [vmem:[%s10522_s3 + $0x60] sm:$0xff]  }
 0x1da   : > { %6979 = vmatmul.mubr.msk.bf16.vlgmr.msra.gmra.mrb[0].mxu1 %vm1168_vm4, %v1970_v47  ;;  %v8994_v44 = vld [vmem:[#allocation3] sm:$0xff] }
 0x1db   : > { %6987 = vmatpush3.bf16.msra.mxu1 %v7948_v54  ;;  %6982 = vmatprep.mubr.msk.bf16.mxu1 %vm1168_vm4, %v1971_v61  ;;  %10580 = vst [vmem:[#allocation14_spill] sm:$0xff] %v8994_v44  ;;  %v8998_v46 = vld [vmem:[#allocation3 + $0x8] sm:$0xff]  ;;  %2978 = vst.msk [vmem:[#allocation3] sm:$0xff] %vm1168_vm4, %v8608_v22  ;;  %v9099_v54 = vld [vmem:[#allocation2 + $0x30] sm:$0xff] }
 0x1dc   : > { %7834 = vmatprep.subr.msk.bf16.mxu1 %vm1271_vm3, %v7949_v30  ;;  %v8996_v52 = vld [vmem:[#allocation3 + $0x20] sm:$0xff]  ;;  %2851 = vst.msk [vmem:[#allocation3 + $0x8] sm:$0xff] %vm1168_vm4, %v8565_v26 }
 0x1dd   : > { %2728 = vst.msk [vmem:[#allocation3 + $0x20] sm:$0xff] %vm1168_vm4, %v8571_v32  ;;  %v9006_v25 = vld [vmem:[#allocation3 + $0x30] sm:$0xff]  ;;  %v1972_v32 = vpack.c.bf16 %v8825_v15, %v8772_v63  ;;  %v10605_v44 = vld [vmem:[#allocation11_spill] sm:$0xff] }
 0x1de   : > { %v9012_v47 = vld [vmem:[#allocation3 + $0x18] sm:$0xff]  ;;  %2732 = vst.msk [vmem:[#allocation3 + $0x30] sm:$0xff] %vm1168_vm4, %v8815_v21 }
 0x1df   : > { %6989 = vmatpush3.bf16.msra.mxu1 %v2128_v60  ;;  %v9014_v30 = vld [vmem:[#allocation3 + $0x38] sm:$0xff]  ;;  %v9016_v61 = vld [vmem:[#allocation3 + $0x28] sm:$0xff]  ;;  %2855 = vst.msk [vmem:[#allocation3 + $0x18] sm:$0xff] %vm1168_vm4, %v8606_v5  ;;  %v2098_v5 = vpack.c.bf16 %v8764_v48, %v8723_v10 }
 0x1e0   : > { %v9020_v22 = vld [vmem:[#allocation3 + $0x10] sm:$0xff]  ;;  %6998 = vmatprep.subr.bf16.mxu1 %v7950_v31  ;;  %2605 = vst.msk [vmem:[#allocation3 + $0x38] sm:$0xff] %vm1168_vm4, %v9002_v19  ;;  %2730 = vst.msk [vmem:[#allocation3 + $0x28] sm:$0xff] %vm1168_vm4, %v8604_v59  ;;  %v9049_v59 = vld [vmem:[#allocation2 + $0x6e] sm:$0xff] }
 0x1e1   : > { %2853 = vst.msk [vmem:[#allocation3 + $0x10] sm:$0xff] %vm1168_vm4, %v8598_v9  ;;  %v3106_v15 = vld [vmem:[#allocation2 + $0x24] sm:$0xff]  ;;  %v9155_v10 = vld [vmem:[#allocation2 + $0x31] sm:$0xff] }
 0x1e2   : > { %6983 = vmatmul.mubr.msk.bf16.gmra.mrb[4].mxu1 %vm1168_vm4, %v1972_v32  ;;  %v9042_v63 = vld [vmem:[#allocation3] sm:$0xff] }
 0x1e3   : > { %6990 = vmatprep.mubr.msk.bf16.mxu1 %vm1168_vm4, %v2098_v5  ;;  %10581 = vst [vmem:[#allocation15_spill] sm:$0xff] %v9042_v63  ;;  %v9046_v26 = vld [vmem:[#allocation3 + $0x8] sm:$0xff]  ;;  %3107 = vst.msk [vmem:[#allocation3] sm:$0xff] %vm1168_vm4, %v3106_v15 }
 0x1e4   : > { %v9044_v60 = vld [vmem:[#allocation3 + $0x20] sm:$0xff]  ;;  %10583 = vst [vmem:[#allocation17_spill] sm:$0xff] %v9046_v26  ;;  %2980 = vst.msk [vmem:[#allocation3 + $0x8] sm:$0xff] %vm1168_vm4, %v8600_v14  ;;  %v7951_v14 = vld [vmem:[%s10522_s3 + $0x68] ss:$0 sps:$4 sm:$0x33]  }
 0x1e5   : > { %10582 = vst [vmem:[#allocation16_spill] sm:$0xff] %v9044_v60  ;;  %2857 = vst.msk [vmem:[#allocation3 + $0x20] sm:$0xff] %vm1168_vm4, %v8614_v1  ;;  %v9053_v9 = vld [vmem:[#allocation3 + $0x30] sm:$0xff]  ;;  %v2099_v1 = vpack.c.bf16 %v8776_v20, %v8784_v16  ;;  %v2100_v20 = vpack.c.bf16 %v8827_v4, %v8809_v45  ;;  %v9095_v16 = vld [vmem:[%s10522_s3 + $0x6c] sm:$0xff]  }
 0x1e6   : > { %10584 = vst [vmem:[#allocation18_spill] sm:$0xff] %v9053_v9  ;;  %v9059_v48 = vld [vmem:[#allocation3 + $0x18] sm:$0xff]  ;;  %2861 = vst.msk [vmem:[#allocation3 + $0x30] sm:$0xff] %vm1168_vm4, %v8854_v27  ;;  %v9219_v9 = vld [vmem:[#allocation2 + $0x55] sm:$0xff] }
 0x1e7   : > { %10585 = vst [vmem:[#allocation19_spill] sm:$0xff] %v9059_v48  ;;  %v9061_v32 = vld [vmem:[#allocation3 + $0x38] sm:$0xff]  ;;  %v9063_v5 = vld [vmem:[#allocation3 + $0x28] sm:$0xff]  ;;  %2984 = vst.msk [vmem:[#allocation3 + $0x18] sm:$0xff] %vm1168_vm4, %v8650_v17  ;;  %v2257_v17 = vsel %vm1271_vm3, %v7951_v14, 0 }
 0x1e8   : > { %10586 = vst [vmem:[#allocation20_spill] sm:$0xff] %v9063_v5  ;;  %v9067_v15 = vld [vmem:[#allocation3 + $0x10] sm:$0xff]  ;;  %2734 = vst.msk [vmem:[#allocation3 + $0x38] sm:$0xff] %vm1168_vm4, %v9049_v59  ;;  %v2358_v5 = vpack.c.bf16 %v8918_v3, %v8898_v2 }
 0x1e9   : > { %10587 = vst [vmem:[#allocation21_spill] sm:$0xff] %v9067_v15  ;;  %2859 = vst.msk [vmem:[#allocation3 + $0x28] sm:$0xff] %vm1168_vm4, %v8648_v36  ;;  %v3235_v36 = vld [vmem:[#allocation2 + $0x25] sm:$0xff]  ;;  %v9344_v3 = vld [vmem:[#allocation2 + $0x7a] sm:$0xff] }
 0x1ea   : > { %2982 = vst.msk [vmem:[#allocation3 + $0x10] sm:$0xff] %vm1168_vm4, %v8644_v43  ;;  %6991 = vmatmul.mubr.msk.bf16.vlgmr.msra.gmra.mrb[0].mxu1 %vm1168_vm4, %v2099_v1  ;;  %v9101_v43 = vld [vmem:[#allocation2 + $0x48] sm:$0xff]  ;;  %v9103_v45 = vld [vmem:[#allocation3] sm:$0xff]  ;;  %v9109_v1 = vld [vmem:[#allocation2 + $0x3c] sm:$0xff] }
 0x1eb   : > { %6999 = vmatpush3.bf16.msra.mxu1 %v7950_v31  ;;  %6994 = vmatprep.mubr.msk.bf16.mxu1 %vm1168_vm4, %v2100_v20  ;;  %10588 = vst [vmem:[#allocation22_spill] sm:$0xff] %v9103_v45  ;;  %v9107_v31 = vld [vmem:[#allocation3 + $0x8] sm:$0xff]  ;;  %3236 = vst.msk [vmem:[#allocation3] sm:$0xff] %vm1168_vm4, %v3235_v36  ;;  %v9112_v20 = vld [vmem:[#allocation2 + $0x6f] sm:$0xff] }
 0x1ec   : > { %7835 = vmatprep.subr.msk.bf16.mxu1 %vm1271_vm3, %v7951_v14  ;;  %v9105_v4 = vld [vmem:[#allocation3 + $0x20] sm:$0xff]  ;;  %10590 = vst [vmem:[#allocation24_spill] sm:$0xff] %v9107_v31  ;;  %3109 = vst.msk [vmem:[#allocation3 + $0x8] sm:$0xff] %vm1168_vm4, %v9099_v54  ;;  %v10606_v26 = vld [vmem:[#allocation10_spill] sm:$0xff] }
 0x1ed   : > { %10589 = vst [vmem:[#allocation23_spill] sm:$0xff] %v9105_v4  ;;  %2986 = vst.msk [vmem:[#allocation3 + $0x20] sm:$0xff] %vm1168_vm4, %v8660_v6  ;;  %v9116_v14 = vld [vmem:[#allocation3 + $0x30] sm:$0xff]  ;;  %v2101_v6 = vpack.c.bf16 %v8864_v34, %v8819_v50  ;;  %v10596_v50 = vld [vmem:[#allocation8_spill] sm:$0xff] }
 0x1ee   : > { %10591 = vst [vmem:[#allocation25_spill] sm:$0xff] %v9116_v14  ;;  %v9122_v51 = vld [vmem:[#allocation3 + $0x18] sm:$0xff]  ;;  %2990 = vst.msk [vmem:[#allocation3 + $0x30] sm:$0xff] %vm1168_vm4, %v8904_v57  ;;  %v2227_v34 = vpack.c.bf16 %v8811_v12, %v10596_v50  ;;  %v9153_v31 = vld [vmem:[#allocation2 + $0x54] sm:$0xff]  ;;  %v2228_v50 = vpack.c.bf16 %v10606_v26, %v10605_v44  ;;  %v2229_v44 = vpack.c.bf16 %v8866_v24, %v8848_v55 }
 0x1ef   : > { %10592 = vst [vmem:[#allocation26_spill] sm:$0xff] %v9122_v51  ;;  %7001 = vmatpush3.bf16.msra.mxu1 %v2257_v17  ;;  %v9124_v62 = vld [vmem:[#allocation3 + $0x38] sm:$0xff]  ;;  %3113 = vst.msk [vmem:[#allocation3 + $0x18] sm:$0xff] %vm1168_vm4, %v9101_v43  ;;  %v9168_v12 = vld [vmem:[#allocation2 + $0x70] sm:$0xff] }
 0x1f0   : > { %10593 = vst [vmem:[#allocation27_spill] sm:$0xff] %v9124_v62  ;;  %v9126_v15 = vld [vmem:[#allocation3 + $0x28] sm:$0xff]  ;;  %7010 = vmatprep.subr.bf16.mxu1 %v9095_v16  ;;  %2863 = vst.msk [vmem:[#allocation3 + $0x38] sm:$0xff] %vm1168_vm4, %v9112_v20  ;;  %v3364_v17 = vld [vmem:[#allocation2 + $0x26] sm:$0xff] }
 0x1f1   : > { %10594 = vst [vmem:[#allocation28_spill] sm:$0xff] %v9126_v15  ;;  %v9130_v36 = vld [vmem:[#allocation3 + $0x10] sm:$0xff]  ;;  %2988 = vst.msk [vmem:[#allocation3 + $0x28] sm:$0xff] %vm1168_vm4, %v8689_v13  ;;  %v9165_v51 = vld [vmem:[#allocation2 + $0x49] sm:$0xff] }
 0x1f2   : > { %10595 = vst [vmem:[#allocation29_spill] sm:$0xff] %v9130_v36  ;;  %3111 = vst.msk [vmem:[#allocation3 + $0x10] sm:$0xff] %vm1168_vm4, %v9109_v1  ;;  %6995 = vmatmul.mubr.msk.bf16.gmra.mrb[4].mxu1 %vm1168_vm4, %v2101_v6  ;;  %v9157_v4 = vld [vmem:[#allocation3] sm:$0xff]  ;;  %v9163_v36 = vld [vmem:[#allocation2 + $0x3d] sm:$0xff] }
 0x1f3   : > { %7002 = vmatprep.mubr.msk.bf16.mxu1 %vm1168_vm4, %v2227_v34  ;;  %10597 = vst [vmem:[#allocation8_spill] sm:$0xff] %v9157_v4  ;;  %v9161_v63 = vld [vmem:[#allocation3 + $0x8] sm:$0xff]  ;;  %3365 = vst.msk [vmem:[#allocation3] sm:$0xff] %vm1168_vm4, %v3364_v17  ;;  %v7953_v45 = vld [vmem:[%s10522_s3 + $0x74] ss:$0 sps:$4 sm:$0x33]  }
 0x1f4   : > { %v9159_v13 = vld [vmem:[#allocation3 + $0x20] sm:$0xff]  ;;  %10599 = vst [vmem:[#allocation31_spill] sm:$0xff] %v9161_v63  ;;  %3238 = vst.msk [vmem:[#allocation3 + $0x8] sm:$0xff] %vm1168_vm4, %v9155_v10  ;;  %v9215_v26 = vld [vmem:[%s10522_s3 + $0x78] sm:$0xff]   ;;  %v2386_v62 = vsel %vm1271_vm3, %v7953_v45, 0 }
 0x1f5   : > { %10598 = vst [vmem:[#allocation30_spill] sm:$0xff] %v9159_v13  ;;  %3115 = vst.msk [vmem:[#allocation3 + $0x20] sm:$0xff] %vm1168_vm4, %v9153_v31  ;;  %v9172_v6 = vld [vmem:[#allocation3 + $0x30] sm:$0xff]  ;;  %v9221_v63 = vld [vmem:[#allocation2 + $0x32] sm:$0xff] }
 0x1f6   : > { %10600 = vst [vmem:[#allocation32_spill] sm:$0xff] %v9172_v6  ;;  %v9178_v34 = vld [vmem:[#allocation3 + $0x18] sm:$0xff]  ;;  %3119 = vst.msk [vmem:[#allocation3 + $0x30] sm:$0xff] %vm1168_vm4, %v8948_v58  ;;  %v9225_v24 = vld [vmem:[#allocation2 + $0x78] sm:$0xff] }
 0x1f7   : > { %10601 = vst [vmem:[#allocation33_spill] sm:$0xff] %v9178_v34  ;;  %v9180_v15 = vld [vmem:[#allocation3 + $0x38] sm:$0xff]  ;;  %3242 = vst.msk [vmem:[#allocation3 + $0x18] sm:$0xff] %vm1168_vm4, %v9165_v51  ;;  %v9275_v6 = vld [vmem:[#allocation2 + $0x56] sm:$0xff] }
 0x1f8   : > { %10602 = vst [vmem:[#allocation34_spill] sm:$0xff] %v9180_v15  ;;  %v9182_v48 = vld [vmem:[#allocation3 + $0x28] sm:$0xff]  ;;  %2992 = vst.msk [vmem:[#allocation3 + $0x38] sm:$0xff] %vm1168_vm4, %v9168_v12  ;;  %v9244_v13 = vld [vmem:[#allocation2 + $0x4a] sm:$0xff] }
 0x1f9   : > { %10603 = vst [vmem:[#allocation35_spill] sm:$0xff] %v9182_v48  ;;  %v9186_v17 = vld [vmem:[#allocation3 + $0x10] sm:$0xff]  ;;  %3117 = vst.msk [vmem:[#allocation3 + $0x28] sm:$0xff] %vm1168_vm4, %v8731_v11  ;;  %v9277_v4 = vld [vmem:[#allocation2 + $0x33] sm:$0xff] }
 0x1fa   : > { %10604 = vst [vmem:[#allocation36_spill] sm:$0xff] %v9186_v17  ;;  %3240 = vst.msk [vmem:[#allocation3 + $0x10] sm:$0xff] %vm1168_vm4, %v9163_v36  ;;  %7003 = vmatmul.mubr.msk.bf16.vlgmr.msra.gmra.mrb[0].mxu1 %vm1168_vm4, %v2228_v50  ;;  %v3493_v11 = vld [vmem:[#allocation2 + $0x27] sm:$0xff]  ;;  %v9223_v55 = vld [vmem:[#allocation3] sm:$0xff]  ;;  %v2230_v17 = vpack.c.bf16 %v8916_v8, %v8858_v18 }
 0x1fb   : > { %7011 = vmatpush3.bf16.msra.mxu1 %v9095_v16  ;;  %7006 = vmatprep.mubr.msk.bf16.mxu1 %vm1168_vm4, %v2229_v44  ;;  %10607 = vst [vmem:[#allocation11_spill] sm:$0xff] %v9223_v55  ;;  %v9229_v50 = vld [vmem:[#allocation3 + $0x8] sm:$0xff]  ;;  %3494 = vst.msk [vmem:[#allocation3] sm:$0xff] %vm1168_vm4, %v3493_v11  ;;  %v7956_v60 = vld [vmem:[%s10522_s3 + $0x84] sm:$0xff]  }
 0x1fc   : > { %7836 = vmatprep.subr.msk.bf16.mxu1 %vm1271_vm3, %v7953_v45  ;;  %v9227_v16 = vld [vmem:[#allocation3 + $0x20] sm:$0xff]  ;;  %10609 = vst [vmem:[#allocation37_spill] sm:$0xff] %v9229_v50  ;;  %v9231_v44 = vld [vmem:[#allocation2 + $0x3e] sm:$0xff]  ;;  %3367 = vst.msk [vmem:[#allocation3 + $0x8] sm:$0xff] %vm1168_vm4, %v9221_v63 }
 0x1fd   : > { %10608 = vst [vmem:[#allocation10_spill] sm:$0xff] %v9227_v16  ;;  %3244 = vst.msk [vmem:[#allocation3 + $0x20] sm:$0xff] %vm1168_vm4, %v9219_v9  ;;  %v9236_v45 = vld [vmem:[#allocation3 + $0x30] sm:$0xff]  ;;  %v10616_v8 = vld [vmem:[#allocation12_spill] sm:$0xff] }
 0x1fe   : > { %10610 = vst [vmem:[#allocation38_spill] sm:$0xff] %v9236_v45  ;;  %v9242_v34 = vld [vmem:[#allocation3 + $0x18] sm:$0xff]  ;;  %3248 = vst.msk [vmem:[#allocation3 + $0x30] sm:$0xff] %vm1168_vm4, %v9002_v19  ;;  %v10615_v18 = vld [vmem:[#allocation9_spill] sm:$0xff] }
 0x1ff   : > { %10611 = vst [vmem:[#allocation39_spill] sm:$0xff] %v9242_v34  ;;  %7013 = vmatpush3.bf16.msra.mxu1 %v2386_v62  ;;  %v9246_v48 = vld [vmem:[#allocation3 + $0x38] sm:$0xff]  ;;  %3371 = vst.msk [vmem:[#allocation3 + $0x18] sm:$0xff] %vm1168_vm4, %v9244_v13  ;;  %v2356_v15 = vpack.c.bf16 %v10616_v8, %v10615_v18  ;;  %v9287_v34 = vld [vmem:[#allocation2 + $0x3f] sm:$0xff] }
 0x200   : > { %10612 = vst [vmem:[#allocation40_spill] sm:$0xff] %v9246_v48  ;;  %v9248_v14 = vld [vmem:[#allocation3 + $0x28] sm:$0xff]  ;;  %7022 = vmatprep.subr.bf16.mxu1 %v9215_v26  ;;  %3121 = vst.msk [vmem:[#allocation3 + $0x38] sm:$0xff] %vm1168_vm4, %v9225_v24  ;;  %v3622_v62 = vld [vmem:[#allocation2 + $0x28] sm:$0xff] }
 0x201   : > { %10613 = vst [vmem:[#allocation41_spill] sm:$0xff] %v9248_v14  ;;  %v9252_v11 = vld [vmem:[#allocation3 + $0x10] sm:$0xff]  ;;  %3246 = vst.msk [vmem:[#allocation3 + $0x28] sm:$0xff] %vm1168_vm4, %v8768_v41  ;;  %v9300_v8 = vld [vmem:[#allocation2 + $0x4b] sm:$0xff] }
 0x202   : > { %10614 = vst [vmem:[#allocation42_spill] sm:$0xff] %v9252_v11  ;;  %3369 = vst.msk [vmem:[#allocation3 + $0x10] sm:$0xff] %vm1168_vm4, %v9231_v44  ;;  %7007 = vmatmul.mubr.msk.bf16.gmra.mrb[4].mxu1 %vm1168_vm4, %v2230_v17  ;;  %v9279_v16 = vld [vmem:[#allocation3] sm:$0xff]  ;;  %v9281_v41 = vld [vmem:[#allocation2 + $0x79] sm:$0xff] }
 0x203   : > { %7014 = vmatprep.mubr.msk.bf16.mxu1 %vm1168_vm4, %v2356_v15  ;;  %10617 = vst [vmem:[#allocation9_spill] sm:$0xff] %v9279_v16  ;;  %v9285_v11 = vld [vmem:[#allocation3 + $0x8] sm:$0xff]  ;;  %3623 = vst.msk [vmem:[#allocation3] sm:$0xff] %vm1168_vm4, %v3622_v62  ;;  %v7955_v17 = vld [vmem:[%s10522_s3 + $0x80] ss:$0 sps:$4 sm:$0x33]  }
 0x204   : > { %v9283_v50 = vld [vmem:[#allocation3 + $0x20] sm:$0xff]  ;;  %10619 = vst [vmem:[#allocation43_spill] sm:$0xff] %v9285_v11  ;;  %3496 = vst.msk [vmem:[#allocation3 + $0x8] sm:$0xff] %vm1168_vm4, %v9277_v4  ;;  %v10623_v55 = vld [vmem:[#allocation13_spill] sm:$0xff] }
 0x205   : > { %10618 = vst [vmem:[#allocation12_spill] sm:$0xff] %v9283_v50  ;;  %3373 = vst.msk [vmem:[#allocation3 + $0x20] sm:$0xff] %vm1168_vm4, %v9275_v6  ;;  %v9292_v15 = vld [vmem:[#allocation3 + $0x30] sm:$0xff]  ;;  %v10624_v45 = vpack.c.bf16 %v8862_v33, %v10623_v55  ;;  %v9340_v11 = vld [vmem:[#allocation2 + $0x57] sm:$0xff] }
 0x206   : > { %v9298_v18 = vld [vmem:[#allocation3 + $0x18] sm:$0xff]  ;;  %3377 = vst.msk [vmem:[#allocation3 + $0x30] sm:$0xff] %vm1168_vm4, %v9049_v59 }
 0x207   : > { %10620 = vst [vmem:[#allocation44_spill] sm:$0xff] %v9298_v18  ;;  %v9302_v14 = vld [vmem:[#allocation3 + $0x38] sm:$0xff]  ;;  %3500 = vst.msk [vmem:[#allocation3 + $0x18] sm:$0xff] %vm1168_vm4, %v9300_v8 }
 0x208   : > { %v9304_v48 = vld [vmem:[#allocation3 + $0x28] sm:$0xff]  ;;  %3250 = vst.msk [vmem:[#allocation3 + $0x38] sm:$0xff] %vm1168_vm4, %v9281_v41  ;;  %v9366_v18 = vld [vmem:[#allocation2 + $0x4c] sm:$0xff] }
 0x209   : > { %10621 = vst [vmem:[#allocation45_spill] sm:$0xff] %v9304_v48  ;;  %v9308_v62 = vld [vmem:[#allocation3 + $0x10] sm:$0xff]  ;;  %3375 = vst.msk [vmem:[#allocation3 + $0x28] sm:$0xff] %vm1168_vm4, %v8815_v21  ;;  %v2515_v21 = vsel %vm1271_vm3, %v7955_v17, 0 }
 0x20a   : > { %10622 = vst [vmem:[#allocation46_spill] sm:$0xff] %v9308_v62  ;;  %3498 = vst.msk [vmem:[#allocation3 + $0x10] sm:$0xff] %vm1168_vm4, %v9287_v34  ;;  %7015 = vmatmul.mubr.msk.bf16.vlgmr.msra.gmra.mrb[0].mxu1 %vm1168_vm4, %v10624_v45  ;;  %v9342_v2 = vld [vmem:[#allocation3] sm:$0xff] }
 0x20b   : > { %7023 = vmatpush3.bf16.msra.mxu1 %v9215_v26  ;;  %7018 = vmatprep.mubr.msk.bf16.mxu1 %vm1168_vm4, %v2358_v5  ;;  %10625 = vst [vmem:[#allocation13_spill] sm:$0xff] %v9342_v2  ;;  %v9348_v55 = vld [vmem:[#allocation3 + $0x8] sm:$0xff]  ;;  %v9352_v5 = vld [vmem:[#allocation2 + $0x40] sm:$0xff]  ;;  %3752 = vst.msk [vmem:[#allocation3] sm:$0xff] %vm1168_vm4, %v9099_v54 }
 0x20c   : > { %7837 = vmatprep.subr.msk.bf16.mxu1 %vm1271_vm3, %v7955_v17  ;;  %v9346_v33 = vld [vmem:[#allocation3 + $0x20] sm:$0xff]  ;;  %10626 = vst [vmem:[#allocation47_spill] sm:$0xff] %v9348_v55  ;;  %v2359_v17 = vpack.c.bf16 %v8960_v53, %v8908_v42  ;;  %v10628_v42 = vpack.c.bf16 %v8900_v29, %v8846_v7  ;;  %v9407_v55 = vld [vmem:[#allocation2 + $0x7b] sm:$0xff]  ;;  %v7957_v7 = vld [vmem:[%s10522_s3 + $0x8c] ss:$0 sps:$4 sm:$0x33]  }
 0x20d   : > { %v9350_v26 = vld [vmem:[#allocation2 + $0x34] sm:$0xff]  ;;  %3502 = vst.msk [vmem:[#allocation3 + $0x20] sm:$0xff] %vm1168_vm4, %v9340_v11  ;;  %v9358_v45 = vld [vmem:[#allocation3 + $0x30] sm:$0xff] }
 0x20e   : > { %3625 = vst.msk [vmem:[#allocation3 + $0x8] sm:$0xff] %vm1168_vm4, %v9350_v26  ;;  %v9364_v62 = vld [vmem:[#allocation3 + $0x18] sm:$0xff]  ;;  %3506 = vst.msk [vmem:[#allocation3 + $0x30] sm:$0xff] %vm1168_vm4, %v9112_v20 }
 0x20f   : > { %7025 = vmatpush3.bf16.msra.mxu1 %v2515_v21  ;;  %v9368_v50 = vld [vmem:[#allocation3 + $0x38] sm:$0xff]  ;;  %3629 = vst.msk [vmem:[#allocation3 + $0x18] sm:$0xff] %vm1168_vm4, %v9366_v18  ;;  %v9401_v21 = vld [vmem:[#allocation2 + $0x58] sm:$0xff] }
 0x210   : > { %v9370_v48 = vld [vmem:[#allocation3 + $0x28] sm:$0xff]  ;;  %7034 = vmatprep.subr.bf16.mxu1 %v7956_v60  ;;  %3379 = vst.msk [vmem:[#allocation3 + $0x38] sm:$0xff] %vm1168_vm4, %v9344_v3 }
 0x211   : > { %v9374_v54 = vld [vmem:[#allocation3 + $0x10] sm:$0xff]  ;;  %3504 = vst.msk [vmem:[#allocation3 + $0x28] sm:$0xff] %vm1168_vm4, %v8854_v27 }
 0x212   : > { %10627 = vst [vmem:[#allocation48_spill] sm:$0xff] %v9374_v54  ;;  %3627 = vst.msk [vmem:[#allocation3 + $0x10] sm:$0xff] %vm1168_vm4, %v9352_v5  ;;  %7019 = vmatmul.mubr.msk.bf16.gmra.mrb[4].mxu1 %vm1168_vm4, %v2359_v17  ;;  %v9397_v53 = vld [vmem:[#allocation3] sm:$0xff] }
 0x213   : > { %7026 = vmatprep.mubr.msk.bf16.mxu1 %vm1168_vm4, %v10628_v42  ;;  %3881 = vst.msk [vmem:[#allocation3] sm:$0xff] %vm1168_vm4, %v9155_v10 }
 0x214   : > { %v9399_v16 = vld [vmem:[#allocation3 + $0x20] sm:$0xff] }
 0x215   : > { %v9403_v27 = vld [vmem:[#allocation3 + $0x8] sm:$0xff]  ;;  %3631 = vst.msk [vmem:[#allocation3 + $0x20] sm:$0xff] %vm1168_vm4, %v9401_v21  ;;  %v9411_v17 = vld [vmem:[#allocation3 + $0x30] sm:$0xff] }
 0x216   : > { %10629 = vst [vmem:[#allocation49_spill] sm:$0xff] %v9403_v27  ;;  %3754 = vst.msk [vmem:[#allocation3 + $0x8] sm:$0xff] %vm1168_vm4, %v9109_v1  ;;  %v9417_v29 = vld [vmem:[#allocation3 + $0x18] sm:$0xff]  ;;  %v10631_v1 = vpack.c.bf16 %v8962_v0, %v8942_v37  ;;  %v7958_v27 = vld [vmem:[%s10522_s3 + $0x90] sm:$0xff]  }
 0x217   : > { %v9419_v42 = vld [vmem:[#allocation3 + $0x38] sm:$0xff]  ;;  %3635 = vst.msk [vmem:[#allocation3 + $0x30] sm:$0xff] %vm1168_vm4, %v9168_v12  ;;  %3758 = vst.msk [vmem:[#allocation3 + $0x18] sm:$0xff] %vm1168_vm4, %v9153_v31  ;;  %v10630_v31 = vpack.c.bf16 %v8914_v39, %v8922_v38  ;;  %v3759_v39 = vld [vmem:[#allocation2 + $0x60] sm:$0xff] }
 0x218   : > { %v9421_v54 = vld [vmem:[#allocation3 + $0x28] sm:$0xff]  ;;  %3508 = vst.msk [vmem:[#allocation3 + $0x38] sm:$0xff] %vm1168_vm4, %v9407_v55 }
 0x219   : > { %v9425_v10 = vld [vmem:[#allocation3 + $0x10] sm:$0xff]  ;;  %3633 = vst.msk [vmem:[#allocation3 + $0x28] sm:$0xff] %vm1168_vm4, %v8904_v57  ;;  %v2644_v57 = vsel %vm1271_vm3, %v7957_v7, 0 }
 0x21a   : > { %3756 = vst.msk [vmem:[#allocation3 + $0x10] sm:$0xff] %vm1168_vm4, %v9101_v43  ;;  %7027 = vmatmul.mubr.msk.bf16.vlgmr.msra.gmra.mrb[0].mxu1 %vm1168_vm4, %v10630_v31  ;;  %v9457_v43 = vld [vmem:[#allocation3] sm:$0xff]  ;;  %v9465_v37 = vld [vmem:[#allocation2 + $0x7c] sm:$0xff] }
 0x21b   : > { %7035 = vmatpush3.bf16.msra.mxu1 %v7956_v60  ;;  %7030 = vmatprep.mubr.msk.bf16.mxu1 %vm1168_vm4, %v10631_v1  ;;  %4010 = vst.msk [vmem:[#allocation3] sm:$0xff] %vm1168_vm4, %v9221_v63 }
 0x21c   : > { %7838 = vmatprep.subr.msk.bf16.mxu1 %vm1271_vm3, %v7957_v7  ;;  %v9459_v2 = vld [vmem:[#allocation3 + $0x20] sm:$0xff] }
 0x21d   : > { %v9461_v38 = vld [vmem:[#allocation3 + $0x8] sm:$0xff]  ;;  %3760 = vst.msk [vmem:[#allocation3 + $0x20] sm:$0xff] %vm1168_vm4, %v3759_v39 }
 0x21e   : > { %v9468_v0 = vld [vmem:[#allocation3 + $0x30] sm:$0xff]  ;;  %3883 = vst.msk [vmem:[#allocation3 + $0x8] sm:$0xff] %vm1168_vm4, %v9163_v36  ;;  %v9474_v7 = vld [vmem:[#allocation3 + $0x18] sm:$0xff] }
 0x21f   : > { %7037 = vmatpush3.bf16.msra.mxu1 %v2644_v57  ;;  %v9476_v1 = vld [vmem:[#allocation3 + $0x38] sm:$0xff]  ;;  %3764 = vst.msk [vmem:[#allocation3 + $0x30] sm:$0xff] %vm1168_vm4, %v9225_v24  ;;  %3887 = vst.msk [vmem:[#allocation3 + $0x18] sm:$0xff] %vm1168_vm4, %v9219_v9  ;;  %v10632_v9 = vpack.c.bf16 %v9014_v30, %v8952_v35  ;;  %v10633_v57 = vpack.c.bf16 %v8944_v28, %v8896_v40 }
 0x220   : > { %v9478_v31 = vld [vmem:[#allocation3 + $0x28] sm:$0xff]  ;;  %7046 = vmatprep.subr.bf16.mxu1 %v7958_v27  ;;  %3637 = vst.msk [vmem:[#allocation3 + $0x38] sm:$0xff] %vm1168_vm4, %v9465_v37  ;;  %v10664_v24 = vld [vmem:[#allocation30_spill] sm:$0xff] }
 0x221   : > { %v9482_v63 = vld [vmem:[#allocation3 + $0x10] sm:$0xff]  ;;  %3762 = vst.msk [vmem:[#allocation3 + $0x28] sm:$0xff] %vm1168_vm4, %v8948_v58 }
 0x222   : > { %3885 = vst.msk [vmem:[#allocation3 + $0x10] sm:$0xff] %vm1168_vm4, %v9165_v51  ;;  %7031 = vmatmul.mubr.msk.bf16.gmra.mrb[4].mxu1 %vm1168_vm4, %v10632_v9  ;;  %v9506_v60 = vld [vmem:[#allocation3] sm:$0xff]  ;;  %v3888_v58 = vld [vmem:[#allocation2 + $0x61] sm:$0xff] }
 0x223   : > { %7038 = vmatprep.mubr.msk.bf16.mxu1 %vm1168_vm4, %v10633_v57  ;;  %4139 = vst.msk [vmem:[#allocation3] sm:$0xff] %vm1168_vm4, %v9277_v4  ;;  %v3765_v51 = vld [vmem:[#allocation2 + $0x84] sm:$0xff]  ;;  %v7959_v57 = vld [vmem:[%s10522_s3 + $0x98] ss:$0 sps:$4 sm:$0x33]  }
 0x224   : > { %v9508_v36 = vld [vmem:[#allocation3 + $0x20] sm:$0xff] }
 0x225   : > { %v9510_v39 = vld [vmem:[#allocation3 + $0x8] sm:$0xff]  ;;  %3889 = vst.msk [vmem:[#allocation3 + $0x20] sm:$0xff] %vm1168_vm4, %v3888_v58 }
 0x226   : > { %v9515_v35 = vld [vmem:[#allocation3 + $0x30] sm:$0xff]  ;;  %4012 = vst.msk [vmem:[#allocation3 + $0x8] sm:$0xff] %vm1168_vm4, %v9231_v44  ;;  %v9521_v28 = vld [vmem:[#allocation3 + $0x18] sm:$0xff] }
 0x227   : > { %v9523_v30 = vld [vmem:[#allocation3 + $0x38] sm:$0xff]  ;;  %3893 = vst.msk [vmem:[#allocation3 + $0x30] sm:$0xff] %vm1168_vm4, %v9281_v41  ;;  %4016 = vst.msk [vmem:[#allocation3 + $0x18] sm:$0xff] %vm1168_vm4, %v9275_v6  ;;  %v10634_v6 = vpack.c.bf16 %v8958_v23, %v8966_v49  ;;  %v7960_v41 = vld [vmem:[%s10522_s3 + $0x9c] sm:$0xff]  }
 0x228   : > { %v9525_v9 = vld [vmem:[#allocation3 + $0x28] sm:$0xff]  ;;  %3766 = vst.msk [vmem:[#allocation3 + $0x38] sm:$0xff] %vm1168_vm4, %v3765_v51  ;;  %v10635_v51 = vpack.c.bf16 %v9016_v61, %v8996_v52  ;;  %v4017_v23 = vld [vmem:[#allocation2 + $0x62] sm:$0xff] }
 0x229   : > { %v9529_v4 = vld [vmem:[#allocation3 + $0x10] sm:$0xff]  ;;  %3891 = vst.msk [vmem:[#allocation3 + $0x28] sm:$0xff] %vm1168_vm4, %v9002_v19  ;;  %v2773_v19 = vsel %vm1271_vm3, %v7959_v57, 0 }
 0x22a   : > { %4014 = vst.msk [vmem:[#allocation3 + $0x10] sm:$0xff] %vm1168_vm4, %v9244_v13  ;;  %7039 = vmatmul.mubr.msk.bf16.vlgmr.msra.gmra.mrb[0].mxu1 %vm1168_vm4, %v10634_v6  ;;  %v9560_v13 = vld [vmem:[#allocation3] sm:$0xff]  ;;  %v3894_v52 = vld [vmem:[#allocation2 + $0x85] sm:$0xff]  ;;  %v10675_v44 = vld [vmem:[#allocation33_spill] sm:$0xff] }
 0x22b   : > { %7047 = vmatpush3.bf16.msra.mxu1 %v7958_v27  ;;  %7042 = vmatprep.mubr.msk.bf16.mxu1 %vm1168_vm4, %v10635_v51  ;;  %4268 = vst.msk [vmem:[#allocation3] sm:$0xff] %vm1168_vm4, %v9350_v26  ;;  %v4146_v27 = vld [vmem:[#allocation2 + $0x63] sm:$0xff] }
 0x22c   : > { %7839 = vmatprep.subr.msk.bf16.mxu1 %vm1271_vm3, %v7959_v57  ;;  %v9562_v40 = vld [vmem:[#allocation3 + $0x20] sm:$0xff] }
 0x22d   : > { %v9564_v49 = vld [vmem:[#allocation3 + $0x8] sm:$0xff]  ;;  %4018 = vst.msk [vmem:[#allocation3 + $0x20] sm:$0xff] %vm1168_vm4, %v4017_v23 }
 0x22e   : > { %v9569_v61 = vld [vmem:[#allocation3 + $0x30] sm:$0xff]  ;;  %4141 = vst.msk [vmem:[#allocation3 + $0x8] sm:$0xff] %vm1168_vm4, %v9287_v34  ;;  %v9575_v57 = vld [vmem:[#allocation3 + $0x18] sm:$0xff] }
 0x22f   : > { %7049 = vmatpush3.bf16.msra.mxu1 %v2773_v19  ;;  %v9577_v6 = vld [vmem:[#allocation3 + $0x38] sm:$0xff]  ;;  %4022 = vst.msk [vmem:[#allocation3 + $0x30] sm:$0xff] %vm1168_vm4, %v9344_v3  ;;  %4145 = vst.msk [vmem:[#allocation3 + $0x18] sm:$0xff] %vm1168_vm4, %v9340_v11  ;;  %v10636_v11 = vpack.c.bf16 %v9061_v32, %v9006_v25  ;;  %v10637_v19 = vpack.c.bf16 %v8998_v46, %v8940_v56 }
 0x230   : > { %v9579_v51 = vld [vmem:[#allocation3 + $0x28] sm:$0xff]  ;;  %7058 = vmatprep.subr.bf16.mxu1 %v7960_v41  ;;  %3895 = vst.msk [vmem:[#allocation3 + $0x38] sm:$0xff] %vm1168_vm4, %v3894_v52  ;;  %v4023_v34 = vld [vmem:[#allocation2 + $0x86] sm:$0xff] }
 0x231   : > { %v9583_v26 = vld [vmem:[#allocation3 + $0x10] sm:$0xff]  ;;  %4020 = vst.msk [vmem:[#allocation3 + $0x28] sm:$0xff] %vm1168_vm4, %v9049_v59 }
 0x232   : > { %4143 = vst.msk [vmem:[#allocation3 + $0x10] sm:$0xff] %vm1168_vm4, %v9300_v8  ;;  %7043 = vmatmul.mubr.msk.bf16.gmra.mrb[4].mxu1 %vm1168_vm4, %v10636_v11  ;;  %v4275_v11 = vld [vmem:[#allocation2 + $0x64] sm:$0xff] }
 0x233   : > { %7050 = vmatprep.mubr.msk.bf16.mxu1 %vm1168_vm4, %v10637_v19  ;;  %v10639_v19 = vld [vmem:[#allocation20_spill] sm:$0xff] }
 0x234   : > { %v9606_v52 = vld [vmem:[#allocation3 + $0x20] sm:$0xff] }
 0x235   : > { %v9608_v59 = vld [vmem:[#allocation3 + $0x8] sm:$0xff]  ;;  %4147 = vst.msk [vmem:[#allocation3 + $0x20] sm:$0xff] %vm1168_vm4, %v4146_v27  ;;  %v7961_v27 = vld [vmem:[%s10522_s3 + $0xa4] ss:$0 sps:$4 sm:$0x33]  }
 0x236   : > { %v9611_v3 = vld [vmem:[#allocation3 + $0x30] sm:$0xff]  ;;  %4270 = vst.msk [vmem:[#allocation3 + $0x8] sm:$0xff] %vm1168_vm4, %v9352_v5  ;;  %v9617_v32 = vld [vmem:[#allocation3 + $0x18] sm:$0xff] }
 0x237   : > { %v9619_v56 = vld [vmem:[#allocation3 + $0x38] sm:$0xff]  ;;  %4151 = vst.msk [vmem:[#allocation3 + $0x30] sm:$0xff] %vm1168_vm4, %v9407_v55  ;;  %4274 = vst.msk [vmem:[#allocation3 + $0x18] sm:$0xff] %vm1168_vm4, %v9401_v21  ;;  %v10638_v21 = vpack.c.bf16 %v9012_v47, %v9020_v22 }
 0x238   : > { %v9621_v46 = vld [vmem:[#allocation3 + $0x28] sm:$0xff]  ;;  %4024 = vst.msk [vmem:[#allocation3 + $0x38] sm:$0xff] %vm1168_vm4, %v4023_v34  ;;  %v7962_v55 = vld [vmem:[%s10522_s3 + $0xa8] sm:$0xff]  }
 0x239   : > { %v9625_v8 = vld [vmem:[#allocation3 + $0x10] sm:$0xff]  ;;  %4149 = vst.msk [vmem:[#allocation3 + $0x28] sm:$0xff] %vm1168_vm4, %v9112_v20  ;;  %v10640_v34 = vld [vmem:[#allocation16_spill] sm:$0xff]  ;;  %v2902_v20 = vsel %vm1271_vm3, %v7961_v27, 0 }
 0x23a   : > { %4272 = vst.msk [vmem:[#allocation3 + $0x10] sm:$0xff] %vm1168_vm4, %v9366_v18  ;;  %7051 = vmatmul.mubr.msk.bf16.vlgmr.msra.gmra.mrb[0].mxu1 %vm1168_vm4, %v10638_v21  ;;  %v10641_v25 = vpack.c.bf16 %v10639_v19, %v10640_v34  ;;  %v10642_v21 = vld [vmem:[#allocation27_spill] sm:$0xff]  ;;  %v10643_v19 = vld [vmem:[#allocation18_spill] sm:$0xff] }
 0x23b   : > { %7059 = vmatpush3.bf16.msra.mxu1 %v7960_v41  ;;  %v4152_v41 = vld [vmem:[#allocation2 + $0x87] sm:$0xff]  ;;  %v10644_v34 = vpack.c.bf16 %v10642_v21, %v10643_v19  ;;  %v10649_v19 = vld [vmem:[#allocation21_spill] sm:$0xff] }
 0x23c   : > { %7054 = vmatprep.mubr.msk.bf16.mxu1 %vm1168_vm4, %v10641_v25  ;;  %7840 = vmatprep.subr.msk.bf16.mxu1 %vm1271_vm3, %v7961_v27  ;;  %v9656_v18 = vld [vmem:[#allocation3 + $0x20] sm:$0xff]  ;;  %v10646_v5 = vld [vmem:[#allocation14_spill] sm:$0xff] }
 0x23d   : > { %4276 = vst.msk [vmem:[#allocation3 + $0x20] sm:$0xff] %vm1168_vm4, %v4275_v11  ;;  %v4281_v27 = vld [vmem:[#allocation2 + $0x88] sm:$0xff] }
 0x23e   : > { %v9659_v47 = vld [vmem:[#allocation3 + $0x30] sm:$0xff]  ;;  %v10648_v21 = vld [vmem:[#allocation19_spill] sm:$0xff] }
 0x23f   : > { %7061 = vmatpush3.bf16.msra.mxu1 %v2902_v20  ;;  %v9661_v22 = vld [vmem:[#allocation3 + $0x38] sm:$0xff]  ;;  %4280 = vst.msk [vmem:[#allocation3 + $0x30] sm:$0xff] %vm1168_vm4, %v9465_v37  ;;  %v10645_v20 = vld [vmem:[#allocation17_spill] sm:$0xff] }
 0x240   : > { %v9663_v25 = vld [vmem:[#allocation3 + $0x28] sm:$0xff]  ;;  %7070 = vmatprep.subr.bf16.mxu1 %v7962_v55  ;;  %4153 = vst.msk [vmem:[#allocation3 + $0x38] sm:$0xff] %vm1168_vm4, %v4152_v41  ;;  %v10647_v37 = vpack.c.bf16 %v10645_v20, %v10646_v5  ;;  %v7963_v41 = vld [vmem:[%s10522_s3 + $0xb0] ss:$0 sps:$4 sm:$0x33]  }
 0x241   : > { %4278 = vst.msk [vmem:[#allocation3 + $0x28] sm:$0xff] %vm1168_vm4, %v9168_v12  ;;  %v10651_v5 = vld [vmem:[#allocation28_spill] sm:$0xff]  ;;  %v10652_v20 = vld [vmem:[#allocation23_spill] sm:$0xff]  ;;  %v3031_v11 = vsel %vm1271_vm3, %v7963_v41, 0 }
 0x242   : > { %7055 = vmatmul.mubr.msk.bf16.gmra.mrb[4].mxu1 %vm1168_vm4, %v10644_v34  ;;  %v10650_v34 = vpack.c.bf16 %v10648_v21, %v10649_v19  ;;  %v7964_v12 = vld [vmem:[%s10522_s3 + $0xb4] sm:$0xff]  }
 0x243   : > { %7062 = vmatprep.mubr.msk.bf16.mxu1 %vm1168_vm4, %v10647_v37  ;;  %v10653_v37 = vpack.c.bf16 %v10651_v5, %v10652_v20  ;;  %v10655_v21 = vld [vmem:[#allocation25_spill] sm:$0xff]  ;;  %v10660_v20 = vld [vmem:[#allocation26_spill] sm:$0xff] }
 0x247   : > { %v9682_v23 = vld [vmem:[#allocation3 + $0x38] sm:$0xff] }
 0x248   : > { %4282 = vst.msk [vmem:[#allocation3 + $0x38] sm:$0xff] %vm1168_vm4, %v4281_v27  ;;  %v10654_v27 = vld [vmem:[#allocation34_spill] sm:$0xff] }
 0x249   : > { %v10656_v19 = vpack.c.bf16 %v10654_v27, %v10655_v21 }
 0x24a   : > { %7063 = vmatmul.mubr.msk.bf16.vlgmr.msra.gmra.mrb[0].mxu1 %vm1168_vm4, %v10650_v34  ;;  %v10658_v34 = vld [vmem:[#allocation15_spill] sm:$0xff] }
 0x24b   : > { %7071 = vmatpush3.bf16.msra.mxu1 %v7962_v55  ;;  %7066 = vmatprep.mubr.msk.bf16.mxu1 %vm1168_vm4, %v10653_v37  ;;  %v10657_v55 = vld [vmem:[#allocation24_spill] sm:$0xff]  ;;  %v10661_v37 = vld [vmem:[#allocation29_spill] sm:$0xff] }
 0x24c   : > { %7841 = vmatprep.subr.msk.bf16.mxu1 %vm1271_vm3, %v7963_v41  ;;  %v10659_v5 = vpack.c.bf16 %v10657_v55, %v10658_v34  ;;  %v7965_v41 = vld [vmem:[%s10522_s3 + $0xbc] ss:$0 sps:$4 sm:$0x33]   ;;  %v10662_v58 = vpack.c.bf16 %v10660_v20, %v10661_v37  ;;  %v10673_v37 = vld [vmem:[#allocation22_spill] sm:$0xff] }
 0x24d   : > { %v3160_v21 = vsel %vm1271_vm3, %v7965_v41, 0 }
 0x24f   : > { %7073 = vmatpush3.bf16.msra.mxu1 %v3031_v11  ;;  %v10663_v11 = vld [vmem:[#allocation35_spill] sm:$0xff] }
 0x250   : > { %7082 = vmatprep.subr.bf16.mxu1 %v7964_v12  ;;  %v10665_v27 = vpack.c.bf16 %v10663_v11, %v10664_v24  ;;  %v10669_v24 = vld [vmem:[#allocation40_spill] sm:$0xff] }
 0x252   : > { %7067 = vmatmul.mubr.msk.bf16.gmra.mrb[4].mxu1 %vm1168_vm4, %v10656_v19  ;;  %v7966_v19 = vld [vmem:[%s10522_s3 + $0xc0] sm:$0xff]  }
 0x253   : > { %7074 = vmatprep.mubr.msk.bf16.mxu1 %vm1168_vm4, %v10659_v5 }
 0x25a   : > { %7075 = vmatmul.mubr.msk.bf16.vlgmr.msra.gmra.mrb[0].mxu1 %vm1168_vm4, %v10662_v58 }
 0x25b   : > { %7083 = vmatpush3.bf16.msra.mxu1 %v7964_v12  ;;  %7078 = vmatprep.mubr.msk.bf16.mxu1 %vm1168_vm4, %v10665_v27  ;;  %v10670_v12 = vld [vmem:[#allocation32_spill] sm:$0xff]  ;;  %v7967_v27 = vld [vmem:[%s10522_s3 + $0xc8] ss:$0 sps:$4 sm:$0x33]  }
 0x25c   : > { %7842 = vmatprep.subr.msk.bf16.mxu1 %vm1271_vm3, %v7965_v41  ;;  %v9727_v55 = vpop.f32.mrb[72].mxu0  ;;  %v10671_v20 = vpack.c.bf16 %v10669_v24, %v10670_v12  ;;  %v10672_v41 = vld [vmem:[#allocation31_spill] sm:$0xff]  ;;  %v3289_v12 = vsel %vm1271_vm3, %v7967_v27, 0 }
 0x25d   : > { %v9729_v34 = vpop.f32.mrb[73].mxu0  ;;  %v10674_v11 = vpack.c.bf16 %v10672_v41, %v10673_v37 }
 0x25e   : > { %10666 = vst [vmem:[#allocation20_spill] sm:$0xff] %v9729_v34  ;;  %v9731_v5 = vpop.f32.mrb[74].mxu0  ;;  %v10679_v34 = vld [vmem:[#allocation10_spill] sm:$0xff] }
 0x25f   : > { %10667 = vst [vmem:[#allocation16_spill] sm:$0xff] %v9731_v5  ;;  %7085 = vmatpush3.bf16.msra.mxu1 %v3160_v21  ;;  %v9733_v58 = vpop.f32.mrb[75].mxu0  ;;  %v10676_v5 = vld [vmem:[#allocation36_spill] sm:$0xff] }
 0x260   : > { %10668 = vst [vmem:[#allocation27_spill] sm:$0xff] %v9733_v58  ;;  %7094 = vmatprep.subr.bf16.mxu1 %v7966_v19  ;;  %v10677_v21 = vpack.c.bf16 %v10675_v44, %v10676_v5  ;;  %v10678_v58 = vld [vmem:[#allocation41_spill] sm:$0xff] }
 0x261   : > { %v10680_v24 = vpack.c.bf16 %v10678_v58, %v10679_v34  ;;  %v10684_v34 = vld [vmem:[#allocation38_spill] sm:$0xff]  ;;  %v10686_v58 = vld [vmem:[#allocation37_spill] sm:$0xff] }
 0x262   : > { %7079 = vmatmul.mubr.msk.bf16.gmra.mrb[4].mxu1 %vm1168_vm4, %v10671_v20  ;;  %v7968_v20 = vld [vmem:[%s10522_s3 + $0xcc] sm:$0xff]   ;;  %v10685_v5 = vpack.c.bf16 %v9302_v14, %v10684_v34 }
 0x263   : > { %7086 = vmatprep.mubr.msk.bf16.mxu1 %vm1168_vm4, %v10674_v11  ;;  %v10687_v11 = vld [vmem:[#allocation8_spill] sm:$0xff] }
 0x26a   : > { %7087 = vmatmul.mubr.msk.bf16.vlgmr.msra.gmra.mrb[0].mxu1 %vm1168_vm4, %v10677_v21  ;;  %v7969_v21 = vld [vmem:[%s10522_s3 + $0xd4] ss:$0 sps:$4 sm:$0x33]  }
 0x26b   : > { %7095 = vmatpush3.bf16.msra.mxu1 %v7966_v19  ;;  %7090 = vmatprep.mubr.msk.bf16.mxu1 %vm1168_vm4, %v10680_v24  ;;  %v10689_v24 = vld [vmem:[#allocation39_spill] sm:$0xff]  ;;  %v3418_v34 = vsel %vm1271_vm3, %v7969_v21, 0 }
 0x26c   : > { %7843 = vmatprep.subr.msk.bf16.mxu1 %vm1271_vm3, %v7967_v27  ;;  %v10688_v27 = vpack.c.bf16 %v10686_v58, %v10687_v11  ;;  %v10697_v58 = vld [vmem:[#allocation11_spill] sm:$0xff]  ;;  %v10699_v11 = vld [vmem:[#allocation44_spill] sm:$0xff] }
 0x26d   : > { %v9759_v41 = vpop.f32.mrb[76].mxu0 }
 0x26e   : > { %v9761_v37 = vpop.f32.mrb[77].mxu0 }
 0x26f   : > { %10681 = vst [vmem:[#allocation18_spill] sm:$0xff] %v9761_v37  ;;  %v9763_v44 = vpop.f32.mrb[78].mxu0  ;;  %7097 = vmatpush3.bf16.msra.mxu1 %v3289_v12  ;;  %v10693_v37 = vld [vmem:[#allocation12_spill] sm:$0xff] }
 0x270   : > { %10682 = vst [vmem:[#allocation17_spill] sm:$0xff] %v9763_v44  ;;  %v9765_v19 = vpop.f32.mrb[79].mxu0  ;;  %7106 = vmatprep.subr.bf16.mxu1 %v7968_v20  ;;  %v10690_v44 = vld [vmem:[#allocation42_spill] sm:$0xff] }
 0x271   : > { %10683 = vst [vmem:[#allocation14_spill] sm:$0xff] %v9765_v19  ;;  %v10691_v12 = vpack.c.bf16 %v10689_v24, %v10690_v44  ;;  %v10692_v19 = vld [vmem:[#allocation45_spill] sm:$0xff]  ;;  %v10695_v44 = vpack.c.bf16 %v9368_v50, %v9292_v15  ;;  %v10702_v50 = vpack.c.bf16 %v9370_v48, %v9346_v33  ;;  %v7972_v24 = vld [vmem:[%s10522_s3 + $0xe4] sm:$0xff]   ;;  %v7973_v33 = vld [vmem:[%s10522_s3 + $0xec] ss:$0 sps:$4 sm:$0x33]  }
 0x272   : > { %7091 = vmatmul.mubr.msk.bf16.gmra.mrb[4].mxu1 %vm1168_vm4, %v10685_v5  ;;  %v10694_v14 = vpack.c.bf16 %v10692_v19, %v10693_v37  ;;  %v7970_v5 = vld [vmem:[%s10522_s3 + $0xd8] sm:$0xff]   ;;  %v7971_v19 = vld [vmem:[%s10522_s3 + $0xe0] ss:$0 sps:$4 sm:$0x33]  }
 0x273   : > { %7098 = vmatprep.mubr.msk.bf16.mxu1 %vm1168_vm4, %v10688_v27  ;;  %v10700_v27 = vld [vmem:[#allocation46_spill] sm:$0xff]  ;;  %v3547_v15 = vsel %vm1271_vm3, %v7971_v19, 0 }
 0x27a   : > { %7099 = vmatmul.mubr.msk.bf16.vlgmr.msra.gmra.mrb[0].mxu1 %vm1168_vm4, %v10691_v12  ;;  %v10703_v12 = vpack.c.bf16 %v9419_v42, %v9358_v45  ;;  %v10709_v45 = vpack.c.bf16 %v9421_v54, %v9399_v16  ;;  %v3676_v42 = vsel %vm1271_vm3, %v7973_v33, 0  ;;  %v7975_v54 = vld [vmem:[%s10522_s3 + $0xf8] ss:$0 sps:$4 sm:$0x33]  }
 0x27b   : > { %7107 = vmatpush3.bf16.msra.mxu1 %v7968_v20  ;;  %7102 = vmatprep.mubr.msk.bf16.mxu1 %vm1168_vm4, %v10694_v14  ;;  %v10696_v20 = vld [vmem:[#allocation43_spill] sm:$0xff] }
 0x27c   : > { %7844 = vmatprep.subr.msk.bf16.mxu1 %vm1271_vm3, %v7969_v21  ;;  %v10698_v37 = vpack.c.bf16 %v10696_v20, %v10697_v58  ;;  %v10701_v21 = vpack.c.bf16 %v10699_v11, %v10700_v27  ;;  %v10704_v14 = vld [vmem:[#allocation47_spill] sm:$0xff]  ;;  %v10711_v58 = vld [vmem:[#allocation49_spill] sm:$0xff] }
 0x27d   : > { %v7974_v20 = vld [vmem:[%s10522_s3 + $0xf0] sm:$0xff]   ;;  %v7976_v11 = vld [vmem:[%s10522_s3 + $0xfc] sm:$0xff]  }
 0x27f   : > { %7109 = vmatpush3.bf16.msra.mxu1 %v3418_v34  ;;  %v10705_v34 = vld [vmem:[#allocation9_spill] sm:$0xff] }
 0x280   : > { %7118 = vmatprep.subr.bf16.mxu1 %v7970_v5  ;;  %v10706_v48 = vpack.c.bf16 %v10704_v14, %v10705_v34  ;;  %v6366_v14 = vld [vmem:[%s10524_s5 + $0x48] sm:$0xff]  ;;  %v6367_v34 = vld [vmem:[%s10524_s5 + $0x50] sm:$0xff] }
 0x282   : > { %7103 = vmatmul.mubr.msk.bf16.gmra.mrb[4].mxu1 %vm1168_vm4, %v10695_v44 }
 0x283   : > { %7110 = vmatprep.mubr.msk.bf16.mxu1 %vm1168_vm4, %v10698_v37  ;;  %v10712_v37 = vld [vmem:[#allocation13_spill] sm:$0xff] }
 0x284   : > { %v10713_v16 = vpack.c.bf16 %v10711_v58, %v10712_v37 }
 0x28a   : > { %7111 = vmatmul.mubr.msk.bf16.vlgmr.msra.gmra.mrb[0].mxu1 %vm1168_vm4, %v10701_v21  ;;  %v4290_v21 = vld [vmem:[#allocation3 + $0x38] sm:$0xff] }
 0x28b   : > { %7119 = vmatpush3.bf16.msra.mxu1 %v7970_v5  ;;  %7114 = vmatprep.mubr.msk.bf16.mxu1 %vm1168_vm4, %v10702_v50  ;;  %v10707_v5 = vld [vmem:[#allocation48_spill] sm:$0xff]  ;;  %v4289_v50 = vld [vmem:[#allocation3 + $0x30] sm:$0xff] }
 0x28c   : > { %7845 = vmatprep.subr.msk.bf16.mxu1 %vm1271_vm3, %v7971_v19  ;;  %v10708_v44 = vpack.c.bf16 %v9364_v62, %v10707_v5  ;;  %v10710_v62 = vpack.c.bf16 %v9476_v1, %v9411_v17  ;;  %v10714_v19 = vpack.c.bf16 %v9417_v29, %v9425_v10  ;;  %v10715_v17 = vpack.c.bf16 %v9478_v31, %v9459_v2  ;;  %v7977_v10 = vld [vmem:[%s10522_s3 + $0x104] ss:$0 sps:$4 sm:$0x33]  }
 0x28d   : > { %v3805_v1 = vsel %vm1271_vm3, %v7975_v54, 0  ;;  %v10716_v29 = vpack.c.bf16 %v9523_v30, %v9468_v0  ;;  %v10717_v2 = vpack.c.bf16 %v9461_v38, %v9397_v53  ;;  %v10718_v31 = vpack.c.bf16 %v9474_v7, %v9482_v63  ;;  %v7978_v38 = vld [vmem:[%s10522_s3 + $0x108] sm:$0xff]   ;;  %v6369_v5 = vld [vmem:[%s10524_s5 + $0x60] sm:$0xff] }
 0x28e   : > { %v10719_v0 = vpack.c.bf16 %v9525_v9, %v9508_v36  ;;  %v3934_v53 = vsel %vm1271_vm3, %v7977_v10, 0  ;;  %v10720_v7 = vpack.c.bf16 %v9577_v6, %v9515_v35  ;;  %v10721_v63 = vpack.c.bf16 %v9510_v39, %v9457_v43  ;;  %v7979_v36 = vld [vmem:[%s10522_s3 + $0x110] ss:$0 sps:$4 sm:$0x33]   ;;  %v7980_v39 = vld [vmem:[%s10522_s3 + $0x114] sm:$0xff]  }
 0x28f   : > { %7121 = vmatpush3.bf16.msra.mxu1 %v3547_v15  ;;  %v10722_v30 = vpack.c.bf16 %v9521_v28, %v9529_v4  ;;  %v10723_v35 = vpack.c.bf16 %v9579_v51, %v9562_v40  ;;  %v4063_v43 = vsel %vm1271_vm3, %v7979_v36, 0  ;;  %v10724_v28 = vpack.c.bf16 %v9619_v56, %v9569_v61  ;;  %v7981_v9 = vld [vmem:[%s10522_s3 + $0x11c] ss:$0 sps:$4 sm:$0x33]  }
 0x290   : > { %7130 = vmatprep.subr.bf16.mxu1 %v7972_v24  ;;  %v10725_v40 = vpack.c.bf16 %v9564_v49, %v9506_v60  ;;  %v10726_v4 = vpack.c.bf16 %v9575_v57, %v9583_v26  ;;  %v10727_v61 = vpack.c.bf16 %v9621_v46, %v9606_v52  ;;  %v4192_v60 = vsel %vm1271_vm3, %v7981_v9, 0  ;;  %v7982_v49 = vld [vmem:[%s10522_s3 + $0x120] sm:$0xff]   ;;  %v7983_v51 = vld [vmem:[%s10522_s3 + $0x128] ss:$0 sps:$4 sm:$0x33]   ;;  %v4284_v52 = vld [vmem:[#allocation3 + $0x8] sm:$0xff] }
 0x291   : > { %v10728_v57 = vpack.c.bf16 %v9661_v22, %v9611_v3  ;;  %v10729_v6 = vpack.c.bf16 %v9608_v59, %v9560_v13  ;;  %v10730_v26 = vpack.c.bf16 %v9617_v32, %v9625_v8  ;;  %v10731_v3 = vpack.c.bf16 %v9663_v25, %v9656_v18  ;;  %v4283_v59 = vld [vmem:[#allocation3] sm:$0xff]  ;;  %v4285_v32 = vld [vmem:[#allocation3 + $0x10] sm:$0xff]  ;;  %v4286_v8 = vld [vmem:[#allocation3 + $0x18] sm:$0xff] }
 0x292   : > { %7115 = vmatmul.mubr.msk.bf16.gmra.mrb[4].mxu1 %vm1168_vm4, %v10703_v12  ;;  %v4321_v13 = vsel %vm1271_vm3, %v7983_v51, 0  ;;  %v4291_v56 = vpack.c.bf16 %v4284_v52, %v4283_v59  ;;  %v10732_v46 = vpack.c.bf16 %v9682_v23, %v9659_v47  ;;  %v4288_v18 = vld [vmem:[#allocation3 + $0x28] sm:$0xff]  ;;  %v4292_v22 = vpack.c.bf16 %v4286_v8, %v4285_v32  ;;  %v4287_v25 = vld [vmem:[#allocation3 + $0x20] sm:$0xff]  ;;  %v6365_v47 = vld [vmem:[%s10524_s5 + $0x40] sm:$0xff] }
 0x293   : > { %7122 = vmatprep.mubr.msk.bf16.mxu1 %vm1168_vm4, %v10706_v48  ;;  %v4293_v27 = vpack.c.bf16 %v4288_v18, %v4287_v25  ;;  %v4294_v15 = vpack.c.bf16 %v4290_v21, %v4289_v50  ;;  %v6364_v23 = vld [vmem:[%s10524_s5 + $0x38] sm:$0xff]  ;;  %v7489_v48 = vpack.c.bf16 %v6367_v34, %v6366_v14  ;;  %v4437_v21 = vld [vmem:[%s10524_s5 + $0x10] sm:$0xff] }
 0x294   : > { %v7486_v12 = vpack.c.bf16 %v6365_v47, %v6364_v23  ;;  %v4438_v50 = vld [vmem:[%s10524_s5 + $0x18] sm:$0xff]  ;;  %v4439_v23 = vld [vmem:[%s10524_s5 + $0x20] sm:$0xff]  ;;  %v4440_v47 = vld [vmem:[%s10524_s5 + $0x28] sm:$0xff] }
 0x29a   : > { %7123 = vmatmul.mubr.msk.bf16.vlgmr.msra.gmra.mrb[0].mxu1 %vm1168_vm4, %v10708_v44  ;;  %v8055_v44 = vmov 0.0  }
 0x29b   : > { %7131 = vmatpush3.bf16.msra.mxu1 %v7972_v24  ;;  %7126 = vmatprep.mubr.msk.bf16.mxu1 %vm1168_vm4, %v10709_v45  ;;  %v8053_v24 = vmov 0.0|0.0  }
 0x29c   : > { %7846 = vmatprep.subr.msk.bf16.mxu1 %vm1271_vm3, %v7973_v33  ;;  %7485 = vmatprep.subr.bf16.mxu0 %v8053_v24  ;;  %v6368_v33 = vld [vmem:[%s10524_s5 + $0x58] sm:$0xff] }
 0x29d   : > { %7487 = vmatpush3.bf16.msra.mxu0 %v7486_v12  ;;  %7216 = vmatprep.mubr.msk.f32.mxu0 %vm8054_vm5, %v8055_v44  ;;  %v7492_v45 = vpack.c.bf16 %v6369_v5, %v6368_v33  ;;  %v7501_v12 = vpack.c.bf16 %v4440_v47, %v4439_v23 }
 0x29e   : > { %7488 = vmatprep.subr.bf16.mxu0 %v8053_v24 }
 0x29f   : > { %7133 = vmatpush3.bf16.msra.mxu1 %v3676_v42  ;;  %v6370_v42 = vld [vmem:[%s10524_s5 + $0x68] sm:$0x3] }
 0x2a0   : > { %7142 = vmatprep.subr.bf16.mxu1 %v7974_v20 }
 0x2a1   : > { %7490 = vmatpush3.bf16.msra.mxu0 %v7489_v48 }
 0x2a2   : > { %7127 = vmatmul.mubr.msk.bf16.gmra.mrb[4].mxu1 %vm1168_vm4, %v10710_v62  ;;  %7491 = vmatprep.subr.bf16.mxu0 %v8053_v24  ;;  %v6363_v62 = vld [vmem:[%s10523_s4] ss:$0 sm:$0xff] }
 0x2a3   : > { %7134 = vmatprep.mubr.msk.bf16.mxu1 %vm1168_vm4, %v10713_v16  ;;  %v10733_v16 = vld [vmem:[#allocation20_spill] sm:$0xff] }
 0x2a5   : > { %7493 = vmatpush3.bf16.msra.mxu0 %v7492_v45  ;;  %v6375_v45 = vld [vmem:[%s10524_s5 + $0x70] sm:$0xff] }
 0x2a6   : > { %7214 = vmatprep.subr.mxu0 %v8055_v44 }
 0x2a9   : > { %7215 = vmatpush3.msk.msra.mxu0 %vm1271_vm3, %v6370_v42  ;;  %v6376_v42 = vld [vmem:[%s10524_s5 + $0x78] sm:$0xff] }
 0x2aa   : > { %7135 = vmatmul.mubr.msk.bf16.vlgmr.msra.gmra.mrb[0].mxu1 %vm1168_vm4, %v10714_v19  ;;  %7494 = vmatprep.subr.bf16.mxu0 %v8053_v24 }
 0x2ab   : > { %7143 = vmatpush3.bf16.msra.mxu1 %v7974_v20  ;;  %7138 = vmatprep.mubr.msk.bf16.mxu1 %vm1168_vm4, %v10715_v17 }
 0x2ac   : > { %7847 = vmatprep.subr.msk.bf16.mxu1 %vm1271_vm3, %v7975_v54 }
 0x2af   : > { %7145 = vmatpush3.bf16.msra.mxu1 %v3805_v1  ;;  %v10734_v1 = vld [vmem:[#allocation16_spill] sm:$0xff] }
 0x2b0   : > { %7154 = vmatprep.subr.bf16.mxu1 %v7976_v11 }
 0x2b2   : > { %7139 = vmatmul.mubr.msk.bf16.gmra.mrb[4].mxu1 %vm1168_vm4, %v10716_v29 }
 0x2b3   : > { %7146 = vmatprep.mubr.msk.bf16.mxu1 %vm1168_vm4, %v10717_v2 }
 0x2ba   : > { %7147 = vmatmul.mubr.msk.bf16.vlgmr.msra.gmra.mrb[0].mxu1 %vm1168_vm4, %v10718_v31 }
 0x2bb   : > { %7155 = vmatpush3.bf16.msra.mxu1 %v7976_v11  ;;  %7150 = vmatprep.mubr.msk.bf16.mxu1 %vm1168_vm4, %v10719_v0 }
 0x2bc   : > { %7848 = vmatprep.subr.msk.bf16.mxu1 %vm1271_vm3, %v7977_v10  ;;  %v10735_v10 = vld [vmem:[#allocation27_spill] sm:$0xff] }
 0x2bf   : > { %7157 = vmatpush3.bf16.msra.mxu1 %v3934_v53 }
 0x2c0   : > { %7166 = vmatprep.subr.bf16.mxu1 %v7978_v38 }
 0x2c2   : > { %7151 = vmatmul.mubr.msk.bf16.gmra.mrb[4].mxu1 %vm1168_vm4, %v10720_v7 }
 0x2c3   : > { %7158 = vmatprep.mubr.msk.bf16.mxu1 %vm1168_vm4, %v10721_v63 }
 0x2ca   : > { %7159 = vmatmul.mubr.msk.bf16.vlgmr.msra.gmra.mrb[0].mxu1 %vm1168_vm4, %v10722_v30 }
 0x2cb   : > { %7167 = vmatpush3.bf16.msra.mxu1 %v7978_v38  ;;  %7162 = vmatprep.mubr.msk.bf16.mxu1 %vm1168_vm4, %v10723_v35 }
 0x2cc   : > { %7849 = vmatprep.subr.msk.bf16.mxu1 %vm1271_vm3, %v7979_v36 }
 0x2cf   : > { %7169 = vmatpush3.bf16.msra.mxu1 %v4063_v43  ;;  %v10736_v43 = vld [vmem:[#allocation18_spill] sm:$0xff] }
 0x2d0   : > { %7178 = vmatprep.subr.bf16.mxu1 %v7980_v39 }
 0x2d2   : > { %7163 = vmatmul.mubr.msk.bf16.gmra.mrb[4].mxu1 %vm1168_vm4, %v10724_v28 }
 0x2d3   : > { %7170 = vmatprep.mubr.msk.bf16.mxu1 %vm1168_vm4, %v10725_v40 }
 0x2da   : > { %7171 = vmatmul.mubr.msk.bf16.vlgmr.msra.gmra.mrb[0].mxu1 %vm1168_vm4, %v10726_v4 }
 0x2db   : > { %7179 = vmatpush3.bf16.msra.mxu1 %v7980_v39  ;;  %7174 = vmatprep.mubr.msk.bf16.mxu1 %vm1168_vm4, %v10727_v61 }
 0x2dc   : > { %7850 = vmatprep.subr.msk.bf16.mxu1 %vm1271_vm3, %v7981_v9  ;;  %v10737_v9 = vld [vmem:[#allocation17_spill] sm:$0xff] }
 0x2df   : > { %7181 = vmatpush3.bf16.msra.mxu1 %v4192_v60 }
 0x2e0   : > { %7190 = vmatprep.subr.bf16.mxu1 %v7982_v49 }
 0x2e2   : > { %7175 = vmatmul.mubr.msk.bf16.gmra.mrb[4].mxu1 %vm1168_vm4, %v10728_v57 }
 0x2e3   : > { %7182 = vmatprep.mubr.msk.bf16.mxu1 %vm1168_vm4, %v10729_v6 }
 0x2ea   : > { %7183 = vmatmul.mubr.msk.bf16.vlgmr.msra.gmra.mrb[0].mxu1 %vm1168_vm4, %v10730_v26 }
 0x2eb   : > { %7191 = vmatpush3.bf16.msra.mxu1 %v7982_v49  ;;  %7186 = vmatprep.mubr.msk.bf16.mxu1 %vm1168_vm4, %v10731_v3  ;;  %v10738_v49 = vld [vmem:[#allocation14_spill] sm:$0xff] }
 0x2ec   : > { %7851 = vmatprep.subr.msk.bf16.mxu1 %vm1271_vm3, %v7983_v51 }
 0x2ef   : > { %7193 = vmatpush3.bf16.msra.mxu1 %v4321_v13 }
 0x2f2   : > { %7187 = vmatmul.mubr.msk.bf16.gmra.mrb[4].mxu1 %vm1168_vm4, %v10732_v46  ;;  %v4436_v46 = vld [vmem:[%s10524_s5 + $0x8] sm:$0xff] }
 0x2f3   : > { %7194 = vmatprep.mubr.msk.bf16.mxu1 %vm1168_vm4, %v4291_v56  ;;  %v4435_v56 = vld [vmem:[%s10524_s5] sm:$0xff] }
 0x2f4   : > { %v7495_v25 = vpack.c.bf16 %v4436_v46, %v4435_v56  ;;  %v6397_v56 = vld [vmem:[%s10524_s5 + $0x100] sm:$0xff]  ;;  %v6398_v46 = vld [vmem:[%s10524_s5 + $0x108] sm:$0xff] }
 0x2fa   : > { %7195 = vmatmul.mubr.msk.bf16.vlgmr.msra.gmra.mrb[0].mxu1 %vm1168_vm4, %v4292_v22 }
 0x2fb   : > { %7198 = vmatprep.mubr.msk.bf16.mxu1 %vm1168_vm4, %v4293_v27 }
 0x302   : > { %7199 = vmatmul.mubr.msk.bf16.gmra.mrb[4].mxu1 %vm1168_vm4, %v4294_v15  ;;  %v7498_v15 = vpack.c.bf16 %v4438_v50, %v4437_v21  ;;  %v6402_v21 = vld [vmem:[%s10524_s5 + $0x118] sm:$0xff]  ;;  %v6403_v50 = vld [vmem:[%s10524_s5 + $0x120] sm:$0xff] }
 0x303   : > { %v7531_v47 = vpack.c.bf16 %v6403_v50, %v6402_v21 }
 0x3cd   : > { %v7196_v20 = vpop.f32.mrb[0].mxu1 }
 0x3ce   : > { %v7635_v58 = vadd.f32 %v7196_v20, %v9727_v55  ;;  %v4357_v37 = vpop.f32.mrb[1].mxu1  ;;  %v4441_v20 = vld [vmem:[%s10524_s5 + $0x30] sm:$0x3] }
 0x3cf   : > { %v7636_v54 = vadd.f32 %v4357_v37, %v10733_v16  ;;  %v7197_v19 = vpop.f32.mrb[2].mxu1  ;;  %v6377_v16 = vld [vmem:[%s10524_s5 + $0x80] sm:$0xff] }
 0x3d0   : > { %v4405_v17 = vadd.f32 %v7635_v58, %v6363_v62  ;;  %v7637_v11 = vadd.f32 %v7197_v19, %v10734_v1  ;;  %v4360_v29 = vpop.f32.mrb[3].mxu1  ;;  %v7504_v58 = vpack.c.bf16 %v6376_v42, %v6375_v45  ;;  %v6380_v1 = vld [vmem:[%s10524_s5 + $0x98] sm:$0xff] }
 0x3d1   : > { %v4403_v2 = vadd.f32 %v7636_v54, %v6363_v62  ;;  %v7638_v31 = vadd.f32 %v4360_v29, %v10735_v10  ;;  %v6378_v54 = vld [vmem:[%s10524_s5 + $0x88] sm:$0xff] }
 0x3d2   : > { %v4413_v0 = vmax.f32 %v4405_v17, 0.0  ;;  %v4406_v53 = vadd.f32 %v7637_v11, %v6363_v62  ;;  %v7507_v19 = vpack.c.bf16 %v6378_v54, %v6377_v16  ;;  %v6379_v17 = vld [vmem:[%s10524_s5 + $0x90] sm:$0xff]  ;;  %v6412_v54 = vld [vmem:[%s10524_s5 + $0x158] sm:$0xff] }
 0x3d3   : > { %v4411_v38 = vmax.f32 %v4403_v2, 0.0  ;;  %v4404_v7 = vadd.f32 %v7638_v31, %v6363_v62  ;;  %v7510_v11 = vpack.c.bf16 %v6380_v1, %v6379_v17  ;;  %v6411_v16 = vld [vmem:[%s10524_s5 + $0x150] sm:$0xff] }
 0x3d4   : > { %4422 = vst.msk [vmem:[#allocation4 + $0x10] sm:$0xff] %vm4419_vm6, %v4413_v0  ;;  %v4414_v63 = vmax.f32 %v4406_v53, 0.0  ;;  %v6384_v53 = vld [vmem:[%s10524_s5 + $0xa8] sm:$0xff]  ;;  %v7540_v1 = vpack.c.bf16 %v6412_v54, %v6411_v16 }
 0x3d5   : > { %4420 = vst.msk [vmem:[#allocation4] sm:$0xff] %vm4419_vm6, %v4411_v38  ;;  %v4412_v55 = vmax.f32 %v4404_v7, 0.0  ;;  %v7200_v36 = vpop.f32.mrb[4].mxu1  ;;  %v6385_v38 = vld [vmem:[%s10524_s5 + $0xb0] sm:$0xff]  ;;  %v6381_v7 = vld [vmem:[%s10524_s5 + $0xa0] sm:$0x3] }
 0x3d6   : > { %4423 = vst.msk [vmem:[#allocation4 + $0x18] sm:$0xff] %vm4419_vm6, %v4414_v63  ;;  %v7639_v30 = vadd.f32 %v7200_v36, %v9759_v41  ;;  %v4373_v35 = vpop.f32.mrb[5].mxu1 }
 0x3d7   : > { %4421 = vst.msk [vmem:[#allocation4 + $0x8] sm:$0xff] %vm4419_vm6, %v4412_v55  ;;  %v7640_v39 = vadd.f32 %v4373_v35, %v10736_v43  ;;  %v7201_v28 = vpop.f32.mrb[6].mxu1  ;;  %v7513_v55 = vpack.c.bf16 %v6385_v38, %v6384_v53  ;;  %v6387_v35 = vld [vmem:[%s10524_s5 + $0xc0] sm:$0xff] }
 0x3d8   : > { %v4409_v40 = vadd.f32 %v7639_v30, %v6363_v62  ;;  %v7641_v4 = vadd.f32 %v7201_v28, %v10737_v9  ;;  %v4376_v61 = vpop.f32.mrb[7].mxu1  ;;  %v6386_v30 = vld [vmem:[%s10524_s5 + $0xb8] sm:$0xff]  ;;  %v6389_v28 = vld [vmem:[%s10524_s5 + $0xd0] sm:$0xff] }
 0x3d9   : > { %v4407_v60 = vadd.f32 %v7640_v39, %v6363_v62  ;;  %v7642_v57 = vadd.f32 %v4376_v61, %v10738_v49  ;;  %v7516_v43 = vpack.c.bf16 %v6387_v35, %v6386_v30  ;;  %v6388_v39 = vld [vmem:[%s10524_s5 + $0xc8] sm:$0xff]  ;;  %v6421_v35 = vld [vmem:[%s10524_s5 + $0x190] sm:$0xff] }
 0x3da   : > { %v4417_v6 = vmax.f32 %v4409_v40, 0.0  ;;  %v4410_v51 = vadd.f32 %v7641_v4, %v6363_v62  ;;  %v7519_v40 = vpack.c.bf16 %v6389_v28, %v6388_v39  ;;  %v6420_v30 = vld [vmem:[%s10524_s5 + $0x188] sm:$0xff] }
 0x3db   : > { %v4415_v26 = vmax.f32 %v4407_v60, 0.0  ;;  %v4408_v3 = vadd.f32 %v7642_v57, %v6363_v62  ;;  %v6393_v57 = vld [vmem:[%s10524_s5 + $0xe0] sm:$0xff]  ;;  %v7549_v28 = vpack.c.bf16 %v6421_v35, %v6420_v30 }
 0x3dc   : > { %4426 = vst.msk [vmem:[#allocation4 + $0x30] sm:$0xff] %vm4419_vm6, %v4417_v6  ;;  %v4418_v41 = vmax.f32 %v4410_v51, 0.0  ;;  %v4442_v13 = vld [vmem:[#allocation4 + $0x2] sm:$0x1]  ;;  %v4443_v52 = vld [vmem:[#allocation4 + $0x3] sm:$0x1] }
 0x3dd   : > { %4424 = vst.msk [vmem:[#allocation4 + $0x20] sm:$0xff] %vm4419_vm6, %v4415_v26  ;;  %v4416_v59 = vmax.f32 %v4408_v3, 0.0  ;;  %v4444_v18 = vmax.f32 %v4442_v13, %v4443_v52  ;;  %v4428_v48 = vld [vmem:[#allocation4] sm:$0x1]  ;;  %v4429_v33 = vld [vmem:[#allocation4 + $0x1] sm:$0x1] }
 0x3de   : > { %4427 = vst.msk [vmem:[#allocation4 + $0x38] sm:$0xff] %vm4419_vm6, %v4418_v41  ;;  %v4445_v32 = vld [vmem:[#allocation4 + $0xa] sm:$0x1]  ;;  %v4446_v8 = vld [vmem:[#allocation4 + $0xb] sm:$0x1]  ;;  %v4430_v62 = vmax.f32 %v4428_v48, %v4429_v33  ;;  %v6394_v6 = vld [vmem:[%s10524_s5 + $0xe8] sm:$0xff] }
 0x3df   : > { %4425 = vst.msk [vmem:[#allocation4 + $0x28] sm:$0xff] %vm4419_vm6, %v4416_v59  ;;  %v4447_v22 = vmax.f32 %v4445_v32, %v4446_v8  ;;  %v4431_v14 = vld [vmem:[#allocation4 + $0x8] sm:$0x1]  ;;  %v4432_v34 = vld [vmem:[#allocation4 + $0x9] sm:$0x1]  ;;  %v7522_v3 = vpack.c.bf16 %v6394_v6, %v6393_v57  ;;  %v6395_v13 = vld [vmem:[%s10524_s5 + $0xf0] sm:$0xff]  ;;  %v7528_v32 = vpack.c.bf16 %v6398_v46, %v6397_v56 }
 0x3e0   : > { %v4433_v5 = vmax.f32 %v4431_v14, %v4432_v34  ;;  %v4612_v29 = vld [vmem:[#allocation4 + $0xc] sm:$0x1]  ;;  %v4613_v2 = vld [vmem:[#allocation4 + $0xd] sm:$0x1]  ;;  %v4609_v10 = vld [vmem:[#allocation4 + $0x4] sm:$0x1] }
 0x3e1   : > { %v4448_v27 = vmax.f32 %v4444_v18, %v4447_v22  ;;  %v4610_v31 = vld [vmem:[#allocation4 + $0x5] sm:$0x1]  ;;  %v4614_v0 = vmax.f32 %v4612_v29, %v4613_v2  ;;  %v4704_v9 = vld [vmem:[#allocation4 + $0xe] sm:$0x1]  ;;  %v4705_v4 = vld [vmem:[#allocation4 + $0xf] sm:$0x1] }
 0x3e2   : > { %v4434_v37 = vmax.f32 %v4430_v62, %v4433_v5  ;;  %v4611_v63 = vmax.f32 %v4609_v10, %v4610_v31  ;;  %v4701_v61 = vld [vmem:[#allocation4 + $0x6] sm:$0x1]  ;;  %v4702_v60 = vld [vmem:[#allocation4 + $0x7] sm:$0x1]  ;;  %v4706_v49 = vmax.f32 %v4704_v9, %v4705_v4  ;;  %v6390_v51 = vld [vmem:[%s10524_s5 + $0xd8] sm:$0x3] }
 0x3e3   : > { %7217 = vmatmul.mubr.msk.f32.vlgmr.msra.gmra.mrb[80].mxu0 %vm4419_vm6, %v4448_v27  ;;  %v4703_v26 = vmax.f32 %v4701_v61, %v4702_v60  ;;  %v6396_v52 = vld [vmem:[%s10524_s5 + $0xf8] sm:$0xff]  ;;  %v4796_v8 = vld [vmem:[#allocation4 + $0x18] sm:$0x1]  ;;  %v4797_v18 = vld [vmem:[#allocation4 + $0x19] sm:$0x1] }
 0x3e4   : > { %7496 = vmatpush3.bf16.msra.mxu0 %v7495_v25  ;;  %7233 = vmatprep.mubr.msk.f32.mxu0 %vm8054_vm5, %v8055_v44  ;;  %v4615_v36 = vmax.f32 %v4611_v63, %v4614_v0  ;;  %v7525_v59 = vpack.c.bf16 %v6396_v52, %v6395_v13  ;;  %v4793_v22 = vld [vmem:[#allocation4 + $0x10] sm:$0x1]  ;;  %v4794_v25 = vld [vmem:[#allocation4 + $0x11] sm:$0x1]  ;;  %v4798_v27 = vmax.f32 %v4796_v8, %v4797_v18  ;;  %v6404_v14 = vld [vmem:[%s10524_s5 + $0x128] sm:$0xff] }
 0x3e5   : > { %7497 = vmatprep.subr.bf16.mxu0 %v8053_v24  ;;  %v4707_v41 = vmax.f32 %v4703_v26, %v4706_v49  ;;  %v4795_v23 = vmax.f32 %v4793_v22, %v4794_v25  ;;  %v6405_v34 = vld [vmem:[%s10524_s5 + $0x130] sm:$0xff]  ;;  %v6406_v33 = vld [vmem:[%s10524_s5 + $0x138] sm:$0xff]  ;;  %v6407_v5 = vld [vmem:[%s10524_s5 + $0x140] sm:$0xff] }
 0x3e6   : > { %v7534_v48 = vpack.c.bf16 %v6405_v34, %v6404_v14  ;;  %v7537_v45 = vpack.c.bf16 %v6407_v5, %v6406_v33  ;;  %v4888_v42 = vld [vmem:[#allocation4 + $0x1a] sm:$0x1]  ;;  %v4885_v62 = vld [vmem:[#allocation4 + $0x12] sm:$0x1]  ;;  %v6415_v31 = vld [vmem:[%s10524_s5 + $0x170] sm:$0xff] }
 0x3e7   : > { %v6413_v29 = vld [vmem:[%s10524_s5 + $0x160] sm:$0xff]  ;;  %v6414_v2 = vld [vmem:[%s10524_s5 + $0x168] sm:$0xff]  ;;  %v6416_v0 = vld [vmem:[%s10524_s5 + $0x178] sm:$0xff] }
 0x3e8   : > { %7499 = vmatpush3.bf16.msra.mxu0 %v7498_v15  ;;  %v6399_v15 = vld [vmem:[%s10524_s5 + $0x110] sm:$0x3]  ;;  %v7543_v10 = vpack.c.bf16 %v6414_v2, %v6413_v29  ;;  %v7546_v53 = vpack.c.bf16 %v6416_v0, %v6415_v31  ;;  %v4980_v38 = vld [vmem:[#allocation4 + $0x1c] sm:$0x1]  ;;  %v4977_v63 = vld [vmem:[#allocation4 + $0x14] sm:$0x1] }
 0x3e9   : > { %7500 = vmatprep.subr.bf16.mxu0 %v8053_v24  ;;  %v6422_v9 = vld [vmem:[%s10524_s5 + $0x198] sm:$0xff]  ;;  %v6423_v4 = vld [vmem:[%s10524_s5 + $0x1a0] sm:$0xff]  ;;  %v6424_v60 = vld [vmem:[%s10524_s5 + $0x1a8] sm:$0xff] }
 0x3ea   : > { %v7552_v61 = vpack.c.bf16 %v6423_v4, %v6422_v9  ;;  %v6425_v49 = vld [vmem:[%s10524_s5 + $0x1b0] sm:$0xff]  ;;  %v5072_v6 = vld [vmem:[#allocation4 + $0x1e] sm:$0x1]  ;;  %v5069_v26 = vld [vmem:[#allocation4 + $0x16] sm:$0x1] }
 0x3eb   : > { %v7555_v57 = vpack.c.bf16 %v6425_v49, %v6424_v60  ;;  %v6429_v13 = vld [vmem:[%s10524_s5 + $0x1c0] sm:$0xff]  ;;  %v6430_v52 = vld [vmem:[%s10524_s5 + $0x1c8] sm:$0xff]  ;;  %v6431_v8 = vld [vmem:[%s10524_s5 + $0x1d0] sm:$0xff] }
 0x3ec   : > { %7502 = vmatpush3.bf16.msra.mxu0 %v7501_v12  ;;  %v4799_v12 = vmax.f32 %v4795_v23, %v4798_v27  ;;  %v7558_v46 = vpack.c.bf16 %v6430_v52, %v6429_v13  ;;  %v6432_v18 = vld [vmem:[%s10524_s5 + $0x1d8] sm:$0xff]  ;;  %v6433_v25 = vld [vmem:[%s10524_s5 + $0x1e0] sm:$0xff]  ;;  %v6434_v27 = vld [vmem:[%s10524_s5 + $0x1e8] sm:$0xff] }
 0x3ed   : > { %7231 = vmatprep.subr.mxu0 %v8055_v44  ;;  %v7561_v22 = vpack.c.bf16 %v6432_v18, %v6431_v8  ;;  %v7564_v21 = vpack.c.bf16 %v6434_v27, %v6433_v25  ;;  %v5164_v50 = vld [vmem:[#allocation4 + $0x28] sm:$0x1]  ;;  %v5161_v23 = vld [vmem:[#allocation4 + $0x20] sm:$0x1]  ;;  %v6439_v34 = vld [vmem:[%s10524_s5 + $0x200] sm:$0xff] }
 0x3ee   : > { %v6438_v14 = vld [vmem:[%s10524_s5 + $0x1f8] sm:$0xff]  ;;  %v6447_v29 = vld [vmem:[%s10524_s5 + $0x230] sm:$0xff]  ;;  %v6456_v9 = vld [vmem:[%s10524_s5 + $0x268] sm:$0xff] }
 0x3ef   : > { %v7567_v5 = vpack.c.bf16 %v6439_v34, %v6438_v14  ;;  %v5256_v54 = vld [vmem:[#allocation4 + $0x2a] sm:$0x1]  ;;  %v5348_v35 = vld [vmem:[#allocation4 + $0x2c] sm:$0x1]  ;;  %v6457_v4 = vld [vmem:[%s10524_s5 + $0x270] sm:$0xff] }
 0x3f0   : > { %7232 = vmatpush3.msk.msra.mxu0 %vm1271_vm3, %v4441_v20  ;;  %v4889_v20 = vld [vmem:[#allocation4 + $0x1b] sm:$0x1]  ;;  %v6448_v2 = vld [vmem:[%s10524_s5 + $0x238] sm:$0xff]  ;;  %v7585_v49 = vpack.c.bf16 %v6457_v4, %v6456_v9  ;;  %v6465_v8 = vld [vmem:[%s10524_s5 + $0x2a0] sm:$0xff] }
 0x3f1   : > { %7234 = vmatmul.mubr.msk.f32.vlgmr.msra.gmra.mrb[82].mxu0 %vm4419_vm6, %v4434_v37  ;;  %7503 = vmatprep.subr.bf16.mxu0 %v8053_v24  ;;  %v4890_v37 = vmax.f32 %v4888_v42, %v4889_v20  ;;  %v6440_v42 = vld [vmem:[%s10524_s5 + $0x208] sm:$0xff]  ;;  %v6441_v20 = vld [vmem:[%s10524_s5 + $0x210] sm:$0xff]  ;;  %v7576_v0 = vpack.c.bf16 %v6448_v2, %v6447_v29  ;;  %v5440_v52 = vld [vmem:[#allocation4 + $0x2e] sm:$0x1] }
 0x3f2   : > { %7505 = vmatpush3.bf16.msra.mxu0 %v7504_v58  ;;  %7250 = vmatprep.mubr.msk.f32.mxu0 %vm8054_vm5, %v8055_v44  ;;  %v4886_v58 = vld [vmem:[#allocation4 + $0x13] sm:$0x1]  ;;  %v6466_v18 = vld [vmem:[%s10524_s5 + $0x2a8] sm:$0xff] }
 0x3f3   : > { %7506 = vmatprep.subr.bf16.mxu0 %v8053_v24  ;;  %v4887_v17 = vmax.f32 %v4885_v62, %v4886_v58  ;;  %v7570_v62 = vpack.c.bf16 %v6441_v20, %v6440_v42  ;;  %v6442_v58 = vld [vmem:[%s10524_s5 + $0x218] sm:$0xff]  ;;  %v7594_v27 = vpack.c.bf16 %v6466_v18, %v6465_v8  ;;  %v5532_v34 = vld [vmem:[#allocation4 + $0x38] sm:$0x1]  ;;  %v6475_v20 = vld [vmem:[%s10524_s5 + $0x2e0] sm:$0xff] }
 0x3f4   : > { %v6474_v42 = vld [vmem:[%s10524_s5 + $0x2d8] sm:$0xff]  ;;  %v5624_v2 = vld [vmem:[#allocation4 + $0x3a] sm:$0x1]  ;;  %v5716_v4 = vld [vmem:[#allocation4 + $0x3c] sm:$0x1] }
 0x3f5   : > { %v5808_v18 = vld [vmem:[#allocation4 + $0x3e] sm:$0x1] }
 0x3f6   : > { %7508 = vmatpush3.bf16.msra.mxu0 %v7507_v19  ;;  %v6408_v19 = vld [vmem:[%s10524_s5 + $0x148] sm:$0x3] }
 0x3f7   : > { %7509 = vmatprep.subr.bf16.mxu0 %v8053_v24 }
 0x3fa   : > { %7511 = vmatpush3.bf16.msra.mxu0 %v7510_v11  ;;  %v4891_v11 = vmax.f32 %v4887_v17, %v4890_v37  ;;  %v6443_v37 = vld [vmem:[%s10524_s5 + $0x220] sm:$0xff]  ;;  %v5253_v17 = vld [vmem:[#allocation4 + $0x22] sm:$0x1] }
 0x3fb   : > { %7248 = vmatprep.subr.mxu0 %v8055_v44  ;;  %v7573_v16 = vpack.c.bf16 %v6443_v37, %v6442_v58  ;;  %v7603_v37 = vpack.c.bf16 %v6475_v20, %v6474_v42 }
 0x3fe   : > { %7249 = vmatpush3.msk.msra.mxu0 %vm1271_vm3, %v6381_v7  ;;  %v4981_v7 = vld [vmem:[#allocation4 + $0x1d] sm:$0x1] }
 0x3ff   : > { %7251 = vmatmul.mubr.msk.f32.vlgmr.msra.gmra.mrb[84].mxu0 %vm4419_vm6, %v4615_v36  ;;  %7512 = vmatprep.subr.bf16.mxu0 %v8053_v24  ;;  %v4982_v36 = vmax.f32 %v4980_v38, %v4981_v7  ;;  %v6449_v38 = vld [vmem:[%s10524_s5 + $0x240] sm:$0xff]  ;;  %v6450_v7 = vld [vmem:[%s10524_s5 + $0x248] sm:$0xff] }
 0x400   : > { %7514 = vmatpush3.bf16.msra.mxu0 %v7513_v55  ;;  %7267 = vmatprep.mubr.msk.f32.mxu0 %vm8054_vm5, %v8055_v44  ;;  %v4978_v55 = vld [vmem:[#allocation4 + $0x15] sm:$0x1] }
 0x401   : > { %7515 = vmatprep.subr.bf16.mxu0 %v8053_v24  ;;  %v4979_v39 = vmax.f32 %v4977_v63, %v4978_v55  ;;  %v7579_v63 = vpack.c.bf16 %v6450_v7, %v6449_v38  ;;  %v6451_v55 = vld [vmem:[%s10524_s5 + $0x250] sm:$0xff]  ;;  %v6484_v7 = vld [vmem:[%s10524_s5 + $0x318] sm:$0xff] }
 0x402   : > { %v6483_v38 = vld [vmem:[%s10524_s5 + $0x310] sm:$0xff] }
 0x404   : > { %7517 = vmatpush3.bf16.msra.mxu0 %v7516_v43  ;;  %v6417_v43 = vld [vmem:[%s10524_s5 + $0x180] sm:$0x3] }
 0x405   : > { %7518 = vmatprep.subr.bf16.mxu0 %v8053_v24 }
 0x408   : > { %7520 = vmatpush3.bf16.msra.mxu0 %v7519_v40  ;;  %v4983_v40 = vmax.f32 %v4979_v39, %v4982_v36  ;;  %v6452_v36 = vld [vmem:[%s10524_s5 + $0x258] sm:$0xff]  ;;  %v5345_v39 = vld [vmem:[#allocation4 + $0x24] sm:$0x1] }
 0x409   : > { %7265 = vmatprep.subr.mxu0 %v8055_v44  ;;  %v7582_v30 = vpack.c.bf16 %v6452_v36, %v6451_v55  ;;  %v7612_v36 = vpack.c.bf16 %v6484_v7, %v6483_v38 }
 0x40c   : > { %7266 = vmatpush3.msk.msra.mxu0 %vm1271_vm3, %v6390_v51  ;;  %v5073_v51 = vld [vmem:[#allocation4 + $0x1f] sm:$0x1] }
 0x40d   : > { %7268 = vmatmul.mubr.msk.f32.vlgmr.msra.gmra.mrb[86].mxu0 %vm4419_vm6, %v4707_v41  ;;  %7521 = vmatprep.subr.bf16.mxu0 %v8053_v24  ;;  %v5074_v41 = vmax.f32 %v5072_v6, %v5073_v51  ;;  %v6458_v6 = vld [vmem:[%s10524_s5 + $0x278] sm:$0xff]  ;;  %v6459_v51 = vld [vmem:[%s10524_s5 + $0x280] sm:$0xff] }
 0x40e   : > { %7523 = vmatpush3.bf16.msra.mxu0 %v7522_v3  ;;  %7284 = vmatprep.mubr.msk.f32.mxu0 %vm8054_vm5, %v8055_v44  ;;  %v5070_v3 = vld [vmem:[#allocation4 + $0x17] sm:$0x1] }
 0x40f   : > { %7524 = vmatprep.subr.bf16.mxu0 %v8053_v24  ;;  %v5071_v56 = vmax.f32 %v5069_v26, %v5070_v3  ;;  %v7588_v26 = vpack.c.bf16 %v6459_v51, %v6458_v6  ;;  %v6460_v3 = vld [vmem:[%s10524_s5 + $0x288] sm:$0xff]  ;;  %v6493_v51 = vld [vmem:[%s10524_s5 + $0x350] sm:$0xff] }
 0x410   : > { %v6492_v6 = vld [vmem:[%s10524_s5 + $0x348] sm:$0xff] }
 0x412   : > { %7526 = vmatpush3.bf16.msra.mxu0 %v7525_v59  ;;  %v6426_v59 = vld [vmem:[%s10524_s5 + $0x1b8] sm:$0x3] }
 0x413   : > { %7527 = vmatprep.subr.bf16.mxu0 %v8053_v24 }
 0x416   : > { %7529 = vmatpush3.bf16.msra.mxu0 %v7528_v32  ;;  %v5075_v32 = vmax.f32 %v5071_v56, %v5074_v41  ;;  %v6461_v41 = vld [vmem:[%s10524_s5 + $0x290] sm:$0xff] }
 0x417   : > { %7282 = vmatprep.subr.mxu0 %v8055_v44  ;;  %v7591_v13 = vpack.c.bf16 %v6461_v41, %v6460_v3  ;;  %v5437_v56 = vld [vmem:[#allocation4 + $0x26] sm:$0x1]  ;;  %v7621_v41 = vpack.c.bf16 %v6493_v51, %v6492_v6 }
 0x41a   : > { %7283 = vmatpush3.msk.msra.mxu0 %vm1271_vm3, %v6399_v15  ;;  %v5165_v15 = vld [vmem:[#allocation4 + $0x29] sm:$0x1] }
 0x41b   : > { %7285 = vmatmul.mubr.msk.f32.vlgmr.msra.gmra.mrb[88].mxu0 %vm4419_vm6, %v4799_v12  ;;  %7530 = vmatprep.subr.bf16.mxu0 %v8053_v24  ;;  %v5166_v12 = vmax.f32 %v5164_v50, %v5165_v15  ;;  %v6467_v50 = vld [vmem:[%s10524_s5 + $0x2b0] sm:$0xff]  ;;  %v6468_v15 = vld [vmem:[%s10524_s5 + $0x2b8] sm:$0xff] }
 0x41c   : > { %7532 = vmatpush3.bf16.msra.mxu0 %v7531_v47  ;;  %7301 = vmatprep.mubr.msk.f32.mxu0 %vm8054_vm5, %v8055_v44  ;;  %v5162_v47 = vld [vmem:[#allocation4 + $0x21] sm:$0x1] }
 0x41d   : > { %7533 = vmatprep.subr.bf16.mxu0 %v8053_v24  ;;  %v5163_v33 = vmax.f32 %v5161_v23, %v5162_v47  ;;  %v7597_v23 = vpack.c.bf16 %v6468_v15, %v6467_v50  ;;  %v6469_v47 = vld [vmem:[%s10524_s5 + $0x2c0] sm:$0xff]  ;;  %v6498_v50 = vld [vmem:[%s10524_s5 + $0x378] sm:$0x3] }
 0x420   : > { %7535 = vmatpush3.bf16.msra.mxu0 %v7534_v48  ;;  %v6435_v48 = vld [vmem:[%s10524_s5 + $0x1f0] sm:$0x3] }
 0x421   : > { %7536 = vmatprep.subr.bf16.mxu0 %v8053_v24 }
 0x424   : > { %7538 = vmatpush3.bf16.msra.mxu0 %v7537_v45  ;;  %v5167_v45 = vmax.f32 %v5163_v33, %v5166_v12  ;;  %v6470_v12 = vld [vmem:[%s10524_s5 + $0x2c8] sm:$0xff]  ;;  %v5529_v33 = vld [vmem:[#allocation4 + $0x30] sm:$0x1] }
 0x425   : > { %7299 = vmatprep.subr.mxu0 %v8055_v44  ;;  %v7600_v14 = vpack.c.bf16 %v6470_v12, %v6469_v47 }
 0x428   : > { %7300 = vmatpush3.msk.msra.mxu0 %vm1271_vm3, %v6408_v19  ;;  %v5257_v19 = vld [vmem:[#allocation4 + $0x2b] sm:$0x1] }
 0x429   : > { %7302 = vmatmul.mubr.msk.f32.vlgmr.msra.gmra.mrb[90].mxu0 %vm4419_vm6, %v4891_v11  ;;  %7539 = vmatprep.subr.bf16.mxu0 %v8053_v24  ;;  %v5258_v11 = vmax.f32 %v5256_v54, %v5257_v19  ;;  %v6476_v54 = vld [vmem:[%s10524_s5 + $0x2e8] sm:$0xff]  ;;  %v6477_v19 = vld [vmem:[%s10524_s5 + $0x2f0] sm:$0xff] }
 0x42a   : > { %7541 = vmatpush3.bf16.msra.mxu0 %v7540_v1  ;;  %7318 = vmatprep.mubr.msk.f32.mxu0 %vm8054_vm5, %v8055_v44  ;;  %v5254_v1 = vld [vmem:[#allocation4 + $0x23] sm:$0x1] }
 0x42b   : > { %7542 = vmatprep.subr.bf16.mxu0 %v8053_v24  ;;  %v5255_v31 = vmax.f32 %v5253_v17, %v5254_v1  ;;  %v7606_v17 = vpack.c.bf16 %v6477_v19, %v6476_v54  ;;  %v6478_v1 = vld [vmem:[%s10524_s5 + $0x2f8] sm:$0xff] }
 0x42e   : > { %7544 = vmatpush3.bf16.msra.mxu0 %v7543_v10  ;;  %v6444_v10 = vld [vmem:[%s10524_s5 + $0x228] sm:$0x3] }
 0x42f   : > { %7545 = vmatprep.subr.bf16.mxu0 %v8053_v24 }
 0x432   : > { %7547 = vmatpush3.bf16.msra.mxu0 %v7546_v53  ;;  %v5259_v53 = vmax.f32 %v5255_v31, %v5258_v11  ;;  %v6479_v11 = vld [vmem:[%s10524_s5 + $0x300] sm:$0xff] }
 0x433   : > { %7316 = vmatprep.subr.mxu0 %v8055_v44  ;;  %v7609_v29 = vpack.c.bf16 %v6479_v11, %v6478_v1  ;;  %v5621_v31 = vld [vmem:[#allocation4 + $0x32] sm:$0x1] }
 0x436   : > { %7317 = vmatpush3.msk.msra.mxu0 %vm1271_vm3, %v6417_v43  ;;  %v5349_v43 = vld [vmem:[#allocation4 + $0x2d] sm:$0x1] }
 0x437   : > { %7319 = vmatmul.mubr.msk.f32.vlgmr.msra.gmra.mrb[92].mxu0 %vm4419_vm6, %v4983_v40  ;;  %7548 = vmatprep.subr.bf16.mxu0 %v8053_v24  ;;  %v5350_v40 = vmax.f32 %v5348_v35, %v5349_v43  ;;  %v6485_v35 = vld [vmem:[%s10524_s5 + $0x320] sm:$0xff]  ;;  %v6486_v43 = vld [vmem:[%s10524_s5 + $0x328] sm:$0xff] }
 0x438   : > { %7550 = vmatpush3.bf16.msra.mxu0 %v7549_v28  ;;  %7335 = vmatprep.mubr.msk.f32.mxu0 %vm8054_vm5, %v8055_v44  ;;  %v5346_v28 = vld [vmem:[#allocation4 + $0x25] sm:$0x1] }
 0x439   : > { %7551 = vmatprep.subr.bf16.mxu0 %v8053_v24  ;;  %v5347_v60 = vmax.f32 %v5345_v39, %v5346_v28  ;;  %v7615_v39 = vpack.c.bf16 %v6486_v43, %v6485_v35  ;;  %v6487_v28 = vld [vmem:[%s10524_s5 + $0x330] sm:$0xff] }
 0x43c   : > { %7553 = vmatpush3.bf16.msra.mxu0 %v7552_v61  ;;  %v6453_v61 = vld [vmem:[%s10524_s5 + $0x260] sm:$0x3] }
 0x43d   : > { %7554 = vmatprep.subr.bf16.mxu0 %v8053_v24 }
 0x440   : > { %7556 = vmatpush3.bf16.msra.mxu0 %v7555_v57  ;;  %v5351_v57 = vmax.f32 %v5347_v60, %v5350_v40  ;;  %v6488_v40 = vld [vmem:[%s10524_s5 + $0x338] sm:$0xff]  ;;  %v5713_v60 = vld [vmem:[#allocation4 + $0x34] sm:$0x1] }
 0x441   : > { %7333 = vmatprep.subr.mxu0 %v8055_v44  ;;  %v7618_v9 = vpack.c.bf16 %v6488_v40, %v6487_v28 }
 0x444   : > { %7334 = vmatpush3.msk.msra.mxu0 %vm1271_vm3, %v6426_v59  ;;  %v5441_v59 = vld [vmem:[#allocation4 + $0x2f] sm:$0x1] }
 0x445   : > { %7336 = vmatmul.mubr.msk.f32.vlgmr.msra.gmra.mrb[94].mxu0 %vm4419_vm6, %v5075_v32  ;;  %7557 = vmatprep.subr.bf16.mxu0 %v8053_v24  ;;  %v5442_v32 = vmax.f32 %v5440_v52, %v5441_v59  ;;  %v6494_v52 = vld [vmem:[%s10524_s5 + $0x358] sm:$0xff]  ;;  %v6495_v59 = vld [vmem:[%s10524_s5 + $0x360] sm:$0xff] }
 0x446   : > { %7559 = vmatpush3.bf16.msra.mxu0 %v7558_v46  ;;  %7352 = vmatprep.mubr.msk.f32.mxu0 %vm8054_vm5, %v8055_v44  ;;  %v5438_v46 = vld [vmem:[#allocation4 + $0x27] sm:$0x1] }
 0x447   : > { %7560 = vmatprep.subr.bf16.mxu0 %v8053_v24  ;;  %v5439_v25 = vmax.f32 %v5437_v56, %v5438_v46  ;;  %v7624_v56 = vpack.c.bf16 %v6495_v59, %v6494_v52  ;;  %v6496_v46 = vld [vmem:[%s10524_s5 + $0x368] sm:$0xff]  ;;  %v5897_v59 = vld [vmem:[%s10525_s6] sm:$0x1] }
 0x44a   : > { %7562 = vmatpush3.bf16.msra.mxu0 %v7561_v22  ;;  %v6462_v22 = vld [vmem:[%s10524_s5 + $0x298] sm:$0x3] }
 0x44b   : > { %7563 = vmatprep.subr.bf16.mxu0 %v8053_v24 }
 0x44e   : > { %7565 = vmatpush3.bf16.msra.mxu0 %v7564_v21  ;;  %v5443_v21 = vmax.f32 %v5439_v25, %v5442_v32  ;;  %v6497_v32 = vld [vmem:[%s10524_s5 + $0x370] sm:$0xff]  ;;  %v5805_v25 = vld [vmem:[#allocation4 + $0x36] sm:$0x1] }
 0x44f   : > { %7350 = vmatprep.subr.mxu0 %v8055_v44  ;;  %v7627_v8 = vpack.c.bf16 %v6497_v32, %v6496_v46 }
 0x452   : > { %7351 = vmatpush3.msk.msra.mxu0 %vm1271_vm3, %v6435_v48  ;;  %v5533_v48 = vld [vmem:[#allocation4 + $0x39] sm:$0x1] }
 0x453   : > { %7353 = vmatmul.mubr.msk.f32.vlgmr.msra.gmra.mrb[96].mxu0 %vm4419_vm6, %v5167_v45  ;;  %7566 = vmatprep.subr.bf16.mxu0 %v8053_v24  ;;  %v5534_v45 = vmax.f32 %v5532_v34, %v5533_v48 }
 0x454   : > { %7568 = vmatpush3.bf16.msra.mxu0 %v7567_v5  ;;  %7369 = vmatprep.mubr.msk.f32.mxu0 %vm8054_vm5, %v8055_v44  ;;  %v5530_v5 = vld [vmem:[#allocation4 + $0x31] sm:$0x1] }
 0x455   : > { %7569 = vmatprep.subr.bf16.mxu0 %v8053_v24  ;;  %v5531_v58 = vmax.f32 %v5529_v33, %v5530_v5 }
 0x458   : > { %7571 = vmatpush3.bf16.msra.mxu0 %v7570_v62  ;;  %v6471_v62 = vld [vmem:[%s10524_s5 + $0x2d0] sm:$0x3] }
 0x459   : > { %7572 = vmatprep.subr.bf16.mxu0 %v8053_v24 }
 0x45c   : > { %7574 = vmatpush3.bf16.msra.mxu0 %v7573_v16  ;;  %v5535_v16 = vmax.f32 %v5531_v58, %v5534_v45 }
 0x45d   : > { %7367 = vmatprep.subr.mxu0 %v8055_v44 }
 0x460   : > { %7368 = vmatpush3.msk.msra.mxu0 %vm1271_vm3, %v6444_v10  ;;  %v5625_v10 = vld [vmem:[#allocation4 + $0x3b] sm:$0x1] }
 0x461   : > { %7370 = vmatmul.mubr.msk.f32.vlgmr.msra.gmra.mrb[98].mxu0 %vm4419_vm6, %v5259_v53  ;;  %7575 = vmatprep.subr.bf16.mxu0 %v8053_v24  ;;  %v5626_v53 = vmax.f32 %v5624_v2, %v5625_v10  ;;  %v5901_v2 = vld [vmem:[%s10526_s7 + $0x8] sm:$0xff]  ;;  %v5902_v10 = vld [vmem:[%s10526_s7 + $0x10] sm:$0xff] }
 0x462   : > { %7577 = vmatpush3.bf16.msra.mxu0 %v7576_v0  ;;  %7386 = vmatprep.mubr.msk.f32.mxu0 %vm8054_vm5, %v8055_v44  ;;  %v5622_v0 = vld [vmem:[#allocation4 + $0x33] sm:$0x1] }
 0x463   : > { %7578 = vmatprep.subr.bf16.mxu0 %v8053_v24  ;;  %v5623_v55 = vmax.f32 %v5621_v31, %v5622_v0  ;;  %v5903_v0 = vld [vmem:[%s10526_s7 + $0x18] sm:$0xff] }
 0x466   : > { %7580 = vmatpush3.bf16.msra.mxu0 %v7579_v63  ;;  %v6480_v63 = vld [vmem:[%s10524_s5 + $0x308] sm:$0x3] }
 0x467   : > { %7581 = vmatprep.subr.bf16.mxu0 %v8053_v24 }
 0x46a   : > { %7583 = vmatpush3.bf16.msra.mxu0 %v7582_v30  ;;  %v5627_v30 = vmax.f32 %v5623_v55, %v5626_v53  ;;  %v7633_v53 = vpack.c.bf16 %v5903_v0, %v5902_v10 }
 0x46b   : > { %7384 = vmatprep.subr.mxu0 %v8055_v44 }
 0x46e   : > { %7385 = vmatpush3.msk.msra.mxu0 %vm1271_vm3, %v6453_v61  ;;  %v5717_v61 = vld [vmem:[#allocation4 + $0x3d] sm:$0x1] }
 0x46f   : > { %7387 = vmatmul.mubr.msk.f32.vlgmr.msra.gmra.mrb[100].mxu0 %vm4419_vm6, %v5351_v57  ;;  %7584 = vmatprep.subr.bf16.mxu0 %v8053_v24  ;;  %v5718_v57 = vmax.f32 %v5716_v4, %v5717_v61 }
 0x470   : > { %7586 = vmatpush3.bf16.msra.mxu0 %v7585_v49  ;;  %7403 = vmatprep.mubr.msk.f32.mxu0 %vm8054_vm5, %v8055_v44  ;;  %v5714_v49 = vld [vmem:[#allocation4 + $0x35] sm:$0x1] }
 0x471   : > { %7587 = vmatprep.subr.bf16.mxu0 %v8053_v24  ;;  %v5715_v3 = vmax.f32 %v5713_v60, %v5714_v49 }
 0x474   : > { %7589 = vmatpush3.bf16.msra.mxu0 %v7588_v26  ;;  %v6489_v26 = vld [vmem:[%s10524_s5 + $0x340] sm:$0x3] }
 0x475   : > { %7590 = vmatprep.subr.bf16.mxu0 %v8053_v24 }
 0x478   : > { %7592 = vmatpush3.bf16.msra.mxu0 %v7591_v13  ;;  %v5719_v13 = vmax.f32 %v5715_v3, %v5718_v57 }
 0x479   : > { %7401 = vmatprep.subr.mxu0 %v8055_v44 }
 0x47c   : > { %7402 = vmatpush3.msk.msra.mxu0 %vm1271_vm3, %v6462_v22  ;;  %v5809_v22 = vld [vmem:[#allocation4 + $0x3f] sm:$0x1] }
 0x47d   : > { %7404 = vmatmul.mubr.msk.f32.vlgmr.msra.gmra.mrb[102].mxu0 %vm4419_vm6, %v5443_v21  ;;  %7593 = vmatprep.subr.bf16.mxu0 %v8053_v24  ;;  %v5810_v21 = vmax.f32 %v5808_v18, %v5809_v22  ;;  %v5904_v18 = vld [vmem:[%s10527_s8] sm:$0x1] }
 0x47e   : > { %7595 = vmatpush3.bf16.msra.mxu0 %v7594_v27  ;;  %7420 = vmatprep.mubr.msk.f32.mxu0 %vm8054_vm5, %v8055_v44  ;;  %v5806_v27 = vld [vmem:[#allocation4 + $0x37] sm:$0x1] }
 0x47f   : > { %7596 = vmatprep.subr.bf16.mxu0 %v8053_v24  ;;  %v5807_v15 = vmax.f32 %v5805_v25, %v5806_v27 }
 0x482   : > { %7598 = vmatpush3.bf16.msra.mxu0 %v7597_v23  ;;  %v5811_v23 = vmax.f32 %v5807_v15, %v5810_v21 }
 0x483   : > { %7599 = vmatprep.subr.bf16.mxu0 %v8053_v24 }
 0x486   : > { %7601 = vmatpush3.bf16.msra.mxu0 %v7600_v14 }
 0x487   : > { %7418 = vmatprep.subr.mxu0 %v8055_v44 }
 0x48a   : > { %7419 = vmatpush3.msk.msra.mxu0 %vm1271_vm3, %v6471_v62 }
 0x48b   : > { %7421 = vmatmul.mubr.msk.f32.vlgmr.msra.gmra.mrb[104].mxu0 %vm4419_vm6, %v5535_v16  ;;  %7602 = vmatprep.subr.bf16.mxu0 %v8053_v24 }
 0x48c   : > { %7604 = vmatpush3.bf16.msra.mxu0 %v7603_v37  ;;  %7437 = vmatprep.mubr.msk.f32.mxu0 %vm8054_vm5, %v8055_v44 }
 0x48d   : > { %7605 = vmatprep.subr.bf16.mxu0 %v8053_v24 }
 0x490   : > { %7607 = vmatpush3.bf16.msra.mxu0 %v7606_v17 }
 0x491   : > { %7608 = vmatprep.subr.bf16.mxu0 %v8053_v24 }
 0x494   : > { %7610 = vmatpush3.bf16.msra.mxu0 %v7609_v29 }
 0x495   : > { %7435 = vmatprep.subr.mxu0 %v8055_v44 }
 0x498   : > { %7436 = vmatpush3.msk.msra.mxu0 %vm1271_vm3, %v6480_v63 }
 0x499   : > { %7438 = vmatmul.mubr.msk.f32.vlgmr.msra.gmra.mrb[106].mxu0 %vm4419_vm6, %v5627_v30  ;;  %7611 = vmatprep.subr.bf16.mxu0 %v8053_v24 }
 0x49a   : > { %7613 = vmatpush3.bf16.msra.mxu0 %v7612_v36  ;;  %7454 = vmatprep.mubr.msk.f32.mxu0 %vm8054_vm5, %v8055_v44 }
 0x49b   : > { %7614 = vmatprep.subr.bf16.mxu0 %v8053_v24 }
 0x49e   : > { %7616 = vmatpush3.bf16.msra.mxu0 %v7615_v39 }
 0x49f   : > { %7617 = vmatprep.subr.bf16.mxu0 %v8053_v24 }
 0x4a2   : > { %7619 = vmatpush3.bf16.msra.mxu0 %v7618_v9 }
 0x4a3   : > { %7452 = vmatprep.subr.mxu0 %v8055_v44 }
 0x4a6   : > { %7453 = vmatpush3.msk.msra.mxu0 %vm1271_vm3, %v6489_v26 }
 0x4a7   : > { %7455 = vmatmul.mubr.msk.f32.vlgmr.msra.gmra.mrb[108].mxu0 %vm4419_vm6, %v5719_v13  ;;  %7620 = vmatprep.subr.bf16.mxu0 %v8053_v24 }
 0x4a8   : > { %7622 = vmatpush3.bf16.msra.mxu0 %v7621_v41  ;;  %7471 = vmatprep.mubr.msk.f32.mxu0 %vm8054_vm5, %v8055_v44 }
 0x4a9   : > { %7623 = vmatprep.subr.bf16.mxu0 %v8053_v24 }
 0x4ac   : > { %7625 = vmatpush3.bf16.msra.mxu0 %v7624_v56 }
 0x4ad   : > { %7626 = vmatprep.subr.bf16.mxu0 %v8053_v24 }
 0x4b0   : > { %7628 = vmatpush3.bf16.msra.mxu0 %v7627_v8 }
 0x4b1   : > { %7469 = vmatprep.subr.mxu0 %v8055_v44 }
 0x4b4   : > { %7470 = vmatpush3.msk.msra.mxu0 %vm1271_vm3, %v6498_v50 }
 0x4b5   : > { %7472 = vmatmul.mubr.msk.f32.vlgmr.msra.gmra.mrb[110].mxu0 %vm4419_vm6, %v5811_v23  ;;  %7629 = vmatprep.subr.bf16.mxu0 %v8053_v24 }
 0x4b6   : > { %v4529_v47 = vpop.f32.mrb[80].mxu0  ;;  %7482 = vmatprep.mubr.msk.f32.mxu0 %vm8054_vm5, %v8055_v44  ;;  %v5900_v44 = vld [vmem:[%s10526_s7] sm:$0xff] }
 0x4b7   : > { %v7218_v12 = vpop.f32.mrb[81].mxu0  ;;  %v7630_v31 = vpack.c.bf16 %v5901_v2, %v5900_v44 }
 0x4b9   : > { %7631 = vmatpush3.bf16.msra.mxu0 %v7630_v31 }
 0x4ba   : > { %7632 = vmatprep.subr.bf16.mxu0 %v8053_v24 }
 0x4bd   : > { %7634 = vmatpush3.bf16.msra.mxu0 %v7633_v53 }
 0x4c4   : > { %v4605_v14 = vpop.f32.mrb[82].mxu0 }
 0x4c5   : > { %v4606_v34 = vadd.f32 %v4605_v14, %v4529_v47  ;;  %v7235_v48 = vpop.f32.mrb[83].mxu0 }
 0x4d2   : > { %v4696_v33 = vpop.f32.mrb[84].mxu0 }
 0x4d3   : > { %v4700_v5 = vadd.f32 %v4696_v33, %v4606_v34  ;;  %v7252_v45 = vpop.f32.mrb[85].mxu0 }
 0x4e0   : > { %v4788_v42 = vpop.f32.mrb[86].mxu0 }
 0x4e1   : > { %v4792_v20 = vadd.f32 %v4788_v42, %v4700_v5  ;;  %v7269_v62 = vpop.f32.mrb[87].mxu0 }
 0x4ee   : > { %v4880_v58 = vpop.f32.mrb[88].mxu0 }
 0x4ef   : > { %v4884_v37 = vadd.f32 %v4880_v58, %v4792_v20  ;;  %v7286_v16 = vpop.f32.mrb[89].mxu0 }
 0x4fc   : > { %v4972_v54 = vpop.f32.mrb[90].mxu0 }
 0x4fd   : > { %v4976_v19 = vadd.f32 %v4972_v54, %v4884_v37  ;;  %v7303_v17 = vpop.f32.mrb[91].mxu0 }
 0x50a   : > { %v5064_v1 = vpop.f32.mrb[92].mxu0 }
 0x50b   : > { %v5068_v11 = vadd.f32 %v5064_v1, %v4976_v19  ;;  %v7320_v29 = vpop.f32.mrb[93].mxu0 }
 0x518   : > { %v5156_v38 = vpop.f32.mrb[94].mxu0 }
 0x519   : > { %v5160_v7 = vadd.f32 %v5156_v38, %v5068_v11  ;;  %v7337_v63 = vpop.f32.mrb[95].mxu0 }
 0x526   : > { %v5248_v55 = vpop.f32.mrb[96].mxu0 }
 0x527   : > { %v5252_v36 = vadd.f32 %v5248_v55, %v5160_v7  ;;  %v7354_v30 = vpop.f32.mrb[97].mxu0 }
 0x534   : > { %v5340_v35 = vpop.f32.mrb[98].mxu0 }
 0x535   : > { %v5344_v43 = vadd.f32 %v5340_v35, %v5252_v36  ;;  %v7371_v39 = vpop.f32.mrb[99].mxu0 }
 0x542   : > { %v5432_v28 = vpop.f32.mrb[100].mxu0 }
 0x543   : > { %v5436_v40 = vadd.f32 %v5432_v28, %v5344_v43  ;;  %v7388_v9 = vpop.f32.mrb[101].mxu0 }
 0x550   : > { %v5524_v4 = vpop.f32.mrb[102].mxu0 }
 0x551   : > { %v5528_v61 = vadd.f32 %v5524_v4, %v5436_v40  ;;  %v7405_v60 = vpop.f32.mrb[103].mxu0 }
 0x55e   : > { %v5616_v49 = vpop.f32.mrb[104].mxu0 }
 0x55f   : > { %v5620_v57 = vadd.f32 %v5616_v49, %v5528_v61  ;;  %v7422_v6 = vpop.f32.mrb[105].mxu0 }
 0x56c   : > { %v5708_v24 = vpop.f32.mrb[106].mxu0 }
 0x56d   : > { %v5712_v51 = vadd.f32 %v5708_v24, %v5620_v57  ;;  %v7439_v26 = vpop.f32.mrb[107].mxu0 }
 0x57a   : > { %v5800_v3 = vpop.f32.mrb[108].mxu0 }
 0x57b   : > { %v5804_v41 = vadd.f32 %v5800_v3, %v5712_v51  ;;  %v7456_v13 = vpop.f32.mrb[109].mxu0 }
 0x588   : > { %v5892_v52 = vpop.f32.mrb[110].mxu0 }
 0x589   : > { %v5896_v56 = vadd.f32 %v5892_v52, %v5804_v41  ;;  %v7473_v46 = vpop.f32.mrb[111].mxu0 }
 0x58b   : > { %v5898_v32 = vadd.f32 %v5897_v59, %v5896_v56 }
 0x58d   : > { %v5899_v8 = vmax.f32 %v5898_v32, 0.0 }
 0x58f   : > { %7483 = vmatmul.mubr.msk.f32.vlgmr.msra.gmra.mrb[112].mxu0 %vm5905_vm7, %v5899_v8 }
 0x662   : > { %v5975_v22 = vpop.f32.mrb[112].mxu0 }
 0x663   : > { %v5976_v25 = vadd.f32 %v5975_v22, %v5904_v18  ;;  %v7484_v27 = vpop.f32.mrb[113].mxu0 }
 0x665   : > { %v5980_v21 = vsel %vm5979_vm8, %v5976_v25, -inf }
 0x666   : > { %5981 = vmax.xlane.f32.xlu0 %v5980_v21 }
 0x6f3   : > { %v5982_v50 = vpop.xlane.xlu0 %5981 }
 0x6f4   : > { %v5983_v15 = vsub.f32 %v5976_v25, %v5982_v50 }
 0x6f6   : > { %v5984_v23 = vmul.f32 1.442695, %v5983_v15 }
 0x6f8   : > { %7984 = vpow2.f32 %v5984_v23 }
 0x702   : > { %v7985_v47 = vpop.eup %7984 }
 0x703   : > { %v5986_v12 = vsel %vm5979_vm8, %v7985_v47, 0.0 }
 0x704   : > { %5987 = vadd.xlane.f32.xlu0 %v5986_v12 }
 0x791   : > { %v5988_v14 = vpop.xlane.xlu0 %5987 }
 0x792   : > { %7986 = vlog2.f32 %v5988_v14 }
 0x79c   : > { %v7987_v34 = vpop.eup %7986 }
 0x79d   : > { %v5990_v48 = vmul.f32 0.6931472, %v7987_v34 }
 0x79f   : > { %v5991_v33 = vsub.f32 %v5983_v15, %v5990_v48 }
 0x7a1   : > { %5992 = vst.msk [vmem:[%s324_s24] sm:$0x1] %vm5979_vm8, %v5991_v33 }
 0x7a2   : > { %8001 = shalt.err (!%p7998_p3)
}
 0x7a3   : > { %s8002_s21 = scalar_lea.hbm %s10476_s28, 16  ;;  %s8006_s24 = scalar_lea.hbm %s10528_s9, 32 }
 0x7a4   : > { %p8003_p4 = scmp.ne.s32.totalorder %s10476_s28, %s8002_s21  ;;  %p8007_p9 = scmp.lt.u32.totalorder %s10476_s28, %s10528_s9 }
 0x7a5   : > { %p8008_p10 = scmp.lt.u32.totalorder %s8006_s24, %s8002_s21  ;;  %p8010_p12 = scmp.lt.u32.totalorder %s8002_s21, %s10476_s28 }
 0x7a6   : > { %p8004_p7 = pnand %p8003_p4, %p8145_p5 }
 0x7a7   : > { %p8009_p11 = por %p8008_p10, %p8007_p9 }
 0x7a8   : > { %p8005_p8 = pneg %p8004_p7 }
 0x7a9   : > { %p8011_p13 = por %p8010_p12, %p8009_p11 }
 0x7ab   : > { %p8012_p0 = pnand %p8011_p13, %p8005_p8 }
 0x7ad   : > { %8015 = shalt.err (!%p8012_p0)
}
 0x7ae   : > { %7853 = dma.vmem_to_hbm [thread:$0]  (%p8145_p5), %s10478_s25, 16, %s10476_s28, %s5994_s29  }
 0x7af PF: > { %p7859_p1 = scmp.ge.s32.totalorder %s8050_s12, 2  ;;  %s6018_s14 = sand.u32 1, %s8038_s30  }
 0x7b0   : > { %s6019_s13 = scalar_lea.sflag [#allocation6], %s6018_s14 }
 0x7b1   : > { %p7856_p2 = pnand %p7859_p1, %p8149_p6 }
 0x7b3   : > { %8033 = dma.done.wait (!%p7856_p2), %s6019_s13, 16  }
 0x7b4   : > { %8035 = vsyncadd (!%p7856_p2), %s6019_s13, 4294967280  ;;  %p19_p3 = scmp.ge.s32.totalorder %s8132_s15, 4   ;;  %s10739_s30 = smov %s8042_s10 }
 0x7b5   : > { %s10740_s10 = smov %s8046_s11  ;;  %s10741_s11 = smov %s8143_s18 }
 0x7b6   : > { %s10742_s12 = smov %s8132_s15  ;;  %21 = sbr.rel (!%p19_p3) target bundleno = 3 (0x3), region = 130 }
 0x7bd   :  { %6023 = vsyncpa [#allocation6], 1 }
 0x7be   :  { %6025 = vsyncpa [#allocation6 + $0x1], 1 }

</bundles_post_ra>
